<compile_context>
chip_gen: v7x
topology: tpu7x:2x2x1
jax: 0.10.0
libtpu: 0.0.40
codegen_flags: <defaults>
</compile_context>

<pallas_src>
import functools

import numpy as np
import jax
import jax.numpy as jnp
from jax.experimental import pallas as pl
from jax.experimental.pallas import tpu as pltpu

F32 = jnp.float32

CONFIG = dict(
    cutoff=8.0,
    alignn_layers=2,
    gcn_layers=2,
    atom_features=64,
    edge_input_features=80,
    triplet_input_features=40,
    embedding_features=64,
    hidden_features=64,
)

ROW_TILE_MAX = 1024        # per-block rows for the F=64 row kernels (amortize grid-step cost)
SEGSUM_N_TILE_MAX = 512    # node-row tile for the incidence matmul
SEGSUM_K_TILE = 1024       # edge-axis (reduction) tile, multiple of 128

# All 1-D grid axes are independent row blocks -> "parallel" lets v7x shard over its 2 TCs.
_CP = pltpu.CompilerParams(dimension_semantics=("parallel",))
# Fused segment-sum kernel: node rows parallel, edge (reduction) axis arbitrary.
_CP2 = pltpu.CompilerParams(dimension_semantics=("parallel", "arbitrary"))


# ----------------------------------------------------------------------------
# small helpers
# ----------------------------------------------------------------------------
def _round_up(x, m):
    return ((x + m - 1) // m) * m


def _row_plan(m, align=8):
    """(padded_rows, row_tile): >=2 row blocks when splittable (v7x dual TC), tile <= 1024."""
    if m <= align:
        return align, align
    tile = min(ROW_TILE_MAX, _round_up(-(-m // 2), align))
    return _round_up(m, tile), tile


def _pad_rows_to(x, mp):
    m = x.shape[0]
    return jnp.pad(x, ((0, mp - m), (0, 0))) if mp != m else x


def _trim_rows(x, m):
    return x[:m] if x.shape[0] != m else x


def _row_spec(tile, f):
    return pl.BlockSpec((tile, f), lambda i: (i, 0))


def _full_spec(shape):
    return pl.BlockSpec(shape, lambda i: (0, 0))


def _ln(h, g, b):
    mu = jnp.mean(h, axis=-1, keepdims=True)
    var = jnp.mean((h - mu) ** 2, axis=-1, keepdims=True)
    return (h - mu) * jax.lax.rsqrt(var + 1e-5) * g + b


def _silu(h):
    return h * jax.nn.sigmoid(h)


def _with_ref_vjp(pallas_fn, ref_fn):
    """Primal runs the Pallas kernel; backward uses a plain-JAX reference VJP."""
    # TODO(synk): backward (force) path still uses the plain-JAX reference VJP; hand-written
    # Pallas backward kernels are the remaining end-to-end lever.
    @jax.custom_vjp
    def op(*args):
        return pallas_fn(*args)

    def fwd(*args):
        return pallas_fn(*args), args

    def bwd(args, ct):
        _, vjp = jax.vjp(ref_fn, *args)
        return vjp(ct)

    op.defvjp(fwd, bwd)
    return op


# ----------------------------------------------------------------------------
# K1: matmul + bias — used for the packed node-side linears
# ----------------------------------------------------------------------------
def _linear_kernel(x_ref, w_ref, b_ref, o_ref):
    o_ref[...] = (
        jnp.dot(x_ref[...], w_ref[...], preferred_element_type=jnp.float32) + b_ref[...]
    )


def _linear_pallas(x, w, b):
    m, k = x.shape
    n = w.shape[1]
    mp, tile = _row_plan(m)
    out = pl.pallas_call(
        _linear_kernel,
        out_shape=jax.ShapeDtypeStruct((mp, n), F32),
        grid=(mp // tile,),
        in_specs=[_row_spec(tile, k), _full_spec((k, n)), _full_spec((1, n))],
        out_specs=_row_spec(tile, n),
        compiler_params=_CP,
    )(_pad_rows_to(x, mp), w, b)
    return _trim_rows(out, m)


def _linear_ref(x, w, b):
    return jnp.dot(x, w, preferred_element_type=jnp.float32) + b


linear_op = _with_ref_vjp(_linear_pallas, _linear_ref)


# ----------------------------------------------------------------------------
# K2: fused edge/angle embedding (RBF -> Linear -> LN -> SiLU -> Linear -> LN -> SiLU)
# ----------------------------------------------------------------------------
def _embed_kernel(gamma, d_ref, c_ref, w1_ref, b1_ref, g1_ref, be1_ref,
                  w2_ref, b2_ref, g2_ref, be2_ref, o_ref):
    rbf = jnp.exp(-gamma * (d_ref[...] - c_ref[...]) ** 2)
    h1 = jnp.dot(rbf, w1_ref[...], preferred_element_type=jnp.float32) + b1_ref[...]
    h1 = _silu(_ln(h1, g1_ref[...], be1_ref[...]))
    h2 = jnp.dot(h1, w2_ref[...], preferred_element_type=jnp.float32) + b2_ref[...]
    o_ref[...] = _silu(_ln(h2, g2_ref[...], be2_ref[...]))


def make_embed_op(vmin, vmax, bins):
    centers = jnp.linspace(vmin, vmax, bins, dtype=F32).reshape(1, bins)
    gamma = float((bins - 1) / (vmax - vmin))  # 1 / mean(diff(centers)), as in RBFExpansion
    kernel = functools.partial(_embed_kernel, gamma)

    def pallas_fn(d, w1, b1, g1, be1, w2, b2, g2, be2):
        m = d.shape[0]
        n1, n2 = w1.shape[1], w2.shape[1]
        mp, tile = _row_plan(m)
        out = pl.pallas_call(
            kernel,
            out_shape=jax.ShapeDtypeStruct((mp, n2), F32),
            grid=(mp // tile,),
            in_specs=[_row_spec(tile, 1), _full_spec((1, bins)),
                      _full_spec((bins, n1)), _full_spec((1, n1)),
                      _full_spec((1, n1)), _full_spec((1, n1)),
                      _full_spec((n1, n2)), _full_spec((1, n2)),
                      _full_spec((1, n2)), _full_spec((1, n2))],
            out_specs=_row_spec(tile, n2),
            compiler_params=_CP,
        )(_pad_rows_to(d, mp), centers, w1, b1, g1, be1, w2, b2, g2, be2)
        return _trim_rows(out, m)

    def ref(d, w1, b1, g1, be1, w2, b2, g2, be2):
        rbf = jnp.exp(-gamma * (d - centers) ** 2)
        h1 = _silu(_ln(jnp.dot(rbf, w1, preferred_element_type=jnp.float32) + b1, g1, be1))
        return _silu(_ln(jnp.dot(h1, w2, preferred_element_type=jnp.float32) + b2, g2, be2))

    return _with_ref_vjp(pallas_fn, ref)


edge_embed_op = make_embed_op(0.0, 8.0, CONFIG["edge_input_features"])
angle_embed_op = make_embed_op(-1.0, 1.0, CONFIG["triplet_input_features"])


# ----------------------------------------------------------------------------
# K3: fused edge-gate: edge linear + m + sigmoid(+mask) + sigma||sigma*Bh + LN/SiLU/residual
#     seg output is one lane-dense (tile, 2F = 128) block feeding the segment-sum directly.
# ----------------------------------------------------------------------------
def _edge_gate_kernel(a_ref, b_ref, y_ref, bh_ref, m_ref, w_ref, wb_ref, g_ref, gb_ref,
                      seg_ref, ynew_ref):
    e_edge = jnp.dot(y_ref[...], w_ref[...], preferred_element_type=jnp.float32) + wb_ref[...]
    msg = a_ref[...] + b_ref[...] + e_edge
    sigma = jax.nn.sigmoid(msg) * m_ref[...]        # r<=4 cutoff / padding mask folded in
    seg_ref[...] = jnp.concatenate([sigma * bh_ref[...], sigma], axis=1)
    ynew_ref[...] = y_ref[...] + _silu(_ln(msg, g_ref[...], gb_ref[...]))


def _edge_gate_pallas(a, b, y, bh, mask, w, wb, g, gb):
    m, f = a.shape
    mp, tile = _row_plan(m)
    ap, bp, yp, bhp, mkp = (_pad_rows_to(t, mp) for t in (a, b, y, bh, mask))
    seg, ynew = pl.pallas_call(
        _edge_gate_kernel,
        out_shape=(jax.ShapeDtypeStruct((mp, 2 * f), F32),
                   jax.ShapeDtypeStruct((mp, f), F32)),
        grid=(mp // tile,),
        in_specs=[_row_spec(tile, f)] * 4 + [_row_spec(tile, 1)]
        + [_full_spec((f, f))] + [_full_spec((1, f))] * 3,
        out_specs=(_row_spec(tile, 2 * f), _row_spec(tile, f)),
        compiler_params=_CP,
    )(ap, bp, yp, bhp, mkp, w, wb, g, gb)
    return _trim_rows(seg, m), _trim_rows(ynew, m)


def _edge_gate_ref(a, b, y, bh, mask, w, wb, g, gb):
    msg = a + b + jnp.dot(y, w, preferred_element_type=jnp.float32) + wb
    sigma = jax.nn.sigmoid(msg) * mask
    return jnp.concatenate([sigma * bh, sigma], axis=1), y + _silu(_ln(msg, g, gb))


edge_gate_op = _with_ref_vjp(_edge_gate_pallas, _edge_gate_ref)


# ----------------------------------------------------------------------------
# K4: fused segment-sum + node-combine
#     acc = sum_E onehot(N,E) @ [sigma*Bh || sigma]  (K-tiled along E, f32 MXU)
#     x_new = x + SiLU(LN(dst_update + sum_sigma_h / (sum_sigma + 1e-6)))
# ----------------------------------------------------------------------------
def _segsum_combine_kernel(ohT_ref, seg_ref, d_ref, x_ref, g_ref, b_ref, o_ref, acc_ref):
    @pl.when(pl.program_id(1) == 0)
    def _init():
        acc_ref[...] = jnp.zeros_like(acc_ref)

    acc_ref[...] += jnp.dot(ohT_ref[...], seg_ref[...], preferred_element_type=jnp.float32)

    @pl.when(pl.program_id(1) == pl.num_programs(1) - 1)
    def _finish():
        f = d_ref.shape[1]
        acc = acc_ref[...]
        t = d_ref[...] + acc[:, :f] / (acc[:, f:] + 1e-6)
        o_ref[...] = x_ref[...] + _silu(_ln(t, g_ref[...], b_ref[...]))


def _segsum_plan(n, e):
    n_tile = min(SEGSUM_N_TILE_MAX, max(8, _round_up(-(-n // 2), 8)))
    np_ = _round_up(n, n_tile)
    if e <= SEGSUM_K_TILE:
        return np_, n_tile, e, e                 # single full-extent reduction block
    return np_, n_tile, _round_up(e, SEGSUM_K_TILE), SEGSUM_K_TILE


def _segsum_combine_pallas(ohT, seg, d, x, g, b):
    n, e = ohT.shape
    f = d.shape[1]
    np_, n_tile, ep, e_tile = _segsum_plan(n, e)
    ohT_p = ohT
    if (np_, ep) != (n, e):
        ohT_p = jnp.pad(ohT, ((0, np_ - n), (0, ep - e)))
    seg_p = _pad_rows_to(seg, ep)
    dp, xp = _pad_rows_to(d, np_), _pad_rows_to(x, np_)
    out = pl.pallas_call(
        _segsum_combine_kernel,
        out_shape=jax.ShapeDtypeStruct((np_, f), F32),
        grid=(np_ // n_tile, ep // e_tile),
        in_specs=[pl.BlockSpec((n_tile, e_tile), lambda i, k: (i, k)),
                  pl.BlockSpec((e_tile, 2 * f), lambda i, k: (k, 0)),
                  pl.BlockSpec((n_tile, f), lambda i, k: (i, 0)),
                  pl.BlockSpec((n_tile, f), lambda i, k: (i, 0)),
                  pl.BlockSpec((1, f), lambda i, k: (0, 0)),
                  pl.BlockSpec((1, f), lambda i, k: (0, 0))],
        out_specs=pl.BlockSpec((n_tile, f), lambda i, k: (i, 0)),
        scratch_shapes=[pltpu.VMEM((n_tile, 2 * f), F32)],
        compiler_params=_CP2,
    )(ohT_p, seg_p, dp, xp, g, b)
    return _trim_rows(out, n)


def _segsum_combine_ref(ohT, seg, d, x, g, b):
    f = d.shape[1]
    acc = jnp.dot(ohT, seg, preferred_element_type=jnp.float32)
    t = d + acc[:, :f] / (acc[:, f:] + 1e-6)
    return x + _silu(_ln(t, g, b))


segsum_combine_op = _with_ref_vjp(_segsum_combine_pallas, _segsum_combine_ref)


# ----------------------------------------------------------------------------
# K5: fused BondOrderConv gate + BondOrderInteraction pair potential
#     packed (E, 16) = [b_src | b_dst | bondlength | fcut | valid | ps(4) | pd(4) | 0 0 0]
#     V = valid * fcut * (A e^{-l1 r} - bo * B e^{-l2 r}),  bo = sigmoid(bs + bd + W y_init)
# ----------------------------------------------------------------------------
def _bond_pair_kernel(p_ref, y_ref, w_ref, wb_ref, v_ref):
    p = p_ref[...]
    bs, bd, bl = p[:, 0:1], p[:, 1:2], p[:, 2:3]
    fcut, valid = p[:, 3:4], p[:, 4:5]
    pp = jnp.exp(p[:, 5:9] + p[:, 9:13])
    b_edge = jnp.dot(y_ref[...], w_ref[...], preferred_element_type=jnp.float32) + wb_ref[...]
    bo = jax.nn.sigmoid(bs + bd + b_edge)
    f_rep = pp[:, 0:1] * jnp.exp(-pp[:, 1:2] * bl)
    f_att = pp[:, 2:3] * jnp.exp(-pp[:, 3:4] * bl)
    v_ref[...] = valid * fcut * (f_rep - bo * f_att)


def _bond_pair_pallas(packed, y, w, wb):
    m, f = y.shape
    mp, tile = _row_plan(m)
    out = pl.pallas_call(
        _bond_pair_kernel,
        out_shape=jax.ShapeDtypeStruct((mp, 1), F32),
        grid=(mp // tile,),
        in_specs=[_row_spec(tile, 16), _row_spec(tile, f),
                  _full_spec((f, 1)), _full_spec((1, 1))],
        out_specs=_row_spec(tile, 1),
        compiler_params=_CP,
    )(_pad_rows_to(packed, mp), _pad_rows_to(y, mp), w, wb)
    return _trim_rows(out, m)


def _bond_pair_ref(packed, y, w, wb):
    bs, bd, bl = packed[:, 0:1], packed[:, 1:2], packed[:, 2:3]
    fcut, valid = packed[:, 3:4], packed[:, 4:5]
    pp = jnp.exp(packed[:, 5:9] + packed[:, 9:13])
    bo = jax.nn.sigmoid(bs + bd + jnp.dot(y, w, preferred_element_type=jnp.float32) + wb)
    f_rep = pp[:, 0:1] * jnp.exp(-pp[:, 1:2] * bl)
    f_att = pp[:, 2:3] * jnp.exp(-pp[:, 3:4] * bl)
    return valid * fcut * (f_rep - bo * f_att)


bond_pair_op = _with_ref_vjp(_bond_pair_pallas, _bond_pair_ref)


def smooth_cutoff(r, cutoff_distance=4.0, cutoff_onset=3.8):
    # BondOrderInteraction.cutoff; sin envelope kept in glue (still differentiable).
    D = 0.5 * (cutoff_distance - cutoff_onset)
    R = cutoff_distance - D
    c = jnp.where(r < R - D, jnp.ones_like(r),
                  0.5 - 0.5 * jnp.sin(jnp.pi * (r - R) / (2.0 * D)))
    return jnp.where(r > R + D, jnp.zeros_like(r), c)


# ----------------------------------------------------------------------------
# parameters (deterministic synthetic init)
# ----------------------------------------------------------------------------
def init_params(key):
    keys = iter(jax.random.split(key, 64))

    def lin(i, o):
        return {"w": jax.random.normal(next(keys), (i, o), F32) / np.sqrt(i),
                "b": jnp.zeros((1, o), F32)}

    def mlp(i, o):
        p = lin(i, o)
        p["g"] = jnp.ones((1, o), F32)
        p["beta"] = jnp.zeros((1, o), F32)
        return p

    def eggc(f):
        return {
            # [src_gate | dst_gate | src_update | dst_update] packed into one (F, 4F) matmul
            "node_w": jax.random.normal(next(keys), (f, 4 * f), F32) / np.sqrt(f),
            "node_b": jnp.zeros((1, 4 * f), F32),
            "edge_gate": lin(f, f),
            "norm_n_g": jnp.ones((1, f), F32), "norm_n_b": jnp.zeros((1, f), F32),
            "norm_e_g": jnp.ones((1, f), F32), "norm_e_b": jnp.zeros((1, f), F32),
        }

    h = CONFIG["hidden_features"]
    a = CONFIG["atom_features"]
    return {
        "atom_embedding": 0.1 * jax.random.normal(next(keys), (128, a), F32),
        "edge_mlp1": mlp(CONFIG["edge_input_features"], CONFIG["embedding_features"]),
        "edge_mlp2": mlp(CONFIG["embedding_features"], h),
        "angle_mlp1": mlp(CONFIG["triplet_input_features"], CONFIG["embedding_features"]),
        "angle_mlp2": mlp(CONFIG["embedding_features"], h),
        "alignn": [{"node": eggc(h), "edge": eggc(h)} for _ in range(CONFIG["alignn_layers"])],
        "gcn": [eggc(h) for _ in range(CONFIG["gcn_layers"])],
        # BondOrderConv: [src_gate | dst_gate] packed; edge_gate fused into K5.
        "bond_node_w": jax.random.normal(next(keys), (h, 2), F32) / np.sqrt(h),
        "bond_node_b": jnp.zeros((1, 2), F32),
        "bond_edge": lin(h, 1),
        # BondOrderInteraction: [src_params | dst_params] packed; src bias = log(1)=0,
        # dst has no bias (kept 0).
        "int_node_w": jax.random.normal(next(keys), (a, 8), F32) / np.sqrt(a),
        "int_node_b": jnp.zeros((1, 8), F32),
    }


# ----------------------------------------------------------------------------
# model pieces
# ----------------------------------------------------------------------------
def edge_gated_conv(p, src, dst, ohT, mask, node_feats, edge_feats):
    f = node_feats.shape[1]
    # one (rows, F) @ (F, 4F) matmul covers src_gate / dst_gate / src_update / dst_update
    nl = linear_op(node_feats, p["node_w"], p["node_b"])
    e_src, e_dst = nl[:, :f], nl[:, f:2 * f]
    bh, dst_up = nl[:, 2 * f:3 * f], nl[:, 3 * f:]
    # TODO(synk): node->edge gathers stay as XLA glue; a scalar-prefetch row-gather inside
    # the edge-gate kernel would remove these (E, F) HBM round-trips.
    seg, y_new = edge_gate_op(e_src[src], e_dst[dst], edge_feats, bh[src], mask,
                              p["edge_gate"]["w"], p["edge_gate"]["b"],
                              p["norm_e_g"], p["norm_e_b"])
    x_new = segsum_combine_op(ohT, seg, dst_up, node_feats, p["norm_n_g"], p["norm_n_b"])
    return x_new, y_new


@functools.partial(jax.jit, static_argnums=(7,))
def _neural_bond_order_impl(params, src, dst, lg_src, lg_dst, r_in, atom_numbers, n_atoms):
    n_edges = src.shape[0]
    n_trip = lg_src.shape[0]
    # ---- pad once; all feature tensors keep padded row counts through the whole layer stack
    NP, _ = _row_plan(n_atoms)
    EP, _ = _row_plan(n_edges)
    TP, _ = _row_plan(n_trip)
    src_p = jnp.pad(src, (0, EP - n_edges))
    dst_p = jnp.pad(dst, (0, EP - n_edges))
    lg_src_p = jnp.pad(lg_src, (0, TP - n_trip))
    lg_dst_p = jnp.pad(lg_dst, (0, TP - n_trip))
    edge_valid = (jnp.arange(EP) < n_edges).astype(F32)[:, None]
    trip_valid = (jnp.arange(TP) < n_trip).astype(F32)[:, None]
    # unmasked one-hot incidence (constant wrt r), built once and reused by every conv layer;
    # the r<=4 subgraph mask is folded into the gate values instead.
    # TODO(synk): replace the dense (N,E)/(E,T) incidence with a scalar-prefetch scatter
    # segment-sum kernel for production edge counts.
    oh_dst = (jnp.arange(NP)[:, None] == dst_p[None, :]).astype(F32)      # (NP, EP)
    oh_lg = (jnp.arange(EP)[:, None] == lg_dst_p[None, :]).astype(F32)    # (EP, TP)
    x_emb = _pad_rows_to(params["atom_embedding"][atom_numbers.reshape(-1)], NP)

    def energy_fn(r):
        # pad bond vectors with unit vectors so sqrt / cosine grads at padded rows stay finite
        if EP != n_edges:
            pad_rows = jnp.tile(jnp.asarray([[1.0, 0.0, 0.0]], F32), (EP - n_edges, 1))
            r_p = jnp.concatenate([r, pad_rows], axis=0)
        else:
            r_p = r
        bondlength = jnp.sqrt(jnp.sum(r_p * r_p, axis=1, keepdims=True))    # (EP, 1)
        pe1, pe2 = params["edge_mlp1"], params["edge_mlp2"]
        y_initial = edge_embed_op(bondlength,
                                  pe1["w"], pe1["b"], pe1["g"], pe1["beta"],
                                  pe2["w"], pe2["b"], pe2["g"], pe2["beta"])
        # edge_subgraph(bondlength <= 4): mask folded into the gate values (not the incidence)
        local_mask = jax.lax.stop_gradient((bondlength <= 4.0).astype(F32)) * edge_valid
        # line-graph bond cosines (compute_bond_cosines)
        r1, r2 = -r_p[lg_src_p], r_p[lg_dst_p]
        cos = jnp.sum(r1 * r2, axis=1, keepdims=True) / (
            jnp.linalg.norm(r1, axis=1, keepdims=True)
            * jnp.linalg.norm(r2, axis=1, keepdims=True))
        cos = jnp.clip(cos, -1.0, 1.0)
        pa1, pa2 = params["angle_mlp1"], params["angle_mlp2"]
        z = angle_embed_op(cos,
                           pa1["w"], pa1["b"], pa1["g"], pa1["beta"],
                           pa2["w"], pa2["b"], pa2["g"], pa2["beta"])
        trip_mask = local_mask[lg_src_p] * local_mask[lg_dst_p] * trip_valid

        x = x_emb
        x_initial = x
        y = y_initial
        for lp in params["alignn"]:                                  # ALIGNNConv
            x, m = edge_gated_conv(lp["node"], src_p, dst_p, oh_dst, local_mask, x, y)
            y, z = edge_gated_conv(lp["edge"], lg_src_p, lg_dst_p, oh_lg, trip_mask, m, z)
        for lp in params["gcn"]:                                     # EdgeGatedGraphConv
            x, y = edge_gated_conv(lp, src_p, dst_p, oh_dst, local_mask, x, y)

        # BondOrderConv (full graph, y_initial) + BondOrderInteraction (x_initial)
        b_node = linear_op(x, params["bond_node_w"], params["bond_node_b"])          # (NP, 2)
        p_node = linear_op(x_initial, params["int_node_w"], params["int_node_b"])    # (NP, 8)
        fcut = smooth_cutoff(bondlength)
        packed = jnp.concatenate(
            [b_node[src_p][:, 0:1], b_node[dst_p][:, 1:2], bondlength, fcut, edge_valid,
             p_node[src_p][:, 0:4], p_node[dst_p][:, 4:8],
             jnp.zeros((EP, 3), F32)], axis=1)                                       # (EP, 16)
        v_pair = bond_pair_op(packed, y_initial,
                              params["bond_edge"]["w"], params["bond_edge"]["b"])    # (EP, 1)
        # per-atom readout: O(E) segment-sum instead of a dense (N, E) f32 matmul
        atomwise = jax.ops.segment_sum(v_pair[:, 0], dst_p, num_segments=NP)
        energy = jnp.sum(atomwise) / n_atoms         # AvgPooling readout ('eV/atom')
        return energy, atomwise

    (energy, atomwise), de_dr = jax.value_and_grad(energy_fn, has_aux=True)(r_in)
    pairwise_forces = -de_dr                                                        # (E, 3)
    forces = jax.ops.segment_sum(pairwise_forces, dst, num_segments=n_atoms)        # (N, 3)
    forces = forces * float(n_atoms)       # eV/atom: multiply by n_nodes (as in the reference)
    return {"energy": energy, "forces": forces, "atomwise_energy": atomwise[:n_atoms]}


def neural_bond_order(params, graph):
    return _neural_bond_order_impl(
        params, graph["src"], graph["dst"], graph["lg_src"], graph["lg_dst"],
        graph["r"], graph["atom_numbers"], graph["n_atoms"])


# ----------------------------------------------------------------------------
# synthetic graph (host-side, deterministic)
# ----------------------------------------------------------------------------
def build_graph(key, n_atoms=8, k=4):
    kp, kz = jax.random.split(key)
    pos = jax.random.uniform(kp, (n_atoms, 3), dtype=F32, minval=0.0, maxval=4.0)
    atom_numbers = jax.random.randint(kz, (n_atoms, 1), 1, 95)
    p = np.asarray(pos)
    d = np.linalg.norm(p[None, :, :] - p[:, None, :], axis=-1)
    np.fill_diagonal(d, np.inf)
    src, dst = [], []
    for i in range(n_atoms):
        for j in np.argsort(d[i])[:k]:     # k-NN, directed j -> i
            src.append(int(j))
            dst.append(int(i))
    src = np.asarray(src, np.int32)
    dst = np.asarray(dst, np.int32)
    r = p[dst] - p[src]
    # line graph (backtracking included, as in dgl line_graph default)
    lg_src, lg_dst = [], []
    for e1 in range(len(src)):
        for e2 in range(len(src)):
            if dst[e1] == src[e2]:
                lg_src.append(e1)
                lg_dst.append(e2)
    return {
        "src": jnp.asarray(src),
        "dst": jnp.asarray(dst),
        "r": jnp.asarray(r, dtype=F32),
        "atom_numbers": jnp.asarray(atom_numbers),
        "lg_src": jnp.asarray(np.asarray(lg_src, np.int32)),
        "lg_dst": jnp.asarray(np.asarray(lg_dst, np.int32)),
        "n_atoms": n_atoms,
    }


if __name__ == "__main__":
    key = jax.random.PRNGKey(0)
    kg, kp = jax.random.split(key)
    graph = build_graph(kg, n_atoms=8, k=4)      # N=8 atoms, E=32 edges, T=128 triplets
    params = init_params(kp)
    result = neural_bond_order(params, graph)
    jax.block_until_ready(result)
    print("KERNEL_OK")
</pallas_src>

<mosaic_0001>
module attributes {stable_mosaic.version = 11 : i64} {
  func.func private @main(%arg0: i32) attributes {dimension_semantics = [#tpu.dimension_semantics<core_parallel>], iteration_bounds = array<i64: 2>, tpu.core_type = #tpu.core_type<sc_scalar_subcore>, window_params = []} {
    return
  }
}

module attributes {stable_mosaic.version = 11 : i64} {
  func.func private @main(%arg0: i32) attributes {dimension_semantics = [#tpu.dimension_semantics<core_parallel>], iteration_bounds = array<i64: 2>, tpu.core_type = #tpu.core_type<sc_scalar_subcore>, window_params = []} {
    return
  }
}

module attributes {stable_mosaic.version = 11 : i64} {
  func.func @_linear_kernel(%arg0: i32, %arg1: memref<8x64xf32, #tpu.memory_space<vmem>>, %arg2: memref<64x8xf32, #tpu.memory_space<vmem>>, %arg3: memref<1x8xf32, #tpu.memory_space<vmem>>, %arg4: memref<8x8xf32, #tpu.memory_space<vmem>>) attributes {dimension_semantics = [#tpu.dimension_semantics<parallel>], iteration_bounds = array<i64: 1>, scalar_prefetch = 0 : i64, scratch_operands = 0 : i64, tpu.core_type = #tpu.core_type<tc>, window_params = [{transform_indices = @transform_0, window_bounds = array<i64: 8, 64>}, {pipeline_mode = #tpu.pipeline_mode<synchronous>, transform_indices = @transform_1, window_bounds = array<i64: 64, 8>}, {pipeline_mode = #tpu.pipeline_mode<synchronous>, transform_indices = @transform_2, window_bounds = array<i64: 1, 8>}, {transform_indices = @transform_3, window_bounds = array<i64: 8, 8>}]} {
    %c0 = arith.constant 0 : index
    %c0_0 = arith.constant 0 : index
    %0 = vector.load %arg1[%c0, %c0_0] : memref<8x64xf32, #tpu.memory_space<vmem>>, vector<8x64xf32>
    %c0_1 = arith.constant 0 : index
    %c0_2 = arith.constant 0 : index
    %1 = vector.load %arg2[%c0_1, %c0_2] : memref<64x8xf32, #tpu.memory_space<vmem>>, vector<64x8xf32>
    %cst = arith.constant dense<0.000000e+00> : vector<8x8xf32>
    %2 = tpu.matmul %0, %1, %cst {dimension_numbers = #tpu.dot_dimension_numbers<[1], [0], [0], [1], [0, 0, 1, 1], [], []>} : vector<8x64xf32>, vector<64x8xf32>, vector<8x8xf32> -> vector<8x8xf32>
    %c0_3 = arith.constant 0 : index
    %c0_4 = arith.constant 0 : index
    %3 = vector.load %arg3[%c0_3, %c0_4] : memref<1x8xf32, #tpu.memory_space<vmem>>, vector<1x8xf32>
    %4 = vector.broadcast %3 : vector<1x8xf32> to vector<8x8xf32>
    %5 = arith.addf %2, %4 : vector<8x8xf32>
    %c0_5 = arith.constant 0 : index
    %c0_6 = arith.constant 0 : index
    %6 = vector.load %arg4[%c0_5, %c0_6] : memref<8x8xf32, #tpu.memory_space<vmem>>, vector<8x8xf32>
    tpu.vector_store %arg4[%c0_5, %c0_6], %5 {strides = array<i32>} : memref<8x8xf32, #tpu.memory_space<vmem>>, vector<8x8xf32>,
    return
  }
  func.func @transform_0(%arg0: i32) -> (i32, i32) {
    %c0_i32 = arith.constant 0 : i32
    %c0_i32_0 = arith.constant 0 : i32
    return %arg0, %c0_i32 : i32, i32
  }
  func.func @transform_1(%arg0: i32) -> (i32, i32) {
    %c0_i32 = arith.constant 0 : i32
    %c0_i32_0 = arith.constant 0 : i32
    %c0_i32_1 = arith.constant 0 : i32
    return %c0_i32, %c0_i32_0 : i32, i32
  }
  func.func @transform_2(%arg0: i32) -> (i32, i32) {
    %c0_i32 = arith.constant 0 : i32
    %c0_i32_0 = arith.constant 0 : i32
    %c0_i32_1 = arith.constant 0 : i32
    return %c0_i32, %c0_i32_0 : i32, i32
  }
  func.func @transform_3(%arg0: i32) -> (i32, i32) {
    %c0_i32 = arith.constant 0 : i32
    %c0_i32_0 = arith.constant 0 : i32
    return %arg0, %c0_i32 : i32, i32
  }
}

module attributes {stable_mosaic.version = 11 : i64} {
  func.func @_linear_kernel(%arg0: i32, %arg1: memref<8x64xf32, #tpu.memory_space<vmem>>, %arg2: memref<64x256xf32, #tpu.memory_space<vmem>>, %arg3: memref<1x256xf32, #tpu.memory_space<vmem>>, %arg4: memref<8x256xf32, #tpu.memory_space<vmem>>) attributes {dimension_semantics = [#tpu.dimension_semantics<parallel>], iteration_bounds = array<i64: 1>, scalar_prefetch = 0 : i64, scratch_operands = 0 : i64, tpu.core_type = #tpu.core_type<tc>, window_params = [{transform_indices = @transform_0, window_bounds = array<i64: 8, 64>}, {pipeline_mode = #tpu.pipeline_mode<synchronous>, transform_indices = @transform_1, window_bounds = array<i64: 64, 256>}, {pipeline_mode = #tpu.pipeline_mode<synchronous>, transform_indices = @transform_2, window_bounds = array<i64: 1, 256>}, {transform_indices = @transform_3, window_bounds = array<i64: 8, 256>}]} {
    %c0 = arith.constant 0 : index
    %c0_0 = arith.constant 0 : index
    %0 = vector.load %arg1[%c0, %c0_0] : memref<8x64xf32, #tpu.memory_space<vmem>>, vector<8x64xf32>
    %c0_1 = arith.constant 0 : index
    %c0_2 = arith.constant 0 : index
    %1 = vector.load %arg2[%c0_1, %c0_2] : memref<64x256xf32, #tpu.memory_space<vmem>>, vector<64x256xf32>
    %cst = arith.constant dense<0.000000e+00> : vector<8x256xf32>
    %2 = tpu.matmul %0, %1, %cst {dimension_numbers = #tpu.dot_dimension_numbers<[1], [0], [0], [1], [0, 0, 1, 1], [], []>} : vector<8x64xf32>, vector<64x256xf32>, vector<8x256xf32> -> vector<8x256xf32>
    %c0_3 = arith.constant 0 : index
    %c0_4 = arith.constant 0 : index
    %3 = vector.load %arg3[%c0_3, %c0_4] : memref<1x256xf32, #tpu.memory_space<vmem>>, vector<1x256xf32>
    %4 = vector.broadcast %3 : vector<1x256xf32> to vector<8x256xf32>
    %5 = arith.addf %2, %4 : vector<8x256xf32>
    %c0_5 = arith.constant 0 : index
    %c0_6 = arith.constant 0 : index
    %6 = vector.load %arg4[%c0_5, %c0_6] : memref<8x256xf32, #tpu.memory_space<vmem>>, vector<8x256xf32>
    tpu.vector_store %arg4[%c0_5, %c0_6], %5 {strides = array<i32>} : memref<8x256xf32, #tpu.memory_space<vmem>>, vector<8x256xf32>,
    return
  }
  func.func @transform_0(%arg0: i32) -> (i32, i32) {
    %c0_i32 = arith.constant 0 : i32
    %c0_i32_0 = arith.constant 0 : i32
    return %arg0, %c0_i32 : i32, i32
  }
  func.func @transform_1(%arg0: i32) -> (i32, i32) {
    %c0_i32 = arith.constant 0 : i32
    %c0_i32_0 = arith.constant 0 : i32
    %c0_i32_1 = arith.constant 0 : i32
    return %c0_i32, %c0_i32_0 : i32, i32
  }
  func.func @transform_2(%arg0: i32) -> (i32, i32) {
    %c0_i32 = arith.constant 0 : i32
    %c0_i32_0 = arith.constant 0 : i32
    %c0_i32_1 = arith.constant 0 : i32
    return %c0_i32, %c0_i32_0 : i32, i32
  }
  func.func @transform_3(%arg0: i32) -> (i32, i32) {
    %c0_i32 = arith.constant 0 : i32
    %c0_i32_0 = arith.constant 0 : i32
    return %arg0, %c0_i32 : i32, i32
  }
}

module attributes {stable_mosaic.version = 11 : i64} {
  func.func @_edge_gate_kernel(%arg0: i32, %arg1: memref<16x64xf32, #tpu.memory_space<vmem>>, %arg2: memref<16x64xf32, #tpu.memory_space<vmem>>, %arg3: memref<16x64xf32, #tpu.memory_space<vmem>>, %arg4: memref<16x64xf32, #tpu.memory_space<vmem>>, %arg5: memref<16x1xf32, #tpu.memory_space<vmem>>, %arg6: memref<64x64xf32, #tpu.memory_space<vmem>>, %arg7: memref<1x64xf32, #tpu.memory_space<vmem>>, %arg8: memref<1x64xf32, #tpu.memory_space<vmem>>, %arg9: memref<1x64xf32, #tpu.memory_space<vmem>>, %arg10: memref<16x128xf32, #tpu.memory_space<vmem>>, %arg11: memref<16x64xf32, #tpu.memory_space<vmem>>) attributes {dimension_semantics = [#tpu.dimension_semantics<parallel>], iteration_bounds = array<i64: 2>, scalar_prefetch = 0 : i64, scratch_operands = 0 : i64, tpu.core_type = #tpu.core_type<tc>, window_params = [{transform_indices = @transform_0, window_bounds = array<i64: 16, 64>}, {transform_indices = @transform_1, window_bounds = array<i64: 16, 64>}, {transform_indices = @transform_2, window_bounds = array<i64: 16, 64>}, {transform_indices = @transform_3, window_bounds = array<i64: 16, 64>}, {transform_indices = @transform_4, window_bounds = array<i64: 16, 1>}, {pipeline_mode = #tpu.pipeline_mode<synchronous>, transform_indices = @transform_5, window_bounds = array<i64: 64, 64>}, {pipeline_mode = #tpu.pipeline_mode<synchronous>, transform_indices = @transform_6, window_bounds = array<i64: 1, 64>}, {pipeline_mode = #tpu.pipeline_mode<synchronous>, transform_indices = @transform_7, window_bounds = array<i64: 1, 64>}, {pipeline_mode = #tpu.pipeline_mode<synchronous>, transform_indices = @transform_8, window_bounds = array<i64: 1, 64>}, {transform_indices = @transform_9, window_bounds = array<i64: 16, 128>}, {transform_indices = @transform_10, window_bounds = array<i64: 16, 64>}]} {
    %c0 = arith.constant 0 : index
    %c0_0 = arith.constant 0 : index
    %0 = vector.load %arg3[%c0, %c0_0] : memref<16x64xf32, #tpu.memory_space<vmem>>, vector<16x64xf32>
    %c0_1 = arith.constant 0 : index
    %c0_2 = arith.constant 0 : index
    %1 = vector.load %arg6[%c0_1, %c0_2] : memref<64x64xf32, #tpu.memory_space<vmem>>, vector<64x64xf32>
    %cst = arith.constant dense<0.000000e+00> : vector<16x64xf32>
    %2 = tpu.matmul %0, %1, %cst {dimension_numbers = #tpu.dot_dimension_numbers<[1], [0], [0], [1], [0, 0, 1, 1], [], []>} : vector<16x64xf32>, vector<64x64xf32>, vector<16x64xf32> -> vector<16x64xf32>
    %c0_3 = arith.constant 0 : index
    %c0_4 = arith.constant 0 : index
    %3 = vector.load %arg7[%c0_3, %c0_4] : memref<1x64xf32, #tpu.memory_space<vmem>>, vector<1x64xf32>
    %4 = vector.broadcast %3 : vector<1x64xf32> to vector<16x64xf32>
    %5 = arith.addf %2, %4 : vector<16x64xf32>
    %c0_5 = arith.constant 0 : index
    %c0_6 = arith.constant 0 : index
    %6 = vector.load %arg1[%c0_5, %c0_6] : memref<16x64xf32, #tpu.memory_space<vmem>>, vector<16x64xf32>
    %c0_7 = arith.constant 0 : index
    %c0_8 = arith.constant 0 : index
    %7 = vector.load %arg2[%c0_7, %c0_8] : memref<16x64xf32, #tpu.memory_space<vmem>>, vector<16x64xf32>
    %8 = arith.addf %6, %7 : vector<16x64xf32>
    %9 = arith.addf %8, %5 : vector<16x64xf32>
    %10 = arith.negf %9 : vector<16x64xf32>
    %11 = math.exp %10 : vector<16x64xf32>
    %cst_9 = arith.constant 1.000000e+00 : f32
    %12 = vector.broadcast %cst_9 : f32 to vector<16x64xf32>
    %13 = arith.addf %12, %11 : vector<16x64xf32>
    %14 = arith.divf %12, %13 : vector<16x64xf32>
    %c0_10 = arith.constant 0 : index
    %c0_11 = arith.constant 0 : index
    %15 = vector.load %arg5[%c0_10, %c0_11] : memref<16x1xf32, #tpu.memory_space<vmem>>, vector<16x1xf32>
    %16 = vector.broadcast %15 : vector<16x1xf32> to vector<16x64xf32>
    %17 = arith.mulf %14, %16 : vector<16x64xf32>
    %c0_12 = arith.constant 0 : index
    %c0_13 = arith.constant 0 : index
    %18 = vector.load %arg4[%c0_12, %c0_13] : memref<16x64xf32, #tpu.memory_space<vmem>>, vector<16x64xf32>
    %19 = arith.mulf %17, %18 : vector<16x64xf32>
    %20 = tpu.concatenate %19, %17 in 1 : vector<16x64xf32>, vector<16x64xf32> -> vector<16x128xf32>
    %c0_14 = arith.constant 0 : index
    %c0_15 = arith.constant 0 : index
    %21 = vector.load %arg10[%c0_14, %c0_15] : memref<16x128xf32, #tpu.memory_space<vmem>>, vector<16x128xf32>
    tpu.vector_store %arg10[%c0_14, %c0_15], %20 {strides = array<i32>} : memref<16x128xf32, #tpu.memory_space<vmem>>, vector<16x128xf32>,
    %c0_16 = arith.constant 0 : index
    %c0_17 = arith.constant 0 : index
    %22 = vector.load %arg3[%c0_16, %c0_17] : memref<16x64xf32, #tpu.memory_space<vmem>>, vector<16x64xf32>
    %c0_18 = arith.constant 0 : index
    %c0_19 = arith.constant 0 : index
    %23 = vector.load %arg8[%c0_18, %c0_19] : memref<1x64xf32, #tpu.memory_space<vmem>>, vector<1x64xf32>
    %c0_20 = arith.constant 0 : index
    %c0_21 = arith.constant 0 : index
    %24 = vector.load %arg9[%c0_20, %c0_21] : memref<1x64xf32, #tpu.memory_space<vmem>>, vector<1x64xf32>
    %cst_22 = arith.constant dense<0.000000e+00> : vector<16xf32>
    %25 = vector.multi_reduction <add>, %9, %cst_22 [1] : vector<16x64xf32> to vector<16xf32>
    %26 = vector.shape_cast %25 : vector<16xf32> to vector<16x1xf32>
    %cst_23 = arith.constant 6.400000e+01 : f32
    %27 = vector.broadcast %cst_23 : f32 to vector<16x1xf32>
    %28 = arith.divf %26, %27 : vector<16x1xf32>
    %29 = vector.broadcast %28 : vector<16x1xf32> to vector<16x64xf32>
    %30 = arith.subf %9, %29 : vector<16x64xf32>
    %31 = arith.mulf %30, %30 : vector<16x64xf32>
    %cst_24 = arith.constant dense<0.000000e+00> : vector<16xf32>
    %32 = vector.multi_reduction <add>, %31, %cst_24 [1] : vector<16x64xf32> to vector<16xf32>
    %33 = vector.shape_cast %32 : vector<16xf32> to vector<16x1xf32>
    %cst_25 = arith.constant 6.400000e+01 : f32
    %34 = vector.broadcast %cst_25 : f32 to vector<16x1xf32>
    %35 = arith.divf %33, %34 : vector<16x1xf32>
    %36 = vector.broadcast %28 : vector<16x1xf32> to vector<16x64xf32>
    %37 = arith.subf %9, %36 : vector<16x64xf32>
    %cst_26 = arith.constant 9.99999974E-6 : f32
    %38 = vector.broadcast %cst_26 : f32 to vector<16x1xf32>
    %39 = arith.addf %35, %38 : vector<16x1xf32>
    %40 = math.rsqrt %39 : vector<16x1xf32>
    %41 = vector.broadcast %40 : vector<16x1xf32> to vector<16x64xf32>
    %42 = arith.mulf %37, %41 : vector<16x64xf32>
    %43 = vector.broadcast %23 : vector<1x64xf32> to vector<16x64xf32>
    %44 = arith.mulf %42, %43 : vector<16x64xf32>
    %45 = vector.broadcast %24 : vector<1x64xf32> to vector<16x64xf32>
    %46 = arith.addf %44, %45 : vector<16x64xf32>
    %47 = arith.negf %46 : vector<16x64xf32>
    %48 = math.exp %47 : vector<16x64xf32>
    %cst_27 = arith.constant 1.000000e+00 : f32
    %49 = vector.broadcast %cst_27 : f32 to vector<16x64xf32>
    %50 = arith.addf %49, %48 : vector<16x64xf32>
    %51 = arith.divf %49, %50 : vector<16x64xf32>
    %52 = arith.mulf %46, %51 : vector<16x64xf32>
    %53 = arith.addf %22, %52 : vector<16x64xf32>
    %c0_28 = arith.constant 0 : index
    %c0_29 = arith.constant 0 : index
    %54 = vector.load %arg11[%c0_28, %c0_29] : memref<16x64xf32, #tpu.memory_space<vmem>>, vector<16x64xf32>
    tpu.vector_store %arg11[%c0_28, %c0_29], %53 {strides = array<i32>} : memref<16x64xf32, #tpu.memory_space<vmem>>, vector<16x64xf32>,
    return
  }
  func.func @transform_0(%arg0: i32) -> (i32, i32) {
    %c0_i32 = arith.constant 0 : i32
    %c0_i32_0 = arith.constant 0 : i32
    return %arg0, %c0_i32 : i32, i32
  }
  func.func @transform_1(%arg0: i32) -> (i32, i32) {
    %c0_i32 = arith.constant 0 : i32
    %c0_i32_0 = arith.constant 0 : i32
    return %arg0, %c0_i32 : i32, i32
  }
  func.func @transform_2(%arg0: i32) -> (i32, i32) {
    %c0_i32 = arith.constant 0 : i32
    %c0_i32_0 = arith.constant 0 : i32
    return %arg0, %c0_i32 : i32, i32
  }
  func.func @transform_3(%arg0: i32) -> (i32, i32) {
    %c0_i32 = arith.constant 0 : i32
    %c0_i32_0 = arith.constant 0 : i32
    return %arg0, %c0_i32 : i32, i32
  }
  func.func @transform_4(%arg0: i32) -> (i32, i32) {
    %c0_i32 = arith.constant 0 : i32
    %c0_i32_0 = arith.constant 0 : i32
    return %arg0, %c0_i32 : i32, i32
  }
  func.func @transform_5(%arg0: i32) -> (i32, i32) {
    %c0_i32 = arith.constant 0 : i32
    %c0_i32_0 = arith.constant 0 : i32
    %c0_i32_1 = arith.constant 0 : i32
    return %c0_i32, %c0_i32_0 : i32, i32
  }
  func.func @transform_6(%arg0: i32) -> (i32, i32) {
    %c0_i32 = arith.constant 0 : i32
    %c0_i32_0 = arith.constant 0 : i32
    %c0_i32_1 = arith.constant 0 : i32
    return %c0_i32, %c0_i32_0 : i32, i32
  }
  func.func @transform_7(%arg0: i32) -> (i32, i32) {
    %c0_i32 = arith.constant 0 : i32
    %c0_i32_0 = arith.constant 0 : i32
    %c0_i32_1 = arith.constant 0 : i32
    return %c0_i32, %c0_i32_0 : i32, i32
  }
  func.func @transform_8(%arg0: i32) -> (i32, i32) {
    %c0_i32 = arith.constant 0 : i32
    %c0_i32_0 = arith.constant 0 : i32
    %c0_i32_1 = arith.constant 0 : i32
    return %c0_i32, %c0_i32_0 : i32, i32
  }
  func.func @transform_9(%arg0: i32) -> (i32, i32) {
    %c0_i32 = arith.constant 0 : i32
    %c0_i32_0 = arith.constant 0 : i32
    return %arg0, %c0_i32 : i32, i32
  }
  func.func @transform_10(%arg0: i32) -> (i32, i32) {
    %c0_i32 = arith.constant 0 : i32
    %c0_i32_0 = arith.constant 0 : i32
    return %arg0, %c0_i32 : i32, i32
  }
}

module attributes {stable_mosaic.version = 11 : i64} {
  func.func @_embed_kernel(%arg0: i32, %arg1: memref<16x1xf32, #tpu.memory_space<vmem>>, %arg2: memref<1x80xf32, #tpu.memory_space<vmem>>, %arg3: memref<80x64xf32, #tpu.memory_space<vmem>>, %arg4: memref<1x64xf32, #tpu.memory_space<vmem>>, %arg5: memref<1x64xf32, #tpu.memory_space<vmem>>, %arg6: memref<1x64xf32, #tpu.memory_space<vmem>>, %arg7: memref<64x64xf32, #tpu.memory_space<vmem>>, %arg8: memref<1x64xf32, #tpu.memory_space<vmem>>, %arg9: memref<1x64xf32, #tpu.memory_space<vmem>>, %arg10: memref<1x64xf32, #tpu.memory_space<vmem>>, %arg11: memref<16x64xf32, #tpu.memory_space<vmem>>) attributes {dimension_semantics = [#tpu.dimension_semantics<parallel>], iteration_bounds = array<i64: 2>, scalar_prefetch = 0 : i64, scratch_operands = 0 : i64, tpu.core_type = #tpu.core_type<tc>, window_params = [{transform_indices = @transform_0, window_bounds = array<i64: 16, 1>}, {pipeline_mode = #tpu.pipeline_mode<synchronous>, transform_indices = @transform_1, window_bounds = array<i64: 1, 80>}, {pipeline_mode = #tpu.pipeline_mode<synchronous>, transform_indices = @transform_2, window_bounds = array<i64: 80, 64>}, {pipeline_mode = #tpu.pipeline_mode<synchronous>, transform_indices = @transform_3, window_bounds = array<i64: 1, 64>}, {pipeline_mode = #tpu.pipeline_mode<synchronous>, transform_indices = @transform_4, window_bounds = array<i64: 1, 64>}, {pipeline_mode = #tpu.pipeline_mode<synchronous>, transform_indices = @transform_5, window_bounds = array<i64: 1, 64>}, {pipeline_mode = #tpu.pipeline_mode<synchronous>, transform_indices = @transform_6, window_bounds = array<i64: 64, 64>}, {pipeline_mode = #tpu.pipeline_mode<synchronous>, transform_indices = @transform_7, window_bounds = array<i64: 1, 64>}, {pipeline_mode = #tpu.pipeline_mode<synchronous>, transform_indices = @transform_8, window_bounds = array<i64: 1, 64>}, {pipeline_mode = #tpu.pipeline_mode<synchronous>, transform_indices = @transform_9, window_bounds = array<i64: 1, 64>}, {transform_indices = @transform_10, window_bounds = array<i64: 16, 64>}]} {
    %c0 = arith.constant 0 : index
    %c0_0 = arith.constant 0 : index
    %0 = vector.load %arg1[%c0, %c0_0] : memref<16x1xf32, #tpu.memory_space<vmem>>, vector<16x1xf32>
    %c0_1 = arith.constant 0 : index
    %c0_2 = arith.constant 0 : index
    %1 = vector.load %arg2[%c0_1, %c0_2] : memref<1x80xf32, #tpu.memory_space<vmem>>, vector<1x80xf32>
    %2 = vector.broadcast %0 : vector<16x1xf32> to vector<16x80xf32>
    %3 = vector.broadcast %1 : vector<1x80xf32> to vector<16x80xf32>
    %4 = arith.subf %2, %3 : vector<16x80xf32>
    %5 = arith.mulf %4, %4 : vector<16x80xf32>
    %cst = arith.constant -9.875000e+00 : f32
    %6 = vector.broadcast %cst : f32 to vector<16x80xf32>
    %7 = arith.mulf %6, %5 : vector<16x80xf32>
    %8 = math.exp %7 : vector<16x80xf32>
    %c0_3 = arith.constant 0 : index
    %c0_4 = arith.constant 0 : index
    %9 = vector.load %arg3[%c0_3, %c0_4] : memref<80x64xf32, #tpu.memory_space<vmem>>, vector<80x64xf32>
    %cst_5 = arith.constant dense<0.000000e+00> : vector<16x64xf32>
    %10 = tpu.matmul %8, %9, %cst_5 {dimension_numbers = #tpu.dot_dimension_numbers<[1], [0], [0], [1], [0, 0, 1, 1], [], []>} : vector<16x80xf32>, vector<80x64xf32>, vector<16x64xf32> -> vector<16x64xf32>
    %c0_6 = arith.constant 0 : index
    %c0_7 = arith.constant 0 : index
    %11 = vector.load %arg4[%c0_6, %c0_7] : memref<1x64xf32, #tpu.memory_space<vmem>>, vector<1x64xf32>
    %12 = vector.broadcast %11 : vector<1x64xf32> to vector<16x64xf32>
    %13 = arith.addf %10, %12 : vector<16x64xf32>
    %c0_8 = arith.constant 0 : index
    %c0_9 = arith.constant 0 : index
    %14 = vector.load %arg5[%c0_8, %c0_9] : memref<1x64xf32, #tpu.memory_space<vmem>>, vector<1x64xf32>
    %c0_10 = arith.constant 0 : index
    %c0_11 = arith.constant 0 : index
    %15 = vector.load %arg6[%c0_10, %c0_11] : memref<1x64xf32, #tpu.memory_space<vmem>>, vector<1x64xf32>
    %cst_12 = arith.constant dense<0.000000e+00> : vector<16xf32>
    %16 = vector.multi_reduction <add>, %13, %cst_12 [1] : vector<16x64xf32> to vector<16xf32>
    %17 = vector.shape_cast %16 : vector<16xf32> to vector<16x1xf32>
    %cst_13 = arith.constant 6.400000e+01 : f32
    %18 = vector.broadcast %cst_13 : f32 to vector<16x1xf32>
    %19 = arith.divf %17, %18 : vector<16x1xf32>
    %20 = vector.broadcast %19 : vector<16x1xf32> to vector<16x64xf32>
    %21 = arith.subf %13, %20 : vector<16x64xf32>
    %22 = arith.mulf %21, %21 : vector<16x64xf32>
    %cst_14 = arith.constant dense<0.000000e+00> : vector<16xf32>
    %23 = vector.multi_reduction <add>, %22, %cst_14 [1] : vector<16x64xf32> to vector<16xf32>
    %24 = vector.shape_cast %23 : vector<16xf32> to vector<16x1xf32>
    %cst_15 = arith.constant 6.400000e+01 : f32
    %25 = vector.broadcast %cst_15 : f32 to vector<16x1xf32>
    %26 = arith.divf %24, %25 : vector<16x1xf32>
    %27 = vector.broadcast %19 : vector<16x1xf32> to vector<16x64xf32>
    %28 = arith.subf %13, %27 : vector<16x64xf32>
    %cst_16 = arith.constant 9.99999974E-6 : f32
    %29 = vector.broadcast %cst_16 : f32 to vector<16x1xf32>
    %30 = arith.addf %26, %29 : vector<16x1xf32>
    %31 = math.rsqrt %30 : vector<16x1xf32>
    %32 = vector.broadcast %31 : vector<16x1xf32> to vector<16x64xf32>
    %33 = arith.mulf %28, %32 : vector<16x64xf32>
    %34 = vector.broadcast %14 : vector<1x64xf32> to vector<16x64xf32>
    %35 = arith.mulf %33, %34 : vector<16x64xf32>
    %36 = vector.broadcast %15 : vector<1x64xf32> to vector<16x64xf32>
    %37 = arith.addf %35, %36 : vector<16x64xf32>
    %38 = arith.negf %37 : vector<16x64xf32>
    %39 = math.exp %38 : vector<16x64xf32>
    %cst_17 = arith.constant 1.000000e+00 : f32
    %40 = vector.broadcast %cst_17 : f32 to vector<16x64xf32>
    %41 = arith.addf %40, %39 : vector<16x64xf32>
    %42 = arith.divf %40, %41 : vector<16x64xf32>
    %43 = arith.mulf %37, %42 : vector<16x64xf32>
    %c0_18 = arith.constant 0 : index
    %c0_19 = arith.constant 0 : index
    %44 = vector.load %arg7[%c0_18, %c0_19] : memref<64x64xf32, #tpu.memory_space<vmem>>, vector<64x64xf32>
    %cst_20 = arith.constant dense<0.000000e+00> : vector<16x64xf32>
    %45 = tpu.matmul %43, %44, %cst_20 {dimension_numbers = #tpu.dot_dimension_numbers<[1], [0], [0], [1], [0, 0, 1, 1], [], []>} : vector<16x64xf32>, vector<64x64xf32>, vector<16x64xf32> -> vector<16x64xf32>
    %c0_21 = arith.constant 0 : index
    %c0_22 = arith.constant 0 : index
    %46 = vector.load %arg8[%c0_21, %c0_22] : memref<1x64xf32, #tpu.memory_space<vmem>>, vector<1x64xf32>
    %47 = vector.broadcast %46 : vector<1x64xf32> to vector<16x64xf32>
    %48 = arith.addf %45, %47 : vector<16x64xf32>
    %c0_23 = arith.constant 0 : index
    %c0_24 = arith.constant 0 : index
    %49 = vector.load %arg9[%c0_23, %c0_24] : memref<1x64xf32, #tpu.memory_space<vmem>>, vector<1x64xf32>
    %c0_25 = arith.constant 0 : index
    %c0_26 = arith.constant 0 : index
    %50 = vector.load %arg10[%c0_25, %c0_26] : memref<1x64xf32, #tpu.memory_space<vmem>>, vector<1x64xf32>
    %cst_27 = arith.constant dense<0.000000e+00> : vector<16xf32>
    %51 = vector.multi_reduction <add>, %48, %cst_27 [1] : vector<16x64xf32> to vector<16xf32>
    %52 = vector.shape_cast %51 : vector<16xf32> to vector<16x1xf32>
    %cst_28 = arith.constant 6.400000e+01 : f32
    %53 = vector.broadcast %cst_28 : f32 to vector<16x1xf32>
    %54 = arith.divf %52, %53 : vector<16x1xf32>
    %55 = vector.broadcast %54 : vector<16x1xf32> to vector<16x64xf32>
    %56 = arith.subf %48, %55 : vector<16x64xf32>
    %57 = arith.mulf %56, %56 : vector<16x64xf32>
    %cst_29 = arith.constant dense<0.000000e+00> : vector<16xf32>
    %58 = vector.multi_reduction <add>, %57, %cst_29 [1] : vector<16x64xf32> to vector<16xf32>
    %59 = vector.shape_cast %58 : vector<16xf32> to vector<16x1xf32>
    %cst_30 = arith.constant 6.400000e+01 : f32
    %60 = vector.broadcast %cst_30 : f32 to vector<16x1xf32>
    %61 = arith.divf %59, %60 : vector<16x1xf32>
    %62 = vector.broadcast %54 : vector<16x1xf32> to vector<16x64xf32>
    %63 = arith.subf %48, %62 : vector<16x64xf32>
    %cst_31 = arith.constant 9.99999974E-6 : f32
    %64 = vector.broadcast %cst_31 : f32 to vector<16x1xf32>
    %65 = arith.addf %61, %64 : vector<16x1xf32>
    %66 = math.rsqrt %65 : vector<16x1xf32>
    %67 = vector.broadcast %66 : vector<16x1xf32> to vector<16x64xf32>
    %68 = arith.mulf %63, %67 : vector<16x64xf32>
    %69 = vector.broadcast %49 : vector<1x64xf32> to vector<16x64xf32>
    %70 = arith.mulf %68, %69 : vector<16x64xf32>
    %71 = vector.broadcast %50 : vector<1x64xf32> to vector<16x64xf32>
    %72 = arith.addf %70, %71 : vector<16x64xf32>
    %73 = arith.negf %72 : vector<16x64xf32>
    %74 = math.exp %73 : vector<16x64xf32>
    %cst_32 = arith.constant 1.000000e+00 : f32
    %75 = vector.broadcast %cst_32 : f32 to vector<16x64xf32>
    %76 = arith.addf %75, %74 : vector<16x64xf32>
    %77 = arith.divf %75, %76 : vector<16x64xf32>
    %78 = arith.mulf %72, %77 : vector<16x64xf32>
    %c0_33 = arith.constant 0 : index
    %c0_34 = arith.constant 0 : index
    %79 = vector.load %arg11[%c0_33, %c0_34] : memref<16x64xf32, #tpu.memory_space<vmem>>, vector<16x64xf32>
    tpu.vector_store %arg11[%c0_33, %c0_34], %78 {strides = array<i32>} : memref<16x64xf32, #tpu.memory_space<vmem>>, vector<16x64xf32>,
    return
  }
  func.func @transform_0(%arg0: i32) -> (i32, i32) {
    %c0_i32 = arith.constant 0 : i32
    %c0_i32_0 = arith.constant 0 : i32
    return %arg0, %c0_i32 : i32, i32
  }
  func.func @transform_1(%arg0: i32) -> (i32, i32) {
    %c0_i32 = arith.constant 0 : i32
    %c0_i32_0 = arith.constant 0 : i32
    %c0_i32_1 = arith.constant 0 : i32
    return %c0_i32, %c0_i32_0 : i32, i32
  }
  func.func @transform_2(%arg0: i32) -> (i32, i32) {
    %c0_i32 = arith.constant 0 : i32
    %c0_i32_0 = arith.constant 0 : i32
    %c0_i32_1 = arith.constant 0 : i32
    return %c0_i32, %c0_i32_0 : i32, i32
  }
  func.func @transform_3(%arg0: i32) -> (i32, i32) {
    %c0_i32 = arith.constant 0 : i32
    %c0_i32_0 = arith.constant 0 : i32
    %c0_i32_1 = arith.constant 0 : i32
    return %c0_i32, %c0_i32_0 : i32, i32
  }
  func.func @transform_4(%arg0: i32) -> (i32, i32) {
    %c0_i32 = arith.constant 0 : i32
    %c0_i32_0 = arith.constant 0 : i32
    %c0_i32_1 = arith.constant 0 : i32
    return %c0_i32, %c0_i32_0 : i32, i32
  }
  func.func @transform_5(%arg0: i32) -> (i32, i32) {
    %c0_i32 = arith.constant 0 : i32
    %c0_i32_0 = arith.constant 0 : i32
    %c0_i32_1 = arith.constant 0 : i32
    return %c0_i32, %c0_i32_0 : i32, i32
  }
  func.func @transform_6(%arg0: i32) -> (i32, i32) {
    %c0_i32 = arith.constant 0 : i32
    %c0_i32_0 = arith.constant 0 : i32
    %c0_i32_1 = arith.constant 0 : i32
    return %c0_i32, %c0_i32_0 : i32, i32
  }
  func.func @transform_7(%arg0: i32) -> (i32, i32) {
    %c0_i32 = arith.constant 0 : i32
    %c0_i32_0 = arith.constant 0 : i32
    %c0_i32_1 = arith.constant 0 : i32
    return %c0_i32, %c0_i32_0 : i32, i32
  }
  func.func @transform_8(%arg0: i32) -> (i32, i32) {
    %c0_i32 = arith.constant 0 : i32
    %c0_i32_0 = arith.constant 0 : i32
    %c0_i32_1 = arith.constant 0 : i32
    return %c0_i32, %c0_i32_0 : i32, i32
  }
  func.func @transform_9(%arg0: i32) -> (i32, i32) {
    %c0_i32 = arith.constant 0 : i32
    %c0_i32_0 = arith.constant 0 : i32
    %c0_i32_1 = arith.constant 0 : i32
    return %c0_i32, %c0_i32_0 : i32, i32
  }
  func.func @transform_10(%arg0: i32) -> (i32, i32) {
    %c0_i32 = arith.constant 0 : i32
    %c0_i32_0 = arith.constant 0 : i32
    return %arg0, %c0_i32 : i32, i32
  }
}

module attributes {stable_mosaic.version = 11 : i64} {
  func.func @_segsum_combine_kernel(%arg0: i32, %arg1: i32, %arg2: memref<8x32xf32, #tpu.memory_space<vmem>>, %arg3: memref<32x128xf32, #tpu.memory_space<vmem>>, %arg4: memref<8x64xf32, #tpu.memory_space<vmem>>, %arg5: memref<8x64xf32, #tpu.memory_space<vmem>>, %arg6: memref<1x64xf32, #tpu.memory_space<vmem>>, %arg7: memref<1x64xf32, #tpu.memory_space<vmem>>, %arg8: memref<8x64xf32, #tpu.memory_space<vmem>>, %arg9: memref<8x128xf32, #tpu.memory_space<vmem>>) attributes {dimension_semantics = [#tpu.dimension_semantics<parallel>, #tpu.dimension_semantics<arbitrary>], iteration_bounds = array<i64: 1, 1>, scalar_prefetch = 0 : i64, scratch_operands = 1 : i64, tpu.core_type = #tpu.core_type<tc>, window_params = [{transform_indices = @transform_0, window_bounds = array<i64: 8, 32>}, {transform_indices = @transform_1, window_bounds = array<i64: 32, 128>}, {transform_indices = @transform_2, window_bounds = array<i64: 8, 64>}, {transform_indices = @transform_3, window_bounds = array<i64: 8, 64>}, {pipeline_mode = #tpu.pipeline_mode<synchronous>, transform_indices = @transform_4, window_bounds = array<i64: 1, 64>}, {pipeline_mode = #tpu.pipeline_mode<synchronous>, transform_indices = @transform_5, window_bounds = array<i64: 1, 64>}, {transform_indices = @transform_6, window_bounds = array<i64: 8, 64>}]} {
    %c0_i32 = arith.constant 0 : i32
    %0 = arith.cmpi eq, %arg1, %c0_i32 : i32
    %1 = arith.extui %0 : i1 to i32
    %c0_i32_0 = arith.constant 0 : i32
    %2 = arith.cmpi ne, %1, %c0_i32_0 : i32
    scf.if %2 {
      %cst_10 = arith.constant 0.000000e+00 : f32
      %12 = vector.broadcast %cst_10 : f32 to vector<8x128xf32>
      %c0_11 = arith.constant 0 : index
      %c0_12 = arith.constant 0 : index
      %13 = vector.load %arg9[%c0_11, %c0_12] : memref<8x128xf32, #tpu.memory_space<vmem>>, vector<8x128xf32>
      tpu.vector_store %arg9[%c0_11, %c0_12], %12 {strides = array<i32>} : memref<8x128xf32, #tpu.memory_space<vmem>>, vector<8x128xf32>,
    } else {
    }
    %c0 = arith.constant 0 : index
    %c0_1 = arith.constant 0 : index
    %3 = vector.load %arg9[%c0, %c0_1] : memref<8x128xf32, #tpu.memory_space<vmem>>, vector<8x128xf32>
    %c0_2 = arith.constant 0 : index
    %c0_3 = arith.constant 0 : index
    %4 = vector.load %arg2[%c0_2, %c0_3] : memref<8x32xf32, #tpu.memory_space<vmem>>, vector<8x32xf32>
    %c0_4 = arith.constant 0 : index
    %c0_5 = arith.constant 0 : index
    %5 = vector.load %arg3[%c0_4, %c0_5] : memref<32x128xf32, #tpu.memory_space<vmem>>, vector<32x128xf32>
    %cst = arith.constant dense<0.000000e+00> : vector<8x128xf32>
    %6 = tpu.matmul %4, %5, %cst {dimension_numbers = #tpu.dot_dimension_numbers<[1], [0], [0], [1], [0, 0, 1, 1], [], []>} : vector<8x32xf32>, vector<32x128xf32>, vector<8x128xf32> -> vector<8x128xf32>
    %7 = arith.addf %3, %6 : vector<8x128xf32>
    %c0_6 = arith.constant 0 : index
    %c0_7 = arith.constant 0 : index
    %8 = vector.load %arg9[%c0_6, %c0_7] : memref<8x128xf32, #tpu.memory_space<vmem>>, vector<8x128xf32>
    tpu.vector_store %arg9[%c0_6, %c0_7], %7 {strides = array<i32>} : memref<8x128xf32, #tpu.memory_space<vmem>>, vector<8x128xf32>,
    %c0_i32_8 = arith.constant 0 : i32
    %9 = arith.cmpi eq, %arg1, %c0_i32_8 : i32
    %10 = arith.extui %9 : i1 to i32
    %c0_i32_9 = arith.constant 0 : i32
    %11 = arith.cmpi ne, %10, %c0_i32_9 : i32
    scf.if %11 {
      %c0_10 = arith.constant 0 : index
      %c0_11 = arith.constant 0 : index
      %12 = vector.load %arg9[%c0_10, %c0_11] : memref<8x128xf32, #tpu.memory_space<vmem>>, vector<8x128xf32>
      %c0_12 = arith.constant 0 : index
      %c0_13 = arith.constant 0 : index
      %13 = vector.load %arg4[%c0_12, %c0_13] : memref<8x64xf32, #tpu.memory_space<vmem>>, vector<8x64xf32>
      %14 = vector.extract_strided_slice %12 {offsets = [0, 0], sizes = [8, 64], strides = [1, 1]} : vector<8x128xf32> to vector<8x64xf32>
      %15 = vector.extract_strided_slice %12 {offsets = [0, 64], sizes = [8, 64], strides = [1, 1]} : vector<8x128xf32> to vector<8x64xf32>
      %cst_14 = arith.constant 9.99999997E-7 : f32
      %16 = vector.broadcast %cst_14 : f32 to vector<8x64xf32>
      %17 = arith.addf %15, %16 : vector<8x64xf32>
      %18 = arith.divf %14, %17 : vector<8x64xf32>
      %19 = arith.addf %13, %18 : vector<8x64xf32>
      %c0_15 = arith.constant 0 : index
      %c0_16 = arith.constant 0 : index
      %20 = vector.load %arg5[%c0_15, %c0_16] : memref<8x64xf32, #tpu.memory_space<vmem>>, vector<8x64xf32>
      %c0_17 = arith.constant 0 : index
      %c0_18 = arith.constant 0 : index
      %21 = vector.load %arg6[%c0_17, %c0_18] : memref<1x64xf32, #tpu.memory_space<vmem>>, vector<1x64xf32>
      %c0_19 = arith.constant 0 : index
      %c0_20 = arith.constant 0 : index
      %22 = vector.load %arg7[%c0_19, %c0_20] : memref<1x64xf32, #tpu.memory_space<vmem>>, vector<1x64xf32>
      %cst_21 = arith.constant dense<0.000000e+00> : vector<8xf32>
      %23 = vector.multi_reduction <add>, %19, %cst_21 [1] : vector<8x64xf32> to vector<8xf32>
      %24 = vector.shape_cast %23 : vector<8xf32> to vector<8x1xf32>
      %cst_22 = arith.constant 6.400000e+01 : f32
      %25 = vector.broadcast %cst_22 : f32 to vector<8x1xf32>
      %26 = arith.divf %24, %25 : vector<8x1xf32>
      %27 = vector.broadcast %26 : vector<8x1xf32> to vector<8x64xf32>
      %28 = arith.subf %19, %27 : vector<8x64xf32>
      %29 = arith.mulf %28, %28 : vector<8x64xf32>
      %cst_23 = arith.constant dense<0.000000e+00> : vector<8xf32>
      %30 = vector.multi_reduction <add>, %29, %cst_23 [1] : vector<8x64xf32> to vector<8xf32>
      %31 = vector.shape_cast %30 : vector<8xf32> to vector<8x1xf32>
      %cst_24 = arith.constant 6.400000e+01 : f32
      %32 = vector.broadcast %cst_24 : f32 to vector<8x1xf32>
      %33 = arith.divf %31, %32 : vector<8x1xf32>
      %34 = vector.broadcast %26 : vector<8x1xf32> to vector<8x64xf32>
      %35 = arith.subf %19, %34 : vector<8x64xf32>
      %cst_25 = arith.constant 9.99999974E-6 : f32
      %36 = vector.broadcast %cst_25 : f32 to vector<8x1xf32>
      %37 = arith.addf %33, %36 : vector<8x1xf32>
      %38 = math.rsqrt %37 : vector<8x1xf32>
      %39 = vector.broadcast %38 : vector<8x1xf32> to vector<8x64xf32>
      %40 = arith.mulf %35, %39 : vector<8x64xf32>
      %41 = vector.broadcast %21 : vector<1x64xf32> to vector<8x64xf32>
      %42 = arith.mulf %40, %41 : vector<8x64xf32>
      %43 = vector.broadcast %22 : vector<1x64xf32> to vector<8x64xf32>
      %44 = arith.addf %42, %43 : vector<8x64xf32>
      %45 = arith.negf %44 : vector<8x64xf32>
      %46 = math.exp %45 : vector<8x64xf32>
      %cst_26 = arith.constant 1.000000e+00 : f32
      %47 = vector.broadcast %cst_26 : f32 to vector<8x64xf32>
      %48 = arith.addf %47, %46 : vector<8x64xf32>
      %49 = arith.divf %47, %48 : vector<8x64xf32>
      %50 = arith.mulf %44, %49 : vector<8x64xf32>
      %51 = arith.addf %20, %50 : vector<8x64xf32>
      %c0_27 = arith.constant 0 : index
      %c0_28 = arith.constant 0 : index
      %52 = vector.load %arg8[%c0_27, %c0_28] : memref<8x64xf32, #tpu.memory_space<vmem>>, vector<8x64xf32>
      tpu.vector_store %arg8[%c0_27, %c0_28], %51 {strides = array<i32>} : memref<8x64xf32, #tpu.memory_space<vmem>>, vector<8x64xf32>,
    } else {
    }
    return
  }
  func.func @transform_0(%arg0: i32, %arg1: i32) -> (i32, i32) {
    %c0_i32 = arith.constant 0 : i32
    return %arg0, %arg1 : i32, i32
  }
  func.func @transform_1(%arg0: i32, %arg1: i32) -> (i32, i32) {
    %c0_i32 = arith.constant 0 : i32
    %c0_i32_0 = arith.constant 0 : i32
    return %arg1, %c0_i32 : i32, i32
  }
  func.func @transform_2(%arg0: i32, %arg1: i32) -> (i32, i32) {
    %c0_i32 = arith.constant 0 : i32
    %c0_i32_0 = arith.constant 0 : i32
    return %arg0, %c0_i32 : i32, i32
  }
  func.func @transform_3(%arg0: i32, %arg1: i32) -> (i32, i32) {
    %c0_i32 = arith.constant 0 : i32
    %c0_i32_0 = arith.constant 0 : i32
    return %arg0, %c0_i32 : i32, i32
  }
  func.func @transform_4(%arg0: i32, %arg1: i32) -> (i32, i32) {
    %c0_i32 = arith.constant 0 : i32
    %c0_i32_0 = arith.constant 0 : i32
    %c0_i32_1 = arith.constant 0 : i32
    return %c0_i32, %c0_i32_0 : i32, i32
  }
  func.func @transform_5(%arg0: i32, %arg1: i32) -> (i32, i32) {
    %c0_i32 = arith.constant 0 : i32
    %c0_i32_0 = arith.constant 0 : i32
    %c0_i32_1 = arith.constant 0 : i32
    return %c0_i32, %c0_i32_0 : i32, i32
  }
  func.func @transform_6(%arg0: i32, %arg1: i32) -> (i32, i32) {
    %c0_i32 = arith.constant 0 : i32
    %c0_i32_0 = arith.constant 0 : i32
    return %arg0, %c0_i32 : i32, i32
  }
}

module attributes {stable_mosaic.version = 11 : i64} {
  func.func @_linear_kernel(%arg0: i32, %arg1: memref<16x64xf32, #tpu.memory_space<vmem>>, %arg2: memref<64x256xf32, #tpu.memory_space<vmem>>, %arg3: memref<1x256xf32, #tpu.memory_space<vmem>>, %arg4: memref<16x256xf32, #tpu.memory_space<vmem>>) attributes {dimension_semantics = [#tpu.dimension_semantics<parallel>], iteration_bounds = array<i64: 2>, scalar_prefetch = 0 : i64, scratch_operands = 0 : i64, tpu.core_type = #tpu.core_type<tc>, window_params = [{transform_indices = @transform_0, window_bounds = array<i64: 16, 64>}, {pipeline_mode = #tpu.pipeline_mode<synchronous>, transform_indices = @transform_1, window_bounds = array<i64: 64, 256>}, {pipeline_mode = #tpu.pipeline_mode<synchronous>, transform_indices = @transform_2, window_bounds = array<i64: 1, 256>}, {transform_indices = @transform_3, window_bounds = array<i64: 16, 256>}]} {
    %c0 = arith.constant 0 : index
    %c0_0 = arith.constant 0 : index
    %0 = vector.load %arg1[%c0, %c0_0] : memref<16x64xf32, #tpu.memory_space<vmem>>, vector<16x64xf32>
    %c0_1 = arith.constant 0 : index
    %c0_2 = arith.constant 0 : index
    %1 = vector.load %arg2[%c0_1, %c0_2] : memref<64x256xf32, #tpu.memory_space<vmem>>, vector<64x256xf32>
    %cst = arith.constant dense<0.000000e+00> : vector<16x256xf32>
    %2 = tpu.matmul %0, %1, %cst {dimension_numbers = #tpu.dot_dimension_numbers<[1], [0], [0], [1], [0, 0, 1, 1], [], []>} : vector<16x64xf32>, vector<64x256xf32>, vector<16x256xf32> -> vector<16x256xf32>
    %c0_3 = arith.constant 0 : index
    %c0_4 = arith.constant 0 : index
    %3 = vector.load %arg3[%c0_3, %c0_4] : memref<1x256xf32, #tpu.memory_space<vmem>>, vector<1x256xf32>
    %4 = vector.broadcast %3 : vector<1x256xf32> to vector<16x256xf32>
    %5 = arith.addf %2, %4 : vector<16x256xf32>
    %c0_5 = arith.constant 0 : index
    %c0_6 = arith.constant 0 : index
    %6 = vector.load %arg4[%c0_5, %c0_6] : memref<16x256xf32, #tpu.memory_space<vmem>>, vector<16x256xf32>
    tpu.vector_store %arg4[%c0_5, %c0_6], %5 {strides = array<i32>} : memref<16x256xf32, #tpu.memory_space<vmem>>, vector<16x256xf32>,
    return
  }
  func.func @transform_0(%arg0: i32) -> (i32, i32) {
    %c0_i32 = arith.constant 0 : i32
    %c0_i32_0 = arith.constant 0 : i32
    return %arg0, %c0_i32 : i32, i32
  }
  func.func @transform_1(%arg0: i32) -> (i32, i32) {
    %c0_i32 = arith.constant 0 : i32
    %c0_i32_0 = arith.constant 0 : i32
    %c0_i32_1 = arith.constant 0 : i32
    return %c0_i32, %c0_i32_0 : i32, i32
  }
  func.func @transform_2(%arg0: i32) -> (i32, i32) {
    %c0_i32 = arith.constant 0 : i32
    %c0_i32_0 = arith.constant 0 : i32
    %c0_i32_1 = arith.constant 0 : i32
    return %c0_i32, %c0_i32_0 : i32, i32
  }
  func.func @transform_3(%arg0: i32) -> (i32, i32) {
    %c0_i32 = arith.constant 0 : i32
    %c0_i32_0 = arith.constant 0 : i32
    return %arg0, %c0_i32 : i32, i32
  }
}

module attributes {stable_mosaic.version = 11 : i64} {
  func.func @_embed_kernel(%arg0: i32, %arg1: memref<64x1xf32, #tpu.memory_space<vmem>>, %arg2: memref<1x40xf32, #tpu.memory_space<vmem>>, %arg3: memref<40x64xf32, #tpu.memory_space<vmem>>, %arg4: memref<1x64xf32, #tpu.memory_space<vmem>>, %arg5: memref<1x64xf32, #tpu.memory_space<vmem>>, %arg6: memref<1x64xf32, #tpu.memory_space<vmem>>, %arg7: memref<64x64xf32, #tpu.memory_space<vmem>>, %arg8: memref<1x64xf32, #tpu.memory_space<vmem>>, %arg9: memref<1x64xf32, #tpu.memory_space<vmem>>, %arg10: memref<1x64xf32, #tpu.memory_space<vmem>>, %arg11: memref<64x64xf32, #tpu.memory_space<vmem>>) attributes {dimension_semantics = [#tpu.dimension_semantics<parallel>], iteration_bounds = array<i64: 2>, scalar_prefetch = 0 : i64, scratch_operands = 0 : i64, tpu.core_type = #tpu.core_type<tc>, window_params = [{transform_indices = @transform_0, window_bounds = array<i64: 64, 1>}, {pipeline_mode = #tpu.pipeline_mode<synchronous>, transform_indices = @transform_1, window_bounds = array<i64: 1, 40>}, {pipeline_mode = #tpu.pipeline_mode<synchronous>, transform_indices = @transform_2, window_bounds = array<i64: 40, 64>}, {pipeline_mode = #tpu.pipeline_mode<synchronous>, transform_indices = @transform_3, window_bounds = array<i64: 1, 64>}, {pipeline_mode = #tpu.pipeline_mode<synchronous>, transform_indices = @transform_4, window_bounds = array<i64: 1, 64>}, {pipeline_mode = #tpu.pipeline_mode<synchronous>, transform_indices = @transform_5, window_bounds = array<i64: 1, 64>}, {pipeline_mode = #tpu.pipeline_mode<synchronous>, transform_indices = @transform_6, window_bounds = array<i64: 64, 64>}, {pipeline_mode = #tpu.pipeline_mode<synchronous>, transform_indices = @transform_7, window_bounds = array<i64: 1, 64>}, {pipeline_mode = #tpu.pipeline_mode<synchronous>, transform_indices = @transform_8, window_bounds = array<i64: 1, 64>}, {pipeline_mode = #tpu.pipeline_mode<synchronous>, transform_indices = @transform_9, window_bounds = array<i64: 1, 64>}, {transform_indices = @transform_10, window_bounds = array<i64: 64, 64>}]} {
    %c0 = arith.constant 0 : index
    %c0_0 = arith.constant 0 : index
    %0 = vector.load %arg1[%c0, %c0_0] : memref<64x1xf32, #tpu.memory_space<vmem>>, vector<64x1xf32>
    %c0_1 = arith.constant 0 : index
    %c0_2 = arith.constant 0 : index
    %1 = vector.load %arg2[%c0_1, %c0_2] : memref<1x40xf32, #tpu.memory_space<vmem>>, vector<1x40xf32>
    %2 = vector.broadcast %0 : vector<64x1xf32> to vector<64x40xf32>
    %3 = vector.broadcast %1 : vector<1x40xf32> to vector<64x40xf32>
    %4 = arith.subf %2, %3 : vector<64x40xf32>
    %5 = arith.mulf %4, %4 : vector<64x40xf32>
    %cst = arith.constant -1.950000e+01 : f32
    %6 = vector.broadcast %cst : f32 to vector<64x40xf32>
    %7 = arith.mulf %6, %5 : vector<64x40xf32>
    %8 = math.exp %7 : vector<64x40xf32>
    %c0_3 = arith.constant 0 : index
    %c0_4 = arith.constant 0 : index
    %9 = vector.load %arg3[%c0_3, %c0_4] : memref<40x64xf32, #tpu.memory_space<vmem>>, vector<40x64xf32>
    %cst_5 = arith.constant dense<0.000000e+00> : vector<64x64xf32>
    %10 = tpu.matmul %8, %9, %cst_5 {dimension_numbers = #tpu.dot_dimension_numbers<[1], [0], [0], [1], [0, 0, 1, 1], [], []>} : vector<64x40xf32>, vector<40x64xf32>, vector<64x64xf32> -> vector<64x64xf32>
    %c0_6 = arith.constant 0 : index
    %c0_7 = arith.constant 0 : index
    %11 = vector.load %arg4[%c0_6, %c0_7] : memref<1x64xf32, #tpu.memory_space<vmem>>, vector<1x64xf32>
    %12 = vector.broadcast %11 : vector<1x64xf32> to vector<64x64xf32>
    %13 = arith.addf %10, %12 : vector<64x64xf32>
    %c0_8 = arith.constant 0 : index
    %c0_9 = arith.constant 0 : index
    %14 = vector.load %arg5[%c0_8, %c0_9] : memref<1x64xf32, #tpu.memory_space<vmem>>, vector<1x64xf32>
    %c0_10 = arith.constant 0 : index
    %c0_11 = arith.constant 0 : index
    %15 = vector.load %arg6[%c0_10, %c0_11] : memref<1x64xf32, #tpu.memory_space<vmem>>, vector<1x64xf32>
    %cst_12 = arith.constant dense<0.000000e+00> : vector<64xf32>
    %16 = vector.multi_reduction <add>, %13, %cst_12 [1] : vector<64x64xf32> to vector<64xf32>
    %17 = vector.shape_cast %16 : vector<64xf32> to vector<64x1xf32>
    %cst_13 = arith.constant 6.400000e+01 : f32
    %18 = vector.broadcast %cst_13 : f32 to vector<64x1xf32>
    %19 = arith.divf %17, %18 : vector<64x1xf32>
    %20 = vector.broadcast %19 : vector<64x1xf32> to vector<64x64xf32>
    %21 = arith.subf %13, %20 : vector<64x64xf32>
    %22 = arith.mulf %21, %21 : vector<64x64xf32>
    %cst_14 = arith.constant dense<0.000000e+00> : vector<64xf32>
    %23 = vector.multi_reduction <add>, %22, %cst_14 [1] : vector<64x64xf32> to vector<64xf32>
    %24 = vector.shape_cast %23 : vector<64xf32> to vector<64x1xf32>
    %cst_15 = arith.constant 6.400000e+01 : f32
    %25 = vector.broadcast %cst_15 : f32 to vector<64x1xf32>
    %26 = arith.divf %24, %25 : vector<64x1xf32>
    %27 = vector.broadcast %19 : vector<64x1xf32> to vector<64x64xf32>
    %28 = arith.subf %13, %27 : vector<64x64xf32>
    %cst_16 = arith.constant 9.99999974E-6 : f32
    %29 = vector.broadcast %cst_16 : f32 to vector<64x1xf32>
    %30 = arith.addf %26, %29 : vector<64x1xf32>
    %31 = math.rsqrt %30 : vector<64x1xf32>
    %32 = vector.broadcast %31 : vector<64x1xf32> to vector<64x64xf32>
    %33 = arith.mulf %28, %32 : vector<64x64xf32>
    %34 = vector.broadcast %14 : vector<1x64xf32> to vector<64x64xf32>
    %35 = arith.mulf %33, %34 : vector<64x64xf32>
    %36 = vector.broadcast %15 : vector<1x64xf32> to vector<64x64xf32>
    %37 = arith.addf %35, %36 : vector<64x64xf32>
    %38 = arith.negf %37 : vector<64x64xf32>
    %39 = math.exp %38 : vector<64x64xf32>
    %cst_17 = arith.constant 1.000000e+00 : f32
    %40 = vector.broadcast %cst_17 : f32 to vector<64x64xf32>
    %41 = arith.addf %40, %39 : vector<64x64xf32>
    %42 = arith.divf %40, %41 : vector<64x64xf32>
    %43 = arith.mulf %37, %42 : vector<64x64xf32>
    %c0_18 = arith.constant 0 : index
    %c0_19 = arith.constant 0 : index
    %44 = vector.load %arg7[%c0_18, %c0_19] : memref<64x64xf32, #tpu.memory_space<vmem>>, vector<64x64xf32>
    %cst_20 = arith.constant dense<0.000000e+00> : vector<64x64xf32>
    %45 = tpu.matmul %43, %44, %cst_20 {dimension_numbers = #tpu.dot_dimension_numbers<[1], [0], [0], [1], [0, 0, 1, 1], [], []>} : vector<64x64xf32>, vector<64x64xf32>, vector<64x64xf32> -> vector<64x64xf32>
    %c0_21 = arith.constant 0 : index
    %c0_22 = arith.constant 0 : index
    %46 = vector.load %arg8[%c0_21, %c0_22] : memref<1x64xf32, #tpu.memory_space<vmem>>, vector<1x64xf32>
    %47 = vector.broadcast %46 : vector<1x64xf32> to vector<64x64xf32>
    %48 = arith.addf %45, %47 : vector<64x64xf32>
    %c0_23 = arith.constant 0 : index
    %c0_24 = arith.constant 0 : index
    %49 = vector.load %arg9[%c0_23, %c0_24] : memref<1x64xf32, #tpu.memory_space<vmem>>, vector<1x64xf32>
    %c0_25 = arith.constant 0 : index
    %c0_26 = arith.constant 0 : index
    %50 = vector.load %arg10[%c0_25, %c0_26] : memref<1x64xf32, #tpu.memory_space<vmem>>, vector<1x64xf32>
    %cst_27 = arith.constant dense<0.000000e+00> : vector<64xf32>
    %51 = vector.multi_reduction <add>, %48, %cst_27 [1] : vector<64x64xf32> to vector<64xf32>
    %52 = vector.shape_cast %51 : vector<64xf32> to vector<64x1xf32>
    %cst_28 = arith.constant 6.400000e+01 : f32
    %53 = vector.broadcast %cst_28 : f32 to vector<64x1xf32>
    %54 = arith.divf %52, %53 : vector<64x1xf32>
    %55 = vector.broadcast %54 : vector<64x1xf32> to vector<64x64xf32>
    %56 = arith.subf %48, %55 : vector<64x64xf32>
    %57 = arith.mulf %56, %56 : vector<64x64xf32>
    %cst_29 = arith.constant dense<0.000000e+00> : vector<64xf32>
    %58 = vector.multi_reduction <add>, %57, %cst_29 [1] : vector<64x64xf32> to vector<64xf32>
    %59 = vector.shape_cast %58 : vector<64xf32> to vector<64x1xf32>
    %cst_30 = arith.constant 6.400000e+01 : f32
    %60 = vector.broadcast %cst_30 : f32 to vector<64x1xf32>
    %61 = arith.divf %59, %60 : vector<64x1xf32>
    %62 = vector.broadcast %54 : vector<64x1xf32> to vector<64x64xf32>
    %63 = arith.subf %48, %62 : vector<64x64xf32>
    %cst_31 = arith.constant 9.99999974E-6 : f32
    %64 = vector.broadcast %cst_31 : f32 to vector<64x1xf32>
    %65 = arith.addf %61, %64 : vector<64x1xf32>
    %66 = math.rsqrt %65 : vector<64x1xf32>
    %67 = vector.broadcast %66 : vector<64x1xf32> to vector<64x64xf32>
    %68 = arith.mulf %63, %67 : vector<64x64xf32>
    %69 = vector.broadcast %49 : vector<1x64xf32> to vector<64x64xf32>
    %70 = arith.mulf %68, %69 : vector<64x64xf32>
    %71 = vector.broadcast %50 : vector<1x64xf32> to vector<64x64xf32>
    %72 = arith.addf %70, %71 : vector<64x64xf32>
    %73 = arith.negf %72 : vector<64x64xf32>
    %74 = math.exp %73 : vector<64x64xf32>
    %cst_32 = arith.constant 1.000000e+00 : f32
    %75 = vector.broadcast %cst_32 : f32 to vector<64x64xf32>
    %76 = arith.addf %75, %74 : vector<64x64xf32>
    %77 = arith.divf %75, %76 : vector<64x64xf32>
    %78 = arith.mulf %72, %77 : vector<64x64xf32>
    %c0_33 = arith.constant 0 : index
    %c0_34 = arith.constant 0 : index
    %79 = vector.load %arg11[%c0_33, %c0_34] : memref<64x64xf32, #tpu.memory_space<vmem>>, vector<64x64xf32>
    tpu.vector_store %arg11[%c0_33, %c0_34], %78 {strides = array<i32>} : memref<64x64xf32, #tpu.memory_space<vmem>>, vector<64x64xf32>,
    return
  }
  func.func @transform_0(%arg0: i32) -> (i32, i32) {
    %c0_i32 = arith.constant 0 : i32
    %c0_i32_0 = arith.constant 0 : i32
    return %arg0, %c0_i32 : i32, i32
  }
  func.func @transform_1(%arg0: i32) -> (i32, i32) {
    %c0_i32 = arith.constant 0 : i32
    %c0_i32_0 = arith.constant 0 : i32
    %c0_i32_1 = arith.constant 0 : i32
    return %c0_i32, %c0_i32_0 : i32, i32
  }
  func.func @transform_2(%arg0: i32) -> (i32, i32) {
    %c0_i32 = arith.constant 0 : i32
    %c0_i32_0 = arith.constant 0 : i32
    %c0_i32_1 = arith.constant 0 : i32
    return %c0_i32, %c0_i32_0 : i32, i32
  }
  func.func @transform_3(%arg0: i32) -> (i32, i32) {
    %c0_i32 = arith.constant 0 : i32
    %c0_i32_0 = arith.constant 0 : i32
    %c0_i32_1 = arith.constant 0 : i32
    return %c0_i32, %c0_i32_0 : i32, i32
  }
  func.func @transform_4(%arg0: i32) -> (i32, i32) {
    %c0_i32 = arith.constant 0 : i32
    %c0_i32_0 = arith.constant 0 : i32
    %c0_i32_1 = arith.constant 0 : i32
    return %c0_i32, %c0_i32_0 : i32, i32
  }
  func.func @transform_5(%arg0: i32) -> (i32, i32) {
    %c0_i32 = arith.constant 0 : i32
    %c0_i32_0 = arith.constant 0 : i32
    %c0_i32_1 = arith.constant 0 : i32
    return %c0_i32, %c0_i32_0 : i32, i32
  }
  func.func @transform_6(%arg0: i32) -> (i32, i32) {
    %c0_i32 = arith.constant 0 : i32
    %c0_i32_0 = arith.constant 0 : i32
    %c0_i32_1 = arith.constant 0 : i32
    return %c0_i32, %c0_i32_0 : i32, i32
  }
  func.func @transform_7(%arg0: i32) -> (i32, i32) {
    %c0_i32 = arith.constant 0 : i32
    %c0_i32_0 = arith.constant 0 : i32
    %c0_i32_1 = arith.constant 0 : i32
    return %c0_i32, %c0_i32_0 : i32, i32
  }
  func.func @transform_8(%arg0: i32) -> (i32, i32) {
    %c0_i32 = arith.constant 0 : i32
    %c0_i32_0 = arith.constant 0 : i32
    %c0_i32_1 = arith.constant 0 : i32
    return %c0_i32, %c0_i32_0 : i32, i32
  }
  func.func @transform_9(%arg0: i32) -> (i32, i32) {
    %c0_i32 = arith.constant 0 : i32
    %c0_i32_0 = arith.constant 0 : i32
    %c0_i32_1 = arith.constant 0 : i32
    return %c0_i32, %c0_i32_0 : i32, i32
  }
  func.func @transform_10(%arg0: i32) -> (i32, i32) {
    %c0_i32 = arith.constant 0 : i32
    %c0_i32_0 = arith.constant 0 : i32
    return %arg0, %c0_i32 : i32, i32
  }
}

module attributes {stable_mosaic.version = 11 : i64} {
  func.func @_edge_gate_kernel(%arg0: i32, %arg1: memref<64x64xf32, #tpu.memory_space<vmem>>, %arg2: memref<64x64xf32, #tpu.memory_space<vmem>>, %arg3: memref<64x64xf32, #tpu.memory_space<vmem>>, %arg4: memref<64x64xf32, #tpu.memory_space<vmem>>, %arg5: memref<64x1xf32, #tpu.memory_space<vmem>>, %arg6: memref<64x64xf32, #tpu.memory_space<vmem>>, %arg7: memref<1x64xf32, #tpu.memory_space<vmem>>, %arg8: memref<1x64xf32, #tpu.memory_space<vmem>>, %arg9: memref<1x64xf32, #tpu.memory_space<vmem>>, %arg10: memref<64x128xf32, #tpu.memory_space<vmem>>, %arg11: memref<64x64xf32, #tpu.memory_space<vmem>>) attributes {dimension_semantics = [#tpu.dimension_semantics<parallel>], iteration_bounds = array<i64: 2>, scalar_prefetch = 0 : i64, scratch_operands = 0 : i64, tpu.core_type = #tpu.core_type<tc>, window_params = [{transform_indices = @transform_0, window_bounds = array<i64: 64, 64>}, {transform_indices = @transform_1, window_bounds = array<i64: 64, 64>}, {transform_indices = @transform_2, window_bounds = array<i64: 64, 64>}, {transform_indices = @transform_3, window_bounds = array<i64: 64, 64>}, {transform_indices = @transform_4, window_bounds = array<i64: 64, 1>}, {pipeline_mode = #tpu.pipeline_mode<synchronous>, transform_indices = @transform_5, window_bounds = array<i64: 64, 64>}, {pipeline_mode = #tpu.pipeline_mode<synchronous>, transform_indices = @transform_6, window_bounds = array<i64: 1, 64>}, {pipeline_mode = #tpu.pipeline_mode<synchronous>, transform_indices = @transform_7, window_bounds = array<i64: 1, 64>}, {pipeline_mode = #tpu.pipeline_mode<synchronous>, transform_indices = @transform_8, window_bounds = array<i64: 1, 64>}, {transform_indices = @transform_9, window_bounds = array<i64: 64, 128>}, {transform_indices = @transform_10, window_bounds = array<i64: 64, 64>}]} {
    %c0 = arith.constant 0 : index
    %c0_0 = arith.constant 0 : index
    %0 = vector.load %arg3[%c0, %c0_0] : memref<64x64xf32, #tpu.memory_space<vmem>>, vector<64x64xf32>
    %c0_1 = arith.constant 0 : index
    %c0_2 = arith.constant 0 : index
    %1 = vector.load %arg6[%c0_1, %c0_2] : memref<64x64xf32, #tpu.memory_space<vmem>>, vector<64x64xf32>
    %cst = arith.constant dense<0.000000e+00> : vector<64x64xf32>
    %2 = tpu.matmul %0, %1, %cst {dimension_numbers = #tpu.dot_dimension_numbers<[1], [0], [0], [1], [0, 0, 1, 1], [], []>} : vector<64x64xf32>, vector<64x64xf32>, vector<64x64xf32> -> vector<64x64xf32>
    %c0_3 = arith.constant 0 : index
    %c0_4 = arith.constant 0 : index
    %3 = vector.load %arg7[%c0_3, %c0_4] : memref<1x64xf32, #tpu.memory_space<vmem>>, vector<1x64xf32>
    %4 = vector.broadcast %3 : vector<1x64xf32> to vector<64x64xf32>
    %5 = arith.addf %2, %4 : vector<64x64xf32>
    %c0_5 = arith.constant 0 : index
    %c0_6 = arith.constant 0 : index
    %6 = vector.load %arg1[%c0_5, %c0_6] : memref<64x64xf32, #tpu.memory_space<vmem>>, vector<64x64xf32>
    %c0_7 = arith.constant 0 : index
    %c0_8 = arith.constant 0 : index
    %7 = vector.load %arg2[%c0_7, %c0_8] : memref<64x64xf32, #tpu.memory_space<vmem>>, vector<64x64xf32>
    %8 = arith.addf %6, %7 : vector<64x64xf32>
    %9 = arith.addf %8, %5 : vector<64x64xf32>
    %10 = arith.negf %9 : vector<64x64xf32>
    %11 = math.exp %10 : vector<64x64xf32>
    %cst_9 = arith.constant 1.000000e+00 : f32
    %12 = vector.broadcast %cst_9 : f32 to vector<64x64xf32>
    %13 = arith.addf %12, %11 : vector<64x64xf32>
    %14 = arith.divf %12, %13 : vector<64x64xf32>
    %c0_10 = arith.constant 0 : index
    %c0_11 = arith.constant 0 : index
    %15 = vector.load %arg5[%c0_10, %c0_11] : memref<64x1xf32, #tpu.memory_space<vmem>>, vector<64x1xf32>
    %16 = vector.broadcast %15 : vector<64x1xf32> to vector<64x64xf32>
    %17 = arith.mulf %14, %16 : vector<64x64xf32>
    %c0_12 = arith.constant 0 : index
    %c0_13 = arith.constant 0 : index
    %18 = vector.load %arg4[%c0_12, %c0_13] : memref<64x64xf32, #tpu.memory_space<vmem>>, vector<64x64xf32>
    %19 = arith.mulf %17, %18 : vector<64x64xf32>
    %20 = tpu.concatenate %19, %17 in 1 : vector<64x64xf32>, vector<64x64xf32> -> vector<64x128xf32>
    %c0_14 = arith.constant 0 : index
    %c0_15 = arith.constant 0 : index
    %21 = vector.load %arg10[%c0_14, %c0_15] : memref<64x128xf32, #tpu.memory_space<vmem>>, vector<64x128xf32>
    tpu.vector_store %arg10[%c0_14, %c0_15], %20 {strides = array<i32>} : memref<64x128xf32, #tpu.memory_space<vmem>>, vector<64x128xf32>,
    %c0_16 = arith.constant 0 : index
    %c0_17 = arith.constant 0 : index
    %22 = vector.load %arg3[%c0_16, %c0_17] : memref<64x64xf32, #tpu.memory_space<vmem>>, vector<64x64xf32>
    %c0_18 = arith.constant 0 : index
    %c0_19 = arith.constant 0 : index
    %23 = vector.load %arg8[%c0_18, %c0_19] : memref<1x64xf32, #tpu.memory_space<vmem>>, vector<1x64xf32>
    %c0_20 = arith.constant 0 : index
    %c0_21 = arith.constant 0 : index
    %24 = vector.load %arg9[%c0_20, %c0_21] : memref<1x64xf32, #tpu.memory_space<vmem>>, vector<1x64xf32>
    %cst_22 = arith.constant dense<0.000000e+00> : vector<64xf32>
    %25 = vector.multi_reduction <add>, %9, %cst_22 [1] : vector<64x64xf32> to vector<64xf32>
    %26 = vector.shape_cast %25 : vector<64xf32> to vector<64x1xf32>
    %cst_23 = arith.constant 6.400000e+01 : f32
    %27 = vector.broadcast %cst_23 : f32 to vector<64x1xf32>
    %28 = arith.divf %26, %27 : vector<64x1xf32>
    %29 = vector.broadcast %28 : vector<64x1xf32> to vector<64x64xf32>
    %30 = arith.subf %9, %29 : vector<64x64xf32>
    %31 = arith.mulf %30, %30 : vector<64x64xf32>
    %cst_24 = arith.constant dense<0.000000e+00> : vector<64xf32>
    %32 = vector.multi_reduction <add>, %31, %cst_24 [1] : vector<64x64xf32> to vector<64xf32>
    %33 = vector.shape_cast %32 : vector<64xf32> to vector<64x1xf32>
    %cst_25 = arith.constant 6.400000e+01 : f32
    %34 = vector.broadcast %cst_25 : f32 to vector<64x1xf32>
    %35 = arith.divf %33, %34 : vector<64x1xf32>
    %36 = vector.broadcast %28 : vector<64x1xf32> to vector<64x64xf32>
    %37 = arith.subf %9, %36 : vector<64x64xf32>
    %cst_26 = arith.constant 9.99999974E-6 : f32
    %38 = vector.broadcast %cst_26 : f32 to vector<64x1xf32>
    %39 = arith.addf %35, %38 : vector<64x1xf32>
    %40 = math.rsqrt %39 : vector<64x1xf32>
    %41 = vector.broadcast %40 : vector<64x1xf32> to vector<64x64xf32>
    %42 = arith.mulf %37, %41 : vector<64x64xf32>
    %43 = vector.broadcast %23 : vector<1x64xf32> to vector<64x64xf32>
    %44 = arith.mulf %42, %43 : vector<64x64xf32>
    %45 = vector.broadcast %24 : vector<1x64xf32> to vector<64x64xf32>
    %46 = arith.addf %44, %45 : vector<64x64xf32>
    %47 = arith.negf %46 : vector<64x64xf32>
    %48 = math.exp %47 : vector<64x64xf32>
    %cst_27 = arith.constant 1.000000e+00 : f32
    %49 = vector.broadcast %cst_27 : f32 to vector<64x64xf32>
    %50 = arith.addf %49, %48 : vector<64x64xf32>
    %51 = arith.divf %49, %50 : vector<64x64xf32>
    %52 = arith.mulf %46, %51 : vector<64x64xf32>
    %53 = arith.addf %22, %52 : vector<64x64xf32>
    %c0_28 = arith.constant 0 : index
    %c0_29 = arith.constant 0 : index
    %54 = vector.load %arg11[%c0_28, %c0_29] : memref<64x64xf32, #tpu.memory_space<vmem>>, vector<64x64xf32>
    tpu.vector_store %arg11[%c0_28, %c0_29], %53 {strides = array<i32>} : memref<64x64xf32, #tpu.memory_space<vmem>>, vector<64x64xf32>,
    return
  }
  func.func @transform_0(%arg0: i32) -> (i32, i32) {
    %c0_i32 = arith.constant 0 : i32
    %c0_i32_0 = arith.constant 0 : i32
    return %arg0, %c0_i32 : i32, i32
  }
  func.func @transform_1(%arg0: i32) -> (i32, i32) {
    %c0_i32 = arith.constant 0 : i32
    %c0_i32_0 = arith.constant 0 : i32
    return %arg0, %c0_i32 : i32, i32
  }
  func.func @transform_2(%arg0: i32) -> (i32, i32) {
    %c0_i32 = arith.constant 0 : i32
    %c0_i32_0 = arith.constant 0 : i32
    return %arg0, %c0_i32 : i32, i32
  }
  func.func @transform_3(%arg0: i32) -> (i32, i32) {
    %c0_i32 = arith.constant 0 : i32
    %c0_i32_0 = arith.constant 0 : i32
    return %arg0, %c0_i32 : i32, i32
  }
  func.func @transform_4(%arg0: i32) -> (i32, i32) {
    %c0_i32 = arith.constant 0 : i32
    %c0_i32_0 = arith.constant 0 : i32
    return %arg0, %c0_i32 : i32, i32
  }
  func.func @transform_5(%arg0: i32) -> (i32, i32) {
    %c0_i32 = arith.constant 0 : i32
    %c0_i32_0 = arith.constant 0 : i32
    %c0_i32_1 = arith.constant 0 : i32
    return %c0_i32, %c0_i32_0 : i32, i32
  }
  func.func @transform_6(%arg0: i32) -> (i32, i32) {
    %c0_i32 = arith.constant 0 : i32
    %c0_i32_0 = arith.constant 0 : i32
    %c0_i32_1 = arith.constant 0 : i32
    return %c0_i32, %c0_i32_0 : i32, i32
  }
  func.func @transform_7(%arg0: i32) -> (i32, i32) {
    %c0_i32 = arith.constant 0 : i32
    %c0_i32_0 = arith.constant 0 : i32
    %c0_i32_1 = arith.constant 0 : i32
    return %c0_i32, %c0_i32_0 : i32, i32
  }
  func.func @transform_8(%arg0: i32) -> (i32, i32) {
    %c0_i32 = arith.constant 0 : i32
    %c0_i32_0 = arith.constant 0 : i32
    %c0_i32_1 = arith.constant 0 : i32
    return %c0_i32, %c0_i32_0 : i32, i32
  }
  func.func @transform_9(%arg0: i32) -> (i32, i32) {
    %c0_i32 = arith.constant 0 : i32
    %c0_i32_0 = arith.constant 0 : i32
    return %arg0, %c0_i32 : i32, i32
  }
  func.func @transform_10(%arg0: i32) -> (i32, i32) {
    %c0_i32 = arith.constant 0 : i32
    %c0_i32_0 = arith.constant 0 : i32
    return %arg0, %c0_i32 : i32, i32
  }
}

module attributes {stable_mosaic.version = 11 : i64} {
  func.func @_segsum_combine_kernel(%arg0: i32, %arg1: i32, %arg2: memref<16x128xf32, #tpu.memory_space<vmem>>, %arg3: memref<128x128xf32, #tpu.memory_space<vmem>>, %arg4: memref<16x64xf32, #tpu.memory_space<vmem>>, %arg5: memref<16x64xf32, #tpu.memory_space<vmem>>, %arg6: memref<1x64xf32, #tpu.memory_space<vmem>>, %arg7: memref<1x64xf32, #tpu.memory_space<vmem>>, %arg8: memref<16x64xf32, #tpu.memory_space<vmem>>, %arg9: memref<16x128xf32, #tpu.memory_space<vmem>>) attributes {dimension_semantics = [#tpu.dimension_semantics<parallel>, #tpu.dimension_semantics<arbitrary>], iteration_bounds = array<i64: 2, 1>, scalar_prefetch = 0 : i64, scratch_operands = 1 : i64, tpu.core_type = #tpu.core_type<tc>, window_params = [{transform_indices = @transform_0, window_bounds = array<i64: 16, 128>}, {transform_indices = @transform_1, window_bounds = array<i64: 128, 128>}, {transform_indices = @transform_2, window_bounds = array<i64: 16, 64>}, {transform_indices = @transform_3, window_bounds = array<i64: 16, 64>}, {pipeline_mode = #tpu.pipeline_mode<synchronous>, transform_indices = @transform_4, window_bounds = array<i64: 1, 64>}, {pipeline_mode = #tpu.pipeline_mode<synchronous>, transform_indices = @transform_5, window_bounds = array<i64: 1, 64>}, {transform_indices = @transform_6, window_bounds = array<i64: 16, 64>}]} {
    %c0_i32 = arith.constant 0 : i32
    %0 = arith.cmpi eq, %arg1, %c0_i32 : i32
    %1 = arith.extui %0 : i1 to i32
    %c0_i32_0 = arith.constant 0 : i32
    %2 = arith.cmpi ne, %1, %c0_i32_0 : i32
    scf.if %2 {
      %cst_10 = arith.constant 0.000000e+00 : f32
      %12 = vector.broadcast %cst_10 : f32 to vector<16x128xf32>
      %c0_11 = arith.constant 0 : index
      %c0_12 = arith.constant 0 : index
      %13 = vector.load %arg9[%c0_11, %c0_12] : memref<16x128xf32, #tpu.memory_space<vmem>>, vector<16x128xf32>
      tpu.vector_store %arg9[%c0_11, %c0_12], %12 {strides = array<i32>} : memref<16x128xf32, #tpu.memory_space<vmem>>, vector<16x128xf32>,
    } else {
    }
    %c0 = arith.constant 0 : index
    %c0_1 = arith.constant 0 : index
    %3 = vector.load %arg9[%c0, %c0_1] : memref<16x128xf32, #tpu.memory_space<vmem>>, vector<16x128xf32>
    %c0_2 = arith.constant 0 : index
    %c0_3 = arith.constant 0 : index
    %4 = vector.load %arg2[%c0_2, %c0_3] : memref<16x128xf32, #tpu.memory_space<vmem>>, vector<16x128xf32>
    %c0_4 = arith.constant 0 : index
    %c0_5 = arith.constant 0 : index
    %5 = vector.load %arg3[%c0_4, %c0_5] : memref<128x128xf32, #tpu.memory_space<vmem>>, vector<128x128xf32>
    %cst = arith.constant dense<0.000000e+00> : vector<16x128xf32>
    %6 = tpu.matmul %4, %5, %cst {dimension_numbers = #tpu.dot_dimension_numbers<[1], [0], [0], [1], [0, 0, 1, 1], [], []>} : vector<16x128xf32>, vector<128x128xf32>, vector<16x128xf32> -> vector<16x128xf32>
    %7 = arith.addf %3, %6 : vector<16x128xf32>
    %c0_6 = arith.constant 0 : index
    %c0_7 = arith.constant 0 : index
    %8 = vector.load %arg9[%c0_6, %c0_7] : memref<16x128xf32, #tpu.memory_space<vmem>>, vector<16x128xf32>
    tpu.vector_store %arg9[%c0_6, %c0_7], %7 {strides = array<i32>} : memref<16x128xf32, #tpu.memory_space<vmem>>, vector<16x128xf32>,
    %c0_i32_8 = arith.constant 0 : i32
    %9 = arith.cmpi eq, %arg1, %c0_i32_8 : i32
    %10 = arith.extui %9 : i1 to i32
    %c0_i32_9 = arith.constant 0 : i32
    %11 = arith.cmpi ne, %10, %c0_i32_9 : i32
    scf.if %11 {
      %c0_10 = arith.constant 0 : index
      %c0_11 = arith.constant 0 : index
      %12 = vector.load %arg9[%c0_10, %c0_11] : memref<16x128xf32, #tpu.memory_space<vmem>>, vector<16x128xf32>
      %c0_12 = arith.constant 0 : index
      %c0_13 = arith.constant 0 : index
      %13 = vector.load %arg4[%c0_12, %c0_13] : memref<16x64xf32, #tpu.memory_space<vmem>>, vector<16x64xf32>
      %14 = vector.extract_strided_slice %12 {offsets = [0, 0], sizes = [16, 64], strides = [1, 1]} : vector<16x128xf32> to vector<16x64xf32>
      %15 = vector.extract_strided_slice %12 {offsets = [0, 64], sizes = [16, 64], strides = [1, 1]} : vector<16x128xf32> to vector<16x64xf32>
      %cst_14 = arith.constant 9.99999997E-7 : f32
      %16 = vector.broadcast %cst_14 : f32 to vector<16x64xf32>
      %17 = arith.addf %15, %16 : vector<16x64xf32>
      %18 = arith.divf %14, %17 : vector<16x64xf32>
      %19 = arith.addf %13, %18 : vector<16x64xf32>
      %c0_15 = arith.constant 0 : index
      %c0_16 = arith.constant 0 : index
      %20 = vector.load %arg5[%c0_15, %c0_16] : memref<16x64xf32, #tpu.memory_space<vmem>>, vector<16x64xf32>
      %c0_17 = arith.constant 0 : index
      %c0_18 = arith.constant 0 : index
      %21 = vector.load %arg6[%c0_17, %c0_18] : memref<1x64xf32, #tpu.memory_space<vmem>>, vector<1x64xf32>
      %c0_19 = arith.constant 0 : index
      %c0_20 = arith.constant 0 : index
      %22 = vector.load %arg7[%c0_19, %c0_20] : memref<1x64xf32, #tpu.memory_space<vmem>>, vector<1x64xf32>
      %cst_21 = arith.constant dense<0.000000e+00> : vector<16xf32>
      %23 = vector.multi_reduction <add>, %19, %cst_21 [1] : vector<16x64xf32> to vector<16xf32>
      %24 = vector.shape_cast %23 : vector<16xf32> to vector<16x1xf32>
      %cst_22 = arith.constant 6.400000e+01 : f32
      %25 = vector.broadcast %cst_22 : f32 to vector<16x1xf32>
      %26 = arith.divf %24, %25 : vector<16x1xf32>
      %27 = vector.broadcast %26 : vector<16x1xf32> to vector<16x64xf32>
      %28 = arith.subf %19, %27 : vector<16x64xf32>
      %29 = arith.mulf %28, %28 : vector<16x64xf32>
      %cst_23 = arith.constant dense<0.000000e+00> : vector<16xf32>
      %30 = vector.multi_reduction <add>, %29, %cst_23 [1] : vector<16x64xf32> to vector<16xf32>
      %31 = vector.shape_cast %30 : vector<16xf32> to vector<16x1xf32>
      %cst_24 = arith.constant 6.400000e+01 : f32
      %32 = vector.broadcast %cst_24 : f32 to vector<16x1xf32>
      %33 = arith.divf %31, %32 : vector<16x1xf32>
      %34 = vector.broadcast %26 : vector<16x1xf32> to vector<16x64xf32>
      %35 = arith.subf %19, %34 : vector<16x64xf32>
      %cst_25 = arith.constant 9.99999974E-6 : f32
      %36 = vector.broadcast %cst_25 : f32 to vector<16x1xf32>
      %37 = arith.addf %33, %36 : vector<16x1xf32>
      %38 = math.rsqrt %37 : vector<16x1xf32>
      %39 = vector.broadcast %38 : vector<16x1xf32> to vector<16x64xf32>
      %40 = arith.mulf %35, %39 : vector<16x64xf32>
      %41 = vector.broadcast %21 : vector<1x64xf32> to vector<16x64xf32>
      %42 = arith.mulf %40, %41 : vector<16x64xf32>
      %43 = vector.broadcast %22 : vector<1x64xf32> to vector<16x64xf32>
      %44 = arith.addf %42, %43 : vector<16x64xf32>
      %45 = arith.negf %44 : vector<16x64xf32>
      %46 = math.exp %45 : vector<16x64xf32>
      %cst_26 = arith.constant 1.000000e+00 : f32
      %47 = vector.broadcast %cst_26 : f32 to vector<16x64xf32>
      %48 = arith.addf %47, %46 : vector<16x64xf32>
      %49 = arith.divf %47, %48 : vector<16x64xf32>
      %50 = arith.mulf %44, %49 : vector<16x64xf32>
      %51 = arith.addf %20, %50 : vector<16x64xf32>
      %c0_27 = arith.constant 0 : index
      %c0_28 = arith.constant 0 : index
      %52 = vector.load %arg8[%c0_27, %c0_28] : memref<16x64xf32, #tpu.memory_space<vmem>>, vector<16x64xf32>
      tpu.vector_store %arg8[%c0_27, %c0_28], %51 {strides = array<i32>} : memref<16x64xf32, #tpu.memory_space<vmem>>, vector<16x64xf32>,
    } else {
    }
    return
  }
  func.func @transform_0(%arg0: i32, %arg1: i32) -> (i32, i32) {
    %c0_i32 = arith.constant 0 : i32
    return %arg0, %arg1 : i32, i32
  }
  func.func @transform_1(%arg0: i32, %arg1: i32) -> (i32, i32) {
    %c0_i32 = arith.constant 0 : i32
    %c0_i32_0 = arith.constant 0 : i32
    return %arg1, %c0_i32 : i32, i32
  }
  func.func @transform_2(%arg0: i32, %arg1: i32) -> (i32, i32) {
    %c0_i32 = arith.constant 0 : i32
    %c0_i32_0 = arith.constant 0 : i32
    return %arg0, %c0_i32 : i32, i32
  }
  func.func @transform_3(%arg0: i32, %arg1: i32) -> (i32, i32) {
    %c0_i32 = arith.constant 0 : i32
    %c0_i32_0 = arith.constant 0 : i32
    return %arg0, %c0_i32 : i32, i32
  }
  func.func @transform_4(%arg0: i32, %arg1: i32) -> (i32, i32) {
    %c0_i32 = arith.constant 0 : i32
    %c0_i32_0 = arith.constant 0 : i32
    %c0_i32_1 = arith.constant 0 : i32
    return %c0_i32, %c0_i32_0 : i32, i32
  }
  func.func @transform_5(%arg0: i32, %arg1: i32) -> (i32, i32) {
    %c0_i32 = arith.constant 0 : i32
    %c0_i32_0 = arith.constant 0 : i32
    %c0_i32_1 = arith.constant 0 : i32
    return %c0_i32, %c0_i32_0 : i32, i32
  }
  func.func @transform_6(%arg0: i32, %arg1: i32) -> (i32, i32) {
    %c0_i32 = arith.constant 0 : i32
    %c0_i32_0 = arith.constant 0 : i32
    return %arg0, %c0_i32 : i32, i32
  }
}

module attributes {stable_mosaic.version = 11 : i64} {
  func.func @_edge_gate_kernel(%arg0: i32, %arg1: memref<64x64xf32, #tpu.memory_space<vmem>>, %arg2: memref<64x64xf32, #tpu.memory_space<vmem>>, %arg3: memref<64x64xf32, #tpu.memory_space<vmem>>, %arg4: memref<64x64xf32, #tpu.memory_space<vmem>>, %arg5: memref<64x1xf32, #tpu.memory_space<vmem>>, %arg6: memref<64x64xf32, #tpu.memory_space<vmem>>, %arg7: memref<1x64xf32, #tpu.memory_space<vmem>>, %arg8: memref<1x64xf32, #tpu.memory_space<vmem>>, %arg9: memref<1x64xf32, #tpu.memory_space<vmem>>, %arg10: memref<64x128xf32, #tpu.memory_space<vmem>>, %arg11: memref<64x64xf32, #tpu.memory_space<vmem>>) attributes {dimension_semantics = [#tpu.dimension_semantics<parallel>], iteration_bounds = array<i64: 2>, scalar_prefetch = 0 : i64, scratch_operands = 0 : i64, tpu.core_type = #tpu.core_type<tc>, window_params = [{transform_indices = @transform_0, window_bounds = array<i64: 64, 64>}, {transform_indices = @transform_1, window_bounds = array<i64: 64, 64>}, {transform_indices = @transform_2, window_bounds = array<i64: 64, 64>}, {transform_indices = @transform_3, window_bounds = array<i64: 64, 64>}, {transform_indices = @transform_4, window_bounds = array<i64: 64, 1>}, {pipeline_mode = #tpu.pipeline_mode<synchronous>, transform_indices = @transform_5, window_bounds = array<i64: 64, 64>}, {pipeline_mode = #tpu.pipeline_mode<synchronous>, transform_indices = @transform_6, window_bounds = array<i64: 1, 64>}, {pipeline_mode = #tpu.pipeline_mode<synchronous>, transform_indices = @transform_7, window_bounds = array<i64: 1, 64>}, {pipeline_mode = #tpu.pipeline_mode<synchronous>, transform_indices = @transform_8, window_bounds = array<i64: 1, 64>}, {transform_indices = @transform_9, window_bounds = array<i64: 64, 128>}, {transform_indices = @transform_10, window_bounds = array<i64: 64, 64>}]} {
    %c0 = arith.constant 0 : index
    %c0_0 = arith.constant 0 : index
    %0 = vector.load %arg3[%c0, %c0_0] : memref<64x64xf32, #tpu.memory_space<vmem>>, vector<64x64xf32>
    %c0_1 = arith.constant 0 : index
    %c0_2 = arith.constant 0 : index
    %1 = vector.load %arg6[%c0_1, %c0_2] : memref<64x64xf32, #tpu.memory_space<vmem>>, vector<64x64xf32>
    %cst = arith.constant dense<0.000000e+00> : vector<64x64xf32>
    %2 = tpu.matmul %0, %1, %cst {dimension_numbers = #tpu.dot_dimension_numbers<[1], [0], [0], [1], [0, 0, 1, 1], [], []>} : vector<64x64xf32>, vector<64x64xf32>, vector<64x64xf32> -> vector<64x64xf32>
    %c0_3 = arith.constant 0 : index
    %c0_4 = arith.constant 0 : index
    %3 = vector.load %arg7[%c0_3, %c0_4] : memref<1x64xf32, #tpu.memory_space<vmem>>, vector<1x64xf32>
    %4 = vector.broadcast %3 : vector<1x64xf32> to vector<64x64xf32>
    %5 = arith.addf %2, %4 : vector<64x64xf32>
    %c0_5 = arith.constant 0 : index
    %c0_6 = arith.constant 0 : index
    %6 = vector.load %arg1[%c0_5, %c0_6] : memref<64x64xf32, #tpu.memory_space<vmem>>, vector<64x64xf32>
    %c0_7 = arith.constant 0 : index
    %c0_8 = arith.constant 0 : index
    %7 = vector.load %arg2[%c0_7, %c0_8] : memref<64x64xf32, #tpu.memory_space<vmem>>, vector<64x64xf32>
    %8 = arith.addf %6, %7 : vector<64x64xf32>
    %9 = arith.addf %8, %5 : vector<64x64xf32>
    %10 = arith.negf %9 : vector<64x64xf32>
    %11 = math.exp %10 : vector<64x64xf32>
    %cst_9 = arith.constant 1.000000e+00 : f32
    %12 = vector.broadcast %cst_9 : f32 to vector<64x64xf32>
    %13 = arith.addf %12, %11 : vector<64x64xf32>
    %14 = arith.divf %12, %13 : vector<64x64xf32>
    %c0_10 = arith.constant 0 : index
    %c0_11 = arith.constant 0 : index
    %15 = vector.load %arg5[%c0_10, %c0_11] : memref<64x1xf32, #tpu.memory_space<vmem>>, vector<64x1xf32>
    %16 = vector.broadcast %15 : vector<64x1xf32> to vector<64x64xf32>
    %17 = arith.mulf %14, %16 : vector<64x64xf32>
    %c0_12 = arith.constant 0 : index
    %c0_13 = arith.constant 0 : index
    %18 = vector.load %arg4[%c0_12, %c0_13] : memref<64x64xf32, #tpu.memory_space<vmem>>, vector<64x64xf32>
    %19 = arith.mulf %17, %18 : vector<64x64xf32>
    %20 = tpu.concatenate %19, %17 in 1 : vector<64x64xf32>, vector<64x64xf32> -> vector<64x128xf32>
    %c0_14 = arith.constant 0 : index
    %c0_15 = arith.constant 0 : index
    %21 = vector.load %arg10[%c0_14, %c0_15] : memref<64x128xf32, #tpu.memory_space<vmem>>, vector<64x128xf32>
    tpu.vector_store %arg10[%c0_14, %c0_15], %20 {strides = array<i32>} : memref<64x128xf32, #tpu.memory_space<vmem>>, vector<64x128xf32>,
    %c0_16 = arith.constant 0 : index
    %c0_17 = arith.constant 0 : index
    %22 = vector.load %arg3[%c0_16, %c0_17] : memref<64x64xf32, #tpu.memory_space<vmem>>, vector<64x64xf32>
    %c0_18 = arith.constant 0 : index
    %c0_19 = arith.constant 0 : index
    %23 = vector.load %arg8[%c0_18, %c0_19] : memref<1x64xf32, #tpu.memory_space<vmem>>, vector<1x64xf32>
    %c0_20 = arith.constant 0 : index
    %c0_21 = arith.constant 0 : index
    %24 = vector.load %arg9[%c0_20, %c0_21] : memref<1x64xf32, #tpu.memory_space<vmem>>, vector<1x64xf32>
    %cst_22 = arith.constant dense<0.000000e+00> : vector<64xf32>
    %25 = vector.multi_reduction <add>, %9, %cst_22 [1] : vector<64x64xf32> to vector<64xf32>
    %26 = vector.shape_cast %25 : vector<64xf32> to vector<64x1xf32>
    %cst_23 = arith.constant 6.400000e+01 : f32
    %27 = vector.broadcast %cst_23 : f32 to vector<64x1xf32>
    %28 = arith.divf %26, %27 : vector<64x1xf32>
    %29 = vector.broadcast %28 : vector<64x1xf32> to vector<64x64xf32>
    %30 = arith.subf %9, %29 : vector<64x64xf32>
    %31 = arith.mulf %30, %30 : vector<64x64xf32>
    %cst_24 = arith.constant dense<0.000000e+00> : vector<64xf32>
    %32 = vector.multi_reduction <add>, %31, %cst_24 [1] : vector<64x64xf32> to vector<64xf32>
    %33 = vector.shape_cast %32 : vector<64xf32> to vector<64x1xf32>
    %cst_25 = arith.constant 6.400000e+01 : f32
    %34 = vector.broadcast %cst_25 : f32 to vector<64x1xf32>
    %35 = arith.divf %33, %34 : vector<64x1xf32>
    %36 = vector.broadcast %28 : vector<64x1xf32> to vector<64x64xf32>
    %37 = arith.subf %9, %36 : vector<64x64xf32>
    %cst_26 = arith.constant 9.99999974E-6 : f32
    %38 = vector.broadcast %cst_26 : f32 to vector<64x1xf32>
    %39 = arith.addf %35, %38 : vector<64x1xf32>
    %40 = math.rsqrt %39 : vector<64x1xf32>
    %41 = vector.broadcast %40 : vector<64x1xf32> to vector<64x64xf32>
    %42 = arith.mulf %37, %41 : vector<64x64xf32>
    %43 = vector.broadcast %23 : vector<1x64xf32> to vector<64x64xf32>
    %44 = arith.mulf %42, %43 : vector<64x64xf32>
    %45 = vector.broadcast %24 : vector<1x64xf32> to vector<64x64xf32>
    %46 = arith.addf %44, %45 : vector<64x64xf32>
    %47 = arith.negf %46 : vector<64x64xf32>
    %48 = math.exp %47 : vector<64x64xf32>
    %cst_27 = arith.constant 1.000000e+00 : f32
    %49 = vector.broadcast %cst_27 : f32 to vector<64x64xf32>
    %50 = arith.addf %49, %48 : vector<64x64xf32>
    %51 = arith.divf %49, %50 : vector<64x64xf32>
    %52 = arith.mulf %46, %51 : vector<64x64xf32>
    %53 = arith.addf %22, %52 : vector<64x64xf32>
    %c0_28 = arith.constant 0 : index
    %c0_29 = arith.constant 0 : index
    %54 = vector.load %arg11[%c0_28, %c0_29] : memref<64x64xf32, #tpu.memory_space<vmem>>, vector<64x64xf32>
    tpu.vector_store %arg11[%c0_28, %c0_29], %53 {strides = array<i32>} : memref<64x64xf32, #tpu.memory_space<vmem>>, vector<64x64xf32>,
    return
  }
  func.func @transform_0(%arg0: i32) -> (i32, i32) {
    %c0_i32 = arith.constant 0 : i32
    %c0_i32_0 = arith.constant 0 : i32
    return %arg0, %c0_i32 : i32, i32
  }
  func.func @transform_1(%arg0: i32) -> (i32, i32) {
    %c0_i32 = arith.constant 0 : i32
    %c0_i32_0 = arith.constant 0 : i32
    return %arg0, %c0_i32 : i32, i32
  }
  func.func @transform_2(%arg0: i32) -> (i32, i32) {
    %c0_i32 = arith.constant 0 : i32
    %c0_i32_0 = arith.constant 0 : i32
    return %arg0, %c0_i32 : i32, i32
  }
  func.func @transform_3(%arg0: i32) -> (i32, i32) {
    %c0_i32 = arith.constant 0 : i32
    %c0_i32_0 = arith.constant 0 : i32
    return %arg0, %c0_i32 : i32, i32
  }
  func.func @transform_4(%arg0: i32) -> (i32, i32) {
    %c0_i32 = arith.constant 0 : i32
    %c0_i32_0 = arith.constant 0 : i32
    return %arg0, %c0_i32 : i32, i32
  }
  func.func @transform_5(%arg0: i32) -> (i32, i32) {
    %c0_i32 = arith.constant 0 : i32
    %c0_i32_0 = arith.constant 0 : i32
    %c0_i32_1 = arith.constant 0 : i32
    return %c0_i32, %c0_i32_0 : i32, i32
  }
  func.func @transform_6(%arg0: i32) -> (i32, i32) {
    %c0_i32 = arith.constant 0 : i32
    %c0_i32_0 = arith.constant 0 : i32
    %c0_i32_1 = arith.constant 0 : i32
    return %c0_i32, %c0_i32_0 : i32, i32
  }
  func.func @transform_7(%arg0: i32) -> (i32, i32) {
    %c0_i32 = arith.constant 0 : i32
    %c0_i32_0 = arith.constant 0 : i32
    %c0_i32_1 = arith.constant 0 : i32
    return %c0_i32, %c0_i32_0 : i32, i32
  }
  func.func @transform_8(%arg0: i32) -> (i32, i32) {
    %c0_i32 = arith.constant 0 : i32
    %c0_i32_0 = arith.constant 0 : i32
    %c0_i32_1 = arith.constant 0 : i32
    return %c0_i32, %c0_i32_0 : i32, i32
  }
  func.func @transform_9(%arg0: i32) -> (i32, i32) {
    %c0_i32 = arith.constant 0 : i32
    %c0_i32_0 = arith.constant 0 : i32
    return %arg0, %c0_i32 : i32, i32
  }
  func.func @transform_10(%arg0: i32) -> (i32, i32) {
    %c0_i32 = arith.constant 0 : i32
    %c0_i32_0 = arith.constant 0 : i32
    return %arg0, %c0_i32 : i32, i32
  }
}

module attributes {stable_mosaic.version = 11 : i64} {
  func.func @_edge_gate_kernel(%arg0: i32, %arg1: memref<16x64xf32, #tpu.memory_space<vmem>>, %arg2: memref<16x64xf32, #tpu.memory_space<vmem>>, %arg3: memref<16x64xf32, #tpu.memory_space<vmem>>, %arg4: memref<16x64xf32, #tpu.memory_space<vmem>>, %arg5: memref<16x1xf32, #tpu.memory_space<vmem>>, %arg6: memref<64x64xf32, #tpu.memory_space<vmem>>, %arg7: memref<1x64xf32, #tpu.memory_space<vmem>>, %arg8: memref<1x64xf32, #tpu.memory_space<vmem>>, %arg9: memref<1x64xf32, #tpu.memory_space<vmem>>, %arg10: memref<16x128xf32, #tpu.memory_space<vmem>>, %arg11: memref<16x64xf32, #tpu.memory_space<vmem>>) attributes {dimension_semantics = [#tpu.dimension_semantics<parallel>], iteration_bounds = array<i64: 2>, scalar_prefetch = 0 : i64, scratch_operands = 0 : i64, tpu.core_type = #tpu.core_type<tc>, window_params = [{transform_indices = @transform_0, window_bounds = array<i64: 16, 64>}, {transform_indices = @transform_1, window_bounds = array<i64: 16, 64>}, {transform_indices = @transform_2, window_bounds = array<i64: 16, 64>}, {transform_indices = @transform_3, window_bounds = array<i64: 16, 64>}, {transform_indices = @transform_4, window_bounds = array<i64: 16, 1>}, {pipeline_mode = #tpu.pipeline_mode<synchronous>, transform_indices = @transform_5, window_bounds = array<i64: 64, 64>}, {pipeline_mode = #tpu.pipeline_mode<synchronous>, transform_indices = @transform_6, window_bounds = array<i64: 1, 64>}, {pipeline_mode = #tpu.pipeline_mode<synchronous>, transform_indices = @transform_7, window_bounds = array<i64: 1, 64>}, {pipeline_mode = #tpu.pipeline_mode<synchronous>, transform_indices = @transform_8, window_bounds = array<i64: 1, 64>}, {transform_indices = @transform_9, window_bounds = array<i64: 16, 128>}, {transform_indices = @transform_10, window_bounds = array<i64: 16, 64>}]} {
    %c0 = arith.constant 0 : index
    %c0_0 = arith.constant 0 : index
    %0 = vector.load %arg3[%c0, %c0_0] : memref<16x64xf32, #tpu.memory_space<vmem>>, vector<16x64xf32>
    %c0_1 = arith.constant 0 : index
    %c0_2 = arith.constant 0 : index
    %1 = vector.load %arg6[%c0_1, %c0_2] : memref<64x64xf32, #tpu.memory_space<vmem>>, vector<64x64xf32>
    %cst = arith.constant dense<0.000000e+00> : vector<16x64xf32>
    %2 = tpu.matmul %0, %1, %cst {dimension_numbers = #tpu.dot_dimension_numbers<[1], [0], [0], [1], [0, 0, 1, 1], [], []>} : vector<16x64xf32>, vector<64x64xf32>, vector<16x64xf32> -> vector<16x64xf32>
    %c0_3 = arith.constant 0 : index
    %c0_4 = arith.constant 0 : index
    %3 = vector.load %arg7[%c0_3, %c0_4] : memref<1x64xf32, #tpu.memory_space<vmem>>, vector<1x64xf32>
    %4 = vector.broadcast %3 : vector<1x64xf32> to vector<16x64xf32>
    %5 = arith.addf %2, %4 : vector<16x64xf32>
    %c0_5 = arith.constant 0 : index
    %c0_6 = arith.constant 0 : index
    %6 = vector.load %arg1[%c0_5, %c0_6] : memref<16x64xf32, #tpu.memory_space<vmem>>, vector<16x64xf32>
    %c0_7 = arith.constant 0 : index
    %c0_8 = arith.constant 0 : index
    %7 = vector.load %arg2[%c0_7, %c0_8] : memref<16x64xf32, #tpu.memory_space<vmem>>, vector<16x64xf32>
    %8 = arith.addf %6, %7 : vector<16x64xf32>
    %9 = arith.addf %8, %5 : vector<16x64xf32>
    %10 = arith.negf %9 : vector<16x64xf32>
    %11 = math.exp %10 : vector<16x64xf32>
    %cst_9 = arith.constant 1.000000e+00 : f32
    %12 = vector.broadcast %cst_9 : f32 to vector<16x64xf32>
    %13 = arith.addf %12, %11 : vector<16x64xf32>
    %14 = arith.divf %12, %13 : vector<16x64xf32>
    %c0_10 = arith.constant 0 : index
    %c0_11 = arith.constant 0 : index
    %15 = vector.load %arg5[%c0_10, %c0_11] : memref<16x1xf32, #tpu.memory_space<vmem>>, vector<16x1xf32>
    %16 = vector.broadcast %15 : vector<16x1xf32> to vector<16x64xf32>
    %17 = arith.mulf %14, %16 : vector<16x64xf32>
    %c0_12 = arith.constant 0 : index
    %c0_13 = arith.constant 0 : index
    %18 = vector.load %arg4[%c0_12, %c0_13] : memref<16x64xf32, #tpu.memory_space<vmem>>, vector<16x64xf32>
    %19 = arith.mulf %17, %18 : vector<16x64xf32>
    %20 = tpu.concatenate %19, %17 in 1 : vector<16x64xf32>, vector<16x64xf32> -> vector<16x128xf32>
    %c0_14 = arith.constant 0 : index
    %c0_15 = arith.constant 0 : index
    %21 = vector.load %arg10[%c0_14, %c0_15] : memref<16x128xf32, #tpu.memory_space<vmem>>, vector<16x128xf32>
    tpu.vector_store %arg10[%c0_14, %c0_15], %20 {strides = array<i32>} : memref<16x128xf32, #tpu.memory_space<vmem>>, vector<16x128xf32>,
    %c0_16 = arith.constant 0 : index
    %c0_17 = arith.constant 0 : index
    %22 = vector.load %arg3[%c0_16, %c0_17] : memref<16x64xf32, #tpu.memory_space<vmem>>, vector<16x64xf32>
    %c0_18 = arith.constant 0 : index
    %c0_19 = arith.constant 0 : index
    %23 = vector.load %arg8[%c0_18, %c0_19] : memref<1x64xf32, #tpu.memory_space<vmem>>, vector<1x64xf32>
    %c0_20 = arith.constant 0 : index
    %c0_21 = arith.constant 0 : index
    %24 = vector.load %arg9[%c0_20, %c0_21] : memref<1x64xf32, #tpu.memory_space<vmem>>, vector<1x64xf32>
    %cst_22 = arith.constant dense<0.000000e+00> : vector<16xf32>
    %25 = vector.multi_reduction <add>, %9, %cst_22 [1] : vector<16x64xf32> to vector<16xf32>
    %26 = vector.shape_cast %25 : vector<16xf32> to vector<16x1xf32>
    %cst_23 = arith.constant 6.400000e+01 : f32
    %27 = vector.broadcast %cst_23 : f32 to vector<16x1xf32>
    %28 = arith.divf %26, %27 : vector<16x1xf32>
    %29 = vector.broadcast %28 : vector<16x1xf32> to vector<16x64xf32>
    %30 = arith.subf %9, %29 : vector<16x64xf32>
    %31 = arith.mulf %30, %30 : vector<16x64xf32>
    %cst_24 = arith.constant dense<0.000000e+00> : vector<16xf32>
    %32 = vector.multi_reduction <add>, %31, %cst_24 [1] : vector<16x64xf32> to vector<16xf32>
    %33 = vector.shape_cast %32 : vector<16xf32> to vector<16x1xf32>
    %cst_25 = arith.constant 6.400000e+01 : f32
    %34 = vector.broadcast %cst_25 : f32 to vector<16x1xf32>
    %35 = arith.divf %33, %34 : vector<16x1xf32>
    %36 = vector.broadcast %28 : vector<16x1xf32> to vector<16x64xf32>
    %37 = arith.subf %9, %36 : vector<16x64xf32>
    %cst_26 = arith.constant 9.99999974E-6 : f32
    %38 = vector.broadcast %cst_26 : f32 to vector<16x1xf32>
    %39 = arith.addf %35, %38 : vector<16x1xf32>
    %40 = math.rsqrt %39 : vector<16x1xf32>
    %41 = vector.broadcast %40 : vector<16x1xf32> to vector<16x64xf32>
    %42 = arith.mulf %37, %41 : vector<16x64xf32>
    %43 = vector.broadcast %23 : vector<1x64xf32> to vector<16x64xf32>
    %44 = arith.mulf %42, %43 : vector<16x64xf32>
    %45 = vector.broadcast %24 : vector<1x64xf32> to vector<16x64xf32>
    %46 = arith.addf %44, %45 : vector<16x64xf32>
    %47 = arith.negf %46 : vector<16x64xf32>
    %48 = math.exp %47 : vector<16x64xf32>
    %cst_27 = arith.constant 1.000000e+00 : f32
    %49 = vector.broadcast %cst_27 : f32 to vector<16x64xf32>
    %50 = arith.addf %49, %48 : vector<16x64xf32>
    %51 = arith.divf %49, %50 : vector<16x64xf32>
    %52 = arith.mulf %46, %51 : vector<16x64xf32>
    %53 = arith.addf %22, %52 : vector<16x64xf32>
    %c0_28 = arith.constant 0 : index
    %c0_29 = arith.constant 0 : index
    %54 = vector.load %arg11[%c0_28, %c0_29] : memref<16x64xf32, #tpu.memory_space<vmem>>, vector<16x64xf32>
    tpu.vector_store %arg11[%c0_28, %c0_29], %53 {strides = array<i32>} : memref<16x64xf32, #tpu.memory_space<vmem>>, vector<16x64xf32>,
    return
  }
  func.func @transform_0(%arg0: i32) -> (i32, i32) {
    %c0_i32 = arith.constant 0 : i32
    %c0_i32_0 = arith.constant 0 : i32
    return %arg0, %c0_i32 : i32, i32
  }
  func.func @transform_1(%arg0: i32) -> (i32, i32) {
    %c0_i32 = arith.constant 0 : i32
    %c0_i32_0 = arith.constant 0 : i32
    return %arg0, %c0_i32 : i32, i32
  }
  func.func @transform_2(%arg0: i32) -> (i32, i32) {
    %c0_i32 = arith.constant 0 : i32
    %c0_i32_0 = arith.constant 0 : i32
    return %arg0, %c0_i32 : i32, i32
  }
  func.func @transform_3(%arg0: i32) -> (i32, i32) {
    %c0_i32 = arith.constant 0 : i32
    %c0_i32_0 = arith.constant 0 : i32
    return %arg0, %c0_i32 : i32, i32
  }
  func.func @transform_4(%arg0: i32) -> (i32, i32) {
    %c0_i32 = arith.constant 0 : i32
    %c0_i32_0 = arith.constant 0 : i32
    return %arg0, %c0_i32 : i32, i32
  }
  func.func @transform_5(%arg0: i32) -> (i32, i32) {
    %c0_i32 = arith.constant 0 : i32
    %c0_i32_0 = arith.constant 0 : i32
    %c0_i32_1 = arith.constant 0 : i32
    return %c0_i32, %c0_i32_0 : i32, i32
  }
  func.func @transform_6(%arg0: i32) -> (i32, i32) {
    %c0_i32 = arith.constant 0 : i32
    %c0_i32_0 = arith.constant 0 : i32
    %c0_i32_1 = arith.constant 0 : i32
    return %c0_i32, %c0_i32_0 : i32, i32
  }
  func.func @transform_7(%arg0: i32) -> (i32, i32) {
    %c0_i32 = arith.constant 0 : i32
    %c0_i32_0 = arith.constant 0 : i32
    %c0_i32_1 = arith.constant 0 : i32
    return %c0_i32, %c0_i32_0 : i32, i32
  }
  func.func @transform_8(%arg0: i32) -> (i32, i32) {
    %c0_i32 = arith.constant 0 : i32
    %c0_i32_0 = arith.constant 0 : i32
    %c0_i32_1 = arith.constant 0 : i32
    return %c0_i32, %c0_i32_0 : i32, i32
  }
  func.func @transform_9(%arg0: i32) -> (i32, i32) {
    %c0_i32 = arith.constant 0 : i32
    %c0_i32_0 = arith.constant 0 : i32
    return %arg0, %c0_i32 : i32, i32
  }
  func.func @transform_10(%arg0: i32) -> (i32, i32) {
    %c0_i32 = arith.constant 0 : i32
    %c0_i32_0 = arith.constant 0 : i32
    return %arg0, %c0_i32 : i32, i32
  }
}

module attributes {stable_mosaic.version = 11 : i64} {
  func.func @_linear_kernel(%arg0: i32, %arg1: memref<8x64xf32, #tpu.memory_space<vmem>>, %arg2: memref<64x2xf32, #tpu.memory_space<vmem>>, %arg3: memref<1x2xf32, #tpu.memory_space<vmem>>, %arg4: memref<8x2xf32, #tpu.memory_space<vmem>>) attributes {dimension_semantics = [#tpu.dimension_semantics<parallel>], iteration_bounds = array<i64: 1>, scalar_prefetch = 0 : i64, scratch_operands = 0 : i64, tpu.core_type = #tpu.core_type<tc>, window_params = [{transform_indices = @transform_0, window_bounds = array<i64: 8, 64>}, {pipeline_mode = #tpu.pipeline_mode<synchronous>, transform_indices = @transform_1, window_bounds = array<i64: 64, 2>}, {pipeline_mode = #tpu.pipeline_mode<synchronous>, transform_indices = @transform_2, window_bounds = array<i64: 1, 2>}, {transform_indices = @transform_3, window_bounds = array<i64: 8, 2>}]} {
    %c0 = arith.constant 0 : index
    %c0_0 = arith.constant 0 : index
    %0 = vector.load %arg1[%c0, %c0_0] : memref<8x64xf32, #tpu.memory_space<vmem>>, vector<8x64xf32>
    %c0_1 = arith.constant 0 : index
    %c0_2 = arith.constant 0 : index
    %1 = vector.load %arg2[%c0_1, %c0_2] : memref<64x2xf32, #tpu.memory_space<vmem>>, vector<64x2xf32>
    %cst = arith.constant dense<0.000000e+00> : vector<8x2xf32>
    %2 = tpu.matmul %0, %1, %cst {dimension_numbers = #tpu.dot_dimension_numbers<[1], [0], [0], [1], [0, 0, 1, 1], [], []>} : vector<8x64xf32>, vector<64x2xf32>, vector<8x2xf32> -> vector<8x2xf32>
    %c0_3 = arith.constant 0 : index
    %c0_4 = arith.constant 0 : index
    %3 = vector.load %arg3[%c0_3, %c0_4] : memref<1x2xf32, #tpu.memory_space<vmem>>, vector<1x2xf32>
    %4 = vector.broadcast %3 : vector<1x2xf32> to vector<8x2xf32>
    %5 = arith.addf %2, %4 : vector<8x2xf32>
    %c0_5 = arith.constant 0 : index
    %c0_6 = arith.constant 0 : index
    %6 = vector.load %arg4[%c0_5, %c0_6] : memref<8x2xf32, #tpu.memory_space<vmem>>, vector<8x2xf32>
    tpu.vector_store %arg4[%c0_5, %c0_6], %5 {strides = array<i32>} : memref<8x2xf32, #tpu.memory_space<vmem>>, vector<8x2xf32>,
    return
  }
  func.func @transform_0(%arg0: i32) -> (i32, i32) {
    %c0_i32 = arith.constant 0 : i32
    %c0_i32_0 = arith.constant 0 : i32
    return %arg0, %c0_i32 : i32, i32
  }
  func.func @transform_1(%arg0: i32) -> (i32, i32) {
    %c0_i32 = arith.constant 0 : i32
    %c0_i32_0 = arith.constant 0 : i32
    %c0_i32_1 = arith.constant 0 : i32
    return %c0_i32, %c0_i32_0 : i32, i32
  }
  func.func @transform_2(%arg0: i32) -> (i32, i32) {
    %c0_i32 = arith.constant 0 : i32
    %c0_i32_0 = arith.constant 0 : i32
    %c0_i32_1 = arith.constant 0 : i32
    return %c0_i32, %c0_i32_0 : i32, i32
  }
  func.func @transform_3(%arg0: i32) -> (i32, i32) {
    %c0_i32 = arith.constant 0 : i32
    %c0_i32_0 = arith.constant 0 : i32
    return %arg0, %c0_i32 : i32, i32
  }
}

module attributes {stable_mosaic.version = 11 : i64} {
  func.func @_bond_pair_kernel(%arg0: i32, %arg1: memref<16x16xf32, #tpu.memory_space<vmem>>, %arg2: memref<16x64xf32, #tpu.memory_space<vmem>>, %arg3: memref<64x1xf32, #tpu.memory_space<vmem>>, %arg4: memref<1x1xf32, #tpu.memory_space<vmem>>, %arg5: memref<16x1xf32, #tpu.memory_space<vmem>>) attributes {dimension_semantics = [#tpu.dimension_semantics<parallel>], iteration_bounds = array<i64: 2>, scalar_prefetch = 0 : i64, scratch_operands = 0 : i64, tpu.core_type = #tpu.core_type<tc>, window_params = [{transform_indices = @transform_0, window_bounds = array<i64: 16, 16>}, {transform_indices = @transform_1, window_bounds = array<i64: 16, 64>}, {pipeline_mode = #tpu.pipeline_mode<synchronous>, transform_indices = @transform_2, window_bounds = array<i64: 64, 1>}, {pipeline_mode = #tpu.pipeline_mode<synchronous>, transform_indices = @transform_3, window_bounds = array<i64: 1, 1>}, {transform_indices = @transform_4, window_bounds = array<i64: 16, 1>}]} {
    %c0 = arith.constant 0 : index
    %c0_0 = arith.constant 0 : index
    %0 = vector.load %arg1[%c0, %c0_0] : memref<16x16xf32, #tpu.memory_space<vmem>>, vector<16x16xf32>
    %1 = vector.extract_strided_slice %0 {offsets = [0, 0], sizes = [16, 1], strides = [1, 1]} : vector<16x16xf32> to vector<16x1xf32>
    %2 = vector.extract_strided_slice %0 {offsets = [0, 1], sizes = [16, 1], strides = [1, 1]} : vector<16x16xf32> to vector<16x1xf32>
    %3 = vector.extract_strided_slice %0 {offsets = [0, 2], sizes = [16, 1], strides = [1, 1]} : vector<16x16xf32> to vector<16x1xf32>
    %4 = vector.extract_strided_slice %0 {offsets = [0, 3], sizes = [16, 1], strides = [1, 1]} : vector<16x16xf32> to vector<16x1xf32>
    %5 = vector.extract_strided_slice %0 {offsets = [0, 4], sizes = [16, 1], strides = [1, 1]} : vector<16x16xf32> to vector<16x1xf32>
    %6 = vector.extract_strided_slice %0 {offsets = [0, 5], sizes = [16, 4], strides = [1, 1]} : vector<16x16xf32> to vector<16x4xf32>
    %7 = vector.extract_strided_slice %0 {offsets = [0, 9], sizes = [16, 4], strides = [1, 1]} : vector<16x16xf32> to vector<16x4xf32>
    %8 = arith.addf %6, %7 : vector<16x4xf32>
    %9 = math.exp %8 : vector<16x4xf32>
    %c0_1 = arith.constant 0 : index
    %c0_2 = arith.constant 0 : index
    %10 = vector.load %arg2[%c0_1, %c0_2] : memref<16x64xf32, #tpu.memory_space<vmem>>, vector<16x64xf32>
    %c0_3 = arith.constant 0 : index
    %c0_4 = arith.constant 0 : index
    %11 = vector.load %arg3[%c0_3, %c0_4] : memref<64x1xf32, #tpu.memory_space<vmem>>, vector<64x1xf32>
    %cst = arith.constant dense<0.000000e+00> : vector<16x1xf32>
    %12 = tpu.matmul %10, %11, %cst {dimension_numbers = #tpu.dot_dimension_numbers<[1], [0], [0], [1], [0, 0, 1, 1], [], []>} : vector<16x64xf32>, vector<64x1xf32>, vector<16x1xf32> -> vector<16x1xf32>
    %c0_5 = arith.constant 0 : index
    %c0_6 = arith.constant 0 : index
    %13 = vector.load %arg4[%c0_5, %c0_6] : memref<1x1xf32, #tpu.memory_space<vmem>>, vector<1x1xf32>
    %14 = vector.broadcast %13 : vector<1x1xf32> to vector<16x1xf32>
    %15 = arith.addf %12, %14 : vector<16x1xf32>
    %16 = arith.addf %1, %2 : vector<16x1xf32>
    %17 = arith.addf %16, %15 : vector<16x1xf32>
    %18 = arith.negf %17 : vector<16x1xf32>
    %19 = math.exp %18 : vector<16x1xf32>
    %cst_7 = arith.constant 1.000000e+00 : f32
    %20 = vector.broadcast %cst_7 : f32 to vector<16x1xf32>
    %21 = arith.addf %20, %19 : vector<16x1xf32>
    %22 = arith.divf %20, %21 : vector<16x1xf32>
    %23 = vector.extract_strided_slice %9 {offsets = [0, 0], sizes = [16, 1], strides = [1, 1]} : vector<16x4xf32> to vector<16x1xf32>
    %24 = vector.extract_strided_slice %9 {offsets = [0, 1], sizes = [16, 1], strides = [1, 1]} : vector<16x4xf32> to vector<16x1xf32>
    %cst_8 = arith.constant 0.000000e+00 : f32
    %25 = vector.broadcast %cst_8 : f32 to vector<16x1xf32>
    %26 = arith.subf %25, %24 : vector<16x1xf32>
    %27 = arith.mulf %26, %3 : vector<16x1xf32>
    %28 = math.exp %27 : vector<16x1xf32>
    %29 = arith.mulf %23, %28 : vector<16x1xf32>
    %30 = vector.extract_strided_slice %9 {offsets = [0, 2], sizes = [16, 1], strides = [1, 1]} : vector<16x4xf32> to vector<16x1xf32>
    %31 = vector.extract_strided_slice %9 {offsets = [0, 3], sizes = [16, 1], strides = [1, 1]} : vector<16x4xf32> to vector<16x1xf32>
    %cst_9 = arith.constant 0.000000e+00 : f32
    %32 = vector.broadcast %cst_9 : f32 to vector<16x1xf32>
    %33 = arith.subf %32, %31 : vector<16x1xf32>
    %34 = arith.mulf %33, %3 : vector<16x1xf32>
    %35 = math.exp %34 : vector<16x1xf32>
    %36 = arith.mulf %30, %35 : vector<16x1xf32>
    %37 = arith.mulf %5, %4 : vector<16x1xf32>
    %38 = arith.mulf %22, %36 : vector<16x1xf32>
    %39 = arith.subf %29, %38 : vector<16x1xf32>
    %40 = arith.mulf %37, %39 : vector<16x1xf32>
    %c0_10 = arith.constant 0 : index
    %c0_11 = arith.constant 0 : index
    %41 = vector.load %arg5[%c0_10, %c0_11] : memref<16x1xf32, #tpu.memory_space<vmem>>, vector<16x1xf32>
    tpu.vector_store %arg5[%c0_10, %c0_11], %40 {strides = array<i32>} : memref<16x1xf32, #tpu.memory_space<vmem>>, vector<16x1xf32>,
    return
  }
  func.func @transform_0(%arg0: i32) -> (i32, i32) {
    %c0_i32 = arith.constant 0 : i32
    %c0_i32_0 = arith.constant 0 : i32
    return %arg0, %c0_i32 : i32, i32
  }
  func.func @transform_1(%arg0: i32) -> (i32, i32) {
    %c0_i32 = arith.constant 0 : i32
    %c0_i32_0 = arith.constant 0 : i32
    return %arg0, %c0_i32 : i32, i32
  }
  func.func @transform_2(%arg0: i32) -> (i32, i32) {
    %c0_i32 = arith.constant 0 : i32
    %c0_i32_0 = arith.constant 0 : i32
    %c0_i32_1 = arith.constant 0 : i32
    return %c0_i32, %c0_i32_0 : i32, i32
  }
  func.func @transform_3(%arg0: i32) -> (i32, i32) {
    %c0_i32 = arith.constant 0 : i32
    %c0_i32_0 = arith.constant 0 : i32
    %c0_i32_1 = arith.constant 0 : i32
    return %c0_i32, %c0_i32_0 : i32, i32
  }
  func.func @transform_4(%arg0: i32) -> (i32, i32) {
    %c0_i32 = arith.constant 0 : i32
    %c0_i32_0 = arith.constant 0 : i32
    return %arg0, %c0_i32 : i32, i32
  }
}

</mosaic_0001>

<bundles_post_ra>
// kernel: jvp__.44
= control target key start
LH: loop header
LB: loop body
LE: loop exit
PB: predicated region body
PF: predicated region fallthrough
CT: control target
= control target key end

     0   :  { %v155_v0 = vmov 0.0|0.0   ;;  %vm156_vm0 = vmmov 0   ;;  %v157_v4 = vmov 0.0   ;;  %vm30_vm1 = vcmask 523264   ;;  %s211_s1 = inlined_call_operand.vmem [shape: f32[64,8], index: 1, kind: input, shape index: {}]   ;;  %s212_s0 = inlined_call_operand.vmem [shape: f32[8,64], index: 0, kind: input, shape index: {}]   ;;  %s213_s2 = inlined_call_operand.vmem [shape: f32[1,8], index: 2, kind: input, shape index: {}]   ;;  %s214_s3 = inlined_call_operand.vmem [shape: f32[8,8], index: 3, kind: output, shape index: {}]  }
   0x1   :  { %140 = vmatprep.subr.bf16.mxu0 %v155_v0  ;;  %v15_v1 = vld [vmem:[%s211_s1] sm:$0xff]  ;;  %v16_v2 = vld [vmem:[%s211_s1 + $0x8] sm:$0xff]  ;;  %v17_v3 = vld [vmem:[%s211_s1 + $0x10] sm:$0xff]  ;;  %137 = vmatprep.mubr.msk.f32.mxu0 %vm156_vm0, %v157_v4  ;;  %vm104_vm2 = vcmask 64512  }
   0x2   :  { %v141_v5 = vpack.c.bf16 %v16_v2, %v15_v1  ;;  %v18_v6 = vld [vmem:[%s211_s1 + $0x18] sm:$0xff]  ;;  %v19_v8 = vld [vmem:[%s211_s1 + $0x20] sm:$0xff]  ;;  %v20_v9 = vld [vmem:[%s211_s1 + $0x28] sm:$0xff] }
   0x3   :  { %v144_v7 = vpack.c.bf16 %v18_v6, %v17_v3  ;;  %v147_v10 = vpack.c.bf16 %v20_v9, %v19_v8  ;;  %v21_v11 = vld [vmem:[%s211_s1 + $0x30] sm:$0xff]  ;;  %v22_v12 = vld [vmem:[%s211_s1 + $0x38] sm:$0xff]  ;;  %v14_v14 = vld [vmem:[%s212_s0] sm:$0xff] }
   0x4   :  { %142 = vmatpush3.bf16.msra.mxu0 %v141_v5  ;;  %v150_v13 = vpack.c.bf16 %v22_v12, %v21_v11  ;;  %v110_v15 = vld [vmem:[%s213_s2] ss:$0 sm:$0xff] }
   0x5   :  { %143 = vmatprep.subr.bf16.mxu0 %v155_v0 }
   0x8   :  { %145 = vmatpush3.bf16.msra.mxu0 %v144_v7 }
   0x9   :  { %146 = vmatprep.subr.bf16.mxu0 %v155_v0 }
   0xc   :  { %148 = vmatpush3.bf16.msra.mxu0 %v147_v10 }
   0xd   :  { %149 = vmatprep.subr.bf16.mxu0 %v155_v0 }
  0x10   :  { %151 = vmatpush3.bf16.msra.mxu0 %v150_v13 }
  0x13   :  { %138 = vmatmul.mubr.msk.f32.vlgmr.msra.gmra.mrb[0].mxu0 %vm30_vm1, %v14_v14 }
  0xe6   :  { %v100_v16 = vpop.f32.mrb[0].mxu0 }
  0xe7   :  { %v101_v17 = vadd.f32 %v110_v15, %v100_v16  ;;  %v139_v18 = vpop.f32.mrb[1].mxu0 }
  0xe9   :  { %105 = vst.msk [vmem:[%s214_s3] sm:$0xff] %vm104_vm2, %v101_v17 }

// kernel: jvp__.25
= control target key start
LH: loop header
LB: loop body
LE: loop exit
PB: predicated region body
PF: predicated region fallthrough
CT: control target
= control target key end

     0   :  { %v142_v3 = vmov 0.0   ;;  %vm43_vm0 = vcmask 523264   ;;  %v33_v26 = vlaneseq  ;;  %s223_s1 = inlined_call_operand.vmem [shape: f32[64,256], index: 1, kind: input, shape index: {}]   ;;  %s224_s0 = inlined_call_operand.vmem [shape: f32[8,64], index: 0, kind: input, shape index: {}]   ;;  %s225_s2 = inlined_call_operand.vmem [shape: f32[1,256], index: 2, kind: input, shape index: {}]   ;;  %s226_s3 = inlined_call_operand.vmem [shape: f32[8,256], index: 3, kind: output, shape index: {}]  }
   0x1   :  { %v16_v0 = vld [vmem:[%s223_s1 + $0x8] sm:$0xff]  ;;  %v18_v1 = vld [vmem:[%s223_s1 + $0x18] sm:$0xff]  ;;  %v15_v2 = vld [vmem:[%s223_s1] sm:$0xff]  ;;  %111 = vmatprep.mubr.f32.mxu0 %v142_v3 }
   0x2   :  { %v125_v4 = vpack.c.bf16 %v18_v1, %v16_v0  ;;  %v17_v5 = vld [vmem:[%s223_s1 + $0x10] sm:$0xff]  ;;  %v20_v6 = vld [vmem:[%s223_s1 + $0x28] sm:$0xff]  ;;  %v22_v7 = vld [vmem:[%s223_s1 + $0x38] sm:$0xff]  ;;  %v34_v27 = vshrl.u32 %v33_v26, 7 }
   0x3   :  { %v127_v8 = vpack.c.bf16 %v17_v5, %v15_v2  ;;  %v129_v9 = vpack.c.bf16 %v22_v7, %v20_v6  ;;  %v19_v10 = vld [vmem:[%s223_s1 + $0x20] sm:$0xff]  ;;  %v21_v11 = vld [vmem:[%s223_s1 + $0x30] sm:$0xff]  ;;  %v24_v12 = vld [vmem:[%s223_s1 + $0x48] sm:$0xff] }
   0x4   :  { %126 = vmatprep.subr.bf16.mxu0 %v125_v4  ;;  %v26_v13 = vld [vmem:[%s223_s1 + $0x58] sm:$0xff]  ;;  %v131_v14 = vpack.c.bf16 %v21_v11, %v19_v10  ;;  %v23_v16 = vld [vmem:[%s223_s1 + $0x40] sm:$0xff]  ;;  %v25_v17 = vld [vmem:[%s223_s1 + $0x50] sm:$0xff]  ;;  %v35_v28 = vsub.s32 0, %v34_v27  ;;  %v39_v30 = vsub.s32 1, %v34_v27 }
   0x5   :  { %128 = vmatpush1.bf16.msra.mxu0 %v127_v8  ;;  %v133_v15 = vpack.c.bf16 %v26_v13, %v24_v12  ;;  %v28_v18 = vld [vmem:[%s223_s1 + $0x68] sm:$0xff]  ;;  %v30_v19 = vld [vmem:[%s223_s1 + $0x78] sm:$0xff]  ;;  %v135_v20 = vpack.c.bf16 %v25_v17, %v23_v16  ;;  %v27_v22 = vld [vmem:[%s223_s1 + $0x60] sm:$0xff] }
   0x6   :  { %130 = vmatprep.subr.bf16.mxu0 %v129_v9  ;;  %v137_v21 = vpack.c.bf16 %v30_v19, %v28_v18  ;;  %v29_v23 = vld [vmem:[%s223_s1 + $0x70] sm:$0xff]  ;;  %v14_v25 = vld [vmem:[%s224_s0] sm:$0xff] }
   0x7   :  { %v139_v24 = vpack.c.bf16 %v29_v23, %v27_v22  ;;  %v31_v29 = vld [vmem:[%s225_s2] sm:$0x3] }
   0x8   :  { %v36_v31 = vrot.slane %v31_v29, %v35_v28  ;;  %v40_v32 = vrot.slane %v31_v29, %v39_v30 }
   0x9   :  { %132 = vmatpush1.bf16.msra.mxu0 %v131_v14 }
   0xa   :  { %134 = vmatprep.subr.bf16.mxu0 %v133_v15 }
   0xd   :  { %136 = vmatpush1.bf16.msra.mxu0 %v135_v20 }
   0xe   :  { %138 = vmatprep.subr.bf16.mxu0 %v137_v21 }
  0x11   :  { %140 = vmatpush1.bf16.msra.mxu0 %v139_v24 }
  0x14   :  { %124 = vmatmul.mubr.msk.f32.vlgmr.msra.gmra.mrb[0].mxu0 %vm43_vm0, %v14_v25 }
  0xe7   :  { %v113_v33 = vpop.f32.mrb[0].mxu0 }
  0xe8   :  { %v114_v34 = vadd.f32 %v113_v33, %v36_v31  ;;  %v115_v35 = vpop.f32.mrb[1].mxu0 }
  0xe9   :  { %v116_v36 = vadd.f32 %v115_v35, %v40_v32 }
  0xea   :  { %118 = vst [vmem:[%s226_s3] sm:$0xff] %v114_v34 }
  0xeb   :  { %119 = vst [vmem:[%s226_s3 + $0x8] sm:$0xff] %v116_v36 }

// kernel: jvp__.26
= control target key start
LH: loop header
LB: loop body
LE: loop exit
PB: predicated region body
PF: predicated region fallthrough
CT: control target
= control target key end

     0   :  { %s989_s13 = smov 0   ;;  %s1081_s0 = inlined_call_operand.vmem [shape: f32[32,64], index: 0, kind: input, shape index: {}]   ;;  %s1082_s1 = inlined_call_operand.vmem [shape: f32[32,64], index: 1, kind: input, shape index: {}]   ;;  %s1083_s2 = inlined_call_operand.vmem [shape: f32[32,64], index: 2, kind: input, shape index: {}]   ;;  %s1084_s3 = inlined_call_operand.vmem [shape: f32[32,64], index: 3, kind: input, shape index: {}]   ;;  %s1085_s4 = inlined_call_operand.vmem [shape: f32[32,1], index: 4, kind: input, shape index: {}]   ;;  %s1086_s5 = inlined_call_operand.vmem [shape: f32[64,64], index: 5, kind: input, shape index: {}]   ;;  %s1087_s6 = inlined_call_operand.vmem [shape: f32[1,64], index: 6, kind: input, shape index: {}]   ;;  %s1088_s7 = inlined_call_operand.vmem [shape: f32[1,64], index: 7, kind: input, shape index: {}]   ;;  %s1089_s8 = inlined_call_operand.vmem [shape: f32[1,64], index: 8, kind: input, shape index: {}]   ;;  %s1090_s9 = inlined_call_operand.vmem [shape: f32[32,128], index: 9, kind: output, shape index: {0}]   ;;  %s1091_s10 = inlined_call_operand.vmem [shape: f32[32,64], index: 10, kind: output, shape index: {1}]  }
   0x1 LB: > { %s817_s14 = sadd.s32 4294967295, %s930_s13   ;;  %p821_p0 = scmp.ge.s32.totalorder %s930_s13, 1  ;;  %s930_s13 = sphi %s989_s13, %s21_s13  }
   0x2   : > { %p360_p1 = scmp.lt.s32.totalorder %s930_s13, 3 }
   0x4   : > { %p361_p2 = pnand %p821_p0, %p360_p1 }
   0x5   : > { %v467_v0 = vld [vmem:[%s1086_s5] sm:$0xff] (!%p361_p2)  ;;  %v468_v1 = vld [vmem:[%s1086_s5 + $0x8] sm:$0xff] (!%p361_p2)  ;;  %v469_v2 = vld [vmem:[%s1086_s5 + $0x10] sm:$0xff] (!%p361_p2)  ;;  %s822_s21 = sshll.u32 (!%p361_p2), %s817_s14, 1  ;;  %v932_v5 = vmov (!%p361_p2), 0   ;;  %vm482_vm0 = vcmask (!%p361_p2), 523264  }
   0x6   : > { %364 = sbr.rel (%p361_p2) target bundleno = 589 (0x24d), region = 56  ;;  %v876_v3 = vpack.c.bf16 (!%p361_p2), %v468_v1, %v467_v0  ;;  %v470_v4 = vld [vmem:[%s1086_s5 + $0x18] sm:$0xff] (!%p361_p2)  ;;  %p424_p3 = scmp.lt.s32.totalorder (!%p361_p2), %s822_s21, 3  ;;  %902 = vset.pattern.permute.xlu1 (!%p361_p2), %v932_v5  ;;  %903 = vset.pattern.permute.xlu0 (!%p361_p2), %v932_v5  ;;  %v471_v7 = vld [vmem:[%s1086_s5 + $0x20] sm:$0xff] (!%p361_p2)  ;;  %v472_v8 = vld [vmem:[%s1086_s5 + $0x28] sm:$0xff] (!%p361_p2) }
   0x7   : > { %v880_v6 = vpack.c.bf16 (!%p361_p2), %v470_v4, %v469_v2  ;;  %v884_v9 = vpack.c.bf16 (!%p361_p2), %v472_v8, %v471_v7  ;;  %v473_v10 = vld [vmem:[%s1086_s5 + $0x30] sm:$0xff] (!%p361_p2)  ;;  %v474_v11 = vld [vmem:[%s1086_s5 + $0x38] sm:$0xff] (!%p361_p2)  ;;  %v836_v19 = vld [vmem:[%s1087_s6] ss:$0 sm:$0xff] (!%p361_p2)  ;;  %s933_s29 = smov (!%p361_p2), 64  }
   0x8   : > { %877 = vmatprep.subr.bf16.mxu0 (!%p361_p2), %v876_v3  ;;  %v888_v14 = vpack.c.bf16 (!%p361_p2), %v474_v11, %v473_v10  ;;  %v841_v5 = vld [vmem:[%s1088_s7] ss:$0 sm:$0xff] (!%p361_p2) }
   0x9   : > { %879 = vmatpush3.bf16.msra.mxu0 (!%p361_p2), %v876_v3  ;;  %v842_v7 = vld [vmem:[%s1089_s8] ss:$0 sm:$0xff] (!%p361_p2) }
   0xa   : > { %881 = vmatprep.subr.bf16.mxu0 (!%p361_p2), %v880_v6 }
   0xd   : > { %s1093_s21 = smov (!%p424_p3, %s822_s21), 3  ;;  %883 = vmatpush3.bf16.msra.mxu0 %v880_v6 }
   0xe   : > { %s1015_s28 = sshll.u32 %s1093_s21, 3  ;;  %885 = vmatprep.subr.bf16.mxu0 %v884_v9 }
   0xf   : > { %s439_s16 = scalar_lea.vmem %s1083_s2, %s1015_s28  ;;  %s451_s19 = scalar_lea.vmem %s1085_s4, %s1015_s28 }
  0x10   : > { %v1031_v12 = vld [vmem:[%s439_s16] sm:$0xff]  ;;  %v585_v15 = vld [vmem:[%s451_s19 + $0x8] sm:$0xff]  ;;  %s427_s22 = scalar_lea.vmem %s1081_s0, %s1015_s28  ;;  %s433_s25 = scalar_lea.vmem %s1082_s1, %s1015_s28 }
  0x11   : > { %v584_v13 = vld [vmem:[%s451_s19] sm:$0xff]  ;;  %873 = vmatprep.mubr.msk.f32.mxu0 %vm482_vm0, %v1031_v12  ;;  %887 = vmatpush3.bf16.msra.mxu0 %v884_v9  ;;  %v1035_v16 = vld [vmem:[%s439_s16 + $0x8] sm:$0xff]  ;;  %s445_s12 = scalar_lea.vmem %s1084_s3, %s1015_s28  ;;  %s457_s16 = scalar_lea.vmem %s1090_s9, %s1015_s28 }
  0x12   : > { %588 = vperm.xlu1 %902, %v584_v13   ;;  %889 = vmatprep.subr.bf16.mxu0 %v888_v14  ;;  %v564_v17 = vld [vmem:[%s427_s22] sm:$0xff]  ;;  %v565_v20 = vld [vmem:[%s427_s22 + $0x8] sm:$0xff]  ;;  %s463_s23 = scalar_lea.vmem %s1091_s10, %s1015_s28 }
  0x13   : > { %v566_v18 = vld [vmem:[%s433_s25] sm:$0xff]  ;;  %v567_v21 = vld [vmem:[%s433_s25 + $0x8] sm:$0xff] }
  0x14   : > { %v568_v23 = vadd.f32 %v566_v18, %v564_v17  ;;  %v569_v26 = vadd.f32 %v567_v21, %v565_v20  ;;  %v598_v54 = vld [vmem:[%s445_s12] sm:$0xff]  ;;  %v599_v59 = vld [vmem:[%s445_s12 + $0x8] sm:$0xff] }
  0x15   : > { %891 = vmatpush3.bf16.msra.mxu0 %v888_v14 }
  0x16   : > { %593 = vperm.xlu1 %902, %v585_v15  }
  0x18   : > { %874 = vmatmul.mubr.msk.f32.vlgmr.msra.gmra.mrb[0].mxu0 %vm482_vm0, %v1035_v16 }
  0x91   : > { %v589_v48 = vpop.permute.xlu1 %588 }
  0x95   : > { %v594_v52 = vpop.permute.xlu1 %593 }
  0xeb   : > { %v875_v22 = vpop.f32.mrb[0].mxu0 }
  0xec   : > { %v555_v24 = vpop.f32.mrb[1].mxu0  ;;  %v561_v25 = vadd.f32 %v875_v22, %v836_v19 }
  0xed   : > { %v556_v27 = vadd.f32 %v836_v19, %v555_v24 }
  0xee   : > { %v571_v29 = vadd.f32 %v569_v26, %v561_v25 }
  0xef   : > { %v570_v28 = vadd.f32 %v568_v23, %v556_v27 }
  0xf0   : > { %v621_v31 = vsel %vm482_vm0, %v571_v29, 0.0  ;;  %v840_v33 = vmul.f32 -1.442695, %v571_v29 }
  0xf1   : > { %v618_v30 = vsel %vm482_vm0, %v570_v28, 0.0  ;;  %v839_v32 = vmul.f32 -1.442695, %v570_v28 }
  0xf2   : > { %619 = vadd.xlane.f32.xlu0 %v618_v30 }
  0xf3   : > { %904 = vpow2.f32 %v839_v32 }
  0xf4   : > { %906 = vpow2.f32 %v840_v33 }
  0xf6   : > { %622 = vadd.xlane.f32.xlu0 %v621_v31 }
  0xfd   : > { %v905_v42 = vpop.eup %904 }
  0xfe   : > { %v578_v44 = vadd.f32 1.0, %v905_v42  ;;  %v907_v46 = vpop.eup %906 }
  0xff   : > { %v579_v47 = vadd.f32 1.0, %v907_v46 }
 0x100   : > { %908 = vrcp.f32 %v578_v44 }
 0x101   : > { %910 = vrcp.f32 %v579_v47 }
 0x10a   : > { %v909_v49 = vpop.eup %908 }
 0x10b   : > { %v596_v50 = vmul.f32 %v909_v49, %v589_v48  ;;  %v911_v51 = vpop.eup %910 }
 0x10c   : > { %v597_v53 = vmul.f32 %v911_v51, %v594_v52 }
 0x10d   : > { %v600_v57 = vmul.f32 %v598_v54, %v596_v50 }
 0x10e   : > { %v601_v0 = vmul.f32 %v599_v59, %v597_v53 }
 0x17f   : > { %v620_v34 = vpop.xlane.xlu0 %619 }
 0x180   : > { %v625_v35 = vmul.f32 0.015625, %v620_v34 }
 0x182   : > { %v627_v36 = vsub.f32 %v570_v28, %v625_v35 }
 0x183   : > { %v623_v37 = vpop.xlane.xlu0 %622 }
 0x184   : > { %v626_v38 = vmul.f32 0.015625, %v623_v37  ;;  %v629_v39 = vmul.f32 %v627_v36, %v627_v36 }
 0x186   : > { %v628_v40 = vsub.f32 %v571_v29, %v626_v38  ;;  %v631_v41 = vsel %vm482_vm0, %v629_v39, 0.0 }
 0x187   : > { %632 = vadd.xlane.f32.xlu0 %v631_v41 }
 0x188   : > { %v630_v43 = vmul.f32 %v628_v40, %v628_v40 }
 0x18a   : > { %v634_v45 = vsel %vm482_vm0, %v630_v43, 0.0 }
 0x18b   : > { %635 = vadd.xlane.f32.xlu1 %v634_v45 }
 0x19d   : > { %604 = vrot.lane.b32.xlu0 %v596_v50, %s933_s29 }
 0x1a1   : > { %606 = vrot.lane.b32.xlu0 %v597_v53, %s933_s29 }
 0x214   : > { %v633_v55 = vpop.xlane.xlu0 %632 }
 0x215   : > { %v637_v56 = vmul.f32 0.015625, %v633_v55 }
 0x217   : > { %v639_v58 = vadd.f32 1e-05, %v637_v56 }
 0x218   : > { %v636_v60 = vpop.xlane.xlu1 %635  ;;  %v605_v61 = vpop.permute.xlu0 %604 }
 0x219   : > { %912 = vrsqrt.f32 %v639_v58  ;;  %v638_v62 = vmul.f32 0.015625, %v636_v60  ;;  %v610_v63 = vsel %vm482_vm0, %v600_v57, %v605_v61 }
 0x21a   : > { %612 = vst [vmem:[%s457_s16] sm:$0xff] %v610_v63 }
 0x21b   : > { %v640_v1 = vadd.f32 1e-05, %v638_v62 }
 0x21c   : > { %v607_v2 = vpop.permute.xlu0 %606 }
 0x21d   : > { %914 = vrsqrt.f32 %v640_v1  ;;  %v611_v3 = vsel %vm482_vm0, %v601_v0, %v607_v2 }
 0x21e   : > { %613 = vst [vmem:[%s457_s16 + $0x8] sm:$0xff] %v611_v3 }
 0x223   : > { %v913_v4 = vpop.eup %912 }
 0x224   : > { %v643_v6 = vmul.f32 %v913_v4, %v627_v36 }
 0x226   : > { %v651_v8 = vmul.f32 %v841_v5, %v643_v6 }
 0x227   : > { %v915_v9 = vpop.eup %914 }
 0x228   : > { %v659_v10 = vadd.f32 %v842_v7, %v651_v8  ;;  %v644_v11 = vmul.f32 %v915_v9, %v628_v40 }
 0x22a   : > { %v843_v13 = vmul.f32 -1.442695, %v659_v10  ;;  %v652_v14 = vmul.f32 %v841_v5, %v644_v11 }
 0x22c   : > { %916 = vpow2.f32 %v843_v13  ;;  %v660_v15 = vadd.f32 %v842_v7, %v652_v14 }
 0x22e   : > { %v844_v17 = vmul.f32 -1.442695, %v660_v15 }
 0x230   : > { %918 = vpow2.f32 %v844_v17 }
 0x236   : > { %v917_v18 = vpop.eup %916 }
 0x237   : > { %v667_v19 = vadd.f32 1.0, %v917_v18 }
 0x239   : > { %920 = vrcp.f32 %v667_v19 }
 0x23a   : > { %v919_v20 = vpop.eup %918 }
 0x23b   : > { %v668_v21 = vadd.f32 1.0, %v919_v20 }
 0x23d   : > { %922 = vrcp.f32 %v668_v21 }
 0x243   : > { %v921_v22 = vpop.eup %920 }
 0x244   : > { %v673_v23 = vmul.f32 %v921_v22, %v659_v10 }
 0x246   : > { %v675_v24 = vadd.f32 %v673_v23, %v1031_v12 }
 0x247   : > { %v923_v25 = vpop.eup %922 }
 0x248   : > { %677 = vst.msk [vmem:[%s463_s23] sm:$0xff] %vm482_vm0, %v675_v24  ;;  %v674_v26 = vmul.f32 %v923_v25, %v660_v15 }
 0x24a   : > { %v676_v27 = vadd.f32 %v674_v26, %v1035_v16 }
 0x24c   : > { %678 = vst.msk [vmem:[%s463_s23 + $0x8] sm:$0xff] %vm482_vm0, %v676_v27 }
 0x24d PF: > { %s21_s13 = sadd.s32 1, %s930_s13  }
 0x24e   : > { %p18_p4 = scmp.ge.s32.totalorder %s21_s13, 4  }
 0x250   :  { %20 = sbr.rel (!%p18_p4) target bundleno = 1 (0x1), region = 110 }

// kernel: jvp__.23
= control target key start
LH: loop header
LB: loop body
LE: loop exit
PB: predicated region body
PF: predicated region fallthrough
CT: control target
= control target key end

     0   :  { %s991_s13 = smov 0   ;;  %s1102_s0 = inlined_call_operand.vmem [shape: f32[32,1], index: 0, kind: input, shape index: {}]   ;;  %s1103_s1 = inlined_call_operand.vmem [shape: f32[1,80], index: 1, kind: input, shape index: {}]   ;;  %s1104_s2 = inlined_call_operand.vmem [shape: f32[80,64], index: 2, kind: input, shape index: {}]   ;;  %s1105_s3 = inlined_call_operand.vmem [shape: f32[1,64], index: 3, kind: input, shape index: {}]   ;;  %s1106_s4 = inlined_call_operand.vmem [shape: f32[1,64], index: 4, kind: input, shape index: {}]   ;;  %s1107_s5 = inlined_call_operand.vmem [shape: f32[1,64], index: 5, kind: input, shape index: {}]   ;;  %s1108_s6 = inlined_call_operand.vmem [shape: f32[64,64], index: 6, kind: input, shape index: {}]   ;;  %s1109_s7 = inlined_call_operand.vmem [shape: f32[1,64], index: 7, kind: input, shape index: {}]   ;;  %s1110_s8 = inlined_call_operand.vmem [shape: f32[1,64], index: 8, kind: input, shape index: {}]   ;;  %s1111_s9 = inlined_call_operand.vmem [shape: f32[1,64], index: 9, kind: input, shape index: {}]   ;;  %s1112_s10 = inlined_call_operand.vmem [shape: f32[32,64], index: 10, kind: output, shape index: {}]  }
   0x1 LB: > { %s763_s14 = sadd.s32 4294967295, %s933_s13   ;;  %p767_p0 = scmp.ge.s32.totalorder %s933_s13, 1  ;;  %s933_s13 = sphi %s991_s13, %s20_s13  }
   0x2   : > { %p313_p1 = scmp.lt.s32.totalorder %s933_s13, 3 }
   0x4   : > { %p314_p2 = pnand %p767_p0, %p313_p1 }
   0x5   : > { %s768_s15 = sshll.u32 (!%p314_p2), %s763_s14, 1  ;;  %v935_v0 = vmov (!%p314_p2), 0   ;;  %v392_v2 = vld [vmem:[%s1104_s2] sm:$0xff] (!%p314_p2)  ;;  %v393_v3 = vld [vmem:[%s1104_s2 + $0x8] sm:$0xff] (!%p314_p2)  ;;  %v394_v6 = vld [vmem:[%s1104_s2 + $0x10] sm:$0xff] (!%p314_p2)  ;;  %vm409_vm0 = vcmask (!%p314_p2), 654336  }
   0x6   : > { %317 = sbr.rel (%p314_p2) target bundleno = 1289 (0x509), region = 60  ;;  %898 = vset.pattern.permute.xlu0 (!%p314_p2), %v935_v0  ;;  %p352_p3 = scmp.lt.s32.totalorder (!%p314_p2), %s768_s15, 3  ;;  %v853_v5 = vpack.c.bf16 (!%p314_p2), %v393_v3, %v392_v2  ;;  %v395_v7 = vld [vmem:[%s1104_s2 + $0x18] sm:$0xff] (!%p314_p2)  ;;  %v396_v9 = vld [vmem:[%s1104_s2 + $0x20] sm:$0xff] (!%p314_p2)  ;;  %v397_v10 = vld [vmem:[%s1104_s2 + $0x28] sm:$0xff] (!%p314_p2)  ;;  %vm493_vm1 = vcmask (!%p314_p2), 523264  }
   0x7   : > { %v857_v8 = vpack.c.bf16 (!%p314_p2), %v395_v7, %v394_v6  ;;  %v861_v11 = vpack.c.bf16 (!%p314_p2), %v397_v10, %v396_v9  ;;  %v398_v12 = vld [vmem:[%s1104_s2 + $0x30] sm:$0xff] (!%p314_p2)  ;;  %v399_v13 = vld [vmem:[%s1104_s2 + $0x38] sm:$0xff] (!%p314_p2)  ;;  %v400_v14 = vld [vmem:[%s1104_s2 + $0x40] sm:$0xff] (!%p314_p2) }
   0x8   : > { %854 = vmatprep.subr.bf16.mxu0 (!%p314_p2), %v853_v5  ;;  %v865_v15 = vpack.c.bf16 (!%p314_p2), %v399_v13, %v398_v12  ;;  %v401_v16 = vld [vmem:[%s1104_s2 + $0x48] sm:$0xff] (!%p314_p2)  ;;  %v772_v18 = vld [vmem:[%s1103_s1] ss:$0 sm:$0xff] (!%p314_p2)  ;;  %v553_v50 = vld [vmem:[%s1108_s6 + $0x10] sm:$0xff] (!%p314_p2) }
   0x9   : > { %856 = vmatpush3.bf16.msra.mxu0 (!%p314_p2), %v853_v5  ;;  %v869_v17 = vpack.c.bf16 (!%p314_p2), %v401_v16, %v400_v14  ;;  %v773_v31 = vld [vmem:[%s1105_s3] ss:$0 sm:$0xff] (!%p314_p2)  ;;  %v552_v49 = vld [vmem:[%s1108_s6 + $0x8] sm:$0xff] (!%p314_p2)  ;;  %v554_v52 = vld [vmem:[%s1108_s6 + $0x18] sm:$0xff] (!%p314_p2) }
   0xa   : > { %858 = vmatprep.subr.bf16.mxu0 (!%p314_p2), %v857_v8  ;;  %v551_v48 = vld [vmem:[%s1108_s6] sm:$0xff] (!%p314_p2)  ;;  %v877_v53 = vpack.c.bf16 (!%p314_p2), %v554_v52, %v553_v50  ;;  %v556_v55 = vld [vmem:[%s1108_s6 + $0x28] sm:$0xff] (!%p314_p2)  ;;  %v557_v57 = vld [vmem:[%s1108_s6 + $0x30] sm:$0xff] (!%p314_p2) }
   0xb   : > { %v873_v51 = vpack.c.bf16 (!%p314_p2), %v552_v49, %v551_v48  ;;  %v555_v54 = vld [vmem:[%s1108_s6 + $0x20] sm:$0xff] (!%p314_p2)  ;;  %v558_v58 = vld [vmem:[%s1108_s6 + $0x38] sm:$0xff] (!%p314_p2) }
   0xc   : > { %v881_v56 = vpack.c.bf16 (!%p314_p2), %v556_v55, %v555_v54  ;;  %v885_v59 = vpack.c.bf16 (!%p314_p2), %v558_v58, %v557_v57  ;;  %v776_v3 = vld [vmem:[%s1106_s4] ss:$0 sm:$0xff] (!%p314_p2) }
   0xd   : > { %s1114_s15 = smov (!%p352_p3, %s768_s15), 3  ;;  %860 = vmatpush3.bf16.msra.mxu0 %v857_v8  ;;  %874 = vmatprep.subr.bf16.mxu1 %v873_v51  ;;  %v777_v5 = vld [vmem:[%s1107_s5] ss:$0 sm:$0xff] }
   0xe   : > { %s769_s16 = sshll.u32 %s1114_s15, 3  ;;  %862 = vmatprep.subr.bf16.mxu0 %v861_v11  ;;  %876 = vmatpush3.bf16.msra.mxu1 %v873_v51  ;;  %v784_v48 = vld [vmem:[%s1111_s9] ss:$0 sm:$0xff] }
   0xf   : > { %s355_s19 = scalar_lea.vmem %s1102_s0, %s769_s16  ;;  %878 = vmatprep.subr.bf16.mxu1 %v877_v53  ;;  %s361_s21 = scalar_lea.vmem %s1112_s10, %s769_s16 }
  0x10   : > { %v363_v1 = vld [vmem:[%s355_s19] sm:$0xff]  ;;  %v364_v4 = vld [vmem:[%s355_s19 + $0x8] sm:$0xff] }
  0x11   : > { %368 = vperm.xlu0 %898, %v363_v1   ;;  %864 = vmatpush3.bf16.msra.mxu0 %v861_v11 }
  0x12   : > { %866 = vmatprep.subr.bf16.mxu0 %v865_v15  ;;  %880 = vmatpush3.bf16.msra.mxu1 %v877_v53 }
  0x13   : > { %882 = vmatprep.subr.bf16.mxu1 %v881_v56 }
  0x15   : > { %373 = vperm.xlu0 %898, %v364_v4   ;;  %868 = vmatpush3.bf16.msra.mxu0 %v865_v15 }
  0x16   : > { %870 = vmatprep.subr.bf16.mxu0 %v869_v17  ;;  %884 = vmatpush3.bf16.msra.mxu1 %v881_v56 }
  0x17   : > { %886 = vmatprep.subr.bf16.mxu1 %v885_v59 }
  0x19   : > { %872 = vmatpush3.bf16.msra.mxu0 %v869_v17 }
  0x1a   : > { %888 = vmatpush3.bf16.msra.mxu1 %v885_v59 }
  0x90   : > { %v369_v19 = vpop.permute.xlu0 %368 }
  0x91   : > { %v382_v20 = vsub.f32 %v369_v19, %v772_v18 }
  0x93   : > { %v384_v21 = vmul.f32 %v382_v20, %v382_v20 }
  0x94   : > { %v374_v22 = vpop.permute.xlu0 %373 }
  0x95   : > { %v386_v23 = vmul.f32 -9.875, %v384_v21  ;;  %v383_v24 = vsub.f32 %v374_v22, %v772_v18  ;;  %v780_v22 = vld [vmem:[%s1109_s7] ss:$0 sm:$0xff] }
  0x97   : > { %v388_v25 = vmul.f32 1.442695, %v386_v23  ;;  %v385_v26 = vmul.f32 %v383_v24, %v383_v24 }
  0x99   : > { %899 = vpow2.f32 %v388_v25  ;;  %v387_v27 = vmul.f32 -9.875, %v385_v26 }
  0x9b   : > { %v390_v28 = vmul.f32 1.442695, %v387_v27 }
  0x9d   : > { %901 = vpow2.f32 %v390_v28 }
  0xa3   : > { %v900_v29 = vpop.eup %899 }
  0xa4   : > { %831 = vmatprep.mubr.msk.f32.mxu0 %vm409_vm0, %v900_v29 }
  0xa7   : > { %v902_v30 = vpop.eup %901 }
  0xa8   : > { %832 = vmatmul.mubr.msk.f32.vlgmr.msra.gmra.mrb[0].mxu0 %vm409_vm0, %v902_v30 }
 0x17b   : > { %v833_v32 = vpop.f32.mrb[0].mxu0 }
 0x17c   : > { %v482_v33 = vpop.f32.mrb[1].mxu0  ;;  %v488_v35 = vadd.f32 %v833_v32, %v773_v31 }
 0x17d   : > { %v483_v34 = vadd.f32 %v773_v31, %v482_v33 }
 0x17e   : > { %v497_v37 = vsel %vm493_vm1, %v488_v35, 0.0 }
 0x17f   : > { %v494_v36 = vsel %vm493_vm1, %v483_v34, 0.0 }
 0x180   : > { %495 = vadd.xlane.f32.xlu1 %v494_v36 }
 0x184   : > { %498 = vadd.xlane.f32.xlu1 %v497_v37 }
 0x20d   : > { %v496_v38 = vpop.xlane.xlu1 %495 }
 0x20e   : > { %v501_v39 = vmul.f32 0.015625, %v496_v38 }
 0x210   : > { %v503_v40 = vsub.f32 %v483_v34, %v501_v39 }
 0x211   : > { %v499_v41 = vpop.xlane.xlu1 %498 }
 0x212   : > { %v502_v42 = vmul.f32 0.015625, %v499_v41  ;;  %v505_v43 = vmul.f32 %v503_v40, %v503_v40 }
 0x214   : > { %v504_v44 = vsub.f32 %v488_v35, %v502_v42  ;;  %v507_v45 = vsel %vm493_vm1, %v505_v43, 0.0 }
 0x215   : > { %508 = vadd.xlane.f32.xlu0 %v507_v45 }
 0x216   : > { %v506_v46 = vmul.f32 %v504_v44, %v504_v44 }
 0x218   : > { %v510_v47 = vsel %vm493_vm1, %v506_v46, 0.0  ;;  %v783_v46 = vld [vmem:[%s1110_s8] ss:$0 sm:$0xff] }
 0x219   : > { %511 = vadd.xlane.f32.xlu1 %v510_v47 }
 0x2a2   : > { %v509_v60 = vpop.xlane.xlu0 %508 }
 0x2a3   : > { %v513_v61 = vmul.f32 0.015625, %v509_v60 }
 0x2a5   : > { %v515_v62 = vadd.f32 1e-05, %v513_v61 }
 0x2a6   : > { %v512_v63 = vpop.xlane.xlu1 %511 }
 0x2a7   : > { %903 = vrsqrt.f32 %v515_v62  ;;  %v514_v0 = vmul.f32 0.015625, %v512_v63 }
 0x2a9   : > { %v516_v1 = vadd.f32 1e-05, %v514_v0 }
 0x2ab   : > { %905 = vrsqrt.f32 %v516_v1 }
 0x2b1   : > { %v904_v2 = vpop.eup %903 }
 0x2b2   : > { %v519_v4 = vmul.f32 %v904_v2, %v503_v40 }
 0x2b4   : > { %v527_v6 = vmul.f32 %v776_v3, %v519_v4 }
 0x2b5   : > { %v906_v7 = vpop.eup %905 }
 0x2b6   : > { %v520_v8 = vmul.f32 %v906_v7, %v504_v44  ;;  %v535_v9 = vadd.f32 %v777_v5, %v527_v6 }
 0x2b8   : > { %v528_v10 = vmul.f32 %v776_v3, %v520_v8  ;;  %v778_v11 = vmul.f32 -1.442695, %v535_v9 }
 0x2ba   : > { %v536_v12 = vadd.f32 %v777_v5, %v528_v10  ;;  %907 = vpow2.f32 %v778_v11 }
 0x2bc   : > { %v779_v13 = vmul.f32 -1.442695, %v536_v12 }
 0x2be   : > { %909 = vpow2.f32 %v779_v13 }
 0x2c4   : > { %v908_v14 = vpop.eup %907 }
 0x2c5   : > { %v543_v15 = vadd.f32 1.0, %v908_v14 }
 0x2c7   : > { %911 = vrcp.f32 %v543_v15 }
 0x2c8   : > { %v910_v16 = vpop.eup %909 }
 0x2c9   : > { %v544_v17 = vadd.f32 1.0, %v910_v16 }
 0x2cb   : > { %913 = vrcp.f32 %v544_v17 }
 0x2d1   : > { %v912_v18 = vpop.eup %911 }
 0x2d2   : > { %v549_v19 = vmul.f32 %v912_v18, %v535_v9 }
 0x2d4   : > { %850 = vmatprep.mubr.msk.f32.mxu1 %vm493_vm1, %v549_v19 }
 0x2d5   : > { %v914_v20 = vpop.eup %913 }
 0x2d6   : > { %v550_v21 = vmul.f32 %v914_v20, %v536_v12 }
 0x2d8   : > { %851 = vmatmul.mubr.msk.f32.vlgmr.msra.gmra.mrb[0].mxu1 %vm493_vm1, %v550_v21 }
 0x3ab   : > { %v852_v23 = vpop.f32.mrb[0].mxu1 }
 0x3ac   : > { %v638_v24 = vpop.f32.mrb[1].mxu1  ;;  %v644_v26 = vadd.f32 %v852_v23, %v780_v22 }
 0x3ad   : > { %v639_v25 = vadd.f32 %v780_v22, %v638_v24 }
 0x3ae   : > { %v652_v28 = vsel %vm493_vm1, %v644_v26, 0.0 }
 0x3af   : > { %v649_v27 = vsel %vm493_vm1, %v639_v25, 0.0 }
 0x3b0   : > { %650 = vadd.xlane.f32.xlu1 %v649_v27 }
 0x3b4   : > { %653 = vadd.xlane.f32.xlu1 %v652_v28 }
 0x43d   : > { %v651_v29 = vpop.xlane.xlu1 %650 }
 0x43e   : > { %v655_v30 = vmul.f32 0.015625, %v651_v29 }
 0x440   : > { %v657_v31 = vsub.f32 %v639_v25, %v655_v30 }
 0x441   : > { %v654_v32 = vpop.xlane.xlu1 %653 }
 0x442   : > { %v656_v33 = vmul.f32 0.015625, %v654_v32  ;;  %v659_v34 = vmul.f32 %v657_v31, %v657_v31 }
 0x444   : > { %v658_v35 = vsub.f32 %v644_v26, %v656_v33  ;;  %v661_v36 = vsel %vm493_vm1, %v659_v34, 0.0 }
 0x445   : > { %662 = vadd.xlane.f32.xlu1 %v661_v36 }
 0x446   : > { %v660_v37 = vmul.f32 %v658_v35, %v658_v35 }
 0x448   : > { %v664_v38 = vsel %vm493_vm1, %v660_v37, 0.0 }
 0x449   : > { %665 = vadd.xlane.f32.xlu1 %v664_v38 }
 0x4d2   : > { %v663_v39 = vpop.xlane.xlu1 %662 }
 0x4d3   : > { %v667_v40 = vmul.f32 0.015625, %v663_v39 }
 0x4d5   : > { %v669_v41 = vadd.f32 1e-05, %v667_v40 }
 0x4d6   : > { %v666_v42 = vpop.xlane.xlu1 %665 }
 0x4d7   : > { %915 = vrsqrt.f32 %v669_v41  ;;  %v668_v43 = vmul.f32 0.015625, %v666_v42 }
 0x4d9   : > { %v670_v44 = vadd.f32 1e-05, %v668_v43 }
 0x4db   : > { %917 = vrsqrt.f32 %v670_v44 }
 0x4e1   : > { %v916_v45 = vpop.eup %915 }
 0x4e2   : > { %v673_v47 = vmul.f32 %v916_v45, %v657_v31 }
 0x4e4   : > { %v681_v49 = vmul.f32 %v783_v46, %v673_v47 }
 0x4e5   : > { %v918_v50 = vpop.eup %917 }
 0x4e6   : > { %v689_v51 = vadd.f32 %v784_v48, %v681_v49  ;;  %v674_v52 = vmul.f32 %v918_v50, %v658_v35 }
 0x4e8   : > { %v785_v53 = vmul.f32 -1.442695, %v689_v51  ;;  %v682_v54 = vmul.f32 %v783_v46, %v674_v52 }
 0x4ea   : > { %919 = vpow2.f32 %v785_v53  ;;  %v690_v55 = vadd.f32 %v784_v48, %v682_v54 }
 0x4ec   : > { %v786_v56 = vmul.f32 -1.442695, %v690_v55 }
 0x4ee   : > { %921 = vpow2.f32 %v786_v56 }
 0x4f4   : > { %v920_v57 = vpop.eup %919 }
 0x4f5   : > { %v697_v58 = vadd.f32 1.0, %v920_v57 }
 0x4f7   : > { %923 = vrcp.f32 %v697_v58 }
 0x4f8   : > { %v922_v59 = vpop.eup %921 }
 0x4f9   : > { %v698_v60 = vadd.f32 1.0, %v922_v59 }
 0x4fb   : > { %925 = vrcp.f32 %v698_v60 }
 0x501   : > { %v924_v61 = vpop.eup %923 }
 0x502   : > { %v703_v62 = vmul.f32 %v924_v61, %v689_v51 }
 0x504   : > { %705 = vst.msk [vmem:[%s361_s21] sm:$0xff] %vm493_vm1, %v703_v62 }
 0x505   : > { %v926_v63 = vpop.eup %925 }
 0x506   : > { %v704_v0 = vmul.f32 %v926_v63, %v690_v55 }
 0x508   : > { %706 = vst.msk [vmem:[%s361_s21 + $0x8] sm:$0xff] %vm493_vm1, %v704_v0 }
 0x509 PF: > { %s20_s13 = sadd.s32 1, %s933_s13  }
 0x50a   : > { %p17_p4 = scmp.ge.s32.totalorder %s20_s13, 4  }
 0x50c   :  { %19 = sbr.rel (!%p17_p4) target bundleno = 1 (0x1), region = 90 }

// kernel: jvp__.27
= control target key start
LH: loop header
LB: loop body
LE: loop exit
PB: predicated region body
PF: predicated region fallthrough
CT: control target
= control target key end

     0   :  { %v206_v0 = vmov 0.0|0.0   ;;  %vm207_vm0 = vmmov 0   ;;  %v208_v4 = vmov 0.0   ;;  %vm34_vm1 = vcmask 261120   ;;  %s209_s7 = smov 64   ;;  %s278_s1 = inlined_call_operand.vmem [shape: f32[32,128], index: 1, kind: input, shape index: {}]   ;;  %s279_s0 = inlined_call_operand.vmem [shape: f32[8,32], index: 0, kind: input, shape index: {}]   ;;  %s280_s2 = inlined_call_operand.vmem [shape: f32[8,64], index: 2, kind: input, shape index: {}]   ;;  %s281_s4 = inlined_call_operand.vmem [shape: f32[1,64], index: 4, kind: input, shape index: {}]   ;;  %s282_s5 = inlined_call_operand.vmem [shape: f32[1,64], index: 5, kind: input, shape index: {}]   ;;  %s283_s3 = inlined_call_operand.vmem [shape: f32[8,64], index: 3, kind: input, shape index: {}]   ;;  %s284_s6 = inlined_call_operand.vmem [shape: f32[8,64], index: 6, kind: output, shape index: {}]  }
   0x1   :  { %188 = vmatprep.subr.bf16.mxu0 %v206_v0  ;;  %v30_v1 = vld [vmem:[%s278_s1] sm:$0xff]  ;;  %v31_v2 = vld [vmem:[%s278_s1 + $0x8] sm:$0xff]  ;;  %v32_v3 = vld [vmem:[%s278_s1 + $0x10] sm:$0xff]  ;;  %185 = vmatprep.mubr.msk.f32.mxu0 %vm207_vm0, %v208_v4  ;;  %vm126_vm2 = vcmask 523264  }
   0x2   :  { %v189_v5 = vpack.c.bf16 %v31_v2, %v30_v1  ;;  %v33_v6 = vld [vmem:[%s278_s1 + $0x18] sm:$0xff]  ;;  %v29_v8 = vld [vmem:[%s279_s0] sm:$0xff] }
   0x3   :  { %v192_v7 = vpack.c.bf16 %v33_v6, %v32_v3  ;;  %v114_v14 = vld [vmem:[%s280_s2] sm:$0xff] }
   0x4   :  { %190 = vmatpush3.bf16.msra.mxu0 %v189_v5  ;;  %v169_v27 = vld [vmem:[%s281_s4] ss:$0 sm:$0xff] }
   0x5   :  { %191 = vmatprep.subr.bf16.mxu0 %v206_v0  ;;  %v170_v29 = vld [vmem:[%s282_s5] ss:$0 sm:$0xff] }
   0x6   :  { %v123_v36 = vld [vmem:[%s283_s3] sm:$0xff] }
   0x8   :  { %193 = vmatpush3.bf16.msra.mxu0 %v192_v7 }
   0xb   :  { %186 = vmatmul.mubr.msk.f32.vlgmr.msra.gmra.mrb[0].mxu0 %vm34_vm1, %v29_v8 }
  0xde   :  { %v104_v9 = vpop.f32.mrb[0].mxu0 }
  0xdf   :  { %v187_v10 = vpop.f32.mrb[1].mxu0  ;;  %v115_v11 = vadd.f32 1e-06, %v104_v9 }
  0xe1   :  { %117 = vrot.lane.b32.xlu0 %v115_v11, %s209_s7 }
 0x153   :  { %v118_v12 = vpop.permute.xlu0 %117 }
 0x154   :  { %198 = vrcp.f32 %v118_v12 }
 0x15e   :  { %v199_v13 = vpop.eup %198 }
 0x15f   :  { %v121_v15 = vmul.f32 %v199_v13, %v104_v9 }
 0x161   :  { %v122_v16 = vadd.f32 %v121_v15, %v114_v14 }
 0x163   :  { %v127_v17 = vsel %vm126_vm2, %v122_v16, 0.0 }
 0x164   :  { %128 = vadd.xlane.f32.xlu0 %v127_v17 }
 0x1f1   :  { %v129_v18 = vpop.xlane.xlu0 %128 }
 0x1f2   :  { %v131_v19 = vmul.f32 0.015625, %v129_v18 }
 0x1f4   :  { %v132_v20 = vsub.f32 %v122_v16, %v131_v19 }
 0x1f6   :  { %v133_v21 = vmul.f32 %v132_v20, %v132_v20 }
 0x1f8   :  { %v134_v22 = vsel %vm126_vm2, %v133_v21, 0.0 }
 0x1f9   :  { %135 = vadd.xlane.f32.xlu1 %v134_v22 }
 0x286   :  { %v136_v23 = vpop.xlane.xlu1 %135 }
 0x287   :  { %v137_v24 = vmul.f32 0.015625, %v136_v23 }
 0x289   :  { %v138_v25 = vadd.f32 1e-05, %v137_v24 }
 0x28b   :  { %200 = vrsqrt.f32 %v138_v25 }
 0x295   :  { %v201_v26 = vpop.eup %200 }
 0x296   :  { %v140_v28 = vmul.f32 %v201_v26, %v132_v20 }
 0x298   :  { %v147_v30 = vmul.f32 %v169_v27, %v140_v28 }
 0x29a   :  { %v154_v31 = vadd.f32 %v170_v29, %v147_v30 }
 0x29c   :  { %v171_v32 = vmul.f32 -1.442695, %v154_v31 }
 0x29e   :  { %202 = vpow2.f32 %v171_v32 }
 0x2a8   :  { %v203_v33 = vpop.eup %202 }
 0x2a9   :  { %v158_v34 = vadd.f32 1.0, %v203_v33 }
 0x2ab   :  { %204 = vrcp.f32 %v158_v34 }
 0x2b5   :  { %v205_v35 = vpop.eup %204 }
 0x2b6   :  { %v161_v37 = vmul.f32 %v205_v35, %v154_v31 }
 0x2b8   :  { %v162_v38 = vadd.f32 %v161_v37, %v123_v36 }
 0x2ba   :  { %163 = vst.msk [vmem:[%s284_s6] sm:$0xff] %vm126_vm2, %v162_v38 }

// kernel: jvp__.28
= control target key start
LH: loop header
LB: loop body
LE: loop exit
PB: predicated region body
PF: predicated region fallthrough
CT: control target
= control target key end

     0   :  { %s429_s12 = smov 0   ;;  %s502_s0 = inlined_call_operand.vmem [shape: f32[32,64], index: 0, kind: input, shape index: {}]   ;;  %s503_s1 = inlined_call_operand.vmem [shape: f32[64,256], index: 1, kind: input, shape index: {}]   ;;  %s504_s2 = inlined_call_operand.vmem [shape: f32[1,256], index: 2, kind: input, shape index: {}]   ;;  %s505_s3 = inlined_call_operand.vmem [shape: f32[32,256], index: 3, kind: output, shape index: {}]  }
   0x1 LB: > { %s352_s13 = sadd.s32 4294967295, %s406_s12   ;;  %p356_p0 = scmp.ge.s32.totalorder %s406_s12, 1  ;;  %s406_s12 = sphi %s429_s12, %s13_s12  }
   0x2   : > { %p138_p1 = scmp.lt.s32.totalorder %s406_s12, 3 }
   0x4   : > { %p139_p2 = pnand %p356_p0, %p138_p1 }
   0x5   : > { %v179_v0 = vld [vmem:[%s503_s1 + $0x8] sm:$0xff] (!%p139_p2)  ;;  %v181_v1 = vld [vmem:[%s503_s1 + $0x18] sm:$0xff] (!%p139_p2)  ;;  %v178_v2 = vld [vmem:[%s503_s1] sm:$0xff] (!%p139_p2)  ;;  %s357_s20 = sshll.u32 (!%p139_p2), %s352_s13, 1  ;;  %v408_v7 = vmov (!%p139_p2), 0.0   ;;  %vm206_vm0 = vcmask (!%p139_p2), 523264   ;;  %v196_v27 = vlaneseq (!%p139_p2) }
   0x6   : > { %142 = sbr.rel (%p139_p2) target bundleno = 240 (0xf0), region = 32  ;;  %v367_v3 = vpack.c.bf16 (!%p139_p2), %v181_v1, %v179_v0  ;;  %v180_v4 = vld [vmem:[%s503_s1 + $0x10] sm:$0xff] (!%p139_p2)  ;;  %v183_v5 = vld [vmem:[%s503_s1 + $0x28] sm:$0xff] (!%p139_p2)  ;;  %v185_v6 = vld [vmem:[%s503_s1 + $0x38] sm:$0xff] (!%p139_p2)  ;;  %277 = vmatprep.mubr.f32.mxu0 (!%p139_p2), %v408_v7  ;;  %283 = vmatprep.mubr.f32.mxu1 (!%p139_p2), %v408_v7  ;;  %p164_p3 = scmp.lt.s32.totalorder (!%p139_p2), %s357_s20, 3 }
   0x7   : > { %v369_v8 = vpack.c.bf16 (!%p139_p2), %v180_v4, %v178_v2  ;;  %v371_v9 = vpack.c.bf16 (!%p139_p2), %v185_v6, %v183_v5  ;;  %v182_v10 = vld [vmem:[%s503_s1 + $0x20] sm:$0xff] (!%p139_p2)  ;;  %v184_v11 = vld [vmem:[%s503_s1 + $0x30] sm:$0xff] (!%p139_p2)  ;;  %v187_v12 = vld [vmem:[%s503_s1 + $0x48] sm:$0xff] (!%p139_p2)  ;;  %v197_v28 = vshrl.u32 (!%p139_p2), %v196_v27, 7 }
   0x8   : > { %368 = vmatprep.subr.bf16.mxu0 (!%p139_p2), %v367_v3  ;;  %383 = vmatprep.subr.bf16.mxu1 (!%p139_p2), %v367_v3  ;;  %v189_v13 = vld [vmem:[%s503_s1 + $0x58] sm:$0xff] (!%p139_p2)  ;;  %v373_v14 = vpack.c.bf16 (!%p139_p2), %v184_v11, %v182_v10  ;;  %v186_v16 = vld [vmem:[%s503_s1 + $0x40] sm:$0xff] (!%p139_p2)  ;;  %v188_v17 = vld [vmem:[%s503_s1 + $0x50] sm:$0xff] (!%p139_p2) }
   0x9   : > { %370 = vmatpush1.bf16.msra.mxu0 (!%p139_p2), %v369_v8  ;;  %387 = vmatpush1.bf16.msra.mxu1 (!%p139_p2), %v369_v8  ;;  %v375_v15 = vpack.c.bf16 (!%p139_p2), %v189_v13, %v187_v12  ;;  %v191_v18 = vld [vmem:[%s503_s1 + $0x68] sm:$0xff] (!%p139_p2)  ;;  %v193_v19 = vld [vmem:[%s503_s1 + $0x78] sm:$0xff] (!%p139_p2)  ;;  %v377_v20 = vpack.c.bf16 (!%p139_p2), %v188_v17, %v186_v16  ;;  %v190_v22 = vld [vmem:[%s503_s1 + $0x60] sm:$0xff] (!%p139_p2)  ;;  %v198_v29 = vsub.s32 (!%p139_p2), 0, %v197_v28  ;;  %v202_v31 = vsub.s32 (!%p139_p2), 1, %v197_v28 }
   0xa   : > { %372 = vmatprep.subr.bf16.mxu0 (!%p139_p2), %v371_v9  ;;  %384 = vmatprep.subr.bf16.mxu1 (!%p139_p2), %v371_v9  ;;  %v379_v21 = vpack.c.bf16 (!%p139_p2), %v193_v19, %v191_v18  ;;  %v192_v23 = vld [vmem:[%s503_s1 + $0x70] sm:$0xff] (!%p139_p2)  ;;  %v194_v30 = vld [vmem:[%s504_s2] sm:$0x3] (!%p139_p2) }
   0xb   : > { %v381_v24 = vpack.c.bf16 (!%p139_p2), %v192_v23, %v190_v22  ;;  %v199_v32 = vrot.slane (!%p139_p2), %v194_v30, %v198_v29  ;;  %v203_v33 = vrot.slane (!%p139_p2), %v194_v30, %v202_v31 }
   0xd   : > { %s507_s20 = smov (!%p164_p3, %s357_s20), 3  ;;  %374 = vmatpush1.bf16.msra.mxu0 %v373_v14  ;;  %388 = vmatpush1.bf16.msra.mxu1 %v373_v14 }
   0xe   : > { %376 = vmatprep.subr.bf16.mxu0 %v375_v15  ;;  %385 = vmatprep.subr.bf16.mxu1 %v375_v15  ;;  %s358_s22 = sshll.u32 %s507_s20, 3  ;;  %s366_s28 = sshll.u32 %s507_s20, 4 }
   0xf   : > { %s167_s25 = scalar_lea.vmem %s502_s0, %s358_s22  ;;  %s174_s4 = scalar_lea.vmem %s505_s3, %s366_s28 }
  0x10   : > { %v176_v25 = vld [vmem:[%s167_s25] sm:$0xff]  ;;  %v177_v26 = vld [vmem:[%s167_s25 + $0x8] sm:$0xff] }
  0x11   : > { %378 = vmatpush1.bf16.msra.mxu0 %v377_v20  ;;  %389 = vmatpush1.bf16.msra.mxu1 %v377_v20 }
  0x12   : > { %380 = vmatprep.subr.bf16.mxu0 %v379_v21  ;;  %386 = vmatprep.subr.bf16.mxu1 %v379_v21 }
  0x15   : > { %382 = vmatpush1.bf16.msra.mxu0 %v381_v24  ;;  %390 = vmatpush1.bf16.msra.mxu1 %v381_v24 }
  0x18   : > { %362 = vmatmul.mubr.msk.f32.vlgmr.msra.gmra.mrb[0].mxu0 %vm206_vm0, %v176_v25  ;;  %363 = vmatmul.mubr.msk.f32.vlgmr.msra.gmra.mrb[0].mxu1 %vm206_vm0, %v177_v26 }
  0xeb   : > { %v279_v34 = vpop.f32.mrb[0].mxu0  ;;  %v285_v35 = vpop.f32.mrb[0].mxu1 }
  0xec   : > { %v280_v36 = vadd.f32 %v279_v34, %v199_v32  ;;  %v286_v37 = vadd.f32 %v285_v35, %v199_v32  ;;  %v281_v38 = vpop.f32.mrb[1].mxu0  ;;  %v287_v39 = vpop.f32.mrb[1].mxu1 }
  0xed   : > { %v282_v40 = vadd.f32 %v281_v38, %v203_v33  ;;  %v288_v41 = vadd.f32 %v287_v39, %v203_v33 }
  0xee   : > { %290 = vst [vmem:[%s174_s4] sm:$0xff] %v280_v36  ;;  %292 = vst [vmem:[%s174_s4 + $0x10] sm:$0xff] %v286_v37 }
  0xef   : > { %291 = vst [vmem:[%s174_s4 + $0x8] sm:$0xff] %v282_v40  ;;  %293 = vst [vmem:[%s174_s4 + $0x18] sm:$0xff] %v288_v41 }
  0xf0 PF: > { %s13_s12 = sadd.s32 1, %s406_s12  }
  0xf1   : > { %p10_p4 = scmp.ge.s32.totalorder %s13_s12, 4  }
  0xf3   :  { %12 = sbr.rel (!%p10_p4) target bundleno = 1 (0x1), region = 62 }

// kernel: jvp__.30
= control target key start
LH: loop header
LB: loop body
LE: loop exit
PB: predicated region body
PF: predicated region fallthrough
CT: control target
= control target key end

     0   :  { %s851_s21 = smov 0   ;;  %s853_s22 = smov 0   ;;  %s956_s0 = inlined_call_operand.vmem [shape: f32[32,128], index: 0, kind: input, shape index: {}]   ;;  %s957_s1 = inlined_call_operand.vmem [shape: f32[128,128], index: 1, kind: input, shape index: {}]   ;;  %s958_s2 = inlined_call_operand.vmem [shape: f32[32,64], index: 2, kind: input, shape index: {}]   ;;  %s959_s3 = inlined_call_operand.vmem [shape: f32[32,64], index: 3, kind: input, shape index: {}]   ;;  %s960_s4 = inlined_call_operand.vmem [shape: f32[1,64], index: 4, kind: input, shape index: {}]   ;;  %s961_s5 = inlined_call_operand.vmem [shape: f32[1,64], index: 5, kind: input, shape index: {}]   ;;  %s962_s6 = inlined_call_operand.vmem [shape: f32[32,64], index: 6, kind: output, shape index: {}]  }
   0x1   :  { %s855_s23 = smov 0  }
   0x2 LB: > { %s28_s24 = sadd.s32 1, %s809_s22  ;;  %p650_p0 = scmp.ge.s32.totalorder %s813_s23, 1  ;;  %s813_s23 = sphi %s855_s23, %s16_s23   ;;  %s809_s22 = sphi %s853_s22, %s964_s22   ;;  %s805_s21 = sphi %s851_s21, %s963_s21  }
   0x3   : > { %p30_p1 = scmp.ge.s32.totalorder %s28_s24, 2  ;;  %p263_p2 = scmp.lt.s32.totalorder %s813_s23, 3 }
   0x5   : > { %s966_s24 = smov (%p30_p1, %s28_s24), 0  ;;  %p264_p3 = pnand %p650_p0, %p263_p2 }
   0x6   : > { %v354_v0 = vld [vmem:[%s957_s1] sm:$0xff] (!%p264_p3)  ;;  %v355_v1 = vld [vmem:[%s957_s1 + $0x8] sm:$0xff] (!%p264_p3)  ;;  %v356_v2 = vld [vmem:[%s957_s1 + $0x10] sm:$0xff] (!%p264_p3)  ;;  %s651_s7 = sshll.u32 (!%p264_p3), %s805_s21, 1  ;;  %s815_s18 = smov (!%p264_p3), 64   ;;  %vm476_vm0 = vcmask (!%p264_p3), 523264  }
   0x7   : > { %267 = sbr.rel (%p264_p3) target bundleno = 734 (0x2de), region = 44  ;;  %v718_v3 = vpack.c.bf16 (!%p264_p3), %v355_v1, %v354_v0  ;;  %v357_v4 = vld [vmem:[%s957_s1 + $0x18] sm:$0xff] (!%p264_p3)  ;;  %p312_p4 = scmp.lt.s32.totalorder (!%p264_p3), %s651_s7, 3  ;;  %v358_v6 = vld [vmem:[%s957_s1 + $0x20] sm:$0xff] (!%p264_p3)  ;;  %v359_v7 = vld [vmem:[%s957_s1 + $0x28] sm:$0xff] (!%p264_p3) }
   0x8   : > { %v722_v5 = vpack.c.bf16 (!%p264_p3), %v357_v4, %v356_v2  ;;  %v726_v8 = vpack.c.bf16 (!%p264_p3), %v359_v7, %v358_v6  ;;  %v360_v9 = vld [vmem:[%s957_s1 + $0x30] sm:$0xff] (!%p264_p3)  ;;  %v361_v10 = vld [vmem:[%s957_s1 + $0x38] sm:$0xff] (!%p264_p3)  ;;  %v362_v13 = vld [vmem:[%s957_s1 + $0x40] sm:$0xff] (!%p264_p3) }
   0x9   : > { %719 = vmatprep.subr.bf16.mxu0 (!%p264_p3), %v718_v3  ;;  %v730_v12 = vpack.c.bf16 (!%p264_p3), %v361_v10, %v360_v9  ;;  %v363_v14 = vld [vmem:[%s957_s1 + $0x48] sm:$0xff] (!%p264_p3)  ;;  %v364_v16 = vld [vmem:[%s957_s1 + $0x50] sm:$0xff] (!%p264_p3)  ;;  %v365_v17 = vld [vmem:[%s957_s1 + $0x58] sm:$0xff] (!%p264_p3) }
   0xa   : > { %721 = vmatpush3.bf16.msra.mxu0 (!%p264_p3), %v718_v3  ;;  %v734_v15 = vpack.c.bf16 (!%p264_p3), %v363_v14, %v362_v13  ;;  %v738_v18 = vpack.c.bf16 (!%p264_p3), %v365_v17, %v364_v16  ;;  %v366_v19 = vld [vmem:[%s957_s1 + $0x60] sm:$0xff] (!%p264_p3)  ;;  %v367_v20 = vld [vmem:[%s957_s1 + $0x68] sm:$0xff] (!%p264_p3)  ;;  %v368_v22 = vld [vmem:[%s957_s1 + $0x70] sm:$0xff] (!%p264_p3) }
   0xb   : > { %723 = vmatprep.subr.bf16.mxu0 (!%p264_p3), %v722_v5  ;;  %v742_v21 = vpack.c.bf16 (!%p264_p3), %v367_v20, %v366_v19  ;;  %v369_v23 = vld [vmem:[%s957_s1 + $0x78] sm:$0xff] (!%p264_p3)  ;;  %v659_v59 = vld [vmem:[%s960_s4] ss:$0 sm:$0xff] (!%p264_p3) }
   0xc   : > { %v746_v24 = vpack.c.bf16 (!%p264_p3), %v369_v23, %v368_v22  ;;  %v660_v61 = vld [vmem:[%s961_s5] ss:$0 sm:$0xff] (!%p264_p3) }
   0xe   : > { %s968_s7 = smov (!%p312_p4, %s651_s7), 3  ;;  %725 = vmatpush3.bf16.msra.mxu0 %v722_v5 }
   0xf   : > { %s887_s14 = sshll.u32 %s968_s7, 3  ;;  %727 = vmatprep.subr.bf16.mxu0 %v726_v8 }
  0x10   : > { %s318_s21 = scalar_lea.vmem %s956_s0, %s887_s14  ;;  %s330_s25 = scalar_lea.vmem %s958_s2, %s887_s14 }
  0x11   : > { %v352_v11 = vld [vmem:[%s318_s21] sm:$0xff]  ;;  %v353_v25 = vld [vmem:[%s318_s21 + $0x8] sm:$0xff]  ;;  %s336_s7 = scalar_lea.vmem %s959_s3, %s887_s14  ;;  %s342_s10 = scalar_lea.vmem %s962_s6, %s887_s14 }
  0x12   : > { %715 = vmatprep.mubr.f32.mxu0 %v352_v11  ;;  %729 = vmatpush3.bf16.msra.mxu0 %v726_v8  ;;  %v454_v33 = vld [vmem:[%s330_s25] sm:$0xff]  ;;  %v455_v37 = vld [vmem:[%s330_s25 + $0x8] sm:$0xff] }
  0x13   : > { %731 = vmatprep.subr.bf16.mxu0 %v730_v12  ;;  %v472_v11 = vld [vmem:[%s336_s7] sm:$0xff] }
  0x16   : > { %733 = vmatpush3.bf16.msra.mxu0 %v730_v12 }
  0x17   : > { %735 = vmatprep.subr.bf16.mxu0 %v734_v15 }
  0x1a   : > { %737 = vmatpush3.bf16.msra.mxu0 %v734_v15  ;;  %v473_v15 = vld [vmem:[%s336_s7 + $0x8] sm:$0xff] }
  0x1b   : > { %739 = vmatprep.subr.bf16.mxu0 %v738_v18 }
  0x1e   : > { %741 = vmatpush3.bf16.msra.mxu0 %v738_v18 }
  0x1f   : > { %743 = vmatprep.subr.bf16.mxu0 %v742_v21 }
  0x22   : > { %745 = vmatpush3.bf16.msra.mxu0 %v742_v21 }
  0x23   : > { %747 = vmatprep.subr.bf16.mxu0 %v746_v24 }
  0x26   : > { %749 = vmatpush3.bf16.msra.mxu0 %v746_v24 }
  0x29   : > { %716 = vmatmul.mubr.f32.vlgmr.msra.gmra.mrb[0].mxu0 %v353_v25 }
  0xfc   : > { %v717_v26 = vpop.f32.mrb[0].mxu0 }
  0xfd   : > { %v436_v27 = vpop.f32.mrb[1].mxu0  ;;  %v457_v29 = vadd.f32 1e-06, %v717_v26 }
  0xfe   : > { %v456_v28 = vadd.f32 1e-06, %v436_v27 }
 0x100   : > { %460 = vrot.lane.b32.xlu0 %v456_v28, %s815_s18 }
 0x104   : > { %462 = vrot.lane.b32.xlu0 %v457_v29, %s815_s18 }
 0x172   : > { %v461_v30 = vpop.permute.xlu0 %460 }
 0x173   : > { %775 = vrcp.f32 %v461_v30 }
 0x176   : > { %v463_v31 = vpop.permute.xlu0 %462 }
 0x177   : > { %777 = vrcp.f32 %v463_v31 }
 0x17d   : > { %v776_v32 = vpop.eup %775 }
 0x17e   : > { %v467_v34 = vmul.f32 %v776_v32, %v436_v27 }
 0x180   : > { %v470_v35 = vadd.f32 %v467_v34, %v454_v33 }
 0x181   : > { %v778_v36 = vpop.eup %777 }
 0x182   : > { %v477_v38 = vsel %vm476_vm0, %v470_v35, 0.0  ;;  %v469_v39 = vmul.f32 %v778_v36, %v717_v26 }
 0x183   : > { %478 = vadd.xlane.f32.xlu1 %v477_v38 }
 0x184   : > { %v471_v40 = vadd.f32 %v469_v39, %v455_v37 }
 0x186   : > { %v480_v41 = vsel %vm476_vm0, %v471_v40, 0.0 }
 0x187   : > { %481 = vadd.xlane.f32.xlu1 %v480_v41 }
 0x210   : > { %v479_v42 = vpop.xlane.xlu1 %478 }
 0x211   : > { %v484_v43 = vmul.f32 0.015625, %v479_v42 }
 0x213   : > { %v486_v44 = vsub.f32 %v470_v35, %v484_v43 }
 0x214   : > { %v482_v45 = vpop.xlane.xlu1 %481 }
 0x215   : > { %v485_v46 = vmul.f32 0.015625, %v482_v45  ;;  %v488_v47 = vmul.f32 %v486_v44, %v486_v44 }
 0x217   : > { %v487_v48 = vsub.f32 %v471_v40, %v485_v46  ;;  %v490_v49 = vsel %vm476_vm0, %v488_v47, 0.0 }
 0x218   : > { %491 = vadd.xlane.f32.xlu0 %v490_v49 }
 0x219   : > { %v489_v50 = vmul.f32 %v487_v48, %v487_v48 }
 0x21b   : > { %v493_v51 = vsel %vm476_vm0, %v489_v50, 0.0 }
 0x21c   : > { %494 = vadd.xlane.f32.xlu1 %v493_v51 }
 0x2a5   : > { %v492_v52 = vpop.xlane.xlu0 %491 }
 0x2a6   : > { %v496_v53 = vmul.f32 0.015625, %v492_v52 }
 0x2a8   : > { %v498_v54 = vadd.f32 1e-05, %v496_v53 }
 0x2a9   : > { %v495_v55 = vpop.xlane.xlu1 %494 }
 0x2aa   : > { %779 = vrsqrt.f32 %v498_v54  ;;  %v497_v56 = vmul.f32 0.015625, %v495_v55 }
 0x2ac   : > { %v499_v57 = vadd.f32 1e-05, %v497_v56 }
 0x2ae   : > { %781 = vrsqrt.f32 %v499_v57 }
 0x2b4   : > { %v780_v58 = vpop.eup %779 }
 0x2b5   : > { %v502_v60 = vmul.f32 %v780_v58, %v486_v44 }
 0x2b7   : > { %v510_v62 = vmul.f32 %v659_v59, %v502_v60 }
 0x2b8   : > { %v782_v63 = vpop.eup %781 }
 0x2b9   : > { %v518_v0 = vadd.f32 %v660_v61, %v510_v62  ;;  %v503_v1 = vmul.f32 %v782_v63, %v487_v48 }
 0x2bb   : > { %v661_v2 = vmul.f32 -1.442695, %v518_v0  ;;  %v511_v3 = vmul.f32 %v659_v59, %v503_v1 }
 0x2bd   : > { %783 = vpow2.f32 %v661_v2  ;;  %v519_v4 = vadd.f32 %v660_v61, %v511_v3 }
 0x2bf   : > { %v662_v5 = vmul.f32 -1.442695, %v519_v4 }
 0x2c1   : > { %785 = vpow2.f32 %v662_v5 }
 0x2c7   : > { %v784_v6 = vpop.eup %783 }
 0x2c8   : > { %v526_v7 = vadd.f32 1.0, %v784_v6 }
 0x2ca   : > { %787 = vrcp.f32 %v526_v7 }
 0x2cb   : > { %v786_v8 = vpop.eup %785 }
 0x2cc   : > { %v527_v9 = vadd.f32 1.0, %v786_v8 }
 0x2ce   : > { %789 = vrcp.f32 %v527_v9 }
 0x2d4   : > { %v788_v10 = vpop.eup %787 }
 0x2d5   : > { %v532_v12 = vmul.f32 %v788_v10, %v518_v0 }
 0x2d7   : > { %v534_v13 = vadd.f32 %v532_v12, %v472_v11 }
 0x2d8   : > { %v790_v14 = vpop.eup %789 }
 0x2d9   : > { %536 = vst.msk [vmem:[%s342_s10] sm:$0xff] %vm476_vm0, %v534_v13  ;;  %v533_v16 = vmul.f32 %v790_v14, %v519_v4 }
 0x2db   : > { %v535_v17 = vadd.f32 %v533_v16, %v473_v15 }
 0x2dd   : > { %537 = vst.msk [vmem:[%s342_s10 + $0x8] sm:$0xff] %vm476_vm0, %v535_v17 }
 0x2de PF: > { %s16_s23 = sadd.s32 1, %s813_s23   ;;  %s963_s21 = smov %s809_s22 }
 0x2df   : > { %p13_p5 = scmp.ge.s32.totalorder %s16_s23, 4   ;;  %s964_s22 = smov %s966_s24 }
 0x2e1   :  { %15 = sbr.rel (!%p13_p5) target bundleno = 2 (0x2), region = 91 }

// kernel: jvp__.24
= control target key start
LH: loop header
LB: loop body
LE: loop exit
PB: predicated region body
PF: predicated region fallthrough
CT: control target
= control target key end

     0   :  { %s1530_s13 = smov 0   ;;  %s1760_s0 = inlined_call_operand.vmem [shape: f32[128,1], index: 0, kind: input, shape index: {}]   ;;  %s1761_s1 = inlined_call_operand.vmem [shape: f32[1,40], index: 1, kind: input, shape index: {}]   ;;  %s1762_s2 = inlined_call_operand.vmem [shape: f32[40,64], index: 2, kind: input, shape index: {}]   ;;  %s1763_s3 = inlined_call_operand.vmem [shape: f32[1,64], index: 3, kind: input, shape index: {}]   ;;  %s1764_s4 = inlined_call_operand.vmem [shape: f32[1,64], index: 4, kind: input, shape index: {}]   ;;  %s1765_s5 = inlined_call_operand.vmem [shape: f32[1,64], index: 5, kind: input, shape index: {}]   ;;  %s1766_s6 = inlined_call_operand.vmem [shape: f32[64,64], index: 6, kind: input, shape index: {}]   ;;  %s1767_s7 = inlined_call_operand.vmem [shape: f32[1,64], index: 7, kind: input, shape index: {}]   ;;  %s1768_s8 = inlined_call_operand.vmem [shape: f32[1,64], index: 8, kind: input, shape index: {}]   ;;  %s1769_s9 = inlined_call_operand.vmem [shape: f32[1,64], index: 9, kind: input, shape index: {}]   ;;  %s1770_s10 = inlined_call_operand.vmem [shape: f32[128,64], index: 10, kind: output, shape index: {}]  }
   0x1 LB: > { %s1190_s14 = sadd.s32 4294967295, %s1472_s13   ;;  %p1194_p0 = scmp.ge.s32.totalorder %s1472_s13, 1  ;;  %s1472_s13 = sphi %s1530_s13, %s20_s13  }
   0x2   : > { %p313_p1 = scmp.lt.s32.totalorder %s1472_s13, 3 }
   0x4   : > { %p314_p2 = pnand %p1194_p0, %p313_p1 }
   0x5   : > { %s1195_s15 = sshll.u32 (!%p314_p2), %s1190_s14, 3  ;;  %v1474_v0 = vmov (!%p314_p2), 0   ;;  %v458_v9 = vld [vmem:[%s1762_s2] sm:$0xff] (!%p314_p2)  ;;  %v459_v10 = vld [vmem:[%s1762_s2 + $0x8] sm:$0xff] (!%p314_p2)  ;;  %v460_v12 = vld [vmem:[%s1762_s2 + $0x10] sm:$0xff] (!%p314_p2)  ;;  %vm470_vm0 = vcmask (!%p314_p2), 326656  }
   0x6   : > { %317 = sbr.rel (%p314_p2) target bundleno = 1299 (0x513), region = 60  ;;  %1353 = vset.pattern.permute.xlu1 (!%p314_p2), %v1474_v0  ;;  %1352 = vset.pattern.permute.xlu0 (!%p314_p2), %v1474_v0  ;;  %p352_p3 = scmp.lt.s32.totalorder (!%p314_p2), %s1195_s15, 15  ;;  %v1319_v11 = vpack.c.bf16 (!%p314_p2), %v459_v10, %v458_v9  ;;  %v461_v13 = vld [vmem:[%s1762_s2 + $0x18] sm:$0xff] (!%p314_p2)  ;;  %v462_v15 = vld [vmem:[%s1762_s2 + $0x20] sm:$0xff] (!%p314_p2)  ;;  %vm602_vm1 = vcmask (!%p314_p2), 523264  }
   0x7   : > { %v1323_v14 = vpack.c.bf16 (!%p314_p2), %v461_v13, %v460_v12  ;;  %v1199_v16 = vld [vmem:[%s1761_s1] ss:$0 sm:$0xff] (!%p314_p2) }
   0x8   : > { %1320 = vmatprep.subr.bf16.mxu0 (!%p314_p2), %v1319_v11 }
   0x9   : > { %1322 = vmatpush3.bf16.msra.mxu0 (!%p314_p2), %v1319_v11 }
   0xa   : > { %1324 = vmatprep.subr.bf16.mxu0 (!%p314_p2), %v1323_v14 }
   0xd   : > { %s1772_s15 = smov (!%p352_p3, %s1195_s15), 15  ;;  %1326 = vmatpush3.bf16.msra.mxu0 %v1323_v14 }
   0xe   : > { %s1196_s16 = sshll.u32 %s1772_s15, 3  ;;  %1277 = vmatprep.subr.mxu0 %v462_v15 }
   0xf   : > { %s355_s19 = scalar_lea.vmem %s1760_s0, %s1196_s16  ;;  %s1739_s28 = scalar_lea.vmem %s1770_s10, %s1196_s16 }
  0x10   : > { %v365_v1 = vld [vmem:[%s355_s19 + $0x10] sm:$0xff]  ;;  %v363_v2 = vld [vmem:[%s355_s19] sm:$0xff]  ;;  %v366_v3 = vld [vmem:[%s355_s19 + $0x18] sm:$0xff] }
  0x11   : > { %384 = vperm.xlu1 %1353, %v365_v1   ;;  %374 = vperm.xlu0 %1352, %v363_v2   ;;  %v364_v4 = vld [vmem:[%s355_s19 + $0x8] sm:$0xff]  ;;  %v367_v6 = vld [vmem:[%s355_s19 + $0x20] sm:$0xff]  ;;  %v370_v7 = vld [vmem:[%s355_s19 + $0x38] sm:$0xff] }
  0x12   : > { %v368_v5 = vld [vmem:[%s355_s19 + $0x28] sm:$0xff]  ;;  %v369_v8 = vld [vmem:[%s355_s19 + $0x30] sm:$0xff]  ;;  %1278 = vmatpush3.msra.mxu0 %v462_v15  ;;  %v1200_v1 = vld [vmem:[%s1763_s3] ss:$0 sm:$0xff] }
  0x15   : > { %389 = vperm.xlu1 %1353, %v366_v3   ;;  %379 = vperm.xlu0 %1352, %v364_v4  }
  0x19   : > { %399 = vperm.xlu1 %1353, %v368_v5   ;;  %394 = vperm.xlu0 %1352, %v367_v6  }
  0x1d   : > { %409 = vperm.xlu1 %1353, %v370_v7   ;;  %404 = vperm.xlu0 %1352, %v369_v8  }
  0x90   : > { %v385_v17 = vpop.permute.xlu1 %384  ;;  %v375_v18 = vpop.permute.xlu0 %374 }
  0x91   : > { %v420_v19 = vsub.f32 %v385_v17, %v1199_v16  ;;  %v418_v20 = vsub.f32 %v375_v18, %v1199_v16 }
  0x93   : > { %v428_v21 = vmul.f32 %v420_v19, %v420_v19  ;;  %v426_v22 = vmul.f32 %v418_v20, %v418_v20 }
  0x94   : > { %v390_v23 = vpop.permute.xlu1 %389  ;;  %v380_v24 = vpop.permute.xlu0 %379 }
  0x95   : > { %v436_v25 = vmul.f32 -19.5, %v428_v21  ;;  %v434_v26 = vmul.f32 -19.5, %v426_v22  ;;  %v421_v27 = vsub.f32 %v390_v23, %v1199_v16  ;;  %v419_v28 = vsub.f32 %v380_v24, %v1199_v16 }
  0x97   : > { %v442_v29 = vmul.f32 1.442695, %v434_v26  ;;  %v429_v30 = vmul.f32 %v421_v27, %v421_v27  ;;  %v427_v31 = vmul.f32 %v419_v28, %v419_v28  ;;  %v446_v32 = vmul.f32 1.442695, %v436_v25 }
  0x98   : > { %v400_v33 = vpop.permute.xlu1 %399  ;;  %v395_v34 = vpop.permute.xlu0 %394 }
  0x99   : > { %v437_v35 = vmul.f32 -19.5, %v429_v30  ;;  %v435_v36 = vmul.f32 -19.5, %v427_v31  ;;  %v423_v37 = vsub.f32 %v400_v33, %v1199_v16  ;;  %1354 = vpow2.f32 %v442_v29 }
  0x9a   : > { %v422_v38 = vsub.f32 %v395_v34, %v1199_v16  ;;  %1356 = vpow2.f32 %v446_v32 }
  0x9b   : > { %v444_v39 = vmul.f32 1.442695, %v435_v36  ;;  %v431_v40 = vmul.f32 %v423_v37, %v423_v37  ;;  %v448_v44 = vmul.f32 1.442695, %v437_v35 }
  0x9c   : > { %v430_v41 = vmul.f32 %v422_v38, %v422_v38  ;;  %v410_v42 = vpop.permute.xlu1 %409  ;;  %v405_v43 = vpop.permute.xlu0 %404 }
  0x9d   : > { %v439_v45 = vmul.f32 -19.5, %v431_v40  ;;  %v425_v46 = vsub.f32 %v410_v42, %v1199_v16  ;;  %v424_v47 = vsub.f32 %v405_v43, %v1199_v16  ;;  %1358 = vpow2.f32 %v444_v39 }
  0x9e   : > { %v438_v48 = vmul.f32 -19.5, %v430_v41  ;;  %1360 = vpow2.f32 %v448_v44 }
  0x9f   : > { %v433_v49 = vmul.f32 %v425_v46, %v425_v46  ;;  %v432_v50 = vmul.f32 %v424_v47, %v424_v47  ;;  %v452_v52 = vmul.f32 1.442695, %v439_v45 }
  0xa0   : > { %v450_v51 = vmul.f32 1.442695, %v438_v48 }
  0xa1   : > { %v440_v53 = vmul.f32 -19.5, %v432_v50  ;;  %v441_v54 = vmul.f32 -19.5, %v433_v49 }
  0xa2   : > { %1362 = vpow2.f32 %v450_v51 }
  0xa3   : > { %v454_v55 = vmul.f32 1.442695, %v440_v53  ;;  %v1355_v56 = vpop.eup %1354  ;;  %1364 = vpow2.f32 %v452_v52  ;;  %v456_v58 = vmul.f32 1.442695, %v441_v54 }
  0xa4   : > { %1279 = vmatprep.mubr.msk.f32.mxu0 %vm470_vm0, %v1355_v56  ;;  %v1357_v57 = vpop.eup %1356 }
  0xa5   : > { %1366 = vpow2.f32 %v454_v55 }
  0xa6   : > { %1368 = vpow2.f32 %v456_v58 }
  0xa7   : > { %v1359_v59 = vpop.eup %1358 }
  0xa8   : > { %1280 = vmatmul.mubr.msk.f32.vlgmr.msra.gmra.mrb[0].mxu0 %vm470_vm0, %v1359_v59  ;;  %v1361_v60 = vpop.eup %1360 }
  0xa9   : > { %1282 = vmatprep.mubr.msk.f32.mxu0 %vm470_vm0, %v1357_v57 }
  0xac   : > { %v1363_v61 = vpop.eup %1362  ;;  %1283 = vmatmul.mubr.msk.f32.gmra.mrb[2].mxu0 %vm470_vm0, %v1361_v60 }
  0xad   : > { %1285 = vmatprep.mubr.msk.f32.mxu0 %vm470_vm0, %v1363_v61  ;;  %v1365_v62 = vpop.eup %1364 }
  0xaf   : > { %v1367_v63 = vpop.eup %1366 }
  0xb0   : > { %1286 = vmatmul.mubr.msk.f32.gmra.mrb[4].mxu0 %vm470_vm0, %v1365_v62  ;;  %v1369_v0 = vpop.eup %1368 }
  0xb1   : > { %1288 = vmatprep.mubr.msk.f32.mxu0 %vm470_vm0, %v1367_v63 }
  0xb4   : > { %1289 = vmatmul.mubr.msk.f32.gmra.mrb[6].mxu0 %vm470_vm0, %v1369_v0 }
 0x17b   : > { %v1281_v2 = vpop.f32.mrb[0].mxu0 }
 0x17c   : > { %v567_v3 = vadd.f32 %v1281_v2, %v1200_v1  ;;  %v561_v4 = vpop.f32.mrb[1].mxu0  ;;  %v792_v2 = vld [vmem:[%s1766_s6] sm:$0xff] }
 0x17d   : > { %v562_v5 = vadd.f32 %v1200_v1, %v561_v4  ;;  %v794_v4 = vld [vmem:[%s1766_s6 + $0x10] sm:$0xff] }
 0x17e   : > { %v606_v6 = vsel %vm602_vm1, %v567_v3, 0.0 }
 0x17f   : > { %607 = vadd.xlane.f32.xlu1 %v606_v6  ;;  %v1284_v7 = vpop.f32.mrb[2].mxu0  ;;  %v603_v8 = vsel %vm602_vm1, %v562_v5, 0.0  ;;  %v795_v6 = vld [vmem:[%s1766_s6 + $0x18] sm:$0xff] }
 0x180   : > { %v571_v9 = vpop.f32.mrb[3].mxu0  ;;  %604 = vadd.xlane.f32.xlu0 %v603_v8  ;;  %v577_v11 = vadd.f32 %v1284_v7, %v1200_v1  ;;  %v1331_v7 = vpack.c.bf16 %v795_v6, %v794_v4  ;;  %v796_v8 = vld [vmem:[%s1766_s6 + $0x20] sm:$0xff] }
 0x181   : > { %v572_v10 = vadd.f32 %v1200_v1, %v571_v9  ;;  %v797_v9 = vld [vmem:[%s1766_s6 + $0x28] sm:$0xff] }
 0x182   : > { %v612_v18 = vsel %vm602_vm1, %v577_v11, 0.0 }
 0x183   : > { %v1287_v12 = vpop.f32.mrb[4].mxu0  ;;  %v609_v13 = vsel %vm602_vm1, %v572_v10, 0.0 }
 0x184   : > { %610 = vadd.xlane.f32.xlu0 %v609_v13  ;;  %v581_v14 = vpop.f32.mrb[5].mxu0  ;;  %v587_v16 = vadd.f32 %v1287_v12, %v1200_v1  ;;  %v799_v12 = vld [vmem:[%s1766_s6 + $0x38] sm:$0xff] }
 0x185   : > { %v582_v15 = vadd.f32 %v1200_v1, %v581_v14 }
 0x186   : > { %v618_v23 = vsel %vm602_vm1, %v587_v16, 0.0 }
 0x187   : > { %v1290_v17 = vpop.f32.mrb[6].mxu0  ;;  %v615_v19 = vsel %vm602_vm1, %v582_v15, 0.0 }
 0x188   : > { %613 = vadd.xlane.f32.xlu0 %v612_v18  ;;  %616 = vadd.xlane.f32.xlu1 %v615_v19  ;;  %v591_v20 = vpop.f32.mrb[7].mxu0  ;;  %v597_v22 = vadd.f32 %v1290_v17, %v1200_v1 }
 0x189   : > { %v592_v21 = vadd.f32 %v1200_v1, %v591_v20 }
 0x18a   : > { %v624_v25 = vsel %vm602_vm1, %v597_v22, 0.0 }
 0x18b   : > { %v621_v24 = vsel %vm602_vm1, %v592_v21, 0.0 }
 0x18c   : > { %619 = vadd.xlane.f32.xlu0 %v618_v23  ;;  %622 = vadd.xlane.f32.xlu1 %v621_v24 }
 0x190   : > { %625 = vadd.xlane.f32.xlu0 %v624_v25 }
 0x20c   : > { %v608_v26 = vpop.xlane.xlu1 %607 }
 0x20d   : > { %v629_v27 = vmul.f32 0.015625, %v608_v26  ;;  %v605_v28 = vpop.xlane.xlu0 %604 }
 0x20e   : > { %v628_v29 = vmul.f32 0.015625, %v605_v28 }
 0x20f   : > { %v1583_v30 = vsub.f32 %v567_v3, %v629_v27  ;;  %v793_v3 = vld [vmem:[%s1766_s6 + $0x8] sm:$0xff] }
 0x210   : > { %v1585_v31 = vsub.f32 %v562_v5, %v628_v29  ;;  %v1327_v5 = vpack.c.bf16 %v793_v3, %v792_v2 }
 0x211   : > { %v611_v32 = vpop.xlane.xlu0 %610  ;;  %v645_v33 = vmul.f32 %v1583_v30, %v1583_v30 }
 0x212   : > { %v630_v34 = vmul.f32 0.015625, %v611_v32  ;;  %v644_v35 = vmul.f32 %v1585_v31, %v1585_v31  ;;  %1328 = vmatprep.subr.bf16.mxu1 %v1327_v5 }
 0x213   : > { %v655_v36 = vsel %vm602_vm1, %v645_v33, 0.0  ;;  %1330 = vmatpush3.bf16.msra.mxu1 %v1327_v5 }
 0x214   : > { %v1592_v37 = vsub.f32 %v572_v10, %v630_v34  ;;  %656 = vadd.xlane.f32.xlu0 %v655_v36  ;;  %v652_v38 = vsel %vm602_vm1, %v644_v35, 0.0  ;;  %1332 = vmatprep.subr.bf16.mxu1 %v1331_v7  ;;  %v1335_v10 = vpack.c.bf16 %v797_v9, %v796_v8  ;;  %v1209_v36 = vld [vmem:[%s1764_s4] ss:$0 sm:$0xff] }
 0x215   : > { %v617_v39 = vpop.xlane.xlu1 %616  ;;  %653 = vadd.xlane.f32.xlu1 %v652_v38  ;;  %v614_v40 = vpop.xlane.xlu0 %613 }
 0x216   : > { %v632_v41 = vmul.f32 0.015625, %v617_v39  ;;  %v631_v42 = vmul.f32 0.015625, %v614_v40  ;;  %v646_v43 = vmul.f32 %v1592_v37, %v1592_v37 }
 0x217   : > { %1334 = vmatpush3.bf16.msra.mxu1 %v1331_v7 }
 0x218   : > { %v1597_v44 = vsub.f32 %v582_v15, %v632_v41  ;;  %v1599_v45 = vsub.f32 %v577_v11, %v631_v42  ;;  %v658_v46 = vsel %vm602_vm1, %v646_v43, 0.0  ;;  %v798_v11 = vld [vmem:[%s1766_s6 + $0x30] sm:$0xff]  ;;  %1336 = vmatprep.subr.bf16.mxu1 %v1335_v10  ;;  %v1210_v43 = vld [vmem:[%s1765_s5] ss:$0 sm:$0xff] }
 0x219   : > { %v623_v47 = vpop.xlane.xlu1 %622  ;;  %659 = vadd.xlane.f32.xlu1 %v658_v46  ;;  %v620_v48 = vpop.xlane.xlu0 %619  ;;  %v1339_v13 = vpack.c.bf16 %v799_v12, %v798_v11 }
 0x21a   : > { %v634_v49 = vmul.f32 0.015625, %v623_v47  ;;  %v633_v50 = vmul.f32 0.015625, %v620_v48  ;;  %v648_v51 = vmul.f32 %v1597_v44, %v1597_v44  ;;  %v647_v52 = vmul.f32 %v1599_v45, %v1599_v45 }
 0x21b   : > { %1338 = vmatpush3.bf16.msra.mxu1 %v1335_v10 }
 0x21c   : > { %v1606_v53 = vsub.f32 %v592_v21, %v634_v49  ;;  %v1608_v54 = vsub.f32 %v587_v16, %v633_v50  ;;  %v664_v55 = vsel %vm602_vm1, %v648_v51, 0.0  ;;  %v661_v56 = vsel %vm602_vm1, %v647_v52, 0.0  ;;  %1340 = vmatprep.subr.bf16.mxu1 %v1339_v13 }
 0x21d   : > { %665 = vadd.xlane.f32.xlu1 %v664_v55  ;;  %662 = vadd.xlane.f32.xlu0 %v661_v56  ;;  %v626_v57 = vpop.xlane.xlu0 %625 }
 0x21e   : > { %v635_v58 = vmul.f32 0.015625, %v626_v57  ;;  %v650_v59 = vmul.f32 %v1606_v53, %v1606_v53  ;;  %v649_v60 = vmul.f32 %v1608_v54, %v1608_v54 }
 0x21f   : > { %1342 = vmatpush3.bf16.msra.mxu1 %v1339_v13 }
 0x220   : > { %v1616_v61 = vsub.f32 %v597_v22, %v635_v58  ;;  %v670_v62 = vsel %vm602_vm1, %v650_v59, 0.0  ;;  %v667_v63 = vsel %vm602_vm1, %v649_v60, 0.0 }
 0x221   : > { %671 = vadd.xlane.f32.xlu1 %v670_v62  ;;  %668 = vadd.xlane.f32.xlu0 %v667_v63 }
 0x222   : > { %v651_v0 = vmul.f32 %v1616_v61, %v1616_v61 }
 0x224   : > { %v673_v1 = vsel %vm602_vm1, %v651_v0, 0.0 }
 0x225   : > { %674 = vadd.xlane.f32.xlu0 %v673_v1 }
 0x2a1   : > { %v657_v14 = vpop.xlane.xlu0 %656 }
 0x2a2   : > { %v677_v15 = vmul.f32 0.015625, %v657_v14  ;;  %v654_v16 = vpop.xlane.xlu1 %653 }
 0x2a3   : > { %v676_v17 = vmul.f32 0.015625, %v654_v16 }
 0x2a4   : > { %v685_v18 = vadd.f32 1e-05, %v677_v15 }
 0x2a5   : > { %v684_v19 = vadd.f32 1e-05, %v676_v17 }
 0x2a6   : > { %1370 = vrsqrt.f32 %v685_v18  ;;  %v660_v20 = vpop.xlane.xlu1 %659 }
 0x2a7   : > { %1372 = vrsqrt.f32 %v684_v19  ;;  %v678_v21 = vmul.f32 0.015625, %v660_v20 }
 0x2a9   : > { %v686_v22 = vadd.f32 1e-05, %v678_v21 }
 0x2aa   : > { %v666_v23 = vpop.xlane.xlu1 %665  ;;  %v663_v24 = vpop.xlane.xlu0 %662 }
 0x2ab   : > { %1374 = vrsqrt.f32 %v686_v22  ;;  %v680_v25 = vmul.f32 0.015625, %v666_v23  ;;  %v679_v26 = vmul.f32 0.015625, %v663_v24 }
 0x2ad   : > { %v688_v27 = vadd.f32 1e-05, %v680_v25  ;;  %v687_v28 = vadd.f32 1e-05, %v679_v26 }
 0x2ae   : > { %v672_v29 = vpop.xlane.xlu1 %671  ;;  %v669_v32 = vpop.xlane.xlu0 %668 }
 0x2af   : > { %1376 = vrsqrt.f32 %v688_v27  ;;  %v682_v33 = vmul.f32 0.015625, %v672_v29  ;;  %v681_v34 = vmul.f32 0.015625, %v669_v32 }
 0x2b0   : > { %v1371_v35 = vpop.eup %1370  ;;  %1378 = vrsqrt.f32 %v687_v28 }
 0x2b1   : > { %v1373_v38 = vpop.eup %1372  ;;  %v701_v39 = vmul.f32 %v1371_v35, %v1583_v30  ;;  %v690_v40 = vadd.f32 1e-05, %v682_v33  ;;  %v689_v41 = vadd.f32 1e-05, %v681_v34 }
 0x2b2   : > { %v675_v42 = vpop.xlane.xlu0 %674  ;;  %v700_v46 = vmul.f32 %v1373_v38, %v1585_v31 }
 0x2b3   : > { %1380 = vrsqrt.f32 %v690_v40  ;;  %v683_v47 = vmul.f32 0.015625, %v675_v42  ;;  %v715_v48 = vmul.f32 %v1209_v36, %v701_v39 }
 0x2b4   : > { %1382 = vrsqrt.f32 %v689_v41  ;;  %v714_v49 = vmul.f32 %v1209_v36, %v700_v46 }
 0x2b5   : > { %v1375_v50 = vpop.eup %1374  ;;  %v691_v51 = vadd.f32 1e-05, %v683_v47  ;;  %v729_v52 = vadd.f32 %v1210_v43, %v715_v48 }
 0x2b6   : > { %v702_v55 = vmul.f32 %v1375_v50, %v1592_v37  ;;  %v728_v30 = vadd.f32 %v1210_v43, %v714_v49 }
 0x2b7   : > { %1384 = vrsqrt.f32 %v691_v51  ;;  %v1212_v56 = vmul.f32 -1.442695, %v729_v52 }
 0x2b8   : > { %v1211_v57 = vmul.f32 -1.442695, %v728_v30  ;;  %v716_v58 = vmul.f32 %v1209_v36, %v702_v55  ;;  %v1219_v55 = vld [vmem:[%s1767_s7] ss:$0 sm:$0xff] }
 0x2b9   : > { %v1377_v59 = vpop.eup %1376  ;;  %1386 = vpow2.f32 %v1212_v56 }
 0x2ba   : > { %v1379_v60 = vpop.eup %1378  ;;  %v704_v31 = vmul.f32 %v1377_v59, %v1597_v44  ;;  %1388 = vpow2.f32 %v1211_v57  ;;  %v730_v62 = vadd.f32 %v1210_v43, %v716_v58 }
 0x2bb   : > { %v703_v63 = vmul.f32 %v1379_v60, %v1599_v45 }
 0x2bc   : > { %v1213_v0 = vmul.f32 -1.442695, %v730_v62  ;;  %v718_v1 = vmul.f32 %v1209_v36, %v704_v31 }
 0x2bd   : > { %v1381_v2 = vpop.eup %1380  ;;  %v717_v3 = vmul.f32 %v1209_v36, %v703_v63 }
 0x2be   : > { %v1383_v4 = vpop.eup %1382  ;;  %v706_v37 = vmul.f32 %v1381_v2, %v1606_v53  ;;  %1390 = vpow2.f32 %v1213_v0  ;;  %v732_v5 = vadd.f32 %v1210_v43, %v718_v1 }
 0x2bf   : > { %v705_v6 = vmul.f32 %v1383_v4, %v1608_v54  ;;  %v731_v7 = vadd.f32 %v1210_v43, %v717_v3 }
 0x2c0   : > { %v1215_v8 = vmul.f32 -1.442695, %v732_v5  ;;  %v720_v9 = vmul.f32 %v1209_v36, %v706_v37 }
 0x2c1   : > { %v1385_v10 = vpop.eup %1384  ;;  %v1214_v44 = vmul.f32 -1.442695, %v731_v7  ;;  %v719_v11 = vmul.f32 %v1209_v36, %v705_v6 }
 0x2c2   : > { %v707_v12 = vmul.f32 %v1385_v10, %v1616_v61  ;;  %1392 = vpow2.f32 %v1215_v8  ;;  %v734_v45 = vadd.f32 %v1210_v43, %v720_v9 }
 0x2c3   : > { %v1387_v13 = vpop.eup %1386  ;;  %1394 = vpow2.f32 %v1214_v44  ;;  %v733_v14 = vadd.f32 %v1210_v43, %v719_v11 }
 0x2c4   : > { %v1389_v15 = vpop.eup %1388  ;;  %v761_v16 = vadd.f32 1.0, %v1387_v13  ;;  %v721_v53 = vmul.f32 %v1209_v36, %v707_v12  ;;  %v1217_v19 = vmul.f32 -1.442695, %v734_v45 }
 0x2c5   : > { %v760_v17 = vadd.f32 1.0, %v1389_v15  ;;  %v1216_v18 = vmul.f32 -1.442695, %v733_v14 }
 0x2c6   : > { %1396 = vrcp.f32 %v761_v16  ;;  %v735_v54 = vadd.f32 %v1210_v43, %v721_v53 }
 0x2c7   : > { %1398 = vrcp.f32 %v760_v17 }
 0x2c8   : > { %v1391_v20 = vpop.eup %1390  ;;  %1400 = vpow2.f32 %v1216_v18  ;;  %v1218_v21 = vmul.f32 -1.442695, %v735_v54 }
 0x2c9   : > { %v762_v22 = vadd.f32 1.0, %v1391_v20  ;;  %1402 = vpow2.f32 %v1217_v19 }
 0x2ca   : > { %1404 = vpow2.f32 %v1218_v21 }
 0x2cb   : > { %1406 = vrcp.f32 %v762_v22 }
 0x2cc   : > { %v1393_v61 = vpop.eup %1392 }
 0x2cd   : > { %v1395_v23 = vpop.eup %1394  ;;  %v764_v24 = vadd.f32 1.0, %v1393_v61 }
 0x2ce   : > { %v763_v25 = vadd.f32 1.0, %v1395_v23 }
 0x2cf   : > { %1408 = vrcp.f32 %v764_v24 }
 0x2d0   : > { %v1397_v26 = vpop.eup %1396  ;;  %1410 = vrcp.f32 %v763_v25 }
 0x2d1   : > { %v1399_v27 = vpop.eup %1398  ;;  %v785_v33 = vmul.f32 %v1397_v26, %v729_v52 }
 0x2d2   : > { %v1401_v28 = vpop.eup %1400  ;;  %v784_v29 = vmul.f32 %v1399_v27, %v728_v30 }
 0x2d3   : > { %v1403_v32 = vpop.eup %1402  ;;  %v765_v34 = vadd.f32 1.0, %v1401_v28 }
 0x2d4   : > { %v1405_v35 = vpop.eup %1404  ;;  %1307 = vmatprep.mubr.msk.f32.mxu1 %vm602_vm1, %v784_v29  ;;  %v766_v36 = vadd.f32 1.0, %v1403_v32 }
 0x2d5   : > { %v1407_v38 = vpop.eup %1406  ;;  %1308 = vmatmul.mubr.msk.f32.vlgmr.msra.gmra.mrb[0].mxu1 %vm602_vm1, %v785_v33  ;;  %1412 = vrcp.f32 %v765_v34  ;;  %v767_v39 = vadd.f32 1.0, %v1405_v35 }
 0x2d6   : > { %v786_v40 = vmul.f32 %v1407_v38, %v730_v62  ;;  %1414 = vrcp.f32 %v766_v36 }
 0x2d7   : > { %1416 = vrcp.f32 %v767_v39 }
 0x2d8   : > { %1310 = vmatprep.mubr.msk.f32.mxu1 %vm602_vm1, %v786_v40 }
 0x2d9   : > { %v1409_v41 = vpop.eup %1408 }
 0x2da   : > { %v1411_v42 = vpop.eup %1410  ;;  %v788_v43 = vmul.f32 %v1409_v41, %v732_v5 }
 0x2db   : > { %v787_v46 = vmul.f32 %v1411_v42, %v731_v7 }
 0x2dd   : > { %1311 = vmatmul.mubr.msk.f32.gmra.mrb[2].mxu1 %vm602_vm1, %v787_v46 }
 0x2de   : > { %1313 = vmatprep.mubr.msk.f32.mxu1 %vm602_vm1, %v788_v43 }
 0x2df   : > { %v1413_v47 = vpop.eup %1412 }
 0x2e0   : > { %v1415_v48 = vpop.eup %1414  ;;  %v789_v49 = vmul.f32 %v1413_v47, %v733_v14 }
 0x2e1   : > { %v1417_v50 = vpop.eup %1416  ;;  %v790_v51 = vmul.f32 %v1415_v48, %v734_v45 }
 0x2e2   : > { %1314 = vmatmul.mubr.msk.f32.gmra.mrb[4].mxu1 %vm602_vm1, %v789_v49  ;;  %v791_v52 = vmul.f32 %v1417_v50, %v735_v54 }
 0x2e3   : > { %1316 = vmatprep.mubr.msk.f32.mxu1 %vm602_vm1, %v790_v51 }
 0x2e6   : > { %1317 = vmatmul.mubr.msk.f32.gmra.mrb[6].mxu1 %vm602_vm1, %v791_v52 }
 0x3a8   : > { %v1309_v30 = vpop.f32.mrb[0].mxu1 }
 0x3a9   : > { %v903_v56 = vadd.f32 %v1309_v30, %v1219_v55  ;;  %v897_v57 = vpop.f32.mrb[1].mxu1 }
 0x3aa   : > { %v898_v58 = vadd.f32 %v1219_v55, %v897_v57 }
 0x3ab   : > { %v941_v59 = vsel %vm602_vm1, %v903_v56, 0.0 }
 0x3ac   : > { %942 = vadd.xlane.f32.xlu0 %v941_v59  ;;  %v938_v60 = vsel %vm602_vm1, %v898_v58, 0.0 }
 0x3ad   : > { %939 = vadd.xlane.f32.xlu1 %v938_v60 }
 0x3b0   : > { %v1312_v31 = vpop.f32.mrb[2].mxu1 }
 0x3b1   : > { %v913_v62 = vadd.f32 %v1312_v31, %v1219_v55  ;;  %v907_v63 = vpop.f32.mrb[3].mxu1 }
 0x3b2   : > { %v908_v0 = vadd.f32 %v1219_v55, %v907_v63 }
 0x3b3   : > { %v947_v1 = vsel %vm602_vm1, %v913_v62, 0.0 }
 0x3b4   : > { %948 = vadd.xlane.f32.xlu0 %v947_v1  ;;  %v944_v2 = vsel %vm602_vm1, %v908_v0, 0.0 }
 0x3b5   : > { %v1315_v3 = vpop.f32.mrb[4].mxu1  ;;  %945 = vadd.xlane.f32.xlu1 %v944_v2 }
 0x3b6   : > { %v923_v4 = vadd.f32 %v1315_v3, %v1219_v55  ;;  %v917_v37 = vpop.f32.mrb[5].mxu1 }
 0x3b7   : > { %v918_v5 = vadd.f32 %v1219_v55, %v917_v37 }
 0x3b8   : > { %v953_v6 = vsel %vm602_vm1, %v923_v4, 0.0 }
 0x3b9   : > { %954 = vadd.xlane.f32.xlu0 %v953_v6  ;;  %v1318_v7 = vpop.f32.mrb[6].mxu1  ;;  %v950_v8 = vsel %vm602_vm1, %v918_v5, 0.0  ;;  %v1228_v6 = vld [vmem:[%s1768_s8] ss:$0 sm:$0xff] }
 0x3ba   : > { %v933_v9 = vadd.f32 %v1318_v7, %v1219_v55  ;;  %951 = vadd.xlane.f32.xlu1 %v950_v8  ;;  %v927_v10 = vpop.f32.mrb[7].mxu1 }
 0x3bb   : > { %v928_v44 = vadd.f32 %v1219_v55, %v927_v10 }
 0x3bc   : > { %v959_v11 = vsel %vm602_vm1, %v933_v9, 0.0 }
 0x3bd   : > { %960 = vadd.xlane.f32.xlu0 %v959_v11  ;;  %v956_v12 = vsel %vm602_vm1, %v928_v44, 0.0 }
 0x3be   : > { %957 = vadd.xlane.f32.xlu1 %v956_v12 }
 0x439   : > { %v943_v45 = vpop.xlane.xlu0 %942 }
 0x43a   : > { %v963_v13 = vmul.f32 0.015625, %v943_v45  ;;  %v940_v14 = vpop.xlane.xlu1 %939 }
 0x43b   : > { %v962_v15 = vmul.f32 0.015625, %v940_v14 }
 0x43c   : > { %v1680_v16 = vsub.f32 %v903_v56, %v963_v13 }
 0x43d   : > { %v1682_v53 = vsub.f32 %v898_v58, %v962_v15 }
 0x43e   : > { %v979_v17 = vmul.f32 %v1680_v16, %v1680_v16 }
 0x43f   : > { %v978_v18 = vmul.f32 %v1682_v53, %v1682_v53 }
 0x440   : > { %v989_v19 = vsel %vm602_vm1, %v979_v17, 0.0 }
 0x441   : > { %v949_v54 = vpop.xlane.xlu0 %948  ;;  %990 = vadd.xlane.f32.xlu0 %v989_v19  ;;  %v986_v20 = vsel %vm602_vm1, %v978_v18, 0.0 }
 0x442   : > { %v965_v21 = vmul.f32 0.015625, %v949_v54  ;;  %v946_v22 = vpop.xlane.xlu1 %945  ;;  %987 = vadd.xlane.f32.xlu1 %v986_v20 }
 0x443   : > { %v964_v61 = vmul.f32 0.015625, %v946_v22 }
 0x444   : > { %v1690_v23 = vsub.f32 %v913_v62, %v965_v21 }
 0x445   : > { %v1692_v24 = vsub.f32 %v908_v0, %v964_v61 }
 0x446   : > { %v955_v25 = vpop.xlane.xlu0 %954  ;;  %v981_v26 = vmul.f32 %v1690_v23, %v1690_v23 }
 0x447   : > { %v967_v27 = vmul.f32 0.015625, %v955_v25  ;;  %v952_v28 = vpop.xlane.xlu1 %951  ;;  %v980_v29 = vmul.f32 %v1692_v24, %v1692_v24 }
 0x448   : > { %v966_v32 = vmul.f32 0.015625, %v952_v28  ;;  %v995_v33 = vsel %vm602_vm1, %v981_v26, 0.0 }
 0x449   : > { %v1699_v34 = vsub.f32 %v923_v4, %v967_v27  ;;  %996 = vadd.xlane.f32.xlu0 %v995_v33  ;;  %v992_v35 = vsel %vm602_vm1, %v980_v29, 0.0 }
 0x44a   : > { %v1702_v36 = vsub.f32 %v918_v5, %v966_v32  ;;  %v961_v38 = vpop.xlane.xlu0 %960  ;;  %993 = vadd.xlane.f32.xlu1 %v992_v35 }
 0x44b   : > { %v969_v39 = vmul.f32 0.015625, %v961_v38  ;;  %v958_v40 = vpop.xlane.xlu1 %957  ;;  %v983_v41 = vmul.f32 %v1699_v34, %v1699_v34 }
 0x44c   : > { %v968_v42 = vmul.f32 0.015625, %v958_v40  ;;  %v982_v43 = vmul.f32 %v1702_v36, %v1702_v36 }
 0x44d   : > { %v1708_v46 = vsub.f32 %v933_v9, %v969_v39  ;;  %v1001_v47 = vsel %vm602_vm1, %v983_v41, 0.0 }
 0x44e   : > { %v1711_v48 = vsub.f32 %v928_v44, %v968_v42  ;;  %1002 = vadd.xlane.f32.xlu0 %v1001_v47  ;;  %v998_v49 = vsel %vm602_vm1, %v982_v43, 0.0  ;;  %v1229_v44 = vld [vmem:[%s1769_s9] ss:$0 sm:$0xff] }
 0x44f   : > { %999 = vadd.xlane.f32.xlu1 %v998_v49  ;;  %v985_v50 = vmul.f32 %v1708_v46, %v1708_v46 }
 0x450   : > { %v984_v51 = vmul.f32 %v1711_v48, %v1711_v48 }
 0x451   : > { %v1007_v52 = vsel %vm602_vm1, %v985_v50, 0.0 }
 0x452   : > { %1008 = vadd.xlane.f32.xlu0 %v1007_v52  ;;  %v1004_v55 = vsel %vm602_vm1, %v984_v51, 0.0 }
 0x453   : > { %1005 = vadd.xlane.f32.xlu1 %v1004_v55 }
 0x4ce   : > { %v991_v30 = vpop.xlane.xlu0 %990 }
 0x4cf   : > { %v1011_v56 = vmul.f32 0.015625, %v991_v30  ;;  %v988_v57 = vpop.xlane.xlu1 %987 }
 0x4d0   : > { %v1010_v58 = vmul.f32 0.015625, %v988_v57 }
 0x4d1   : > { %v1019_v59 = vadd.f32 1e-05, %v1011_v56 }
 0x4d2   : > { %v1018_v60 = vadd.f32 1e-05, %v1010_v58 }
 0x4d3   : > { %1418 = vrsqrt.f32 %v1019_v59 }
 0x4d4   : > { %1420 = vrsqrt.f32 %v1018_v60 }
 0x4d6   : > { %v997_v31 = vpop.xlane.xlu0 %996 }
 0x4d7   : > { %v1013_v62 = vmul.f32 0.015625, %v997_v31  ;;  %v994_v63 = vpop.xlane.xlu1 %993 }
 0x4d8   : > { %v1012_v0 = vmul.f32 0.015625, %v994_v63 }
 0x4d9   : > { %v1021_v1 = vadd.f32 1e-05, %v1013_v62 }
 0x4da   : > { %v1020_v2 = vadd.f32 1e-05, %v1012_v0 }
 0x4db   : > { %1422 = vrsqrt.f32 %v1021_v1  ;;  %v1003_v3 = vpop.xlane.xlu0 %1002 }
 0x4dc   : > { %1424 = vrsqrt.f32 %v1020_v2  ;;  %v1015_v4 = vmul.f32 0.015625, %v1003_v3  ;;  %v1000_v37 = vpop.xlane.xlu1 %999 }
 0x4dd   : > { %v1419_v5 = vpop.eup %1418  ;;  %v1014_v7 = vmul.f32 0.015625, %v1000_v37 }
 0x4de   : > { %v1421_v8 = vpop.eup %1420  ;;  %v1035_v9 = vmul.f32 %v1419_v5, %v1680_v16  ;;  %v1023_v10 = vadd.f32 1e-05, %v1015_v4 }
 0x4df   : > { %v1034_v11 = vmul.f32 %v1421_v8, %v1682_v53  ;;  %v1022_v12 = vadd.f32 1e-05, %v1014_v7  ;;  %v1009_v45 = vpop.xlane.xlu0 %1008 }
 0x4e0   : > { %v1049_v13 = vmul.f32 %v1228_v6, %v1035_v9  ;;  %1426 = vrsqrt.f32 %v1023_v10  ;;  %v1017_v14 = vmul.f32 0.015625, %v1009_v45  ;;  %v1006_v15 = vpop.xlane.xlu1 %1005 }
 0x4e1   : > { %v1048_v17 = vmul.f32 %v1228_v6, %v1034_v11  ;;  %1428 = vrsqrt.f32 %v1022_v12  ;;  %v1016_v18 = vmul.f32 0.015625, %v1006_v15 }
 0x4e2   : > { %v1063_v19 = vadd.f32 %v1229_v44, %v1049_v13  ;;  %v1025_v54 = vadd.f32 1e-05, %v1017_v14 }
 0x4e3   : > { %v1062_v20 = vadd.f32 %v1229_v44, %v1048_v17  ;;  %v1024_v16 = vadd.f32 1e-05, %v1016_v18 }
 0x4e4   : > { %v1231_v21 = vmul.f32 -1.442695, %v1063_v19  ;;  %1430 = vrsqrt.f32 %v1025_v54 }
 0x4e5   : > { %v1423_v22 = vpop.eup %1422  ;;  %v1230_v61 = vmul.f32 -1.442695, %v1062_v20  ;;  %1432 = vrsqrt.f32 %v1024_v16 }
 0x4e6   : > { %v1425_v25 = vpop.eup %1424  ;;  %1434 = vpow2.f32 %v1231_v21  ;;  %v1037_v53 = vmul.f32 %v1423_v22, %v1690_v23 }
 0x4e7   : > { %1436 = vpow2.f32 %v1230_v61  ;;  %v1036_v26 = vmul.f32 %v1425_v25, %v1692_v24 }
 0x4e8   : > { %v1051_v27 = vmul.f32 %v1228_v6, %v1037_v53 }
 0x4e9   : > { %v1050_v28 = vmul.f32 %v1228_v6, %v1036_v26 }
 0x4ea   : > { %v1427_v29 = vpop.eup %1426  ;;  %v1065_v32 = vadd.f32 %v1229_v44, %v1051_v27 }
 0x4eb   : > { %v1429_v33 = vpop.eup %1428  ;;  %v1064_v35 = vadd.f32 %v1229_v44, %v1050_v28  ;;  %v1039_v38 = vmul.f32 %v1427_v29, %v1699_v34 }
 0x4ec   : > { %v1233_v39 = vmul.f32 -1.442695, %v1065_v32  ;;  %v1038_v40 = vmul.f32 %v1429_v33, %v1702_v36 }
 0x4ed   : > { %v1232_v41 = vmul.f32 -1.442695, %v1064_v35  ;;  %v1053_v42 = vmul.f32 %v1228_v6, %v1039_v38 }
 0x4ee   : > { %v1431_v43 = vpop.eup %1430  ;;  %1438 = vpow2.f32 %v1233_v39  ;;  %v1052_v47 = vmul.f32 %v1228_v6, %v1038_v40 }
 0x4ef   : > { %v1433_v23 = vpop.eup %1432  ;;  %1440 = vpow2.f32 %v1232_v41  ;;  %v1067_v49 = vadd.f32 %v1229_v44, %v1053_v42  ;;  %v1041_v24 = vmul.f32 %v1431_v43, %v1708_v46 }
 0x4f0   : > { %v1435_v50 = vpop.eup %1434  ;;  %v1066_v51 = vadd.f32 %v1229_v44, %v1052_v47  ;;  %v1040_v52 = vmul.f32 %v1433_v23, %v1711_v48 }
 0x4f1   : > { %v1437_v55 = vpop.eup %1436  ;;  %v1095_v30 = vadd.f32 1.0, %v1435_v50  ;;  %v1235_v34 = vmul.f32 -1.442695, %v1067_v49  ;;  %v1055_v56 = vmul.f32 %v1228_v6, %v1041_v24 }
 0x4f2   : > { %v1094_v57 = vadd.f32 1.0, %v1437_v55  ;;  %v1234_v36 = vmul.f32 -1.442695, %v1066_v51  ;;  %v1054_v58 = vmul.f32 %v1228_v6, %v1040_v52 }
 0x4f3   : > { %1442 = vrcp.f32 %v1095_v30  ;;  %v1069_v59 = vadd.f32 %v1229_v44, %v1055_v56 }
 0x4f4   : > { %1444 = vrcp.f32 %v1094_v57  ;;  %v1068_v60 = vadd.f32 %v1229_v44, %v1054_v58 }
 0x4f5   : > { %1446 = vpow2.f32 %v1235_v34  ;;  %v1237_v31 = vmul.f32 -1.442695, %v1069_v59 }
 0x4f6   : > { %1448 = vpow2.f32 %v1234_v36  ;;  %v1236_v46 = vmul.f32 -1.442695, %v1068_v60 }
 0x4f7   : > { %1450 = vpow2.f32 %v1237_v31 }
 0x4f8   : > { %v1439_v62 = vpop.eup %1438  ;;  %1452 = vpow2.f32 %v1236_v46 }
 0x4f9   : > { %v1441_v48 = vpop.eup %1440  ;;  %v1097_v63 = vadd.f32 1.0, %v1439_v62 }
 0x4fa   : > { %v1096_v0 = vadd.f32 1.0, %v1441_v48 }
 0x4fb   : > { %1454 = vrcp.f32 %v1097_v63 }
 0x4fc   : > { %1456 = vrcp.f32 %v1096_v0 }
 0x4fd   : > { %v1443_v1 = vpop.eup %1442 }
 0x4fe   : > { %v1445_v2 = vpop.eup %1444  ;;  %v1119_v3 = vmul.f32 %v1443_v1, %v1063_v19 }
 0x4ff   : > { %v1447_v4 = vpop.eup %1446  ;;  %v1118_v37 = vmul.f32 %v1445_v2, %v1062_v20 }
 0x500   : > { %v1449_v5 = vpop.eup %1448  ;;  %1127 = vst.msk [vmem:[%s1739_s28 + $0x8] sm:$0xff] %vm602_vm1, %v1119_v3  ;;  %v1099_v6 = vadd.f32 1.0, %v1447_v4 }
 0x501   : > { %v1451_v7 = vpop.eup %1450  ;;  %1126 = vst.msk [vmem:[%s1739_s28] sm:$0xff] %vm602_vm1, %v1118_v37  ;;  %v1098_v8 = vadd.f32 1.0, %v1449_v5 }
 0x502   : > { %v1453_v9 = vpop.eup %1452  ;;  %1458 = vrcp.f32 %v1099_v6  ;;  %v1101_v10 = vadd.f32 1.0, %v1451_v7 }
 0x503   : > { %1460 = vrcp.f32 %v1098_v8  ;;  %v1100_v44 = vadd.f32 1.0, %v1453_v9 }
 0x504   : > { %1462 = vrcp.f32 %v1101_v10 }
 0x505   : > { %v1455_v11 = vpop.eup %1454  ;;  %1464 = vrcp.f32 %v1100_v44 }
 0x506   : > { %v1457_v12 = vpop.eup %1456  ;;  %v1121_v45 = vmul.f32 %v1455_v11, %v1065_v32 }
 0x507   : > { %v1120_v13 = vmul.f32 %v1457_v12, %v1064_v35 }
 0x508   : > { %1129 = vst.msk [vmem:[%s1739_s28 + $0x18] sm:$0xff] %vm602_vm1, %v1121_v45 }
 0x509   : > { %1128 = vst.msk [vmem:[%s1739_s28 + $0x10] sm:$0xff] %vm602_vm1, %v1120_v13 }
 0x50c   : > { %v1459_v14 = vpop.eup %1458 }
 0x50d   : > { %v1461_v15 = vpop.eup %1460  ;;  %v1123_v17 = vmul.f32 %v1459_v14, %v1067_v49 }
 0x50e   : > { %v1463_v18 = vpop.eup %1462  ;;  %v1122_v19 = vmul.f32 %v1461_v15, %v1066_v51 }
 0x50f   : > { %v1465_v54 = vpop.eup %1464  ;;  %1131 = vst.msk [vmem:[%s1739_s28 + $0x28] sm:$0xff] %vm602_vm1, %v1123_v17  ;;  %v1125_v20 = vmul.f32 %v1463_v18, %v1069_v59 }
 0x510   : > { %1130 = vst.msk [vmem:[%s1739_s28 + $0x20] sm:$0xff] %vm602_vm1, %v1122_v19  ;;  %v1124_v16 = vmul.f32 %v1465_v54, %v1068_v60 }
 0x511   : > { %1133 = vst.msk [vmem:[%s1739_s28 + $0x38] sm:$0xff] %vm602_vm1, %v1125_v20 }
 0x512   : > { %1132 = vst.msk [vmem:[%s1739_s28 + $0x30] sm:$0xff] %vm602_vm1, %v1124_v16 }
 0x513 PF: > { %s20_s13 = sadd.s32 1, %s1472_s13  }
 0x514   : > { %p17_p4 = scmp.ge.s32.totalorder %s20_s13, 4  }
 0x516   :  { %19 = sbr.rel (!%p17_p4) target bundleno = 1 (0x1), region = 90 }

// kernel: jvp__.29
= control target key start
LH: loop header
LB: loop body
LE: loop exit
PB: predicated region body
PF: predicated region fallthrough
CT: control target
= control target key end

     0   :  { %s1444_s13 = smov 0   ;;  %s1792_s0 = inlined_call_operand.vmem [shape: f32[128,64], index: 0, kind: input, shape index: {}]   ;;  %s1793_s1 = inlined_call_operand.vmem [shape: f32[128,64], index: 1, kind: input, shape index: {}]   ;;  %s1794_s2 = inlined_call_operand.vmem [shape: f32[128,64], index: 2, kind: input, shape index: {}]   ;;  %s1795_s3 = inlined_call_operand.vmem [shape: f32[128,64], index: 3, kind: input, shape index: {}]   ;;  %s1796_s4 = inlined_call_operand.vmem [shape: f32[128,1], index: 4, kind: input, shape index: {}]   ;;  %s1797_s5 = inlined_call_operand.vmem [shape: f32[64,64], index: 5, kind: input, shape index: {}]   ;;  %s1798_s6 = inlined_call_operand.vmem [shape: f32[1,64], index: 6, kind: input, shape index: {}]   ;;  %s1799_s7 = inlined_call_operand.vmem [shape: f32[1,64], index: 7, kind: input, shape index: {}]   ;;  %s1800_s8 = inlined_call_operand.vmem [shape: f32[1,64], index: 8, kind: input, shape index: {}]   ;;  %s1801_s9 = inlined_call_operand.vmem [shape: f32[128,128], index: 9, kind: output, shape index: {0}]   ;;  %s1802_s10 = inlined_call_operand.vmem [shape: f32[128,64], index: 10, kind: output, shape index: {1}]  }
   0x1 LB: > { %s1171_s14 = sadd.s32 4294967295, %s1385_s13   ;;  %p1175_p0 = scmp.ge.s32.totalorder %s1385_s13, 1  ;;  %s1385_s13 = sphi %s1444_s13, %s21_s13  }
   0x2   : > { %p360_p1 = scmp.lt.s32.totalorder %s1385_s13, 3 }
   0x4   : > { %p361_p2 = pnand %p1175_p0, %p360_p1 }
   0x5   : > { %v473_v0 = vld [vmem:[%s1797_s5] sm:$0xff] (!%p361_p2)  ;;  %v474_v1 = vld [vmem:[%s1797_s5 + $0x8] sm:$0xff] (!%p361_p2)  ;;  %v475_v2 = vld [vmem:[%s1797_s5 + $0x10] sm:$0xff] (!%p361_p2)  ;;  %s1176_s21 = sshll.u32 (!%p361_p2), %s1171_s14, 3  ;;  %vm488_vm0 = vcmask (!%p361_p2), 523264   ;;  %v1387_v20 = vmov (!%p361_p2), 0  }
   0x6   : > { %364 = sbr.rel (%p361_p2) target bundleno = 602 (0x25a), region = 56  ;;  %v1263_v3 = vpack.c.bf16 (!%p361_p2), %v474_v1, %v473_v0  ;;  %v476_v4 = vld [vmem:[%s1797_s5 + $0x18] sm:$0xff] (!%p361_p2)  ;;  %p424_p3 = scmp.lt.s32.totalorder (!%p361_p2), %s1176_s21, 15  ;;  %v477_v6 = vld [vmem:[%s1797_s5 + $0x20] sm:$0xff] (!%p361_p2)  ;;  %v478_v7 = vld [vmem:[%s1797_s5 + $0x28] sm:$0xff] (!%p361_p2)  ;;  %1298 = vset.pattern.permute.xlu1 (!%p361_p2), %v1387_v20  ;;  %1297 = vset.pattern.permute.xlu0 (!%p361_p2), %v1387_v20 }
   0x7   : > { %v1267_v5 = vpack.c.bf16 (!%p361_p2), %v476_v4, %v475_v2  ;;  %v1271_v8 = vpack.c.bf16 (!%p361_p2), %v478_v7, %v477_v6  ;;  %v479_v9 = vld [vmem:[%s1797_s5 + $0x30] sm:$0xff] (!%p361_p2)  ;;  %v480_v10 = vld [vmem:[%s1797_s5 + $0x38] sm:$0xff] (!%p361_p2)  ;;  %v1190_v25 = vld [vmem:[%s1798_s6] ss:$0 sm:$0xff] (!%p361_p2)  ;;  %s1388_s29 = smov (!%p361_p2), 64  }
   0x8   : > { %1264 = vmatprep.subr.bf16.mxu0 (!%p361_p2), %v1263_v3  ;;  %1279 = vmatprep.subr.bf16.mxu1 (!%p361_p2), %v1263_v3  ;;  %v1275_v13 = vpack.c.bf16 (!%p361_p2), %v480_v10, %v479_v9 }
   0x9   : > { %1266 = vmatpush3.bf16.msra.mxu0 (!%p361_p2), %v1263_v3  ;;  %1283 = vmatpush3.bf16.msra.mxu1 (!%p361_p2), %v1263_v3 }
   0xa   : > { %1268 = vmatprep.subr.bf16.mxu0 (!%p361_p2), %v1267_v5  ;;  %1280 = vmatprep.subr.bf16.mxu1 (!%p361_p2), %v1267_v5 }
   0xd   : > { %s1804_s21 = smov (!%p424_p3, %s1176_s21), 15  ;;  %1270 = vmatpush3.bf16.msra.mxu0 %v1267_v5  ;;  %1284 = vmatpush3.bf16.msra.mxu1 %v1267_v5 }
   0xe   : > { %s1470_s28 = sshll.u32 %s1804_s21, 3  ;;  %1272 = vmatprep.subr.bf16.mxu0 %v1271_v8  ;;  %1281 = vmatprep.subr.bf16.mxu1 %v1271_v8 }
   0xf   : > { %s439_s16 = scalar_lea.vmem %s1794_s2, %s1470_s28  ;;  %s1518_s19 = scalar_lea.vmem %s1792_s0, %s1470_s28 }
  0x10   : > { %v1482_v11 = vld [vmem:[%s439_s16] sm:$0xff]  ;;  %v1490_v14 = vld [vmem:[%s439_s16 + $0x8] sm:$0xff]  ;;  %v1494_v16 = vld [vmem:[%s439_s16 + $0x10] sm:$0xff]  ;;  %s1524_s22 = scalar_lea.vmem %s1793_s1, %s1470_s28  ;;  %s451_s27 = scalar_lea.vmem %s1796_s4, %s1470_s28 }
  0x11   : > { %v1484_v12 = vld [vmem:[%s439_s16 + $0x20] sm:$0xff]  ;;  %1251 = vmatprep.mubr.msk.f32.mxu0 %vm488_vm0, %v1482_v11  ;;  %1274 = vmatpush3.bf16.msra.mxu0 %v1271_v8  ;;  %v1492_v15 = vld [vmem:[%s439_s16 + $0x28] sm:$0xff]  ;;  %v1496_v17 = vld [vmem:[%s439_s16 + $0x30] sm:$0xff]  ;;  %s1665_s12 = scalar_lea.vmem %s1795_s3, %s1470_s28  ;;  %s1679_s18 = scalar_lea.vmem %s1801_s9, %s1470_s28 }
  0x12   : > { %1257 = vmatprep.mubr.msk.f32.mxu1 %vm488_vm0, %v1484_v12  ;;  %1285 = vmatpush3.bf16.msra.mxu1 %v1271_v8  ;;  %v1504_v18 = vld [vmem:[%s439_s16 + $0x18] sm:$0xff]  ;;  %v619_v21 = vld [vmem:[%s1518_s19 + $0x8] sm:$0xff]  ;;  %v618_v28 = vld [vmem:[%s1518_s19] sm:$0xff]  ;;  %s1759_s23 = scalar_lea.vmem %s1802_s10, %s1470_s28 }
  0x13   : > { %1276 = vmatprep.subr.bf16.mxu0 %v1275_v13  ;;  %1282 = vmatprep.subr.bf16.mxu1 %v1275_v13  ;;  %v1508_v19 = vld [vmem:[%s439_s16 + $0x38] sm:$0xff]  ;;  %v627_v22 = vld [vmem:[%s1524_s22 + $0x8] sm:$0xff]  ;;  %v626_v29 = vld [vmem:[%s1524_s22] sm:$0xff] }
  0x14   : > { %v623_v23 = vld [vmem:[%s1518_s19 + $0x28] sm:$0xff]  ;;  %v635_v26 = vadd.f32 %v627_v22, %v619_v21  ;;  %v621_v32 = vld [vmem:[%s1518_s19 + $0x18] sm:$0xff]  ;;  %v622_v38 = vld [vmem:[%s1518_s19 + $0x20] sm:$0xff]  ;;  %v634_v41 = vadd.f32 %v626_v29, %v618_v28 }
  0x15   : > { %1278 = vmatpush3.bf16.msra.mxu0 %v1275_v13  ;;  %v631_v24 = vld [vmem:[%s1524_s22 + $0x28] sm:$0xff]  ;;  %v629_v33 = vld [vmem:[%s1524_s22 + $0x18] sm:$0xff]  ;;  %v630_v39 = vld [vmem:[%s1524_s22 + $0x20] sm:$0xff] }
  0x16   : > { %1286 = vmatpush3.bf16.msra.mxu1 %v1275_v13  ;;  %v639_v27 = vadd.f32 %v631_v24, %v623_v23  ;;  %v625_v42 = vld [vmem:[%s1518_s19 + $0x38] sm:$0xff]  ;;  %v637_v46 = vadd.f32 %v629_v33, %v621_v32  ;;  %v638_v47 = vadd.f32 %v630_v39, %v622_v38  ;;  %v620_v53 = vld [vmem:[%s1518_s19 + $0x10] sm:$0xff]  ;;  %v699_v22 = vld [vmem:[%s451_s27 + $0x8] sm:$0xff] }
  0x17   : > { %v633_v43 = vld [vmem:[%s1524_s22 + $0x38] sm:$0xff]  ;;  %v628_v57 = vld [vmem:[%s1524_s22 + $0x10] sm:$0xff]  ;;  %v698_v24 = vld [vmem:[%s451_s27] sm:$0xff] }
  0x18   : > { %1252 = vmatmul.mubr.msk.f32.vlgmr.msra.gmra.mrb[0].mxu0 %vm488_vm0, %v1490_v14  ;;  %v641_v55 = vadd.f32 %v633_v43, %v625_v42  ;;  %v624_v60 = vld [vmem:[%s1518_s19 + $0x30] sm:$0xff]  ;;  %v636_v1 = vadd.f32 %v628_v57, %v620_v53  ;;  %v705_v29 = vld [vmem:[%s451_s27 + $0x38] sm:$0xff] }
  0x19   : > { %1258 = vmatmul.mubr.msk.f32.vlgmr.msra.gmra.mrb[0].mxu1 %vm488_vm0, %v1492_v15  ;;  %1254 = vmatprep.mubr.msk.f32.mxu0 %vm488_vm0, %v1494_v16  ;;  %v632_v61 = vld [vmem:[%s1524_s22 + $0x30] sm:$0xff] }
  0x1a   : > { %1260 = vmatprep.mubr.msk.f32.mxu1 %vm488_vm0, %v1496_v17  ;;  %v640_v3 = vadd.f32 %v632_v61, %v624_v60  ;;  %v700_v23 = vld [vmem:[%s451_s27 + $0x10] sm:$0xff] }
  0x1b   : > { %v704_v28 = vld [vmem:[%s451_s27 + $0x30] sm:$0xff] }
  0x1c   : > { %1255 = vmatmul.mubr.msk.f32.gmra.mrb[2].mxu0 %vm488_vm0, %v1504_v18 }
  0x1d   : > { %1261 = vmatmul.mubr.msk.f32.gmra.mrb[2].mxu1 %vm488_vm0, %v1508_v19 }
  0xeb   : > { %v1253_v30 = vpop.f32.mrb[0].mxu0 }
  0xec   : > { %v1259_v31 = vpop.f32.mrb[0].mxu1  ;;  %v585_v34 = vadd.f32 %v1253_v30, %v1190_v25  ;;  %v579_v36 = vpop.f32.mrb[1].mxu0 }
  0xed   : > { %v605_v35 = vadd.f32 %v1259_v31, %v1190_v25  ;;  %v599_v37 = vpop.f32.mrb[1].mxu1  ;;  %v580_v40 = vadd.f32 %v1190_v25, %v579_v36 }
  0xee   : > { %v1541_v44 = vadd.f32 %v635_v26, %v585_v34  ;;  %v600_v50 = vadd.f32 %v1190_v25, %v599_v37  ;;  %v702_v26 = vld [vmem:[%s451_s27 + $0x20] sm:$0xff] }
  0xef   : > { %v1543_v45 = vadd.f32 %v639_v27, %v605_v35  ;;  %v1256_v48 = vpop.f32.mrb[2].mxu0  ;;  %v1548_v56 = vadd.f32 %v634_v41, %v580_v40  ;;  %v703_v27 = vld [vmem:[%s451_s27 + $0x28] sm:$0xff] }
  0xf0   : > { %v1262_v49 = vpop.f32.mrb[2].mxu1  ;;  %v595_v51 = vadd.f32 %v1256_v48, %v1190_v25  ;;  %v589_v52 = vpop.f32.mrb[3].mxu0  ;;  %v831_v58 = vsel %vm488_vm0, %v1541_v44, 0.0  ;;  %v1557_v0 = vadd.f32 %v638_v47, %v600_v50  ;;  %v1200_v34 = vmul.f32 -1.442695, %v1541_v44 }
  0xf1   : > { %v843_v54 = vsel %vm488_vm0, %v1543_v45, 0.0  ;;  %v609_v59 = vpop.f32.mrb[3].mxu1  ;;  %832 = vadd.xlane.f32.xlu0 %v831_v58  ;;  %v615_v63 = vadd.f32 %v1262_v49, %v1190_v25  ;;  %v590_v4 = vadd.f32 %v1190_v25, %v589_v52  ;;  %v828_v7 = vsel %vm488_vm0, %v1548_v56, 0.0 }
  0xf2   : > { %844 = vadd.xlane.f32.xlu1 %v843_v54  ;;  %v1555_v62 = vadd.f32 %v637_v46, %v595_v51  ;;  %v610_v5 = vadd.f32 %v1190_v25, %v609_v59  ;;  %v840_v13 = vsel %vm488_vm0, %v1557_v0, 0.0  ;;  %v701_v25 = vld [vmem:[%s451_s27 + $0x18] sm:$0xff]  ;;  %1299 = vpow2.f32 %v1200_v34 }
  0xf3   : > { %v1559_v2 = vadd.f32 %v641_v55, %v615_v63  ;;  %v1567_v9 = vadd.f32 %v636_v1, %v590_v4  ;;  %v1203_v54 = vmul.f32 -1.442695, %v1557_v0  ;;  %v1199_v60 = vmul.f32 -1.442695, %v1548_v56 }
  0xf4   : > { %v837_v6 = vsel %vm488_vm0, %v1555_v62, 0.0  ;;  %v1569_v10 = vadd.f32 %v640_v3, %v610_v5 }
  0xf5   : > { %829 = vadd.xlane.f32.xlu0 %v828_v7  ;;  %v849_v8 = vsel %vm488_vm0, %v1559_v2, 0.0  ;;  %v834_v20 = vsel %vm488_vm0, %v1567_v9, 0.0  ;;  %v1201_v46 = vmul.f32 -1.442695, %v1567_v9 }
  0xf6   : > { %838 = vadd.xlane.f32.xlu1 %v837_v6  ;;  %v846_v21 = vsel %vm488_vm0, %v1569_v10, 0.0  ;;  %v1205_v5 = vmul.f32 -1.442695, %v1569_v10 }
  0xf7   : > { %1301 = vpow2.f32 %v1201_v46 }
  0xf8   : > { %1303 = vpow2.f32 %v1203_v54 }
  0xf9   : > { %841 = vadd.xlane.f32.xlu0 %v840_v13  ;;  %1305 = vpow2.f32 %v1199_v60 }
  0xfa   : > { %850 = vadd.xlane.f32.xlu1 %v849_v8  ;;  %1307 = vpow2.f32 %v1205_v5 }
  0xfc   : > { %v1300_v13 = vpop.eup %1299 }
  0xfd   : > { %847 = vadd.xlane.f32.xlu0 %v846_v21 }
  0xfe   : > { %835 = vadd.xlane.f32.xlu1 %v834_v20  ;;  %v1202_v20 = vmul.f32 -1.442695, %v1555_v62 }
 0x100   : > { %1309 = vpow2.f32 %v1202_v20 }
 0x10f   : > { %713 = vperm.xlu1 %1298, %v699_v22  }
 0x113   : > { %718 = vperm.xlu1 %1298, %v700_v23   ;;  %708 = vperm.xlu0 %1297, %v698_v24  }
 0x117   : > { %723 = vperm.xlu1 %1298, %v701_v25   ;;  %v675_v25 = vadd.f32 1.0, %v1300_v13 }
 0x11b   : > { %728 = vperm.xlu1 %1298, %v702_v26  }
 0x11f   : > { %733 = vperm.xlu1 %1298, %v703_v27   ;;  %v1206_v27 = vmul.f32 -1.442695, %v1559_v2 }
 0x123   : > { %738 = vperm.xlu1 %1298, %v704_v28  }
 0x127   : > { %743 = vperm.xlu1 %1298, %v705_v29  }
 0x17e   : > { %v833_v32 = vpop.xlane.xlu0 %832 }
 0x17f   : > { %v845_v30 = vpop.xlane.xlu1 %844  ;;  %v854_v33 = vmul.f32 0.015625, %v833_v32 }
 0x180   : > { %v858_v31 = vmul.f32 0.015625, %v845_v30 }
 0x181   : > { %v1586_v36 = vsub.f32 %v1541_v44, %v854_v33 }
 0x182   : > { %v1583_v35 = vsub.f32 %v1543_v45, %v858_v31  ;;  %v830_v38 = vpop.xlane.xlu0 %829 }
 0x183   : > { %v839_v37 = vpop.xlane.xlu1 %838  ;;  %v853_v41 = vmul.f32 0.015625, %v830_v38  ;;  %v870_v42 = vmul.f32 %v1586_v36, %v1586_v36 }
 0x184   : > { %v874_v39 = vmul.f32 %v1583_v35, %v1583_v35  ;;  %v856_v40 = vmul.f32 0.015625, %v839_v37 }
 0x185   : > { %v1598_v44 = vsub.f32 %v1548_v56, %v853_v41  ;;  %v880_v48 = vsel %vm488_vm0, %v870_v42, 0.0 }
 0x186   : > { %v892_v43 = vsel %vm488_vm0, %v874_v39, 0.0  ;;  %v1595_v47 = vsub.f32 %v1555_v62, %v856_v40  ;;  %881 = vadd.xlane.f32.xlu0 %v880_v48  ;;  %v842_v50 = vpop.xlane.xlu0 %841  ;;  %v1302_v62 = vpop.eup %1301 }
 0x187   : > { %893 = vadd.xlane.f32.xlu1 %v892_v43  ;;  %v851_v49 = vpop.xlane.xlu1 %850  ;;  %v857_v52 = vmul.f32 0.015625, %v842_v50  ;;  %v869_v53 = vmul.f32 %v1598_v44, %v1598_v44  ;;  %v676_v29 = vadd.f32 1.0, %v1302_v62 }
 0x188   : > { %v860_v51 = vmul.f32 0.015625, %v851_v49  ;;  %v872_v55 = vmul.f32 %v1595_v47, %v1595_v47 }
 0x189   : > { %v1610_v58 = vsub.f32 %v1557_v0, %v857_v52  ;;  %v877_v59 = vsel %vm488_vm0, %v869_v53, 0.0 }
 0x18a   : > { %v1607_v57 = vsub.f32 %v1559_v2, %v860_v51  ;;  %v848_v63 = vpop.xlane.xlu0 %847  ;;  %v886_v6 = vsel %vm488_vm0, %v872_v55, 0.0 }
 0x18b   : > { %v836_v61 = vpop.xlane.xlu1 %835  ;;  %878 = vadd.xlane.f32.xlu1 %v877_v59  ;;  %v859_v3 = vmul.f32 0.015625, %v848_v63  ;;  %v873_v4 = vmul.f32 %v1610_v58, %v1610_v58 }
 0x18c   : > { %v855_v1 = vmul.f32 0.015625, %v836_v61  ;;  %v876_v8 = vmul.f32 %v1607_v57, %v1607_v57 }
 0x18d   : > { %v1622_v7 = vsub.f32 %v1569_v10, %v859_v3  ;;  %v889_v56 = vsel %vm488_vm0, %v873_v4, 0.0 }
 0x18e   : > { %v1619_v0 = vsub.f32 %v1567_v9, %v855_v1  ;;  %890 = vadd.xlane.f32.xlu0 %v889_v56  ;;  %v1204_v9 = vmul.f32 -1.442695, %v1543_v45  ;;  %v898_v10 = vsel %vm488_vm0, %v876_v8, 0.0  ;;  %v1304_v45 = vpop.eup %1303 }
 0x18f   : > { %v714_v21 = vpop.permute.xlu1 %713  ;;  %887 = vadd.xlane.f32.xlu1 %v886_v6  ;;  %v875_v24 = vmul.f32 %v1622_v7, %v1622_v7  ;;  %v1306_v30 = vpop.eup %1305  ;;  %v678_v32 = vadd.f32 1.0, %v1304_v45 }
 0x190   : > { %v871_v22 = vmul.f32 %v1619_v0, %v1619_v0  ;;  %1311 = vpow2.f32 %v1204_v9  ;;  %v1308_v33 = vpop.eup %1307  ;;  %v674_v34 = vadd.f32 1.0, %v1306_v30  ;;  %v755_v30 = vld [vmem:[%s1665_s12 + $0x8] sm:$0xff] }
 0x191   : > { %v895_v28 = vsel %vm488_vm0, %v875_v24, 0.0  ;;  %1313 = vrcp.f32 %v675_v25  ;;  %v1310_v37 = vpop.eup %1309  ;;  %v680_v38 = vadd.f32 1.0, %v1308_v33 }
 0x192   : > { %v883_v23 = vsel %vm488_vm0, %v871_v22, 0.0  ;;  %1315 = vpow2.f32 %v1206_v27  ;;  %v677_v2 = vadd.f32 1.0, %v1310_v37  ;;  %v709_v52 = vpop.permute.xlu0 %708 }
 0x193   : > { %v719_v26 = vpop.permute.xlu1 %718  ;;  %899 = vadd.xlane.f32.xlu1 %v898_v10  ;;  %884 = vadd.xlane.f32.xlu0 %v883_v23  ;;  %1317 = vrcp.f32 %v676_v29 }
 0x194   : > { %1319 = vrcp.f32 %v678_v32 }
 0x195   : > { %1321 = vrcp.f32 %v674_v34 }
 0x196   : > { %1323 = vrcp.f32 %v680_v38  ;;  %v1671_v38 = vld [vmem:[%s1799_s7] ss:$0 sm:$0xff] }
 0x197   : > { %896 = vadd.xlane.f32.xlu0 %v895_v28  ;;  %v724_v31 = vpop.permute.xlu1 %723  ;;  %1325 = vrcp.f32 %v677_v2 }
 0x19a   : > { %v1312_v40 = vpop.eup %1311 }
 0x19b   : > { %v729_v39 = vpop.permute.xlu1 %728  ;;  %v1314_v41 = vpop.eup %1313  ;;  %v679_v46 = vadd.f32 1.0, %v1312_v40 }
 0x19c   : > { %v1637_v42 = vmul.f32 %v1314_v41, %v714_v21  ;;  %v1316_v43 = vpop.eup %1315 }
 0x19d   : > { %v1318_v48 = vpop.eup %1317  ;;  %1327 = vrcp.f32 %v679_v46  ;;  %v681_v51 = vadd.f32 1.0, %v1316_v43  ;;  %v756_v46 = vld [vmem:[%s1665_s12 + $0x10] sm:$0xff] }
 0x19e   : > { %v1640_v50 = vmul.f32 %v1318_v48, %v719_v26  ;;  %v1320_v53 = vpop.eup %1319  ;;  %v763_v40 = vmul.f32 %v755_v30, %v1637_v42  ;;  %v754_v48 = vld [vmem:[%s1665_s12] sm:$0xff] }
 0x19f   : > { %v734_v49 = vpop.permute.xlu1 %733  ;;  %v1322_v54 = vpop.eup %1321  ;;  %v1643_v55 = vmul.f32 %v1320_v53, %v729_v39  ;;  %1329 = vrcp.f32 %v681_v51 }
 0x1a0   : > { %v1645_v59 = vmul.f32 %v1322_v54, %v709_v52  ;;  %v1324_v61 = vpop.eup %1323 }
 0x1a1   : > { %v1326_v63 = vpop.eup %1325 }
 0x1a2   : > { %v1651_v3 = vmul.f32 %v1326_v63, %v724_v31  ;;  %v764_v63 = vmul.f32 %v756_v46, %v1640_v50 }
 0x1a3   : > { %v739_v60 = vpop.permute.xlu1 %738 }
 0x1a4   : > { %780 = vrot.lane.b32.xlu1 %v1637_v42, %s1388_s29  ;;  %v1649_v1 = vmul.f32 %v1324_v61, %v739_v60 }
 0x1a7   : > { %v1328_v4 = vpop.eup %1327  ;;  %v744_v6 = vpop.permute.xlu1 %743 }
 0x1a8   : > { %782 = vrot.lane.b32.xlu1 %v1640_v50, %s1388_s29  ;;  %v1655_v5 = vmul.f32 %v1328_v4, %v734_v49  ;;  %v1686_v49 = vld [vmem:[%s1800_s8] ss:$0 sm:$0xff]  ;;  %v762_v4 = vmul.f32 %v754_v48, %v1645_v59 }
 0x1a9   : > { %v1330_v56 = vpop.eup %1329 }
 0x1aa   : > { %v1658_v8 = vmul.f32 %v1330_v56, %v744_v6  ;;  %v757_v56 = vld [vmem:[%s1665_s12 + $0x18] sm:$0xff] }
 0x1ac   : > { %786 = vrot.lane.b32.xlu1 %v1643_v55, %s1388_s29 }
 0x1ad   : > { %778 = vrot.lane.b32.xlu0 %v1645_v59, %s1388_s29 }
 0x1b0   : > { %790 = vrot.lane.b32.xlu1 %v1649_v1, %s1388_s29 }
 0x1b1   : > { %784 = vrot.lane.b32.xlu0 %v1651_v3, %s1388_s29 }
 0x1b5   : > { %788 = vrot.lane.b32.xlu0 %v1655_v5, %s1388_s29 }
 0x1b9   : > { %792 = vrot.lane.b32.xlu0 %v1658_v8, %s1388_s29 }
 0x213   : > { %v882_v21 = vpop.xlane.xlu0 %881 }
 0x214   : > { %v894_v13 = vpop.xlane.xlu1 %893  ;;  %v902_v22 = vmul.f32 0.015625, %v882_v21 }
 0x215   : > { %v906_v20 = vmul.f32 0.015625, %v894_v13  ;;  %v758_v13 = vld [vmem:[%s1665_s12 + $0x20] sm:$0xff] }
 0x216   : > { %v910_v10 = vadd.f32 1e-05, %v902_v22 }
 0x217   : > { %v914_v9 = vadd.f32 1e-05, %v906_v20 }
 0x218   : > { %v879_v23 = vpop.xlane.xlu1 %878 }
 0x219   : > { %1331 = vrsqrt.f32 %v914_v9  ;;  %v901_v24 = vmul.f32 0.015625, %v879_v23 }
 0x21a   : > { %1333 = vrsqrt.f32 %v910_v10 }
 0x21b   : > { %v909_v25 = vadd.f32 1e-05, %v901_v24  ;;  %v891_v62 = vpop.xlane.xlu0 %890 }
 0x21c   : > { %v888_v26 = vpop.xlane.xlu1 %887  ;;  %v905_v28 = vmul.f32 0.015625, %v891_v62 }
 0x21d   : > { %1335 = vrsqrt.f32 %v909_v25  ;;  %v904_v27 = vmul.f32 0.015625, %v888_v26  ;;  %v766_v26 = vmul.f32 %v758_v13, %v1643_v55 }
 0x21e   : > { %v913_v29 = vadd.f32 1e-05, %v905_v28  ;;  %v760_v28 = vld [vmem:[%s1665_s12 + $0x30] sm:$0xff] }
 0x21f   : > { %v912_v45 = vadd.f32 1e-05, %v904_v27  ;;  %v759_v27 = vld [vmem:[%s1665_s12 + $0x28] sm:$0xff] }
 0x220   : > { %v900_v31 = vpop.xlane.xlu1 %899  ;;  %v885_v32 = vpop.xlane.xlu0 %884 }
 0x221   : > { %1337 = vrsqrt.f32 %v912_v45  ;;  %v908_v33 = vmul.f32 0.015625, %v900_v31  ;;  %v903_v34 = vmul.f32 0.015625, %v885_v32 }
 0x222   : > { %1339 = vrsqrt.f32 %v913_v29 }
 0x223   : > { %v1332_v37 = vpop.eup %1331  ;;  %v916_v41 = vadd.f32 1e-05, %v908_v33  ;;  %v911_v43 = vadd.f32 1e-05, %v903_v34 }
 0x224   : > { %v1334_v39 = vpop.eup %1333  ;;  %v930_v2 = vmul.f32 %v1332_v37, %v1583_v35  ;;  %v781_v35 = vpop.permute.xlu1 %780 }
 0x225   : > { %v926_v42 = vmul.f32 %v1334_v39, %v1586_v36  ;;  %v897_v51 = vpop.xlane.xlu0 %896  ;;  %1341 = vrsqrt.f32 %v916_v41  ;;  %v803_v53 = vsel %vm488_vm0, %v763_v40, %v781_v35  ;;  %v767_v39 = vmul.f32 %v759_v27, %v1655_v5 }
 0x226   : > { %v944_v52 = vmul.f32 %v1671_v38, %v930_v2  ;;  %v907_v54 = vmul.f32 0.015625, %v897_v51  ;;  %1343 = vrsqrt.f32 %v911_v43  ;;  %811 = vst [vmem:[%s1679_s18 + $0x8] sm:$0xff] %v803_v53  ;;  %v761_v2 = vld [vmem:[%s1665_s12 + $0x38] sm:$0xff] }
 0x227   : > { %v940_v60 = vmul.f32 %v1671_v38, %v926_v42  ;;  %v1336_v61 = vpop.eup %1335 }
 0x228   : > { %v1696_v36 = vadd.f32 %v1686_v49, %v944_v52  ;;  %v915_v6 = vadd.f32 1e-05, %v907_v54  ;;  %v925_v21 = vmul.f32 %v1336_v61, %v1598_v44  ;;  %v783_v22 = vpop.permute.xlu1 %782  ;;  %v765_v44 = vmul.f32 %v757_v56, %v1651_v3 }
 0x229   : > { %v1701_v20 = vadd.f32 %v1686_v49, %v940_v60  ;;  %v779_v9 = vpop.permute.xlu0 %778  ;;  %v804_v59 = vsel %vm488_vm0, %v764_v63, %v783_v22 }
 0x22a   : > { %v1214_v50 = vmul.f32 -1.442695, %v1696_v36  ;;  %1345 = vrsqrt.f32 %v915_v6  ;;  %v802_v10 = vsel %vm488_vm0, %v762_v4, %v779_v9  ;;  %v939_v24 = vmul.f32 %v1671_v38, %v925_v21  ;;  %812 = vst [vmem:[%s1679_s18 + $0x10] sm:$0xff] %v804_v59 }
 0x22b   : > { %v1210_v23 = vmul.f32 -1.442695, %v1701_v20  ;;  %810 = vst [vmem:[%s1679_s18] sm:$0xff] %v802_v10  ;;  %v1338_v25 = vpop.eup %1337 }
 0x22c   : > { %1347 = vpow2.f32 %v1214_v50  ;;  %v1340_v62 = vpop.eup %1339  ;;  %v1716_v45 = vadd.f32 %v1686_v49, %v939_v24  ;;  %v928_v29 = vmul.f32 %v1338_v25, %v1595_v47  ;;  %v787_v30 = vpop.permute.xlu1 %786  ;;  %v768_v47 = vmul.f32 %v760_v28, %v1649_v1 }
 0x22d   : > { %1349 = vpow2.f32 %v1210_v23  ;;  %v785_v31 = vpop.permute.xlu0 %784  ;;  %v929_v32 = vmul.f32 %v1340_v62, %v1610_v58  ;;  %v806_v3 = vsel %vm488_vm0, %v766_v26, %v787_v30 }
 0x22e   : > { %v805_v55 = vsel %vm488_vm0, %v765_v44, %v785_v31  ;;  %v1209_v33 = vmul.f32 -1.442695, %v1716_v45  ;;  %v942_v34 = vmul.f32 %v1671_v38, %v928_v29  ;;  %814 = vst [vmem:[%s1679_s18 + $0x20] sm:$0xff] %v806_v3 }
 0x22f   : > { %813 = vst [vmem:[%s1679_s18 + $0x18] sm:$0xff] %v805_v55  ;;  %v1342_v37 = vpop.eup %1341  ;;  %v943_v40 = vmul.f32 %v1671_v38, %v929_v32 }
 0x230   : > { %v1344_v58 = vpop.eup %1343  ;;  %1351 = vpow2.f32 %v1209_v33  ;;  %v1731_v41 = vadd.f32 %v1686_v49, %v942_v34  ;;  %v932_v43 = vmul.f32 %v1342_v37, %v1607_v57  ;;  %v791_v46 = vpop.permute.xlu1 %790  ;;  %v769_v57 = vmul.f32 %v761_v2, %v1658_v8 }
 0x231   : > { %v789_v48 = vpop.permute.xlu0 %788  ;;  %v1735_v42 = vadd.f32 %v1686_v49, %v943_v40  ;;  %v927_v5 = vmul.f32 %v1344_v58, %v1619_v0  ;;  %v808_v1 = vsel %vm488_vm0, %v768_v47, %v791_v46 }
 0x232   : > { %v807_v35 = vsel %vm488_vm0, %v767_v39, %v789_v48  ;;  %v1212_v51 = vmul.f32 -1.442695, %v1731_v41  ;;  %v946_v52 = vmul.f32 %v1671_v38, %v932_v43  ;;  %816 = vst [vmem:[%s1679_s18 + $0x30] sm:$0xff] %v808_v1 }
 0x233   : > { %815 = vst [vmem:[%s1679_s18 + $0x28] sm:$0xff] %v807_v35  ;;  %v1213_v54 = vmul.f32 -1.442695, %v1735_v42  ;;  %v941_v60 = vmul.f32 %v1671_v38, %v927_v5 }
 0x234   : > { %v1346_v53 = vpop.eup %1345  ;;  %1353 = vpow2.f32 %v1212_v51  ;;  %v960_v0 = vadd.f32 %v1686_v49, %v946_v52 }
 0x235   : > { %v931_v61 = vmul.f32 %v1346_v53, %v1622_v7  ;;  %v793_v63 = vpop.permute.xlu0 %792  ;;  %1355 = vpow2.f32 %v1213_v54  ;;  %v955_v6 = vadd.f32 %v1686_v49, %v941_v60 }
 0x236   : > { %v1348_v4 = vpop.eup %1347  ;;  %v809_v56 = vsel %vm488_vm0, %v769_v57, %v793_v63  ;;  %v1216_v22 = vmul.f32 -1.442695, %v960_v0 }
 0x237   : > { %v1350_v13 = vpop.eup %1349  ;;  %v990_v21 = vadd.f32 1.0, %v1348_v4  ;;  %v945_v8 = vmul.f32 %v1671_v38, %v931_v61  ;;  %817 = vst [vmem:[%s1679_s18 + $0x38] sm:$0xff] %v809_v56  ;;  %v1211_v50 = vmul.f32 -1.442695, %v955_v6 }
 0x238   : > { %v986_v9 = vadd.f32 1.0, %v1350_v13 }
 0x239   : > { %1357 = vrcp.f32 %v990_v21  ;;  %v959_v59 = vadd.f32 %v1686_v49, %v945_v8 }
 0x23a   : > { %1359 = vrcp.f32 %v986_v9  ;;  %v1352_v7 = vpop.eup %1351 }
 0x23b   : > { %1361 = vpow2.f32 %v1216_v22  ;;  %v1215_v10 = vmul.f32 -1.442695, %v959_v59  ;;  %v985_v23 = vadd.f32 1.0, %v1352_v7 }
 0x23c   : > { %1363 = vpow2.f32 %v1211_v50 }
 0x23d   : > { %1365 = vpow2.f32 %v1215_v10 }
 0x23e   : > { %1367 = vrcp.f32 %v985_v23  ;;  %v1354_v24 = vpop.eup %1353 }
 0x23f   : > { %v1356_v25 = vpop.eup %1355  ;;  %v988_v44 = vadd.f32 1.0, %v1354_v24 }
 0x240   : > { %v989_v26 = vadd.f32 1.0, %v1356_v25 }
 0x241   : > { %1369 = vrcp.f32 %v988_v44 }
 0x242   : > { %1371 = vrcp.f32 %v989_v26 }
 0x243   : > { %v1358_v38 = vpop.eup %1357 }
 0x244   : > { %v1360_v62 = vpop.eup %1359  ;;  %v1014_v27 = vmul.f32 %v1358_v38, %v1696_v36 }
 0x245   : > { %v1362_v49 = vpop.eup %1361  ;;  %v1010_v28 = vmul.f32 %v1360_v62, %v1701_v20 }
 0x246   : > { %v1364_v29 = vpop.eup %1363  ;;  %v1022_v30 = vadd.f32 %v1014_v27, %v1492_v15  ;;  %v992_v31 = vadd.f32 1.0, %v1362_v49 }
 0x247   : > { %v1366_v32 = vpop.eup %1365  ;;  %v1018_v3 = vadd.f32 %v1010_v28, %v1490_v14  ;;  %v987_v55 = vadd.f32 1.0, %v1364_v29 }
 0x248   : > { %v1368_v36 = vpop.eup %1367  ;;  %1030 = vst.msk [vmem:[%s1759_s23 + $0x28] sm:$0xff] %vm488_vm0, %v1022_v30  ;;  %1373 = vrcp.f32 %v992_v31  ;;  %v991_v33 = vadd.f32 1.0, %v1366_v32 }
 0x249   : > { %1026 = vst.msk [vmem:[%s1759_s23 + $0x8] sm:$0xff] %vm488_vm0, %v1018_v3  ;;  %v1009_v20 = vmul.f32 %v1368_v36, %v1716_v45  ;;  %1375 = vrcp.f32 %v987_v55 }
 0x24a   : > { %1377 = vrcp.f32 %v991_v33 }
 0x24b   : > { %v1017_v15 = vadd.f32 %v1009_v20, %v1482_v11  ;;  %v1370_v34 = vpop.eup %1369 }
 0x24c   : > { %v1372_v37 = vpop.eup %1371  ;;  %v1012_v14 = vmul.f32 %v1370_v34, %v1731_v41 }
 0x24d   : > { %1025 = vst.msk [vmem:[%s1759_s23] sm:$0xff] %vm488_vm0, %v1017_v15  ;;  %v1013_v39 = vmul.f32 %v1372_v37, %v1735_v42 }
 0x24e   : > { %v1020_v47 = vadd.f32 %v1012_v14, %v1504_v18 }
 0x24f   : > { %v1021_v40 = vadd.f32 %v1013_v39, %v1484_v12 }
 0x250   : > { %1028 = vst.msk [vmem:[%s1759_s23 + $0x18] sm:$0xff] %vm488_vm0, %v1020_v47 }
 0x251   : > { %1029 = vst.msk [vmem:[%s1759_s23 + $0x20] sm:$0xff] %vm488_vm0, %v1021_v40 }
 0x252   : > { %v1374_v45 = vpop.eup %1373 }
 0x253   : > { %v1376_v11 = vpop.eup %1375  ;;  %v1016_v58 = vmul.f32 %v1374_v45, %v960_v0 }
 0x254   : > { %v1378_v2 = vpop.eup %1377  ;;  %v1011_v43 = vmul.f32 %v1376_v11, %v955_v6 }
 0x255   : > { %v1024_v46 = vadd.f32 %v1016_v58, %v1508_v19  ;;  %v1015_v41 = vmul.f32 %v1378_v2, %v959_v59 }
 0x256   : > { %v1019_v48 = vadd.f32 %v1011_v43, %v1494_v16 }
 0x257   : > { %1032 = vst.msk [vmem:[%s1759_s23 + $0x38] sm:$0xff] %vm488_vm0, %v1024_v46  ;;  %v1023_v18 = vadd.f32 %v1015_v41, %v1496_v17 }
 0x258   : > { %1027 = vst.msk [vmem:[%s1759_s23 + $0x10] sm:$0xff] %vm488_vm0, %v1019_v48 }
 0x259   : > { %1031 = vst.msk [vmem:[%s1759_s23 + $0x30] sm:$0xff] %vm488_vm0, %v1023_v18 }
 0x25a PF: > { %s21_s13 = sadd.s32 1, %s1385_s13  }
 0x25b   : > { %p18_p4 = scmp.ge.s32.totalorder %s21_s13, 4  }
 0x25d   :  { %20 = sbr.rel (!%p18_p4) target bundleno = 1 (0x1), region = 110 }

// kernel: jvp__.35
= control target key start
LH: loop header
LB: loop body
LE: loop exit
PB: predicated region body
PF: predicated region fallthrough
CT: control target
= control target key end

     0   :  { %16 = vsyncpa [#allocation3], 0  ;;  %s2001_s0 = inlined_call_operand.vmem [shape: f32[128,64], index: 0, kind: input, shape index: {}]   ;;  %s2002_s1 = inlined_call_operand.vmem [shape: f32[128,64], index: 1, kind: input, shape index: {}]   ;;  %s2003_s2 = inlined_call_operand.vmem [shape: f32[128,64], index: 2, kind: input, shape index: {}]   ;;  %s2004_s3 = inlined_call_operand.vmem [shape: f32[128,64], index: 3, kind: input, shape index: {}]   ;;  %s2005_s4 = inlined_call_operand.vmem [shape: f32[128,1], index: 4, kind: input, shape index: {}]   ;;  %s2006_s5 = inlined_call_operand.vmem [shape: f32[64,64], index: 5, kind: input, shape index: {}]   ;;  %s2007_s6 = inlined_call_operand.vmem [shape: f32[1,64], index: 6, kind: input, shape index: {}]   ;;  %s2008_s7 = inlined_call_operand.vmem [shape: f32[1,64], index: 7, kind: input, shape index: {}]   ;;  %s2009_s8 = inlined_call_operand.vmem [shape: f32[1,64], index: 8, kind: input, shape index: {}]   ;;  %s2010_s9 = inlined_call_operand.vmem [shape: f32[128,128], index: 9, kind: output, shape index: {0}]   ;;  %s2011_s10 = inlined_call_operand.hbm [shape: f32[128,64], index: 10, kind: output, shape index: {1}]  }
   0x1   :  { %18 = vsyncpa [#allocation3 + $0x1], 0  ;;  %s1556_s13 = smov 0   ;;  %s1558_s14 = smov 0  }
   0x2   :  { %s1560_s15 = smov 0   ;;  %s1562_s16 = smov 0  }
   0x3 LB: > { %s1577_s17 = sadd.s32 4294967295, %s1494_s16   ;;  %s1189_s18 = sadd.s32 4294967294, %s1494_s16   ;;  %s1494_s16 = sphi %s1562_s16, %s2017_s16   ;;  %s1490_s15 = sphi %s1560_s15, %s2016_s15   ;;  %s1486_s14 = sphi %s1558_s14, %s2015_s14   ;;  %s1482_s13 = sphi %s1556_s13, %s2014_s13  }
   0x4   : > { %s1581_s19 = sadd.s32 1, %s1494_s16   ;;  %s271_s20 = sadd.s32 1, %s1490_s15 }
   0x5   : > { %s268_s21 = ssub.s32 %s1494_s16, %s1581_s19  ;;  %p281_p0 = scmp.ne.s32.totalorder %s1490_s15, %s1486_s14 }
   0x6   : > { %p269_p1 = scmp.eq.s32.totalorder %s268_s21, 0  ;;  %p282_p2 = scmp.eq.s32.totalorder %s1577_s17, 1 }
   0x7   : > { %p287_p3 = scmp.ne.s32.totalorder %s1486_s14, %s1482_s13  ;;  %p288_p4 = scmp.eq.s32.totalorder %s1189_s18, 1 }
   0x8   : > { %s1592_s22 = scalar_select %p269_p1, %s1490_s15, %s271_s20  }
   0x9   : > { %p1594_p5 = por %p282_p2, %p281_p0  ;;  %p1598_p6 = por %p288_p4, %p287_p3 }
   0xa   : > { %p1192_p7 = scmp.ge.s32.totalorder %s1494_s16, 1  ;;  %p363_p8 = scmp.lt.s32.totalorder %s1494_s16, 3 }
   0xc   : > { %p364_p9 = pnand %p1192_p7, %p363_p8 }
   0xd   : > { %v471_v0 = vld [vmem:[%s2006_s5] sm:$0xff] (!%p364_p9)  ;;  %v472_v1 = vld [vmem:[%s2006_s5 + $0x8] sm:$0xff] (!%p364_p9)  ;;  %v473_v2 = vld [vmem:[%s2006_s5 + $0x10] sm:$0xff] (!%p364_p9)  ;;  %s1194_s11 = sshll.u32 (!%p364_p9), %s1577_s17, 3  ;;  %vm486_vm0 = vcmask (!%p364_p9), 523264   ;;  %v1496_v20 = vmov (!%p364_p9), 0  }
   0xe   : > { %367 = sbr.rel (%p364_p9) target bundleno = 624 (0x270), region = 56  ;;  %v1283_v3 = vpack.c.bf16 (!%p364_p9), %v472_v1, %v471_v0  ;;  %v474_v4 = vld [vmem:[%s2006_s5 + $0x18] sm:$0xff] (!%p364_p9)  ;;  %p427_p10 = scmp.lt.s32.totalorder (!%p364_p9), %s1194_s11, 15  ;;  %v475_v6 = vld [vmem:[%s2006_s5 + $0x20] sm:$0xff] (!%p364_p9)  ;;  %v476_v7 = vld [vmem:[%s2006_s5 + $0x28] sm:$0xff] (!%p364_p9)  ;;  %1351 = vset.pattern.permute.xlu1 (!%p364_p9), %v1496_v20  ;;  %1350 = vset.pattern.permute.xlu0 (!%p364_p9), %v1496_v20 }
   0xf   : > { %v1287_v5 = vpack.c.bf16 (!%p364_p9), %v474_v4, %v473_v2  ;;  %v1291_v8 = vpack.c.bf16 (!%p364_p9), %v476_v7, %v475_v6  ;;  %v477_v9 = vld [vmem:[%s2006_s5 + $0x30] sm:$0xff] (!%p364_p9)  ;;  %v478_v10 = vld [vmem:[%s2006_s5 + $0x38] sm:$0xff] (!%p364_p9)  ;;  %v1206_v25 = vld [vmem:[%s2007_s6] ss:$0 sm:$0xff] (!%p364_p9)  ;;  %s1497_s25 = smov (!%p364_p9), 64  }
  0x10   : > { %1284 = vmatprep.subr.bf16.mxu0 (!%p364_p9), %v1283_v3  ;;  %1299 = vmatprep.subr.bf16.mxu1 (!%p364_p9), %v1283_v3  ;;  %v1295_v13 = vpack.c.bf16 (!%p364_p9), %v478_v10, %v477_v9 }
  0x11   : > { %1286 = vmatpush3.bf16.msra.mxu0 (!%p364_p9), %v1283_v3  ;;  %1303 = vmatpush3.bf16.msra.mxu1 (!%p364_p9), %v1283_v3 }
  0x12   : > { %1288 = vmatprep.subr.bf16.mxu0 (!%p364_p9), %v1287_v5  ;;  %1300 = vmatprep.subr.bf16.mxu1 (!%p364_p9), %v1287_v5 }
  0x15   : > { %s2019_s11 = smov (!%p427_p10, %s1194_s11), 15  ;;  %1290 = vmatpush3.bf16.msra.mxu0 %v1287_v5  ;;  %1304 = vmatpush3.bf16.msra.mxu1 %v1287_v5 }
  0x16   : > { %s1623_s27 = sshll.u32 %s2019_s11, 3  ;;  %1292 = vmatprep.subr.bf16.mxu0 %v1291_v8  ;;  %1301 = vmatprep.subr.bf16.mxu1 %v1291_v8 }
  0x17   : > { %s442_s21 = scalar_lea.vmem %s2003_s2, %s1623_s27  ;;  %s1671_s26 = scalar_lea.vmem %s2001_s0, %s1623_s27 }
  0x18   : > { %v1635_v11 = vld [vmem:[%s442_s21] sm:$0xff]  ;;  %v1643_v14 = vld [vmem:[%s442_s21 + $0x8] sm:$0xff]  ;;  %v1647_v16 = vld [vmem:[%s442_s21 + $0x10] sm:$0xff]  ;;  %s1677_s30 = scalar_lea.vmem %s2002_s1, %s1623_s27  ;;  %s454_s11 = scalar_lea.vmem %s2005_s4, %s1623_s27 }
  0x19   : > { %v1637_v12 = vld [vmem:[%s442_s21 + $0x20] sm:$0xff]  ;;  %1271 = vmatprep.mubr.msk.f32.mxu0 %vm486_vm0, %v1635_v11  ;;  %1294 = vmatpush3.bf16.msra.mxu0 %v1291_v8  ;;  %v1645_v15 = vld [vmem:[%s442_s21 + $0x28] sm:$0xff]  ;;  %v1649_v17 = vld [vmem:[%s442_s21 + $0x30] sm:$0xff]  ;;  %s1818_s29 = scalar_lea.vmem %s2004_s3, %s1623_s27 }
  0x1a   : > { %1277 = vmatprep.mubr.msk.f32.mxu1 %vm486_vm0, %v1637_v12  ;;  %1305 = vmatpush3.bf16.msra.mxu1 %v1291_v8  ;;  %v1657_v18 = vld [vmem:[%s442_s21 + $0x18] sm:$0xff]  ;;  %v617_v21 = vld [vmem:[%s1671_s26 + $0x8] sm:$0xff]  ;;  %v616_v28 = vld [vmem:[%s1671_s26] sm:$0xff] }
  0x1b   : > { %1296 = vmatprep.subr.bf16.mxu0 %v1295_v13  ;;  %1302 = vmatprep.subr.bf16.mxu1 %v1295_v13  ;;  %v1661_v19 = vld [vmem:[%s442_s21 + $0x38] sm:$0xff]  ;;  %v625_v22 = vld [vmem:[%s1677_s30 + $0x8] sm:$0xff]  ;;  %v624_v29 = vld [vmem:[%s1677_s30] sm:$0xff]  ;;  %s1832_s21 = scalar_lea.vmem %s2010_s9, %s1623_s27  ;;  %s423_s27 = sand.u32 1, %s1486_s14  }
  0x1c   : > { %v621_v23 = vld [vmem:[%s1671_s26 + $0x28] sm:$0xff]  ;;  %v633_v26 = vadd.f32 %v625_v22, %v617_v21  ;;  %v619_v32 = vld [vmem:[%s1671_s26 + $0x18] sm:$0xff]  ;;  %v620_v38 = vld [vmem:[%s1671_s26 + $0x20] sm:$0xff]  ;;  %v632_v41 = vadd.f32 %v624_v29, %v616_v28 }
  0x1d   : > { %1298 = vmatpush3.bf16.msra.mxu0 %v1295_v13  ;;  %v629_v24 = vld [vmem:[%s1677_s30 + $0x28] sm:$0xff]  ;;  %v627_v33 = vld [vmem:[%s1677_s30 + $0x18] sm:$0xff]  ;;  %v628_v39 = vld [vmem:[%s1677_s30 + $0x20] sm:$0xff] }
  0x1e   : > { %1306 = vmatpush3.bf16.msra.mxu1 %v1295_v13  ;;  %v637_v27 = vadd.f32 %v629_v24, %v621_v23  ;;  %v623_v42 = vld [vmem:[%s1671_s26 + $0x38] sm:$0xff]  ;;  %v635_v46 = vadd.f32 %v627_v33, %v619_v32  ;;  %v636_v47 = vadd.f32 %v628_v39, %v620_v38  ;;  %v618_v53 = vld [vmem:[%s1671_s26 + $0x10] sm:$0xff]  ;;  %v697_v22 = vld [vmem:[%s454_s11 + $0x8] sm:$0xff] }
  0x1f   : > { %v631_v43 = vld [vmem:[%s1677_s30 + $0x38] sm:$0xff]  ;;  %v626_v57 = vld [vmem:[%s1677_s30 + $0x10] sm:$0xff]  ;;  %v696_v24 = vld [vmem:[%s454_s11] sm:$0xff] }
  0x20   : > { %1272 = vmatmul.mubr.msk.f32.vlgmr.msra.gmra.mrb[0].mxu0 %vm486_vm0, %v1643_v14  ;;  %v639_v55 = vadd.f32 %v631_v43, %v623_v42  ;;  %v622_v60 = vld [vmem:[%s1671_s26 + $0x30] sm:$0xff]  ;;  %v634_v1 = vadd.f32 %v626_v57, %v618_v53  ;;  %v703_v29 = vld [vmem:[%s454_s11 + $0x38] sm:$0xff]  ;;  %s1193_s26 = sshll.u32 %s423_s27, 6 }
  0x21   : > { %1278 = vmatmul.mubr.msk.f32.vlgmr.msra.gmra.mrb[0].mxu1 %vm486_vm0, %v1645_v15  ;;  %1274 = vmatprep.mubr.msk.f32.mxu0 %vm486_vm0, %v1647_v16  ;;  %v630_v61 = vld [vmem:[%s1677_s30 + $0x30] sm:$0xff]  ;;  %s1920_s28 = scalar_lea.vmem [#allocation2], %s1193_s26 }
  0x22   : > { %1280 = vmatprep.mubr.msk.f32.mxu1 %vm486_vm0, %v1649_v17  ;;  %v638_v3 = vadd.f32 %v630_v61, %v622_v60  ;;  %v698_v23 = vld [vmem:[%s454_s11 + $0x10] sm:$0xff]  ;;  %s1054_s30 = sshll.u32 %s1920_s28, 4  ;;  %s1949_s30 = int_to_ptr.vmem [resolvable:$true] %s1054_s30 }
  0x23   : > { %v702_v28 = vld [vmem:[%s454_s11 + $0x30] sm:$0xff] }
  0x24   : > { %1275 = vmatmul.mubr.msk.f32.gmra.mrb[2].mxu0 %vm486_vm0, %v1657_v18 }
  0x25   : > { %1281 = vmatmul.mubr.msk.f32.gmra.mrb[2].mxu1 %vm486_vm0, %v1661_v19 }
  0xf3   : > { %v1273_v30 = vpop.f32.mrb[0].mxu0 }
  0xf4   : > { %v1279_v31 = vpop.f32.mrb[0].mxu1  ;;  %v583_v34 = vadd.f32 %v1273_v30, %v1206_v25  ;;  %v577_v36 = vpop.f32.mrb[1].mxu0 }
  0xf5   : > { %v603_v35 = vadd.f32 %v1279_v31, %v1206_v25  ;;  %v597_v37 = vpop.f32.mrb[1].mxu1  ;;  %v578_v40 = vadd.f32 %v1206_v25, %v577_v36 }
  0xf6   : > { %v1694_v44 = vadd.f32 %v633_v26, %v583_v34  ;;  %v598_v50 = vadd.f32 %v1206_v25, %v597_v37  ;;  %v700_v26 = vld [vmem:[%s454_s11 + $0x20] sm:$0xff] }
  0xf7   : > { %v1696_v45 = vadd.f32 %v637_v27, %v603_v35  ;;  %v1276_v48 = vpop.f32.mrb[2].mxu0  ;;  %v1701_v56 = vadd.f32 %v632_v41, %v578_v40  ;;  %v701_v27 = vld [vmem:[%s454_s11 + $0x28] sm:$0xff] }
  0xf8   : > { %v1282_v49 = vpop.f32.mrb[2].mxu1  ;;  %v593_v51 = vadd.f32 %v1276_v48, %v1206_v25  ;;  %v587_v52 = vpop.f32.mrb[3].mxu0  ;;  %v829_v58 = vsel %vm486_vm0, %v1694_v44, 0.0  ;;  %v1710_v0 = vadd.f32 %v636_v47, %v598_v50  ;;  %v1216_v34 = vmul.f32 -1.442695, %v1694_v44 }
  0xf9   : > { %v841_v54 = vsel %vm486_vm0, %v1696_v45, 0.0  ;;  %v607_v59 = vpop.f32.mrb[3].mxu1  ;;  %830 = vadd.xlane.f32.xlu0 %v829_v58  ;;  %v613_v63 = vadd.f32 %v1282_v49, %v1206_v25  ;;  %v588_v4 = vadd.f32 %v1206_v25, %v587_v52  ;;  %v826_v7 = vsel %vm486_vm0, %v1701_v56, 0.0 }
  0xfa   : > { %842 = vadd.xlane.f32.xlu1 %v841_v54  ;;  %v1708_v62 = vadd.f32 %v635_v46, %v593_v51  ;;  %v608_v5 = vadd.f32 %v1206_v25, %v607_v59  ;;  %v838_v13 = vsel %vm486_vm0, %v1710_v0, 0.0  ;;  %v699_v25 = vld [vmem:[%s454_s11 + $0x18] sm:$0xff]  ;;  %1352 = vpow2.f32 %v1216_v34  ;;  %s1498_s11 = smov [#allocation2]  }
  0xfb   : > { %v1712_v2 = vadd.f32 %v639_v55, %v613_v63  ;;  %v1720_v9 = vadd.f32 %v634_v1, %v588_v4  ;;  %v1219_v54 = vmul.f32 -1.442695, %v1710_v0  ;;  %v1215_v60 = vmul.f32 -1.442695, %v1701_v56 }
  0xfc   : > { %v835_v6 = vsel %vm486_vm0, %v1708_v62, 0.0  ;;  %v1722_v10 = vadd.f32 %v638_v3, %v608_v5 }
  0xfd   : > { %827 = vadd.xlane.f32.xlu0 %v826_v7  ;;  %v847_v8 = vsel %vm486_vm0, %v1712_v2, 0.0  ;;  %v832_v20 = vsel %vm486_vm0, %v1720_v9, 0.0  ;;  %v1217_v46 = vmul.f32 -1.442695, %v1720_v9 }
  0xfe   : > { %836 = vadd.xlane.f32.xlu1 %v835_v6  ;;  %v844_v21 = vsel %vm486_vm0, %v1722_v10, 0.0  ;;  %v1221_v5 = vmul.f32 -1.442695, %v1722_v10 }
  0xff   : > { %1354 = vpow2.f32 %v1217_v46 }
 0x100   : > { %1356 = vpow2.f32 %v1219_v54 }
 0x101   : > { %839 = vadd.xlane.f32.xlu0 %v838_v13  ;;  %1358 = vpow2.f32 %v1215_v60 }
 0x102   : > { %848 = vadd.xlane.f32.xlu1 %v847_v8  ;;  %1360 = vpow2.f32 %v1221_v5 }
 0x104   : > { %v1353_v13 = vpop.eup %1352 }
 0x105   : > { %845 = vadd.xlane.f32.xlu0 %v844_v21 }
 0x106   : > { %833 = vadd.xlane.f32.xlu1 %v832_v20  ;;  %v1218_v20 = vmul.f32 -1.442695, %v1708_v62 }
 0x108   : > { %1362 = vpow2.f32 %v1218_v20 }
 0x117   : > { %711 = vperm.xlu1 %1351, %v697_v22  }
 0x11b   : > { %716 = vperm.xlu1 %1351, %v698_v23   ;;  %706 = vperm.xlu0 %1350, %v696_v24  }
 0x11f   : > { %721 = vperm.xlu1 %1351, %v699_v25   ;;  %v673_v25 = vadd.f32 1.0, %v1353_v13 }
 0x123   : > { %726 = vperm.xlu1 %1351, %v700_v26  }
 0x127   : > { %731 = vperm.xlu1 %1351, %v701_v27   ;;  %v1222_v27 = vmul.f32 -1.442695, %v1712_v2 }
 0x12b   : > { %736 = vperm.xlu1 %1351, %v702_v28  }
 0x12f   : > { %741 = vperm.xlu1 %1351, %v703_v29  }
 0x186   : > { %v831_v32 = vpop.xlane.xlu0 %830 }
 0x187   : > { %v843_v30 = vpop.xlane.xlu1 %842  ;;  %v852_v33 = vmul.f32 0.015625, %v831_v32 }
 0x188   : > { %v856_v31 = vmul.f32 0.015625, %v843_v30 }
 0x189   : > { %v1739_v36 = vsub.f32 %v1694_v44, %v852_v33 }
 0x18a   : > { %v1736_v35 = vsub.f32 %v1696_v45, %v856_v31  ;;  %v828_v38 = vpop.xlane.xlu0 %827 }
 0x18b   : > { %v837_v37 = vpop.xlane.xlu1 %836  ;;  %v851_v41 = vmul.f32 0.015625, %v828_v38  ;;  %v868_v42 = vmul.f32 %v1739_v36, %v1739_v36 }
 0x18c   : > { %v872_v39 = vmul.f32 %v1736_v35, %v1736_v35  ;;  %v854_v40 = vmul.f32 0.015625, %v837_v37 }
 0x18d   : > { %v1751_v44 = vsub.f32 %v1701_v56, %v851_v41  ;;  %v878_v48 = vsel %vm486_vm0, %v868_v42, 0.0 }
 0x18e   : > { %v890_v43 = vsel %vm486_vm0, %v872_v39, 0.0  ;;  %v1748_v47 = vsub.f32 %v1708_v62, %v854_v40  ;;  %879 = vadd.xlane.f32.xlu0 %v878_v48  ;;  %v840_v50 = vpop.xlane.xlu0 %839  ;;  %v1355_v62 = vpop.eup %1354 }
 0x18f   : > { %891 = vadd.xlane.f32.xlu1 %v890_v43  ;;  %v849_v49 = vpop.xlane.xlu1 %848  ;;  %v855_v52 = vmul.f32 0.015625, %v840_v50  ;;  %v867_v53 = vmul.f32 %v1751_v44, %v1751_v44  ;;  %v674_v29 = vadd.f32 1.0, %v1355_v62 }
 0x190   : > { %v858_v51 = vmul.f32 0.015625, %v849_v49  ;;  %v870_v55 = vmul.f32 %v1748_v47, %v1748_v47 }
 0x191   : > { %v1763_v58 = vsub.f32 %v1710_v0, %v855_v52  ;;  %v875_v59 = vsel %vm486_vm0, %v867_v53, 0.0 }
 0x192   : > { %v1760_v57 = vsub.f32 %v1712_v2, %v858_v51  ;;  %v846_v63 = vpop.xlane.xlu0 %845  ;;  %v884_v6 = vsel %vm486_vm0, %v870_v55, 0.0 }
 0x193   : > { %v834_v61 = vpop.xlane.xlu1 %833  ;;  %876 = vadd.xlane.f32.xlu1 %v875_v59  ;;  %v857_v3 = vmul.f32 0.015625, %v846_v63  ;;  %v871_v4 = vmul.f32 %v1763_v58, %v1763_v58 }
 0x194   : > { %v853_v1 = vmul.f32 0.015625, %v834_v61  ;;  %v874_v8 = vmul.f32 %v1760_v57, %v1760_v57 }
 0x195   : > { %v1775_v7 = vsub.f32 %v1722_v10, %v857_v3  ;;  %v887_v56 = vsel %vm486_vm0, %v871_v4, 0.0 }
 0x196   : > { %v1772_v0 = vsub.f32 %v1720_v9, %v853_v1  ;;  %888 = vadd.xlane.f32.xlu0 %v887_v56  ;;  %v1220_v9 = vmul.f32 -1.442695, %v1696_v45  ;;  %v896_v10 = vsel %vm486_vm0, %v874_v8, 0.0  ;;  %v1357_v45 = vpop.eup %1356 }
 0x197   : > { %v712_v21 = vpop.permute.xlu1 %711  ;;  %885 = vadd.xlane.f32.xlu1 %v884_v6  ;;  %v873_v24 = vmul.f32 %v1775_v7, %v1775_v7  ;;  %v1359_v30 = vpop.eup %1358  ;;  %v676_v32 = vadd.f32 1.0, %v1357_v45 }
 0x198   : > { %v869_v22 = vmul.f32 %v1772_v0, %v1772_v0  ;;  %1364 = vpow2.f32 %v1220_v9  ;;  %v1361_v33 = vpop.eup %1360  ;;  %v672_v34 = vadd.f32 1.0, %v1359_v30  ;;  %v753_v30 = vld [vmem:[%s1818_s29 + $0x8] sm:$0xff] }
 0x199   : > { %v893_v28 = vsel %vm486_vm0, %v873_v24, 0.0  ;;  %1366 = vrcp.f32 %v673_v25  ;;  %v1363_v37 = vpop.eup %1362  ;;  %v678_v38 = vadd.f32 1.0, %v1361_v33 }
 0x19a   : > { %v881_v23 = vsel %vm486_vm0, %v869_v22, 0.0  ;;  %1368 = vpow2.f32 %v1222_v27  ;;  %v675_v2 = vadd.f32 1.0, %v1363_v37  ;;  %v707_v52 = vpop.permute.xlu0 %706 }
 0x19b   : > { %v717_v26 = vpop.permute.xlu1 %716  ;;  %897 = vadd.xlane.f32.xlu1 %v896_v10  ;;  %882 = vadd.xlane.f32.xlu0 %v881_v23  ;;  %1370 = vrcp.f32 %v674_v29 }
 0x19c   : > { %1372 = vrcp.f32 %v676_v32 }
 0x19d   : > { %1374 = vrcp.f32 %v672_v34 }
 0x19e   : > { %1376 = vrcp.f32 %v678_v38  ;;  %v1824_v38 = vld [vmem:[%s2008_s7] ss:$0 sm:$0xff] }
 0x19f   : > { %894 = vadd.xlane.f32.xlu0 %v893_v28  ;;  %v722_v31 = vpop.permute.xlu1 %721  ;;  %1378 = vrcp.f32 %v675_v2 }
 0x1a2   : > { %v1365_v40 = vpop.eup %1364 }
 0x1a3   : > { %v727_v39 = vpop.permute.xlu1 %726  ;;  %v1367_v41 = vpop.eup %1366  ;;  %v677_v46 = vadd.f32 1.0, %v1365_v40 }
 0x1a4   : > { %v1790_v42 = vmul.f32 %v1367_v41, %v712_v21  ;;  %v1369_v43 = vpop.eup %1368 }
 0x1a5   : > { %v1371_v48 = vpop.eup %1370  ;;  %1380 = vrcp.f32 %v677_v46  ;;  %v679_v51 = vadd.f32 1.0, %v1369_v43  ;;  %v754_v46 = vld [vmem:[%s1818_s29 + $0x10] sm:$0xff] }
 0x1a6   : > { %v1793_v50 = vmul.f32 %v1371_v48, %v717_v26  ;;  %v1373_v53 = vpop.eup %1372  ;;  %v761_v40 = vmul.f32 %v753_v30, %v1790_v42  ;;  %v752_v48 = vld [vmem:[%s1818_s29] sm:$0xff] }
 0x1a7   : > { %v732_v49 = vpop.permute.xlu1 %731  ;;  %v1375_v54 = vpop.eup %1374  ;;  %v1796_v55 = vmul.f32 %v1373_v53, %v727_v39  ;;  %1382 = vrcp.f32 %v679_v51 }
 0x1a8   : > { %v1798_v59 = vmul.f32 %v1375_v54, %v707_v52  ;;  %v1377_v61 = vpop.eup %1376 }
 0x1a9   : > { %v1379_v63 = vpop.eup %1378 }
 0x1aa   : > { %v1804_v3 = vmul.f32 %v1379_v63, %v722_v31  ;;  %v762_v63 = vmul.f32 %v754_v46, %v1793_v50 }
 0x1ab   : > { %v737_v60 = vpop.permute.xlu1 %736 }
 0x1ac   : > { %778 = vrot.lane.b32.xlu1 %v1790_v42, %s1497_s25  ;;  %v1802_v1 = vmul.f32 %v1377_v61, %v737_v60 }
 0x1af   : > { %v1381_v4 = vpop.eup %1380  ;;  %v742_v6 = vpop.permute.xlu1 %741 }
 0x1b0   : > { %780 = vrot.lane.b32.xlu1 %v1793_v50, %s1497_s25  ;;  %v1808_v5 = vmul.f32 %v1381_v4, %v732_v49  ;;  %v1839_v49 = vld [vmem:[%s2009_s8] ss:$0 sm:$0xff]  ;;  %v760_v4 = vmul.f32 %v752_v48, %v1798_v59 }
 0x1b1   : > { %v1383_v56 = vpop.eup %1382 }
 0x1b2   : > { %v1811_v8 = vmul.f32 %v1383_v56, %v742_v6  ;;  %v755_v56 = vld [vmem:[%s1818_s29 + $0x18] sm:$0xff] }
 0x1b4   : > { %784 = vrot.lane.b32.xlu1 %v1796_v55, %s1497_s25 }
 0x1b5   : > { %776 = vrot.lane.b32.xlu0 %v1798_v59, %s1497_s25 }
 0x1b8   : > { %788 = vrot.lane.b32.xlu1 %v1802_v1, %s1497_s25 }
 0x1b9   : > { %782 = vrot.lane.b32.xlu0 %v1804_v3, %s1497_s25 }
 0x1bd   : > { %786 = vrot.lane.b32.xlu0 %v1808_v5, %s1497_s25 }
 0x1c1   : > { %790 = vrot.lane.b32.xlu0 %v1811_v8, %s1497_s25  ;;  %s1436_s25 = sshll.u32 %s1498_s11, 4  ;;  %s1437_s25 = int_to_ptr.vmem [resolvable:$false] %s1436_s25 }
 0x1c2   : > { %s1438_s26 = scalar_lea.vmem %s1437_s25, 2048  ;;  %p1439_p0 = scmp.lt.s32.totalorder %s1949_s30, %s1437_s25 }
 0x21b   : > { %v880_v21 = vpop.xlane.xlu0 %879 }
 0x21c   : > { %v892_v13 = vpop.xlane.xlu1 %891  ;;  %v900_v22 = vmul.f32 0.015625, %v880_v21 }
 0x21d   : > { %v904_v20 = vmul.f32 0.015625, %v892_v13  ;;  %v756_v13 = vld [vmem:[%s1818_s29 + $0x20] sm:$0xff] }
 0x21e   : > { %v908_v10 = vadd.f32 1e-05, %v900_v22 }
 0x21f   : > { %v912_v9 = vadd.f32 1e-05, %v904_v20 }
 0x220   : > { %v877_v23 = vpop.xlane.xlu1 %876 }
 0x221   : > { %1384 = vrsqrt.f32 %v912_v9  ;;  %v899_v24 = vmul.f32 0.015625, %v877_v23 }
 0x222   : > { %1386 = vrsqrt.f32 %v908_v10 }
 0x223   : > { %v907_v25 = vadd.f32 1e-05, %v899_v24  ;;  %v889_v62 = vpop.xlane.xlu0 %888 }
 0x224   : > { %v886_v26 = vpop.xlane.xlu1 %885  ;;  %v903_v28 = vmul.f32 0.015625, %v889_v62 }
 0x225   : > { %1388 = vrsqrt.f32 %v907_v25  ;;  %v902_v27 = vmul.f32 0.015625, %v886_v26  ;;  %v764_v26 = vmul.f32 %v756_v13, %v1796_v55 }
 0x226   : > { %v911_v29 = vadd.f32 1e-05, %v903_v28  ;;  %v758_v28 = vld [vmem:[%s1818_s29 + $0x30] sm:$0xff] }
 0x227   : > { %v910_v45 = vadd.f32 1e-05, %v902_v27  ;;  %v757_v27 = vld [vmem:[%s1818_s29 + $0x28] sm:$0xff] }
 0x228   : > { %v898_v31 = vpop.xlane.xlu1 %897  ;;  %v883_v32 = vpop.xlane.xlu0 %882 }
 0x229   : > { %1390 = vrsqrt.f32 %v910_v45  ;;  %v906_v33 = vmul.f32 0.015625, %v898_v31  ;;  %v901_v34 = vmul.f32 0.015625, %v883_v32 }
 0x22a   : > { %1392 = vrsqrt.f32 %v911_v29 }
 0x22b   : > { %v1385_v37 = vpop.eup %1384  ;;  %v914_v41 = vadd.f32 1e-05, %v906_v33  ;;  %v909_v43 = vadd.f32 1e-05, %v901_v34 }
 0x22c   : > { %v1387_v39 = vpop.eup %1386  ;;  %v928_v2 = vmul.f32 %v1385_v37, %v1736_v35  ;;  %v779_v35 = vpop.permute.xlu1 %778 }
 0x22d   : > { %v924_v42 = vmul.f32 %v1387_v39, %v1739_v36  ;;  %v895_v51 = vpop.xlane.xlu0 %894  ;;  %1394 = vrsqrt.f32 %v914_v41  ;;  %v801_v53 = vsel %vm486_vm0, %v761_v40, %v779_v35  ;;  %v765_v39 = vmul.f32 %v757_v27, %v1808_v5 }
 0x22e   : > { %v942_v52 = vmul.f32 %v1824_v38, %v928_v2  ;;  %v905_v54 = vmul.f32 0.015625, %v895_v51  ;;  %1396 = vrsqrt.f32 %v909_v43  ;;  %809 = vst [vmem:[%s1832_s21 + $0x8] sm:$0xff] %v801_v53  ;;  %v759_v2 = vld [vmem:[%s1818_s29 + $0x38] sm:$0xff]  ;;  %s1238_s29 = sshll.u32 %s1577_s17, 10  ;;  %s1960_s17 = scalar_lea.sflag [#allocation3], %s423_s27 }
 0x22f   : > { %v938_v60 = vmul.f32 %v1824_v38, %v924_v42  ;;  %v1389_v61 = vpop.eup %1388  ;;  %s1947_s20 = scalar_lea.hbm %s2011_s10, %s1238_s29 }
 0x230   : > { %v1849_v36 = vadd.f32 %v1839_v49, %v942_v52  ;;  %v913_v6 = vadd.f32 1e-05, %v905_v54  ;;  %v923_v21 = vmul.f32 %v1389_v61, %v1751_v44  ;;  %v781_v22 = vpop.permute.xlu1 %780  ;;  %v763_v44 = vmul.f32 %v755_v56, %v1804_v3 }
 0x231   : > { %v1854_v20 = vadd.f32 %v1839_v49, %v938_v60  ;;  %v777_v9 = vpop.permute.xlu0 %776  ;;  %v802_v59 = vsel %vm486_vm0, %v762_v63, %v781_v22 }
 0x232   : > { %v1230_v50 = vmul.f32 -1.442695, %v1849_v36  ;;  %1398 = vrsqrt.f32 %v913_v6  ;;  %v800_v10 = vsel %vm486_vm0, %v760_v4, %v777_v9  ;;  %v937_v24 = vmul.f32 %v1824_v38, %v923_v21  ;;  %810 = vst [vmem:[%s1832_s21 + $0x10] sm:$0xff] %v802_v59 }
 0x233   : > { %v1226_v23 = vmul.f32 -1.442695, %v1854_v20  ;;  %808 = vst [vmem:[%s1832_s21] sm:$0xff] %v800_v10  ;;  %v1391_v25 = vpop.eup %1390 }
 0x234   : > { %1400 = vpow2.f32 %v1230_v50  ;;  %v1393_v62 = vpop.eup %1392  ;;  %v1869_v45 = vadd.f32 %v1839_v49, %v937_v24  ;;  %v926_v29 = vmul.f32 %v1391_v25, %v1748_v47  ;;  %v785_v30 = vpop.permute.xlu1 %784  ;;  %v766_v47 = vmul.f32 %v758_v28, %v1802_v1 }
 0x235   : > { %1402 = vpow2.f32 %v1226_v23  ;;  %v783_v31 = vpop.permute.xlu0 %782  ;;  %v927_v32 = vmul.f32 %v1393_v62, %v1763_v58  ;;  %v804_v3 = vsel %vm486_vm0, %v764_v26, %v785_v30 }
 0x236   : > { %v803_v55 = vsel %vm486_vm0, %v763_v44, %v783_v31  ;;  %v1225_v33 = vmul.f32 -1.442695, %v1869_v45  ;;  %v940_v34 = vmul.f32 %v1824_v38, %v926_v29  ;;  %812 = vst [vmem:[%s1832_s21 + $0x20] sm:$0xff] %v804_v3 }
 0x237   : > { %811 = vst [vmem:[%s1832_s21 + $0x18] sm:$0xff] %v803_v55  ;;  %v1395_v37 = vpop.eup %1394  ;;  %v941_v40 = vmul.f32 %v1824_v38, %v927_v32 }
 0x238   : > { %v1397_v58 = vpop.eup %1396  ;;  %1404 = vpow2.f32 %v1225_v33  ;;  %v1884_v41 = vadd.f32 %v1839_v49, %v940_v34  ;;  %v930_v43 = vmul.f32 %v1395_v37, %v1760_v57  ;;  %v789_v46 = vpop.permute.xlu1 %788  ;;  %v767_v57 = vmul.f32 %v759_v2, %v1811_v8 }
 0x239   : > { %v787_v48 = vpop.permute.xlu0 %786  ;;  %v1888_v42 = vadd.f32 %v1839_v49, %v941_v40  ;;  %v925_v5 = vmul.f32 %v1397_v58, %v1772_v0  ;;  %v806_v1 = vsel %vm486_vm0, %v766_v47, %v789_v46 }
 0x23a   : > { %v805_v35 = vsel %vm486_vm0, %v765_v39, %v787_v48  ;;  %v1228_v51 = vmul.f32 -1.442695, %v1884_v41  ;;  %v944_v52 = vmul.f32 %v1824_v38, %v930_v43  ;;  %814 = vst [vmem:[%s1832_s21 + $0x30] sm:$0xff] %v806_v1 }
 0x23b   : > { %813 = vst [vmem:[%s1832_s21 + $0x28] sm:$0xff] %v805_v35  ;;  %v1229_v54 = vmul.f32 -1.442695, %v1888_v42  ;;  %v939_v60 = vmul.f32 %v1824_v38, %v925_v5 }
 0x23c   : > { %v1399_v53 = vpop.eup %1398  ;;  %1406 = vpow2.f32 %v1228_v51  ;;  %v1901_v0 = vadd.f32 %v1839_v49, %v944_v52 }
 0x23d   : > { %v929_v61 = vmul.f32 %v1399_v53, %v1775_v7  ;;  %v791_v63 = vpop.permute.xlu0 %790  ;;  %1408 = vpow2.f32 %v1229_v54  ;;  %v1905_v6 = vadd.f32 %v1839_v49, %v939_v60 }
 0x23e   : > { %v1401_v4 = vpop.eup %1400  ;;  %v807_v56 = vsel %vm486_vm0, %v767_v57, %v791_v63  ;;  %v1232_v21 = vmul.f32 -1.442695, %v1901_v0 }
 0x23f   : > { %v1403_v13 = vpop.eup %1402  ;;  %v988_v8 = vadd.f32 1.0, %v1401_v4  ;;  %v943_v22 = vmul.f32 %v1824_v38, %v929_v61  ;;  %815 = vst [vmem:[%s1832_s21 + $0x38] sm:$0xff] %v807_v56  ;;  %v1227_v50 = vmul.f32 -1.442695, %v1905_v6  ;;  %s1432_s21 = scalar_lea.vmem %s1949_s30, 1024 }
 0x240   : > { %v984_v9 = vadd.f32 1.0, %v1403_v13  ;;  %p1433_p11 = scmp.ne.s32.totalorder %s1949_s30, %s1432_s21  ;;  %p1440_p1 = scmp.lt.s32.totalorder %s1438_s26, %s1432_s21 }
 0x241   : > { %1410 = vrcp.f32 %v988_v8  ;;  %v957_v7 = vadd.f32 %v1839_v49, %v943_v22 }
 0x242   : > { %1412 = vrcp.f32 %v984_v9  ;;  %v1405_v59 = vpop.eup %1404  ;;  %p1434_p12 = pnand %p1433_p11, %p1594_p5  ;;  %p1441_p2 = por %p1440_p1, %p1439_p0 }
 0x243   : > { %1414 = vpow2.f32 %v1232_v21  ;;  %v1231_v10 = vmul.f32 -1.442695, %v957_v7  ;;  %v983_v23 = vadd.f32 1.0, %v1405_v59 }
 0x244   : > { %1416 = vpow2.f32 %v1227_v50  ;;  %p1435_p13 = pneg %p1434_p12 }
 0x245   : > { %1418 = vpow2.f32 %v1231_v10 }
 0x246   : > { %1420 = vrcp.f32 %v983_v23  ;;  %v1407_v24 = vpop.eup %1406  ;;  %p1442_p3 = pnand %p1441_p2, %p1435_p13 }
 0x247   : > { %v1409_v25 = vpop.eup %1408  ;;  %v986_v38 = vadd.f32 1.0, %v1407_v24 }
 0x248   : > { %v987_v44 = vadd.f32 1.0, %v1409_v25 }
 0x249   : > { %1422 = vrcp.f32 %v986_v38 }
 0x24a   : > { %1424 = vrcp.f32 %v987_v44 }
 0x24b   : > { %v1411_v26 = vpop.eup %1410 }
 0x24c   : > { %v1413_v62 = vpop.eup %1412  ;;  %v1012_v49 = vmul.f32 %v1411_v26, %v1849_v36 }
 0x24d   : > { %v1415_v27 = vpop.eup %1414  ;;  %v1008_v28 = vmul.f32 %v1413_v62, %v1854_v20 }
 0x24e   : > { %v1417_v29 = vpop.eup %1416  ;;  %v1020_v30 = vadd.f32 %v1012_v49, %v1645_v15  ;;  %v990_v31 = vadd.f32 1.0, %v1415_v27 }
 0x24f   : > { %v1419_v32 = vpop.eup %1418  ;;  %v1016_v3 = vadd.f32 %v1008_v28, %v1643_v14  ;;  %v985_v55 = vadd.f32 1.0, %v1417_v29 }
 0x250   : > { %v1421_v33 = vpop.eup %1420  ;;  %1028 = vst.msk [vmem:[%s1920_s28 + $0x28] sm:$0xff] %vm486_vm0, %v1020_v30  ;;  %1426 = vrcp.f32 %v990_v31  ;;  %v989_v36 = vadd.f32 1.0, %v1419_v32 }
 0x251   : > { %1024 = vst.msk [vmem:[%s1920_s28 + $0x8] sm:$0xff] %vm486_vm0, %v1016_v3  ;;  %v1007_v15 = vmul.f32 %v1421_v33, %v1869_v45  ;;  %1428 = vrcp.f32 %v985_v55 }
 0x252   : > { %1430 = vrcp.f32 %v989_v36 }
 0x253   : > { %v1015_v14 = vadd.f32 %v1007_v15, %v1635_v11  ;;  %v1423_v20 = vpop.eup %1422 }
 0x254   : > { %v1425_v34 = vpop.eup %1424  ;;  %v1010_v37 = vmul.f32 %v1423_v20, %v1884_v41 }
 0x255   : > { %1023 = vst.msk [vmem:[%s1920_s28] sm:$0xff] %vm486_vm0, %v1015_v14  ;;  %v1011_v39 = vmul.f32 %v1425_v34, %v1888_v42 }
 0x256   : > { %v1018_v47 = vadd.f32 %v1010_v37, %v1657_v18 }
 0x257   : > { %v1019_v40 = vadd.f32 %v1011_v39, %v1637_v12 }
 0x258   : > { %1026 = vst.msk [vmem:[%s1920_s28 + $0x18] sm:$0xff] %vm486_vm0, %v1018_v47 }
 0x259   : > { %1027 = vst.msk [vmem:[%s1920_s28 + $0x20] sm:$0xff] %vm486_vm0, %v1019_v40 }
 0x25a   : > { %v1427_v45 = vpop.eup %1426 }
 0x25b   : > { %v1429_v11 = vpop.eup %1428  ;;  %v1014_v58 = vmul.f32 %v1427_v45, %v1901_v0 }
 0x25c   : > { %v1431_v2 = vpop.eup %1430  ;;  %v1009_v18 = vmul.f32 %v1429_v11, %v1905_v6 }
 0x25d   : > { %v1022_v41 = vadd.f32 %v1014_v58, %v1661_v19  ;;  %v1013_v12 = vmul.f32 %v1431_v2, %v957_v7 }
 0x25e   : > { %v1017_v43 = vadd.f32 %v1009_v18, %v1647_v16 }
 0x25f   : > { %1030 = vst.msk [vmem:[%s1920_s28 + $0x38] sm:$0xff] %vm486_vm0, %v1022_v41  ;;  %v1021_v46 = vadd.f32 %v1013_v12, %v1649_v17 }
 0x260   : > { %1025 = vst.msk [vmem:[%s1920_s28 + $0x10] sm:$0xff] %vm486_vm0, %v1017_v43 }
 0x261   : > { %1029 = vst.msk [vmem:[%s1920_s28 + $0x30] sm:$0xff] %vm486_vm0, %v1021_v46 }
 0x262   : > { %1445 = shalt.err (!%p1442_p3)
}
 0x263   : > { %s1446_s27 = scalar_lea.hbm %s1947_s20, 1024  ;;  %s1450_s12 = scalar_lea.hbm %s2011_s10, 2048 }
 0x264   : > { %p1447_p4 = scmp.ne.s32.totalorder %s1947_s20, %s1446_s27  ;;  %p1451_p9 = scmp.lt.u32.totalorder %s1947_s20, %s2011_s10 }
 0x265   : > { %p1452_p10 = scmp.lt.u32.totalorder %s1450_s12, %s1446_s27  ;;  %p1454_p12 = scmp.lt.u32.totalorder %s1446_s27, %s1947_s20 }
 0x266   : > { %p1448_p7 = pnand %p1447_p4, %p1594_p5 }
 0x267   : > { %p1453_p11 = por %p1452_p10, %p1451_p9 }
 0x268   : > { %p1449_p8 = pneg %p1448_p7 }
 0x269   : > { %p1455_p13 = por %p1454_p12, %p1453_p11 }
 0x26b   : > { %p1456_p0 = pnand %p1455_p13, %p1449_p8 }
 0x26d   : > { %1459 = shalt.err (!%p1456_p0)
}
 0x26e   : > { %s1499_s21 = smov 128   ;;  %s1500_s25 = smov 8  }
 0x26f   : > { %1307 = dma.vmem_to_hbm [thread:$0]  (%p1594_p5), %s1949_s30, 1024, %s1947_s20, %s1960_s17, %s1499_s21, %s1499_s21, %s1500_s25  }
 0x270 PF: > { %p1313_p1 = scmp.ge.s32.totalorder %s1494_s16, 2  ;;  %s1077_s26 = sand.u32 1, %s1482_s13  }
 0x271   : > { %s1078_s27 = scalar_lea.sflag [#allocation3], %s1077_s26 }
 0x272   : > { %p1310_p2 = pnand %p1313_p1, %p1598_p6 }
 0x274   : > { %1477 = dma.done.wait (!%p1310_p2), %s1078_s27, 1024  }
 0x275   : > { %1479 = vsyncadd (!%p1310_p2), %s1078_s27, 4294966272  ;;  %p21_p3 = scmp.ge.s32.totalorder %s1581_s19, 4   ;;  %s2014_s13 = smov %s1486_s14 }
 0x276   : > { %s2015_s14 = smov %s1490_s15  ;;  %s2016_s15 = smov %s1592_s22 }
 0x277   : > { %s2017_s16 = smov %s1581_s19  ;;  %23 = sbr.rel (!%p21_p3) target bundleno = 3 (0x3), region = 115 }
 0x27e   :  { %1083 = vsyncpa [#allocation3], 1 }
 0x27f   :  { %1085 = vsyncpa [#allocation3 + $0x1], 1 }

// kernel: jvp__.41
= control target key start
LH: loop header
LB: loop body
LE: loop exit
PB: predicated region body
PF: predicated region fallthrough
CT: control target
= control target key end

     0   :  { %16 = vsyncpa [#allocation3], 0  ;;  %s1277_s0 = inlined_call_operand.vmem [shape: f32[32,64], index: 0, kind: input, shape index: {}]   ;;  %s1278_s1 = inlined_call_operand.vmem [shape: f32[32,64], index: 1, kind: input, shape index: {}]   ;;  %s1279_s2 = inlined_call_operand.vmem [shape: f32[32,64], index: 2, kind: input, shape index: {}]   ;;  %s1280_s3 = inlined_call_operand.vmem [shape: f32[32,64], index: 3, kind: input, shape index: {}]   ;;  %s1281_s4 = inlined_call_operand.vmem [shape: f32[32,1], index: 4, kind: input, shape index: {}]   ;;  %s1282_s5 = inlined_call_operand.vmem [shape: f32[64,64], index: 5, kind: input, shape index: {}]   ;;  %s1283_s6 = inlined_call_operand.vmem [shape: f32[1,64], index: 6, kind: input, shape index: {}]   ;;  %s1284_s7 = inlined_call_operand.vmem [shape: f32[1,64], index: 7, kind: input, shape index: {}]   ;;  %s1285_s8 = inlined_call_operand.vmem [shape: f32[1,64], index: 8, kind: input, shape index: {}]   ;;  %s1286_s9 = inlined_call_operand.vmem [shape: f32[32,128], index: 9, kind: output, shape index: {0}]   ;;  %s1287_s10 = inlined_call_operand.hbm [shape: f32[32,64], index: 10, kind: output, shape index: {1}]  }
   0x1   :  { %18 = vsyncpa [#allocation3 + $0x1], 0  ;;  %s1101_s13 = smov 0   ;;  %s1103_s14 = smov 0  }
   0x2   :  { %s1105_s15 = smov 0   ;;  %s1107_s16 = smov 0  }
   0x3 LB: > { %s1122_s17 = sadd.s32 4294967295, %s1039_s16   ;;  %s835_s18 = sadd.s32 4294967294, %s1039_s16   ;;  %s1039_s16 = sphi %s1107_s16, %s1293_s16   ;;  %s1035_s15 = sphi %s1105_s15, %s1292_s15   ;;  %s1031_s14 = sphi %s1103_s14, %s1291_s14   ;;  %s1027_s13 = sphi %s1101_s13, %s1290_s13  }
   0x4   : > { %s1126_s19 = sadd.s32 1, %s1039_s16   ;;  %s271_s20 = sadd.s32 1, %s1035_s15 }
   0x5   : > { %s268_s21 = ssub.s32 %s1039_s16, %s1126_s19  ;;  %p281_p0 = scmp.ne.s32.totalorder %s1035_s15, %s1031_s14 }
   0x6   : > { %p269_p1 = scmp.eq.s32.totalorder %s268_s21, 0  ;;  %p282_p2 = scmp.eq.s32.totalorder %s1122_s17, 1 }
   0x7   : > { %p287_p3 = scmp.ne.s32.totalorder %s1031_s14, %s1027_s13  ;;  %p288_p4 = scmp.eq.s32.totalorder %s835_s18, 1 }
   0x8   : > { %s1137_s22 = scalar_select %p269_p1, %s1035_s15, %s271_s20  }
   0x9   : > { %p1139_p5 = por %p282_p2, %p281_p0  ;;  %p1143_p6 = por %p288_p4, %p287_p3 }
   0xa   : > { %p838_p7 = scmp.ge.s32.totalorder %s1039_s16, 1  ;;  %p363_p8 = scmp.lt.s32.totalorder %s1039_s16, 3 }
   0xc   : > { %p364_p9 = pnand %p838_p7, %p363_p8 }
   0xd   : > { %v465_v0 = vld [vmem:[%s1282_s5] sm:$0xff] (!%p364_p9)  ;;  %v466_v1 = vld [vmem:[%s1282_s5 + $0x8] sm:$0xff] (!%p364_p9)  ;;  %v467_v2 = vld [vmem:[%s1282_s5 + $0x10] sm:$0xff] (!%p364_p9)  ;;  %s840_s11 = sshll.u32 (!%p364_p9), %s1122_s17, 1  ;;  %v1041_v5 = vmov (!%p364_p9), 0   ;;  %vm480_vm0 = vcmask (!%p364_p9), 523264  }
   0xe   : > { %367 = sbr.rel (%p364_p9) target bundleno = 611 (0x263), region = 56  ;;  %v896_v3 = vpack.c.bf16 (!%p364_p9), %v466_v1, %v465_v0  ;;  %v468_v4 = vld [vmem:[%s1282_s5 + $0x18] sm:$0xff] (!%p364_p9)  ;;  %p427_p10 = scmp.lt.s32.totalorder (!%p364_p9), %s840_s11, 3  ;;  %955 = vset.pattern.permute.xlu1 (!%p364_p9), %v1041_v5  ;;  %956 = vset.pattern.permute.xlu0 (!%p364_p9), %v1041_v5  ;;  %v469_v7 = vld [vmem:[%s1282_s5 + $0x20] sm:$0xff] (!%p364_p9)  ;;  %v470_v8 = vld [vmem:[%s1282_s5 + $0x28] sm:$0xff] (!%p364_p9) }
   0xf   : > { %v900_v6 = vpack.c.bf16 (!%p364_p9), %v468_v4, %v467_v2  ;;  %v904_v9 = vpack.c.bf16 (!%p364_p9), %v470_v8, %v469_v7  ;;  %v471_v10 = vld [vmem:[%s1282_s5 + $0x30] sm:$0xff] (!%p364_p9)  ;;  %v472_v11 = vld [vmem:[%s1282_s5 + $0x38] sm:$0xff] (!%p364_p9)  ;;  %v852_v19 = vld [vmem:[%s1283_s6] ss:$0 sm:$0xff] (!%p364_p9)  ;;  %s866_s28 = sshll.u32 (!%p364_p9), %s1122_s17, 8 }
  0x10   : > { %897 = vmatprep.subr.bf16.mxu0 (!%p364_p9), %v896_v3  ;;  %v908_v14 = vpack.c.bf16 (!%p364_p9), %v472_v11, %v471_v10  ;;  %v857_v5 = vld [vmem:[%s1284_s7] ss:$0 sm:$0xff] (!%p364_p9) }
  0x11   : > { %899 = vmatpush3.bf16.msra.mxu0 (!%p364_p9), %v896_v3  ;;  %v858_v7 = vld [vmem:[%s1285_s8] ss:$0 sm:$0xff] (!%p364_p9) }
  0x12   : > { %901 = vmatprep.subr.bf16.mxu0 (!%p364_p9), %v900_v6 }
  0x15   : > { %s1295_s11 = smov (!%p427_p10, %s840_s11), 3  ;;  %903 = vmatpush3.bf16.msra.mxu0 %v900_v6 }
  0x16   : > { %s1168_s27 = sshll.u32 %s1295_s11, 3  ;;  %905 = vmatprep.subr.bf16.mxu0 %v904_v9 }
  0x17   : > { %s442_s21 = scalar_lea.vmem %s1279_s2, %s1168_s27  ;;  %s454_s11 = scalar_lea.vmem %s1281_s4, %s1168_s27 }
  0x18   : > { %v1184_v12 = vld [vmem:[%s442_s21] sm:$0xff]  ;;  %v583_v15 = vld [vmem:[%s454_s11 + $0x8] sm:$0xff]  ;;  %s430_s30 = scalar_lea.vmem %s1277_s0, %s1168_s27  ;;  %s436_s20 = scalar_lea.vmem %s1278_s1, %s1168_s27 }
  0x19   : > { %v582_v13 = vld [vmem:[%s454_s11] sm:$0xff]  ;;  %893 = vmatprep.mubr.msk.f32.mxu0 %vm480_vm0, %v1184_v12  ;;  %907 = vmatpush3.bf16.msra.mxu0 %v904_v9  ;;  %v1188_v16 = vld [vmem:[%s442_s21 + $0x8] sm:$0xff]  ;;  %s1042_s21 = smov 64   ;;  %s448_s29 = scalar_lea.vmem %s1280_s3, %s1168_s27 }
  0x1a   : > { %586 = vperm.xlu1 %955, %v582_v13   ;;  %909 = vmatprep.subr.bf16.mxu0 %v908_v14  ;;  %v562_v17 = vld [vmem:[%s430_s30] sm:$0xff]  ;;  %v563_v20 = vld [vmem:[%s430_s30 + $0x8] sm:$0xff]  ;;  %s460_s18 = scalar_lea.vmem %s1286_s9, %s1168_s27  ;;  %s1043_s27 = smov [#allocation2]  }
  0x1b   : > { %v564_v18 = vld [vmem:[%s436_s20] sm:$0xff]  ;;  %v565_v21 = vld [vmem:[%s436_s20 + $0x8] sm:$0xff]  ;;  %s1230_s20 = scalar_lea.hbm %s1287_s10, %s866_s28  ;;  %s981_s26 = sshll.u32 %s1043_s27, 4  ;;  %s982_s26 = int_to_ptr.vmem [resolvable:$false] %s981_s26 }
  0x1c   : > { %v566_v23 = vadd.f32 %v564_v18, %v562_v17  ;;  %v567_v26 = vadd.f32 %v565_v21, %v563_v20  ;;  %v596_v54 = vld [vmem:[%s448_s29] sm:$0xff]  ;;  %v597_v59 = vld [vmem:[%s448_s29 + $0x8] sm:$0xff] }
  0x1d   : > { %911 = vmatpush3.bf16.msra.mxu0 %v908_v14 }
  0x1e   : > { %591 = vperm.xlu1 %955, %v583_v15  }
  0x20   : > { %894 = vmatmul.mubr.msk.f32.vlgmr.msra.gmra.mrb[0].mxu0 %vm480_vm0, %v1188_v16 }
  0x99   : > { %v587_v48 = vpop.permute.xlu1 %586 }
  0x9d   : > { %v592_v52 = vpop.permute.xlu1 %591 }
  0xf3   : > { %v895_v22 = vpop.f32.mrb[0].mxu0 }
  0xf4   : > { %v553_v24 = vpop.f32.mrb[1].mxu0  ;;  %v559_v25 = vadd.f32 %v895_v22, %v852_v19 }
  0xf5   : > { %v554_v27 = vadd.f32 %v852_v19, %v553_v24 }
  0xf6   : > { %v569_v29 = vadd.f32 %v567_v26, %v559_v25 }
  0xf7   : > { %v568_v28 = vadd.f32 %v566_v23, %v554_v27 }
  0xf8   : > { %v619_v31 = vsel %vm480_vm0, %v569_v29, 0.0  ;;  %v856_v33 = vmul.f32 -1.442695, %v569_v29 }
  0xf9   : > { %v616_v30 = vsel %vm480_vm0, %v568_v28, 0.0  ;;  %v855_v32 = vmul.f32 -1.442695, %v568_v28 }
  0xfa   : > { %617 = vadd.xlane.f32.xlu0 %v616_v30 }
  0xfb   : > { %957 = vpow2.f32 %v855_v32 }
  0xfc   : > { %959 = vpow2.f32 %v856_v33 }
  0xfe   : > { %620 = vadd.xlane.f32.xlu0 %v619_v31 }
 0x105   : > { %v958_v42 = vpop.eup %957 }
 0x106   : > { %v576_v44 = vadd.f32 1.0, %v958_v42  ;;  %v960_v46 = vpop.eup %959 }
 0x107   : > { %v577_v47 = vadd.f32 1.0, %v960_v46 }
 0x108   : > { %961 = vrcp.f32 %v576_v44 }
 0x109   : > { %963 = vrcp.f32 %v577_v47 }
 0x112   : > { %v962_v49 = vpop.eup %961 }
 0x113   : > { %v594_v50 = vmul.f32 %v962_v49, %v587_v48  ;;  %v964_v51 = vpop.eup %963 }
 0x114   : > { %v595_v53 = vmul.f32 %v964_v51, %v592_v52 }
 0x115   : > { %v598_v57 = vmul.f32 %v596_v54, %v594_v50 }
 0x116   : > { %v599_v0 = vmul.f32 %v597_v59, %v595_v53 }
 0x187   : > { %v618_v34 = vpop.xlane.xlu0 %617 }
 0x188   : > { %v623_v35 = vmul.f32 0.015625, %v618_v34 }
 0x18a   : > { %v625_v36 = vsub.f32 %v568_v28, %v623_v35 }
 0x18b   : > { %v621_v37 = vpop.xlane.xlu0 %620 }
 0x18c   : > { %v624_v38 = vmul.f32 0.015625, %v621_v37  ;;  %v627_v39 = vmul.f32 %v625_v36, %v625_v36 }
 0x18e   : > { %v626_v40 = vsub.f32 %v569_v29, %v624_v38  ;;  %v629_v41 = vsel %vm480_vm0, %v627_v39, 0.0 }
 0x18f   : > { %630 = vadd.xlane.f32.xlu0 %v629_v41 }
 0x190   : > { %v628_v43 = vmul.f32 %v626_v40, %v626_v40 }
 0x192   : > { %v632_v45 = vsel %vm480_vm0, %v628_v43, 0.0 }
 0x193   : > { %633 = vadd.xlane.f32.xlu1 %v632_v45 }
 0x1a5   : > { %602 = vrot.lane.b32.xlu0 %v594_v50, %s1042_s21 }
 0x1a9   : > { %604 = vrot.lane.b32.xlu0 %v595_v53, %s1042_s21  ;;  %s423_s21 = sand.u32 1, %s1031_s14  }
 0x1aa   : > { %s839_s11 = sshll.u32 %s423_s21, 4  ;;  %s1236_s17 = scalar_lea.sflag [#allocation3], %s423_s21 }
 0x1ab   : > { %s425_s29 = scalar_lea.vmem [#allocation2], %s839_s11  ;;  %s983_s11 = scalar_lea.vmem %s982_s26, 512 }
 0x1ac   : > { %s700_s30 = sshll.u32 %s425_s29, 4  ;;  %s1232_s30 = int_to_ptr.vmem [resolvable:$true] %s700_s30 }
 0x1ad   : > { %s977_s25 = scalar_lea.vmem %s1232_s30, 256  ;;  %p984_p0 = scmp.lt.s32.totalorder %s1232_s30, %s982_s26 }
 0x1ae   : > { %p978_p11 = scmp.ne.s32.totalorder %s1232_s30, %s977_s25  ;;  %p985_p1 = scmp.lt.s32.totalorder %s983_s11, %s977_s25 }
 0x1b0   : > { %p979_p12 = pnand %p978_p11, %p1139_p5  ;;  %p986_p2 = por %p985_p1, %p984_p0 }
 0x1b2   : > { %p980_p13 = pneg %p979_p12 }
 0x1b4   : > { %p987_p3 = pnand %p986_p2, %p980_p13 }
 0x21c   : > { %v631_v55 = vpop.xlane.xlu0 %630 }
 0x21d   : > { %v635_v56 = vmul.f32 0.015625, %v631_v55 }
 0x21f   : > { %v637_v58 = vadd.f32 1e-05, %v635_v56 }
 0x220   : > { %v634_v60 = vpop.xlane.xlu1 %633  ;;  %v603_v61 = vpop.permute.xlu0 %602 }
 0x221   : > { %965 = vrsqrt.f32 %v637_v58  ;;  %v636_v62 = vmul.f32 0.015625, %v634_v60  ;;  %v608_v63 = vsel %vm480_vm0, %v598_v57, %v603_v61 }
 0x222   : > { %610 = vst [vmem:[%s460_s18] sm:$0xff] %v608_v63 }
 0x223   : > { %v638_v1 = vadd.f32 1e-05, %v636_v62 }
 0x224   : > { %v605_v2 = vpop.permute.xlu0 %604 }
 0x225   : > { %967 = vrsqrt.f32 %v638_v1  ;;  %v609_v3 = vsel %vm480_vm0, %v599_v0, %v605_v2 }
 0x226   : > { %611 = vst [vmem:[%s460_s18 + $0x8] sm:$0xff] %v609_v3 }
 0x22b   : > { %v966_v4 = vpop.eup %965 }
 0x22c   : > { %v641_v6 = vmul.f32 %v966_v4, %v625_v36 }
 0x22e   : > { %v649_v8 = vmul.f32 %v857_v5, %v641_v6 }
 0x22f   : > { %v968_v9 = vpop.eup %967 }
 0x230   : > { %v657_v10 = vadd.f32 %v858_v7, %v649_v8  ;;  %v642_v11 = vmul.f32 %v968_v9, %v626_v40 }
 0x232   : > { %v859_v13 = vmul.f32 -1.442695, %v657_v10  ;;  %v650_v14 = vmul.f32 %v857_v5, %v642_v11 }
 0x234   : > { %969 = vpow2.f32 %v859_v13  ;;  %v658_v15 = vadd.f32 %v858_v7, %v650_v14 }
 0x236   : > { %v860_v17 = vmul.f32 -1.442695, %v658_v15 }
 0x238   : > { %971 = vpow2.f32 %v860_v17 }
 0x23e   : > { %v970_v18 = vpop.eup %969 }
 0x23f   : > { %v665_v19 = vadd.f32 1.0, %v970_v18 }
 0x241   : > { %973 = vrcp.f32 %v665_v19 }
 0x242   : > { %v972_v20 = vpop.eup %971 }
 0x243   : > { %v666_v21 = vadd.f32 1.0, %v972_v20 }
 0x245   : > { %975 = vrcp.f32 %v666_v21 }
 0x24b   : > { %v974_v22 = vpop.eup %973 }
 0x24c   : > { %v671_v23 = vmul.f32 %v974_v22, %v657_v10 }
 0x24e   : > { %v673_v24 = vadd.f32 %v671_v23, %v1184_v12 }
 0x24f   : > { %v976_v25 = vpop.eup %975 }
 0x250   : > { %v672_v26 = vmul.f32 %v976_v25, %v658_v15  ;;  %675 = vst.msk [vmem:[%s425_s29] sm:$0xff] %vm480_vm0, %v673_v24 }
 0x252   : > { %v674_v27 = vadd.f32 %v672_v26, %v1188_v16 }
 0x254   : > { %676 = vst.msk [vmem:[%s425_s29 + $0x8] sm:$0xff] %vm480_vm0, %v674_v27 }
 0x255   : > { %990 = shalt.err (!%p987_p3)
}
 0x256   : > { %s991_s21 = scalar_lea.hbm %s1230_s20, 256  ;;  %s995_s12 = scalar_lea.hbm %s1287_s10, 512 }
 0x257   : > { %p992_p4 = scmp.ne.s32.totalorder %s1230_s20, %s991_s21  ;;  %p996_p9 = scmp.lt.u32.totalorder %s1230_s20, %s1287_s10 }
 0x258   : > { %p997_p10 = scmp.lt.u32.totalorder %s995_s12, %s991_s21  ;;  %p999_p12 = scmp.lt.u32.totalorder %s991_s21, %s1230_s20 }
 0x259   : > { %p993_p7 = pnand %p992_p4, %p1139_p5 }
 0x25a   : > { %p998_p11 = por %p997_p10, %p996_p9 }
 0x25b   : > { %p994_p8 = pneg %p993_p7 }
 0x25c   : > { %p1000_p13 = por %p999_p12, %p998_p11 }
 0x25e   : > { %p1001_p0 = pnand %p1000_p13, %p994_p8 }
 0x260   : > { %1004 = shalt.err (!%p1001_p0)
}
 0x261   : > { %s1044_s25 = smov 128   ;;  %s1045_s26 = smov 8  }
 0x262   : > { %912 = dma.vmem_to_hbm [thread:$0]  (%p1139_p5), %s1232_s30, 256, %s1230_s20, %s1236_s17, %s1044_s25, %s1044_s25, %s1045_s26  }
 0x263 PF: > { %p918_p1 = scmp.ge.s32.totalorder %s1039_s16, 2  ;;  %s723_s11 = sand.u32 1, %s1027_s13  }
 0x264   : > { %s724_s21 = scalar_lea.sflag [#allocation3], %s723_s11 }
 0x265   : > { %p915_p2 = pnand %p918_p1, %p1143_p6 }
 0x267   : > { %1022 = dma.done.wait (!%p915_p2), %s724_s21, 256  }
 0x268   : > { %1024 = vsyncadd (!%p915_p2), %s724_s21, 4294967040  ;;  %p21_p3 = scmp.ge.s32.totalorder %s1126_s19, 4   ;;  %s1290_s13 = smov %s1031_s14 }
 0x269   : > { %s1291_s14 = smov %s1035_s15  ;;  %s1292_s15 = smov %s1137_s22 }
 0x26a   : > { %s1293_s16 = smov %s1126_s19  ;;  %23 = sbr.rel (!%p21_p3) target bundleno = 3 (0x3), region = 115 }
 0x271   :  { %729 = vsyncpa [#allocation3], 1 }
 0x272   :  { %731 = vsyncpa [#allocation3 + $0x1], 1 }

// kernel: jvp__.43
= control target key start
LH: loop header
LB: loop body
LE: loop exit
PB: predicated region body
PF: predicated region fallthrough
CT: control target
= control target key end

     0   :  { %v155_v0 = vmov 0.0|0.0   ;;  %vm156_vm0 = vmmov 0   ;;  %v157_v4 = vmov 0.0   ;;  %vm30_vm1 = vcmask 523264   ;;  %s211_s1 = inlined_call_operand.vmem [shape: f32[64,2], index: 1, kind: input, shape index: {}]   ;;  %s212_s0 = inlined_call_operand.vmem [shape: f32[8,64], index: 0, kind: input, shape index: {}]   ;;  %s213_s2 = inlined_call_operand.vmem [shape: f32[1,2], index: 2, kind: input, shape index: {}]   ;;  %s214_s3 = inlined_call_operand.vmem [shape: f32[8,2], index: 3, kind: output, shape index: {}]  }
   0x1   :  { %140 = vmatprep.subr.bf16.mxu0 %v155_v0  ;;  %v15_v1 = vld [vmem:[%s211_s1] sm:$0xff]  ;;  %v16_v2 = vld [vmem:[%s211_s1 + $0x8] sm:$0xff]  ;;  %v17_v3 = vld [vmem:[%s211_s1 + $0x10] sm:$0xff]  ;;  %137 = vmatprep.mubr.msk.f32.mxu0 %vm156_vm0, %v157_v4  ;;  %vm104_vm2 = vcmask 15360  }
   0x2   :  { %v141_v5 = vpack.c.bf16 %v16_v2, %v15_v1  ;;  %v18_v6 = vld [vmem:[%s211_s1 + $0x18] sm:$0xff]  ;;  %v19_v8 = vld [vmem:[%s211_s1 + $0x20] sm:$0xff]  ;;  %v20_v9 = vld [vmem:[%s211_s1 + $0x28] sm:$0xff] }
   0x3   :  { %v144_v7 = vpack.c.bf16 %v18_v6, %v17_v3  ;;  %v147_v10 = vpack.c.bf16 %v20_v9, %v19_v8  ;;  %v21_v11 = vld [vmem:[%s211_s1 + $0x30] sm:$0xff]  ;;  %v22_v12 = vld [vmem:[%s211_s1 + $0x38] sm:$0xff]  ;;  %v14_v14 = vld [vmem:[%s212_s0] sm:$0xff] }
   0x4   :  { %142 = vmatpush3.bf16.msra.mxu0 %v141_v5  ;;  %v150_v13 = vpack.c.bf16 %v22_v12, %v21_v11  ;;  %v110_v15 = vld [vmem:[%s213_s2] ss:$0 sm:$0xff] }
   0x5   :  { %143 = vmatprep.subr.bf16.mxu0 %v155_v0 }
   0x8   :  { %145 = vmatpush3.bf16.msra.mxu0 %v144_v7 }
   0x9   :  { %146 = vmatprep.subr.bf16.mxu0 %v155_v0 }
   0xc   :  { %148 = vmatpush3.bf16.msra.mxu0 %v147_v10 }
   0xd   :  { %149 = vmatprep.subr.bf16.mxu0 %v155_v0 }
  0x10   :  { %151 = vmatpush3.bf16.msra.mxu0 %v150_v13 }
  0x13   :  { %138 = vmatmul.mubr.msk.f32.vlgmr.msra.gmra.mrb[0].mxu0 %vm30_vm1, %v14_v14 }
  0xe6   :  { %v100_v16 = vpop.f32.mrb[0].mxu0 }
  0xe7   :  { %v101_v17 = vadd.f32 %v110_v15, %v100_v16  ;;  %v139_v18 = vpop.f32.mrb[1].mxu0 }
  0xe9   :  { %105 = vst.msk [vmem:[%s214_s3] sm:$0xff] %vm104_vm2, %v101_v17 }

// kernel: split.0
= control target key start
LH: loop header
LB: loop body
LE: loop exit
PB: predicated region body
PF: predicated region fallthrough
CT: control target
= control target key end

     0   :  { %v3_v0 = vlaneseq  ;;  %s82_s0 = inlined_call_operand.vmem [shape: f32[32,16], index: 0, kind: input, shape index: {}]   ;;  %s83_s1 = inlined_call_operand.vmem [shape: f32[32,1], index: 1, kind: output, shape index: {}]  }
   0x1   :  { %v42_v2 = vld [vmem:[%s82_s0 + $0x10] sm:$0xff]  ;;  %v2_v3 = vld [vmem:[%s82_s0] sm:$0xff]  ;;  %v44_v4 = vld [vmem:[%s82_s0 + $0x18] sm:$0xff] }
   0x2   :  { %v4_v1 = vand.u32 127, %v3_v0  ;;  %v40_v5 = vld [vmem:[%s82_s0 + $0x8] sm:$0xff]  ;;  %s47_s0 = smov 127  }
   0x4   :  { %vm5_vm0 = vcmp.lt.s32.totalorder %v4_v1, 1 }
   0x5   :  { %v25_v6 = vsel %vm5_vm0, 0, %v42_v2  ;;  %v6_v7 = vsel %vm5_vm0, 0, %v2_v3  ;;  %v35_v8 = vsel %vm5_vm0, 0, %v44_v4  ;;  %v15_v9 = vsel %vm5_vm0, 0, %v40_v5 }
   0x6   :  { %26 = vrot.lane.b32.xlu1 %v25_v6, %s47_s0  ;;  %7 = vrot.lane.b32.xlu0 %v6_v7, %s47_s0 }
   0xa   :  { %36 = vrot.lane.b32.xlu1 %v35_v8, %s47_s0  ;;  %16 = vrot.lane.b32.xlu0 %v15_v9, %s47_s0 }
  0x78   :  { %v27_v10 = vpop.permute.xlu1 %26  ;;  %v8_v11 = vpop.permute.xlu0 %7 }
  0x79   :  { %43 = vst [vmem:[%s83_s1 + $0x10] sm:$0xff] %v27_v10  ;;  %9 = vst [vmem:[%s83_s1] sm:$0xff] %v8_v11 }
  0x7c   :  { %v37_v12 = vpop.permute.xlu1 %36  ;;  %v17_v13 = vpop.permute.xlu0 %16 }
  0x7d   :  { %45 = vst [vmem:[%s83_s1 + $0x18] sm:$0xff] %v37_v12  ;;  %41 = vst [vmem:[%s83_s1 + $0x8] sm:$0xff] %v17_v13 }

// kernel: jvp__.45
= control target key start
LH: loop header
LB: loop body
LE: loop exit
PB: predicated region body
PF: predicated region fallthrough
CT: control target
= control target key end

     0   :  { %s666_s17 = smov 0   ;;  %s757_s0 = inlined_call_operand.vmem [shape: f32[32,16], index: 0, kind: input, shape index: {}]   ;;  %s758_s1 = inlined_call_operand.vmem [shape: f32[32,64], index: 1, kind: input, shape index: {}]   ;;  %s759_s2 = inlined_call_operand.vmem [shape: f32[64,1], index: 2, kind: input, shape index: {}]   ;;  %s760_s3 = inlined_call_operand.<no memory space> [shape: f32[1,1], index: 3, kind: input, shape index: {}]   ;;  %s761_s4 = inlined_call_operand.vmem [shape: f32[32,1], index: 4, kind: output, shape index: {}]  }
   0x1   :  { %v9_v0 = vstv %s760_s3 }
   0x2   :  { %10 = vst [vmem:[#allocation2] sm:$0x1] %v9_v0 }
   0x3 LB: > { %s525_s18 = sadd.s32 4294967295, %s629_s17   ;;  %p529_p0 = scmp.ge.s32.totalorder %s629_s17, 1  ;;  %s629_s17 = sphi %s666_s17, %s16_s17  }
   0x4   : > { %p176_p1 = scmp.lt.s32.totalorder %s629_s17, 3 }
   0x6   : > { %p177_p2 = pnand %p529_p0, %p176_p1 }
   0x7   : > { %s530_s19 = sshll.u32 (!%p177_p2), %s525_s18, 1  ;;  %v243_v1 = vld [vmem:[%s759_s2] sm:$0xff] (!%p177_p2)  ;;  %v244_v2 = vld [vmem:[%s759_s2 + $0x8] sm:$0xff] (!%p177_p2)  ;;  %v245_v4 = vld [vmem:[%s759_s2 + $0x10] sm:$0xff] (!%p177_p2)  ;;  %s631_s9 = smov (!%p177_p2), 124   ;;  %vm258_vm0 = vcmask (!%p177_p2), 523264  }
   0x8   : > { %180 = sbr.rel (%p177_p2) target bundleno = 754 (0x2f2), region = 36  ;;  %p208_p3 = scmp.lt.s32.totalorder (!%p177_p2), %s530_s19, 3  ;;  %v572_v3 = vpack.c.bf16 (!%p177_p2), %v244_v2, %v243_v1  ;;  %v246_v5 = vld [vmem:[%s759_s2 + $0x18] sm:$0xff] (!%p177_p2)  ;;  %v247_v7 = vld [vmem:[%s759_s2 + $0x20] sm:$0xff] (!%p177_p2)  ;;  %v248_v8 = vld [vmem:[%s759_s2 + $0x28] sm:$0xff] (!%p177_p2)  ;;  %vm454_vm1 = vcmask (!%p177_p2), 7168  }
   0x9   : > { %v576_v6 = vpack.c.bf16 (!%p177_p2), %v246_v5, %v245_v4  ;;  %v580_v9 = vpack.c.bf16 (!%p177_p2), %v248_v8, %v247_v7  ;;  %s632_s10 = smov (!%p177_p2), 6   ;;  %v249_v12 = vld [vmem:[%s759_s2 + $0x30] sm:$0xff] (!%p177_p2)  ;;  %v250_v13 = vld [vmem:[%s759_s2 + $0x38] sm:$0xff] (!%p177_p2)  ;;  %s634_s20 = smov (!%p177_p2), 4   ;;  %v536_v38 = vld [vmem:[#allocation2] ss:$0 sm:$0xff] (!%p177_p2) }
   0xa   : > { %573 = vmatprep.subr.bf16.mxu0 (!%p177_p2), %v572_v3  ;;  %v584_v14 = vpack.c.bf16 (!%p177_p2), %v250_v13, %v249_v12  ;;  %s635_s21 = smov (!%p177_p2), 121   ;;  %s636_s3 = smov (!%p177_p2), 5  }
   0xb   : > { %575 = vmatpush3.bf16.msra.mxu0 (!%p177_p2), %v572_v3  ;;  %s637_s22 = smov (!%p177_p2), 1  }
   0xc   : > { %577 = vmatprep.subr.bf16.mxu0 (!%p177_p2), %v576_v6 }
   0xf   : > { %s763_s19 = smov (!%p208_p3, %s530_s19), 3  ;;  %579 = vmatpush3.bf16.msra.mxu0 %v576_v6 }
  0x10   : > { %s692_s5 = sshll.u32 %s763_s19, 3  ;;  %581 = vmatprep.subr.bf16.mxu0 %v580_v9  ;;  %s633_s19 = smov 127  }
  0x11   : > { %s211_s8 = scalar_lea.vmem %s757_s0, %s692_s5  ;;  %s217_s18 = scalar_lea.vmem %s758_s1, %s692_s5 }
  0x12   : > { %v698_v10 = vld [vmem:[%s211_s8] sm:$0xff]  ;;  %v703_v11 = vld [vmem:[%s211_s8 + $0x8] sm:$0xff]  ;;  %s223_s25 = scalar_lea.vmem %s761_s4, %s692_s5 }
  0x13   : > { %229 = vrot.lane.b32.xlu0 %v698_v10, %s631_s9  ;;  %386 = vrot.lane.b32.xlu1 %v698_v10, %s632_s10  ;;  %v241_v15 = vld [vmem:[%s217_s18] sm:$0xff]  ;;  %v242_v16 = vld [vmem:[%s217_s18 + $0x8] sm:$0xff] }
  0x14   : > { %583 = vmatpush3.bf16.msra.mxu0 %v580_v9  ;;  %569 = vmatprep.mubr.msk.f32.mxu0 %vm258_vm0, %v241_v15 }
  0x15   : > { %585 = vmatprep.subr.bf16.mxu0 %v584_v14 }
  0x17   : > { %231 = vrot.lane.b32.xlu0 %v703_v11, %s631_s9  ;;  %388 = vrot.lane.b32.xlu1 %v703_v11, %s632_s10 }
  0x18   : > { %587 = vmatpush3.bf16.msra.mxu0 %v584_v14 }
  0x1b   : > { %570 = vmatmul.mubr.msk.f32.vlgmr.msra.gmra.mrb[0].mxu0 %vm258_vm0, %v242_v16 }
  0x85   : > { %v230_v17 = vpop.permute.xlu0 %229  ;;  %v387_v23 = vpop.permute.xlu1 %386 }
  0x86   : > { %v235_v18 = vadd.f32 %v230_v17, %v698_v10 }
  0x88   : > { %v237_v19 = vmul.f32 1.442695, %v235_v18 }
  0x89   : > { %v232_v20 = vpop.permute.xlu0 %231  ;;  %v389_v28 = vpop.permute.xlu1 %388 }
  0x8a   : > { %603 = vpow2.f32 %v237_v19  ;;  %v236_v21 = vadd.f32 %v232_v20, %v703_v11 }
  0x8c   : > { %v239_v22 = vmul.f32 1.442695, %v236_v21 }
  0x8e   : > { %605 = vpow2.f32 %v239_v22 }
  0x94   : > { %v720_v24 = vpop.eup %603 }
  0x95   : > { %v362_v25 = vsub.f32 0.0, %v720_v24 }
  0x97   : > { %v392_v26 = vmul.f32 %v387_v23, %v362_v25 }
  0x98   : > { %v723_v27 = vpop.eup %605 }
  0x99   : > { %v394_v29 = vmul.f32 1.442695, %v392_v26  ;;  %v363_v30 = vsub.f32 0.0, %v723_v27 }
  0x9b   : > { %607 = vpow2.f32 %v394_v29  ;;  %v393_v31 = vmul.f32 %v389_v28, %v363_v30 }
  0x9d   : > { %v396_v32 = vmul.f32 1.442695, %v393_v31 }
  0x9f   : > { %609 = vpow2.f32 %v396_v32 }
  0xa5   : > { %v608_v33 = vpop.eup %607 }
  0xa6   : > { %400 = vrot.lane.b32.xlu0 %v608_v33, %s633_s19 }
  0xa9   : > { %v610_v34 = vpop.eup %609 }
  0xaa   : > { %340 = vrot.lane.b32.xlu0 %v698_v10, %s633_s19  ;;  %402 = vrot.lane.b32.xlu1 %v610_v34, %s633_s19 }
  0xae   : > { %364 = vrot.lane.b32.xlu0 %v698_v10, %s634_s20  ;;  %342 = vrot.lane.b32.xlu1 %v703_v11, %s633_s19 }
  0xb2   : > { %366 = vrot.lane.b32.xlu1 %v703_v11, %s634_s20 }
  0xee   : > { %v571_v35 = vpop.f32.mrb[0].mxu0 }
  0xef   : > { %v331_v36 = vpop.f32.mrb[1].mxu0  ;;  %v337_v45 = vadd.f32 %v571_v35, %v536_v38 }
  0xf0   : > { %v332_v40 = vadd.f32 %v536_v38, %v331_v36 }
 0x118   : > { %v401_v37 = vpop.permute.xlu0 %400 }
 0x119   : > { %v406_v39 = vmul.f32 %v720_v24, %v401_v37 }
 0x11b   : > { %418 = vrot.lane.b32.xlu0 %v406_v39, %s635_s21 }
 0x11c   : > { %v403_v41 = vpop.permute.xlu1 %402  ;;  %v341_v42 = vpop.permute.xlu0 %340 }
 0x11d   : > { %v407_v43 = vmul.f32 %v723_v27, %v403_v41  ;;  %v346_v44 = vadd.f32 %v341_v42, %v698_v10 }
 0x11f   : > { %420 = vrot.lane.b32.xlu1 %v407_v43, %s635_s21  ;;  %v348_v46 = vadd.f32 %v346_v44, %v332_v40 }
 0x120   : > { %v343_v47 = vpop.permute.xlu1 %342  ;;  %v365_v48 = vpop.permute.xlu0 %364 }
 0x121   : > { %v347_v49 = vadd.f32 %v343_v47, %v703_v11  ;;  %v370_v50 = vmul.f32 %v365_v48, %v362_v25  ;;  %v539_v58 = vmul.f32 -1.442695, %v348_v46 }
 0x123   : > { %v372_v51 = vmul.f32 1.442695, %v370_v50  ;;  %v349_v52 = vadd.f32 %v347_v49, %v337_v45 }
 0x124   : > { %v367_v53 = vpop.permute.xlu1 %366 }
 0x125   : > { %611 = vpow2.f32 %v372_v51  ;;  %v371_v54 = vmul.f32 %v367_v53, %v363_v30  ;;  %v540_v59 = vmul.f32 -1.442695, %v349_v52 }
 0x127   : > { %v374_v55 = vmul.f32 1.442695, %v371_v54 }
 0x129   : > { %613 = vpow2.f32 %v374_v55 }
 0x12a   : > { %615 = vpow2.f32 %v539_v58 }
 0x12b   : > { %617 = vpow2.f32 %v540_v59 }
 0x12f   : > { %v612_v56 = vpop.eup %611 }
 0x130   : > { %378 = vrot.lane.b32.xlu0 %v612_v56, %s633_s19 }
 0x133   : > { %v614_v57 = vpop.eup %613 }
 0x134   : > { %380 = vrot.lane.b32.xlu1 %v614_v57, %s633_s19  ;;  %v616_v60 = vpop.eup %615 }
 0x135   : > { %v356_v61 = vadd.f32 1.0, %v616_v60  ;;  %v618_v62 = vpop.eup %617 }
 0x136   : > { %v357_v63 = vadd.f32 1.0, %v618_v62 }
 0x137   : > { %619 = vrcp.f32 %v356_v61 }
 0x138   : > { %621 = vrcp.f32 %v357_v63 }
 0x141   : > { %v620_v0 = vpop.eup %619 }
 0x142   : > { %v622_v3 = vpop.eup %621 }
 0x18d   : > { %v419_v1 = vpop.permute.xlu0 %418 }
 0x18e   : > { %v424_v2 = vmul.f32 %v620_v0, %v419_v1 }
 0x190   : > { %428 = vrot.lane.b32.xlu0 %v424_v2, %s636_s3 }
 0x191   : > { %v421_v4 = vpop.permute.xlu1 %420 }
 0x192   : > { %v425_v5 = vmul.f32 %v622_v3, %v421_v4 }
 0x194   : > { %430 = vrot.lane.b32.xlu1 %v425_v5, %s636_s3  ;;  %408 = vrot.lane.b32.xlu0 %v698_v10, %s637_s22 }
 0x198   : > { %410 = vrot.lane.b32.xlu1 %v703_v11, %s637_s22 }
 0x1a2   : > { %v379_v6 = vpop.permute.xlu0 %378 }
 0x1a3   : > { %v384_v7 = vmul.f32 %v720_v24, %v379_v6 }
 0x1a6   : > { %v381_v8 = vpop.permute.xlu1 %380 }
 0x1a7   : > { %v385_v13 = vmul.f32 %v723_v27, %v381_v8 }
 0x202   : > { %v429_v9 = vpop.permute.xlu0 %428 }
 0x203   : > { %v434_v12 = vsub.f32 %v384_v7, %v429_v9 }
 0x205   : > { %438 = vrot.lane.b32.xlu0 %v434_v12, %s633_s19 }
 0x206   : > { %v431_v14 = vpop.permute.xlu1 %430  ;;  %v409_v16 = vpop.permute.xlu0 %408 }
 0x207   : > { %v435_v15 = vsub.f32 %v385_v13, %v431_v14  ;;  %v414_v17 = vmul.f32 %v409_v16, %v698_v10 }
 0x209   : > { %440 = vrot.lane.b32.xlu1 %v435_v15, %s633_s19 }
 0x20a   : > { %v411_v18 = vpop.permute.xlu1 %410 }
 0x20b   : > { %v415_v21 = vmul.f32 %v411_v18, %v703_v11 }
 0x277   : > { %v439_v19 = vpop.permute.xlu0 %438 }
 0x278   : > { %v444_v20 = vmul.f32 %v439_v19, %v414_v17 }
 0x27a   : > { %448 = vrot.lane.b32.xlu0 %v444_v20, %s631_s9 }
 0x27b   : > { %v441_v22 = vpop.permute.xlu1 %440 }
 0x27c   : > { %v445_v23 = vmul.f32 %v441_v22, %v415_v21 }
 0x27e   : > { %450 = vrot.lane.b32.xlu1 %v445_v23, %s631_s9 }
 0x2ec   : > { %v449_v24 = vpop.permute.xlu0 %448 }
 0x2ed   : > { %455 = vst.msk [vmem:[%s223_s25] sm:$0xff] %vm454_vm1, %v449_v24 }
 0x2f0   : > { %v451_v25 = vpop.permute.xlu1 %450 }
 0x2f1   : > { %456 = vst.msk [vmem:[%s223_s25 + $0x8] sm:$0xff] %vm454_vm1, %v451_v25 }
 0x2f2 PF: > { %s16_s17 = sadd.s32 1, %s629_s17  }
 0x2f3   : > { %p13_p4 = scmp.ge.s32.totalorder %s16_s17, 4  }
 0x2f5   :  { %15 = sbr.rel (!%p13_p4) target bundleno = 3 (0x3), region = 69 }

</bundles_post_ra>
